<compile_context>
chip_gen: v6e
topology: v6e:2x2x1
jax: 0.10.0
libtpu: 0.0.40
codegen_flags: <defaults>
</compile_context>

<pallas_src>
import jax
import jax.numpy as jnp
from jax.experimental import pallas as pl
from jax.experimental.pallas import tpu as pltpu

HIDDEN = 2000   # hardcoded in the PyTorch module
LANE = 128


def _round_up(n, m):
    return pl.cdiv(n, m) * m


# ----------------------------------------------------------------------------
# Fused kernel:
#   h1 = relu(x @ (W1*M1)^T + b1)          (k == 0 prologue, resident weights)
#   h2 = relu(h1 @ (W2*M2)^T + b2)         (K reduction streamed over the grid)
#   out = log_softmax(h2 @ W3^T + b3)      (k == last epilogue)
# Refs: x[B,Kin_p] bf16, wm1t[Kin_p,Hp] bf16, b1[1,Hp] f32,
#       wm2t[tk,Hp] bf16 (streamed), b2[1,Hp] f32, w3t[Hp,C] bf16, b3[1,C] f32
#       -> o[B,C] f32; scratch h1[B,Hp] bf16, acc[B,Hp] f32.
# ----------------------------------------------------------------------------
def _mnist_fused_kernel(x_ref, wm1t_ref, b1_ref,
                        wm2t_ref, b2_ref,
                        w3t_ref, b3_ref,
                        o_ref,
                        h1_ref, acc_ref):
    k = pl.program_id(0)
    tk = wm2t_ref.shape[0]

    @pl.when(k == 0)
    def _prologue():
        # fc1 (mask already folded into wm1t) + ReLU; small resident weight.
        y1 = jnp.dot(x_ref[...], wm1t_ref[...],
                     preferred_element_type=jnp.float32) + b1_ref[...]
        h1_ref[...] = jnp.maximum(y1, 0.0).astype(h1_ref.dtype)

    # fc2 partial product for this streamed K tile (mask pre-folded).
    start = pl.multiple_of(k * tk, LANE)
    h1_k = h1_ref[:, pl.ds(start, tk)]
    partial = jnp.dot(h1_k, wm2t_ref[...], preferred_element_type=jnp.float32)

    @pl.when(k == 0)
    def _first():
        acc_ref[...] = partial            # direct write: no zero-fill + RMW

    @pl.when(k > 0)
    def _rest():
        acc_ref[...] += partial

    @pl.when(k == pl.num_programs(0) - 1)
    def _epilogue():
        # Dropout (p=0.5) is identity in eval mode.
        h2 = jnp.maximum(acc_ref[...] + b2_ref[...], 0.0)
        y = jnp.dot(h2.astype(w3t_ref.dtype), w3t_ref[...],
                    preferred_element_type=jnp.float32) + b3_ref[...]
        m = jnp.max(y, axis=1, keepdims=True)
        lse = m + jnp.log(jnp.sum(jnp.exp(y - m), axis=1, keepdims=True))
        o_ref[...] = (y - lse).astype(o_ref.dtype)


def mnist_net_fused(packed, x, *, tk=1024):
    B = x.shape[0]
    Kin = x.shape[1]
    Kin_p, Hp = packed["wm1t"].shape
    C = packed["w3t"].shape[1]
    if Kin_p != Kin:
        x = jnp.pad(x, ((0, 0), (0, Kin_p - Kin)))   # tiny (B x Kin) pad only
    x = x.astype(packed["wm1t"].dtype)               # bf16 feeds the MXU natively

    # Largest LANE-multiple tile <= tk that divides Hp (Hp is a LANE multiple).
    tk = max(LANE, min((tk // LANE) * LANE, Hp))
    while Hp % tk != 0:
        tk -= LANE
    grid = (Hp // tk,)

    return pl.pallas_call(
        _mnist_fused_kernel,
        out_shape=jax.ShapeDtypeStruct((B, C), jnp.float32),
        grid_spec=pltpu.PrefetchScalarGridSpec(
            num_scalar_prefetch=0,
            grid=grid,
            in_specs=[
                pl.BlockSpec((B, Kin_p), lambda k: (0, 0)),    # x             (resident)
                pl.BlockSpec((Kin_p, Hp), lambda k: (0, 0)),   # fc1 (W*M)^T   (resident)
                pl.BlockSpec((1, Hp), lambda k: (0, 0)),       # fc1 b
                pl.BlockSpec((tk, Hp), lambda k: (k, 0)),      # fc2 (W*M)^T   (streamed)
                pl.BlockSpec((1, Hp), lambda k: (0, 0)),       # fc2 b
                pl.BlockSpec((Hp, C), lambda k: (0, 0)),       # fc3 W^T       (resident)
                pl.BlockSpec((1, C), lambda k: (0, 0)),        # fc3 b
            ],
            out_specs=pl.BlockSpec((B, C), lambda k: (0, 0)),
            scratch_shapes=[
                pltpu.VMEM((B, Hp), packed["wm1t"].dtype),     # h1 (fc1 activations)
                pltpu.VMEM((B, Hp), jnp.float32),              # fc2 f32 accumulator
            ],
        ),
        compiler_params=pltpu.CompilerParams(
            dimension_semantics=("arbitrary",),      # reduction axis
            vmem_limit_bytes=32 << 20,               # live set ~10 MiB; v7x-safe
        ),
    )(x, packed["wm1t"], packed["b1"],
      packed["wm2t"], packed["b2"],
      packed["w3t"], packed["b3"])


# ----------------------------------------------------------------------------
# Parameter handling
# ----------------------------------------------------------------------------
def init_params(key, input_size, num_classes, dtype=jnp.float32):
    """PyTorch-layout parameters ([out, in] weights, [out] biases)."""
    ks = jax.random.split(key, 7)
    return {
        "fc1_w": jax.random.normal(ks[0], (HIDDEN, input_size), dtype) * 0.02,
        "fc1_m": (jax.random.uniform(ks[1], (HIDDEN, input_size)) > 0.25).astype(dtype),
        "fc1_b": jax.random.normal(ks[2], (HIDDEN,), dtype) * 0.01,
        "fc2_w": jax.random.normal(ks[3], (HIDDEN, HIDDEN), dtype) * 0.02,
        "fc2_m": (jax.random.uniform(ks[4], (HIDDEN, HIDDEN)) > 0.25).astype(dtype),
        "fc2_b": jax.random.normal(ks[5], (HIDDEN,), dtype) * 0.01,
        "fc3_w": jax.random.normal(ks[6], (num_classes, HIDDEN), dtype) * 0.02,
        "fc3_b": jnp.zeros((num_classes,), dtype),
    }


def pack_params(params, dtype=jnp.bfloat16):
    """ONE-TIME layout conversion: fold mask into weight, transpose
    [out,in] -> [in,out], zero-pad to lane-dense shapes, cast weights to bf16.
    Done at model setup, never in the forward path."""
    in_sz = params["fc1_w"].shape[1]
    C = params["fc3_w"].shape[0]
    Kin_p = max(_round_up(in_sz, LANE), LANE)
    Hp = _round_up(HIDDEN, LANE)   # 2000 -> 2048

    def pad2(a, rows, cols):
        return jnp.pad(a, ((0, rows - a.shape[0]), (0, cols - a.shape[1])))

    wm1 = params["fc1_w"] * params["fc1_m"]   # fold MaskLinear masks ONCE here
    wm2 = params["fc2_w"] * params["fc2_m"]
    return {
        "wm1t": pad2(wm1.T, Kin_p, Hp).astype(dtype),
        "b1":   pad2(params["fc1_b"].reshape(1, -1), 1, Hp).astype(jnp.float32),
        "wm2t": pad2(wm2.T, Hp, Hp).astype(dtype),
        "b2":   pad2(params["fc2_b"].reshape(1, -1), 1, Hp).astype(jnp.float32),
        "w3t":  pad2(params["fc3_w"].T, Hp, C).astype(dtype),
        "b3":   params["fc3_b"].reshape(1, C).astype(jnp.float32),
    }


@jax.jit
def mnist_net_forward(packed, x):
    # drp1 (p=0.5) -> identity in eval mode.
    return mnist_net_fused(packed, x)


def mnist_net_reference_f32(params, x):
    """Pure-JAX f32 reference, exact PyTorch layout/semantics."""
    h1 = jax.nn.relu(x @ (params["fc1_w"] * params["fc1_m"]).T + params["fc1_b"])
    h2 = jax.nn.relu(h1 @ (params["fc2_w"] * params["fc2_m"]).T + params["fc2_b"])
    y = h2 @ params["fc3_w"].T + params["fc3_b"]
    return jax.nn.log_softmax(y, axis=1)


def mnist_net_reference_bf16(params, x):
    """Pure-JAX reference mirroring the kernel's bf16-weight / f32-accumulate
    numerics (mask folded, bf16 operands, f32 accumulation, bf16 h1)."""
    bf = jnp.bfloat16
    wm1t = (params["fc1_w"] * params["fc1_m"]).T.astype(bf)
    wm2t = (params["fc2_w"] * params["fc2_m"]).T.astype(bf)
    w3t = params["fc3_w"].T.astype(bf)
    h1 = jax.nn.relu(jnp.dot(x.astype(bf), wm1t,
                             preferred_element_type=jnp.float32) + params["fc1_b"])
    h1 = h1.astype(bf)
    h2 = jax.nn.relu(jnp.dot(h1, wm2t,
                             preferred_element_type=jnp.float32) + params["fc2_b"])
    y = jnp.dot(h2.astype(bf), w3t,
                preferred_element_type=jnp.float32) + params["fc3_b"]
    return jax.nn.log_softmax(y, axis=1)


if __name__ == "__main__":
    key = jax.random.PRNGKey(0)
    k_param, k_x = jax.random.split(key)

    batch = 8
    input_size = 128
    num_classes = 10

    params = init_params(k_param, input_size, num_classes)
    packed = pack_params(params)            # one-time fold/transpose/pad/cast
    x = jax.random.normal(k_x, (batch, input_size), jnp.float32)

    out = mnist_net_forward(packed, x)
    out = jax.block_until_ready(out)
    assert out.shape == (batch, num_classes)

    # Tight check vs a reference with matching bf16-weight / f32-acc numerics.
    ref_bf16 = mnist_net_reference_bf16(params, x)
    assert jnp.allclose(out, ref_bf16, atol=2e-3, rtol=2e-3), "mismatch vs bf16 reference"

    # Loose check vs the exact f32 PyTorch-semantics reference (bf16 weight
    # rounding is the only difference).
    ref_f32 = mnist_net_reference_f32(params, x)
    assert jnp.allclose(out, ref_f32, atol=5e-2, rtol=5e-2), "mismatch vs f32 reference"

    print("KERNEL_OK")
</pallas_src>

<mosaic_0001>
module attributes {stable_mosaic.version = 11 : i64} {
  func.func @_mnist_fused_kernel(%arg0: i32, %arg1: memref<8x128xbf16, #tpu.memory_space<vmem>>, %arg2: memref<128x2048xbf16, #tpu.memory_space<vmem>>, %arg3: memref<1x2048xf32, #tpu.memory_space<vmem>>, %arg4: memref<1024x2048xbf16, #tpu.memory_space<vmem>>, %arg5: memref<1x2048xf32, #tpu.memory_space<vmem>>, %arg6: memref<2048x10xbf16, #tpu.memory_space<vmem>>, %arg7: memref<1x10xf32, #tpu.memory_space<vmem>>, %arg8: memref<8x10xf32, #tpu.memory_space<vmem>>, %arg9: memref<8x2048xbf16, #tpu.memory_space<vmem>>, %arg10: memref<8x2048xf32, #tpu.memory_space<vmem>>) attributes {dimension_semantics = [#tpu.dimension_semantics<arbitrary>], iteration_bounds = array<i64: 2>, scalar_prefetch = 0 : i64, scratch_operands = 2 : i64, tpu.core_type = #tpu.core_type<tc>, window_params = [{pipeline_mode = #tpu.pipeline_mode<synchronous>, transform_indices = @transform_0, window_bounds = array<i64: 8, 128>}, {pipeline_mode = #tpu.pipeline_mode<synchronous>, transform_indices = @transform_1, window_bounds = array<i64: 128, 2048>}, {pipeline_mode = #tpu.pipeline_mode<synchronous>, transform_indices = @transform_2, window_bounds = array<i64: 1, 2048>}, {transform_indices = @transform_3, window_bounds = array<i64: 1024, 2048>}, {pipeline_mode = #tpu.pipeline_mode<synchronous>, transform_indices = @transform_4, window_bounds = array<i64: 1, 2048>}, {pipeline_mode = #tpu.pipeline_mode<synchronous>, transform_indices = @transform_5, window_bounds = array<i64: 2048, 10>}, {pipeline_mode = #tpu.pipeline_mode<synchronous>, transform_indices = @transform_6, window_bounds = array<i64: 1, 10>}, {pipeline_mode = #tpu.pipeline_mode<synchronous>, transform_indices = @transform_7, window_bounds = array<i64: 8, 10>}]} {
    %c0_i32 = arith.constant 0 : i32
    %0 = arith.cmpi eq, %arg0, %c0_i32 : i32
    %1 = arith.extui %0 : i1 to i32
    %c0_i32_0 = arith.constant 0 : i32
    %2 = arith.cmpi ne, %1, %c0_i32_0 : i32
    scf.if %2 {
      %c0_8 = arith.constant 0 : index
      %c0_9 = arith.constant 0 : index
      %18 = vector.load %arg1[%c0_8, %c0_9] : memref<8x128xbf16, #tpu.memory_space<vmem>>, vector<8x128xbf16>
      %c0_10 = arith.constant 0 : index
      %c0_11 = arith.constant 0 : index
      %19 = vector.load %arg2[%c0_10, %c0_11] : memref<128x2048xbf16, #tpu.memory_space<vmem>>, vector<128x2048xbf16>
      %cst_12 = arith.constant dense<0.000000e+00> : vector<8x2048xf32>
      %20 = tpu.matmul %18, %19, %cst_12 {dimension_numbers = #tpu.dot_dimension_numbers<[1], [0], [0], [1], [0, 0, 1, 1], [], []>} : vector<8x128xbf16>, vector<128x2048xbf16>, vector<8x2048xf32> -> vector<8x2048xf32>
      %c0_13 = arith.constant 0 : index
      %c0_14 = arith.constant 0 : index
      %21 = vector.load %arg3[%c0_13, %c0_14] : memref<1x2048xf32, #tpu.memory_space<vmem>>, vector<1x2048xf32>
      %22 = vector.broadcast %21 : vector<1x2048xf32> to vector<8x2048xf32>
      %23 = arith.addf %20, %22 : vector<8x2048xf32>
      %cst_15 = arith.constant 0.000000e+00 : f32
      %24 = vector.broadcast %cst_15 : f32 to vector<8x2048xf32>
      %25 = arith.maximumf %23, %24 : vector<8x2048xf32>
      %26 = arith.truncf %25 : vector<8x2048xf32> to vector<8x2048xbf16>
      %c0_16 = arith.constant 0 : index
      %c0_17 = arith.constant 0 : index
      %27 = vector.load %arg9[%c0_16, %c0_17] : memref<8x2048xbf16, #tpu.memory_space<vmem>>, vector<8x2048xbf16>
      tpu.vector_store %arg9[%c0_16, %c0_17], %26 {strides = array<i32>} : memref<8x2048xbf16, #tpu.memory_space<vmem>>, vector<8x2048xbf16>,
    } else {
    }
    %c1024_i32 = arith.constant 1024 : i32
    %3 = arith.muli %arg0, %c1024_i32 : i32
    %4 = tpu.assume_multiple %3, 128 : i32
    %c0 = arith.constant 0 : index
    %5 = arith.index_cast %4 : i32 to index
    %6 = vector.load %arg9[%c0, %5] : memref<8x2048xbf16, #tpu.memory_space<vmem>>, vector<8x1024xbf16>
    %c0_1 = arith.constant 0 : index
    %c0_2 = arith.constant 0 : index
    %7 = vector.load %arg4[%c0_1, %c0_2] : memref<1024x2048xbf16, #tpu.memory_space<vmem>>, vector<1024x2048xbf16>
    %cst = arith.constant dense<0.000000e+00> : vector<8x2048xf32>
    %8 = tpu.matmul %6, %7, %cst {dimension_numbers = #tpu.dot_dimension_numbers<[1], [0], [0], [1], [0, 0, 1, 1], [], []>} : vector<8x1024xbf16>, vector<1024x2048xbf16>, vector<8x2048xf32> -> vector<8x2048xf32>
    %c0_i32_3 = arith.constant 0 : i32
    %9 = arith.cmpi eq, %arg0, %c0_i32_3 : i32
    %10 = arith.extui %9 : i1 to i32
    %c0_i32_4 = arith.constant 0 : i32
    %11 = arith.cmpi ne, %10, %c0_i32_4 : i32
    scf.if %11 {
      %c0_8 = arith.constant 0 : index
      %c0_9 = arith.constant 0 : index
      %18 = vector.load %arg10[%c0_8, %c0_9] : memref<8x2048xf32, #tpu.memory_space<vmem>>, vector<8x2048xf32>
      tpu.vector_store %arg10[%c0_8, %c0_9], %8 {strides = array<i32>} : memref<8x2048xf32, #tpu.memory_space<vmem>>, vector<8x2048xf32>,
    } else {
    }
    %c0_i32_5 = arith.constant 0 : i32
    %12 = arith.cmpi sgt, %arg0, %c0_i32_5 : i32
    %13 = arith.extui %12 : i1 to i32
    %c0_i32_6 = arith.constant 0 : i32
    %14 = arith.cmpi ne, %13, %c0_i32_6 : i32
    scf.if %14 {
      %c0_8 = arith.constant 0 : index
      %c0_9 = arith.constant 0 : index
      %18 = vector.load %arg10[%c0_8, %c0_9] : memref<8x2048xf32, #tpu.memory_space<vmem>>, vector<8x2048xf32>
      %19 = arith.addf %18, %8 : vector<8x2048xf32>
      %c0_10 = arith.constant 0 : index
      %c0_11 = arith.constant 0 : index
      %20 = vector.load %arg10[%c0_10, %c0_11] : memref<8x2048xf32, #tpu.memory_space<vmem>>, vector<8x2048xf32>
      tpu.vector_store %arg10[%c0_10, %c0_11], %19 {strides = array<i32>} : memref<8x2048xf32, #tpu.memory_space<vmem>>, vector<8x2048xf32>,
    } else {
    }
    %c1_i32 = arith.constant 1 : i32
    %15 = arith.cmpi eq, %arg0, %c1_i32 : i32
    %16 = arith.extui %15 : i1 to i32
    %c0_i32_7 = arith.constant 0 : i32
    %17 = arith.cmpi ne, %16, %c0_i32_7 : i32
    scf.if %17 {
      %c0_8 = arith.constant 0 : index
      %c0_9 = arith.constant 0 : index
      %18 = vector.load %arg10[%c0_8, %c0_9] : memref<8x2048xf32, #tpu.memory_space<vmem>>, vector<8x2048xf32>
      %c0_10 = arith.constant 0 : index
      %c0_11 = arith.constant 0 : index
      %19 = vector.load %arg5[%c0_10, %c0_11] : memref<1x2048xf32, #tpu.memory_space<vmem>>, vector<1x2048xf32>
      %20 = vector.broadcast %19 : vector<1x2048xf32> to vector<8x2048xf32>
      %21 = arith.addf %18, %20 : vector<8x2048xf32>
      %cst_12 = arith.constant 0.000000e+00 : f32
      %22 = vector.broadcast %cst_12 : f32 to vector<8x2048xf32>
      %23 = arith.maximumf %21, %22 : vector<8x2048xf32>
      %24 = arith.truncf %23 : vector<8x2048xf32> to vector<8x2048xbf16>
      %c0_13 = arith.constant 0 : index
      %c0_14 = arith.constant 0 : index
      %25 = vector.load %arg6[%c0_13, %c0_14] : memref<2048x10xbf16, #tpu.memory_space<vmem>>, vector<2048x10xbf16>
      %cst_15 = arith.constant dense<0.000000e+00> : vector<8x10xf32>
      %26 = tpu.matmul %24, %25, %cst_15 {dimension_numbers = #tpu.dot_dimension_numbers<[1], [0], [0], [1], [0, 0, 1, 1], [], []>} : vector<8x2048xbf16>, vector<2048x10xbf16>, vector<8x10xf32> -> vector<8x10xf32>
      %c0_16 = arith.constant 0 : index
      %c0_17 = arith.constant 0 : index
      %27 = vector.load %arg7[%c0_16, %c0_17] : memref<1x10xf32, #tpu.memory_space<vmem>>, vector<1x10xf32>
      %28 = vector.broadcast %27 : vector<1x10xf32> to vector<8x10xf32>
      %29 = arith.addf %26, %28 : vector<8x10xf32>
      %cst_18 = arith.constant dense<0xFF800000> : vector<8xf32>
      %30 = vector.multi_reduction <maximumf>, %29, %cst_18 [1] : vector<8x10xf32> to vector<8xf32>
      %31 = vector.shape_cast %30 : vector<8xf32> to vector<8x1xf32>
      %32 = vector.broadcast %31 : vector<8x1xf32> to vector<8x10xf32>
      %33 = arith.subf %29, %32 : vector<8x10xf32>
      %34 = math.exp %33 : vector<8x10xf32>
      %cst_19 = arith.constant dense<0.000000e+00> : vector<8xf32>
      %35 = vector.multi_reduction <add>, %34, %cst_19 [1] : vector<8x10xf32> to vector<8xf32>
      %36 = vector.shape_cast %35 : vector<8xf32> to vector<8x1xf32>
      %37 = math.log %36 : vector<8x1xf32>
      %38 = arith.addf %31, %37 : vector<8x1xf32>
      %39 = vector.broadcast %38 : vector<8x1xf32> to vector<8x10xf32>
      %40 = arith.subf %29, %39 : vector<8x10xf32>
      %c0_20 = arith.constant 0 : index
      %c0_21 = arith.constant 0 : index
      %41 = vector.load %arg8[%c0_20, %c0_21] : memref<8x10xf32, #tpu.memory_space<vmem>>, vector<8x10xf32>
      tpu.vector_store %arg8[%c0_20, %c0_21], %40 {strides = array<i32>} : memref<8x10xf32, #tpu.memory_space<vmem>>, vector<8x10xf32>,
    } else {
    }
    return
  }
  func.func @transform_0(%arg0: i32) -> (i32, i32) {
    %c0_i32 = arith.constant 0 : i32
    %c0_i32_0 = arith.constant 0 : i32
    %c0_i32_1 = arith.constant 0 : i32
    return %c0_i32, %c0_i32_0 : i32, i32
  }
  func.func @transform_1(%arg0: i32) -> (i32, i32) {
    %c0_i32 = arith.constant 0 : i32
    %c0_i32_0 = arith.constant 0 : i32
    %c0_i32_1 = arith.constant 0 : i32
    return %c0_i32, %c0_i32_0 : i32, i32
  }
  func.func @transform_2(%arg0: i32) -> (i32, i32) {
    %c0_i32 = arith.constant 0 : i32
    %c0_i32_0 = arith.constant 0 : i32
    %c0_i32_1 = arith.constant 0 : i32
    return %c0_i32, %c0_i32_0 : i32, i32
  }
  func.func @transform_3(%arg0: i32) -> (i32, i32) {
    %c0_i32 = arith.constant 0 : i32
    %c0_i32_0 = arith.constant 0 : i32
    return %arg0, %c0_i32 : i32, i32
  }
  func.func @transform_4(%arg0: i32) -> (i32, i32) {
    %c0_i32 = arith.constant 0 : i32
    %c0_i32_0 = arith.constant 0 : i32
    %c0_i32_1 = arith.constant 0 : i32
    return %c0_i32, %c0_i32_0 : i32, i32
  }
  func.func @transform_5(%arg0: i32) -> (i32, i32) {
    %c0_i32 = arith.constant 0 : i32
    %c0_i32_0 = arith.constant 0 : i32
    %c0_i32_1 = arith.constant 0 : i32
    return %c0_i32, %c0_i32_0 : i32, i32
  }
  func.func @transform_6(%arg0: i32) -> (i32, i32) {
    %c0_i32 = arith.constant 0 : i32
    %c0_i32_0 = arith.constant 0 : i32
    %c0_i32_1 = arith.constant 0 : i32
    return %c0_i32, %c0_i32_0 : i32, i32
  }
  func.func @transform_7(%arg0: i32) -> (i32, i32) {
    %c0_i32 = arith.constant 0 : i32
    %c0_i32_0 = arith.constant 0 : i32
    %c0_i32_1 = arith.constant 0 : i32
    return %c0_i32, %c0_i32_0 : i32, i32
  }
}

</mosaic_0001>

<bundles_post_ra>
// kernel: mnist_net_forward.1
= control target key start
LH: loop header
LB: loop body
LE: loop exit
PB: predicated region body
PF: predicated region fallthrough
CT: control target
= control target key end

     0   :  { %12 = vsyncpa [#allocation5], 0  ;;  %s14698_s0 = inlined_call_operand.vmem [shape: bf16[8,128], index: 0, kind: input, shape index: {}]   ;;  %s14699_s1 = inlined_call_operand.hbm [shape: bf16[128,2048], index: 1, kind: input, shape index: {}]   ;;  %s14700_s2 = inlined_call_operand.hbm [shape: f32[1,2048], index: 2, kind: input, shape index: {}]   ;;  %s14701_s3 = inlined_call_operand.hbm [shape: bf16[2048,2048], index: 3, kind: input, shape index: {}]   ;;  %s14702_s4 = inlined_call_operand.hbm [shape: f32[1,2048], index: 4, kind: input, shape index: {}]   ;;  %s14703_s5 = inlined_call_operand.vmem [shape: bf16[2048,10], index: 5, kind: input, shape index: {}]   ;;  %s14704_s6 = inlined_call_operand.hbm [shape: f32[1,10], index: 6, kind: input, shape index: {}]   ;;  %s14705_s7 = inlined_call_operand.hbm [shape: f32[8,10], index: 7, kind: output, shape index: {}]  }
   0x1   :  { %13 = vsyncpa [#allocation8], 0 }
   0x2   :  { %14 = vsyncpa [#allocation12], 0 }
   0x3   :  { %15 = vsyncpa [#allocation6], 0  ;;  %s12791_s24 = smov 0   ;;  %s12793_s25 = smov 0  }
   0x4   :  { %s12795_s26 = smov 0   ;;  %s12797_s27 = smov 0  }
   0x5 LB: > { %s12810_s28 = sadd.s32 4294967295, %s12740_s27   ;;  %p104_p0 = scmp.ne.s32.totalorder %s12732_s25, %s12728_s24  ;;  %s12740_s27 = sphi %s12797_s27, %s14728_s27   ;;  %s12736_s26 = sphi %s12795_s26, %s14727_s26   ;;  %s12732_s25 = sphi %s12793_s25, %s14726_s25   ;;  %s12728_s24 = sphi %s12791_s24, %s14725_s24  }
   0x6   : > { %p14706_p1 = scmp.eq.s32.totalorder %s12810_s28, 0  ;;  %p10791_p2 = scmp.ge.s32.totalorder %s12740_s27, 1 }
   0x7   : > { %p199_p3 = scmp.lt.s32.totalorder %s12740_s27, 3  ;;  %s12742_s8 = smov [#allocation4]  }
   0x8   : > { %p12819_p5 = por %p14706_p1, %p104_p0  ;;  %s214_s9 = sshll.u32 %s12742_s8, 4  ;;  %s215_s9 = int_to_ptr.vmem [resolvable:$true] %s214_s9 }
   0x9   : > { %p12823_p6 = pnand %p10791_p2, %p199_p3  ;;  %s12743_s11 = smov [#allocation7]  }
   0xa   : > { %s14709_s29 = scalar_select %p12819_p5, 1, 0 }
   0xb   : > { %s14710_s30 = scalar_select %p12823_p6, 1, 0 }
   0xc   : > { %p12322_p7 = pneg %p12823_p6  ;;  %s228_s12 = sshll.u32 %s12743_s11, 4  ;;  %s229_s12 = int_to_ptr.vmem [resolvable:$true] %s228_s12 }
   0xd   : > { %s12744_s13 = smov [#allocation10]   ;;  %s12541_s15 = scalar_lea.vmem %s215_s9, 16384 }
   0xe   : > { %p12831_p8 = pnand %p12322_p7, %p14706_p1  ;;  %s239_s14 = sshll.u32 %s12744_s13, 4  ;;  %s240_s14 = int_to_ptr.vmem [resolvable:$true] %s239_s14 }
   0xf   : > { %p12542_p10 = scmp.ne.s32.totalorder %s215_s9, %s12541_s15  ;;  %p12549_p13 = scmp.lt.s32.totalorder %s215_s9, %s215_s9 }
  0x10   : > { %p12532_p9 = pneg %p12831_p8  ;;  %p12550_p0 = scmp.lt.s32.totalorder %s12541_s15, %s12541_s15 }
  0x12   : > { %p12544_p11 = pnand %p12542_p10, %p12532_p9  ;;  %p12551_p2 = por %p12550_p0, %p12549_p13 }
  0x14   : > { %p12545_p12 = pneg %p12544_p11 }
  0x16   : > { %p12552_p3 = pnand %p12551_p2, %p12545_p12 }
  0x18   : > { %12555 = shalt.err (!%p12552_p3)
}
  0x19   : > { %s12745_s16 = smov 1024   ;;  %s12746_s17 = smov 64  }
  0x1a   : > { %12325 = dma.hbm_to_vmem [thread:$0]  (!%p12831_p8), %s14699_s1, 16384, %s215_s9, [#allocation5], %s12745_s16, %s12745_s16, %s12746_s17  }
  0x1b   : > { %s12567_s20 = scalar_lea.vmem %s229_s12, 256  ;;  %p12575_p12 = scmp.lt.s32.totalorder %s229_s12, %s229_s12 }
  0x1c   : > { %p12568_p7 = scmp.ne.s32.totalorder %s229_s12, %s12567_s20  ;;  %p12576_p13 = scmp.lt.s32.totalorder %s12567_s20, %s12567_s20 }
  0x1e   : > { %p12570_p10 = pnand %p12568_p7, %p12532_p9  ;;  %p12577_p0 = por %p12576_p13, %p12575_p12 }
  0x20   : > { %p12571_p11 = pneg %p12570_p10 }
  0x22   : > { %p12578_p2 = pnand %p12577_p0, %p12571_p11 }
  0x24   : > { %12581 = shalt.err (!%p12578_p2)
}
  0x25   : > { %12328 = dma.hbm_to_vmem [thread:$0]  (!%p12831_p8), %s14700_s2, 256, %s229_s12, [#allocation8]  }
  0x26   : > { %s12593_s23 = scalar_lea.vmem %s240_s14, 256  ;;  %p12601_p10 = scmp.lt.s32.totalorder %s240_s14, %s240_s14 }
  0x27   : > { %p12594_p3 = scmp.ne.s32.totalorder %s240_s14, %s12593_s23  ;;  %p12602_p1 = scmp.lt.s32.totalorder %s12593_s23, %s12593_s23 }
  0x29   : > { %p12596_p4 = pnand %p12594_p3, %p12532_p9  ;;  %p12603_p5 = por %p12602_p1, %p12601_p10 }
  0x2b   : > { %p12597_p7 = pneg %p12596_p4 }
  0x2d   : > { %p12604_p12 = pnand %p12603_p5, %p12597_p7 }
  0x2f   : > { %12607 = shalt.err (!%p12604_p12)
}
  0x30   : > { %12331 = dma.hbm_to_vmem [thread:$0]  (!%p12831_p8), %s14702_s4, 256, %s240_s14, [#allocation8]  }
  0x31   : > { %s12747_s9 = smov [#allocation11]  }
  0x32   : > { %s253_s11 = sshll.u32 %s12747_s9, 4  ;;  %s254_s11 = int_to_ptr.vmem [resolvable:$true] %s253_s11 }
  0x33   : > { %s12619_s12 = scalar_lea.vmem %s254_s11, 16  ;;  %s12626_s13 = scalar_lea.vmem %s254_s11, 32 }
  0x34   : > { %p12620_p11 = scmp.ne.s32.totalorder %s254_s11, %s12619_s12  ;;  %p12627_p1 = scmp.lt.s32.totalorder %s254_s11, %s254_s11 }
  0x35   : > { %p12628_p5 = scmp.lt.s32.totalorder %s12626_s13, %s12619_s12 }
  0x36   : > { %p12622_p4 = pnand %p12620_p11, %p12532_p9 }
  0x37   : > { %p12629_p0 = por %p12628_p5, %p12627_p1 }
  0x38   : > { %p12623_p13 = pneg %p12622_p4 }
  0x3a   : > { %p12630_p2 = pnand %p12629_p0, %p12623_p13 }
  0x3c   : > { %12633 = shalt.err (!%p12630_p2)
}
  0x3d   : > { %12334 = dma.hbm_to_vmem [thread:$0]  (!%p12831_p8), %s14704_s6, 16, %s254_s11, [#allocation12]  }
  0x3e   : > { %s12873_s14 = sadd.s32 1, %s12740_s27   ;;  %s91_s19 = sadd.s32 1, %s12736_s26 }
  0x3f   : > { %s88_s10 = ssub.s32 %s12740_s27, %s12873_s14  ;;  %p98_p9 = scmp.ne.s32.totalorder %s12736_s26, %s12732_s25 }
  0x40   : > { %p89_p3 = scmp.eq.s32.totalorder %s88_s10, 0  ;;  %p99_p7 = scmp.eq.s32.totalorder %s12740_s27, 0 }
  0x41   : > { %p12343_p10 = scmp.lt.s32.totalorder %s12740_s27, 2  ;;  %s264_s20 = sand.u32 1, %s12740_s27  }
  0x42   : > { %s12884_s21 = scalar_select %p89_p3, %s12736_s26, %s91_s19  }
  0x43   : > { %p100_p12 = por %p99_p7, %p98_p9  ;;  %s266_s22 = sand.u32 1, %s12736_s26  }
  0x44   : > { %s12115_s23 = sshll.u32 %s12740_s27, 17  ;;  %s10797_s24 = sshll.u32 %s266_s22, 13 }
  0x45   : > { %s12891_s11 = scalar_lea.hbm %s14701_s3, %s12115_s23  ;;  %p12893_p8 = pnand %p12343_p10, %p100_p12 }
  0x46   : > { %s268_s13 = scalar_lea.vmem [#allocation9], %s10797_s24  ;;  %s12899_s18 = scalar_lea.sflag [#allocation5], %s264_s20 }
  0x47   : > { %s276_s15 = sshll.u32 %s268_s13, 4  ;;  %s12634_s27 = scalar_lea.hbm %s12891_s11, 131072  ;;  %s12897_s15 = int_to_ptr.vmem [resolvable:$true] %s276_s15 }
  0x48   : > { %p12635_p11 = scmp.ne.s32.totalorder %s12891_s11, %s12634_s27  ;;  %p12636_p4 = pneg %p12893_p8 }
  0x49   : > { %s12639_s22 = scalar_lea.hbm %s14701_s3, 262144  ;;  %p12640_p5 = scmp.lt.s32.totalorder %s12891_s11, %s14701_s3 }
  0x4a   : > { %p12637_p13 = pnand %p12636_p4, %p12635_p11  ;;  %p12641_p0 = scmp.lt.s32.totalorder %s12639_s22, %s12634_s27 }
  0x4c   : > { %p12638_p1 = pneg %p12637_p13  ;;  %p12642_p2 = por %p12641_p0, %p12640_p5 }
  0x4e   : > { %p12643_p9 = pnand %p12642_p2, %p12638_p1 }
  0x50   : > { %12646 = shalt.err (!%p12643_p9)
}
  0x51   : > { %s12647_s20 = scalar_lea.vmem %s12897_s15, 131072  ;;  %s12748_s24 = smov [#allocation9]  }
  0x52   : > { %p12648_p3 = scmp.ne.s32.totalorder %s12897_s15, %s12647_s20  ;;  %s12652_s9 = sshll.u32 %s12748_s24, 4  ;;  %s12653_s9 = int_to_ptr.vmem [resolvable:$false] %s12652_s9 }
  0x53   : > { %s12654_s13 = scalar_lea.vmem %s12653_s9, 262144  ;;  %p12655_p12 = scmp.lt.s32.totalorder %s12897_s15, %s12653_s9 }
  0x54   : > { %p12650_p7 = pnand %p12648_p3, %p12636_p4  ;;  %p12656_p11 = scmp.lt.s32.totalorder %s12654_s13, %s12647_s20 }
  0x56   : > { %p12651_p10 = pneg %p12650_p7  ;;  %p12657_p13 = por %p12656_p11, %p12655_p12 }
  0x58   : > { %p12658_p6 = pnand %p12657_p13, %p12651_p10 }
  0x5a   : > { %12661 = shalt.err (!%p12658_p6)
}
  0x5b   : > { %12338 = dma.hbm_to_vmem [thread:$0]  (!%p12893_p8), %s12891_s11, 131072, %s12897_s15, %s12899_s18, %s12745_s16, %s12745_s16, %s12746_s17  }
  0x5c   : > { %p14713_p4 = scmp.ne.s32.totalorder %s14710_s30, 0 }
  0x5d   : > { %p14714_p1 = scmp.eq.s32.totalorder (!%p14713_p4), %s12810_s28, 0 }
  0x5e   : > { %288 = sbr.rel (%p14713_p4) target bundleno = 2381 (0x94d), region = 48 }
  0x63   : > { %12703 = dma.done.wait (%p14714_p1), [#allocation5], 16384   ;;  %p14715_p5 = pmov %p14714_p1 }
  0x64   : > { %p14716_p6 = pmov %p14714_p1 }
  0x65   : > { %12705 = vsyncadd (%p14715_p5), [#allocation5], 4294950912 }
  0x66   : > { %12707 = dma.done.wait (%p14716_p6), [#allocation8], 256   ;;  %p14717_p0 = pmov %p14714_p1 }
  0x67   : > { %s298_s12 = sand.u32 1, %s12810_s28   ;;  %s300_s16 = sand.u32 1, %s12732_s25  }
  0x68   : > { %12709 = vsyncadd (%p14717_p0), [#allocation8], 4294967040  ;;  %s10804_s17 = sshll.u32 %s300_s16, 13  ;;  %s299_s30 = scalar_lea.sflag [#allocation5], %s298_s12 }
  0x69   : > { %s12935_s11 = scalar_lea.vmem [#allocation9], %s10804_s17  ;;  %p14718_p8 = scmp.ne.s32.totalorder %s14709_s29, 0 }
  0x6b   : > { %12711 = dma.done.wait (%p14718_p8), %s299_s30, 131072  }
  0x6c   : > { %12713 = vsyncadd (%p14718_p8), %s299_s30, 4294836224  ;;  %p14719_p2 = pmov %p14717_p0 }
  0x6d   : > { %p14720_p9 = pmov %p14717_p0 }
  0x6e   : > { %12715 = dma.done.wait (%p14719_p2), [#allocation8], 256  }
  0x6f   : > { %12717 = vsyncadd (%p14720_p9), [#allocation8], 4294967040  ;;  %p14721_p3 = pmov %p14717_p0 }
  0x70   : > { %p14722_p7 = pmov %p14717_p0 }
  0x71   : > { %12719 = dma.done.wait (%p14721_p3), [#allocation12], 16  }
  0x72   : > { %12721 = vsyncadd (%p14722_p7), [#allocation12], 4294967280  ;;  %p14723_p10 = scmp.ne.s32.totalorder %s12810_s28, 0 }
  0x74   : > { %341 = sbr.rel (%p14723_p10) target bundleno = 455 (0x1c7), region = 72 }
  0x79   : > { %v455_v0 = vld [vmem:[#allocation4 + $0x380] sm:$0xff]  ;;  %v456_v2 = vld [vmem:[#allocation4 + $0x388] sm:$0xff]  ;;  %v12749_v8 = vmov 0   ;;  %v457_v63 = vld [vmem:[#allocation4 + $0x390] sm:$0xff] }
  0x7a   : > { %v463_v1 = vld [vmem:[#allocation4 + $0x3c0] sm:$0xff]  ;;  %v464_v4 = vld [vmem:[#allocation4 + $0x3c8] sm:$0xff]  ;;  %1227 = vmatprep.mubr.bf16.mxu0 %v12749_v8  ;;  %1268 = vmatprep.mubr.bf16.mxu1 %v12749_v8 }
  0x7b   : > { %v10921_v3 = vcombine.high %v455_v0, %v463_v1  ;;  %v10920_v5 = vcombine.low %v455_v0, %v463_v1  ;;  %v439_v6 = vld [vmem:[#allocation4 + $0x300] sm:$0xff]  ;;  %v10923_v9 = vcombine.high %v456_v2, %v464_v4  ;;  %v10922_v10 = vcombine.low %v456_v2, %v464_v4  ;;  %v440_v12 = vld [vmem:[#allocation4 + $0x308] sm:$0xff]  ;;  %v465_v0 = vld [vmem:[#allocation4 + $0x3d0] sm:$0xff] }
  0x7c   : > { %v447_v7 = vld [vmem:[#allocation4 + $0x340] sm:$0xff]  ;;  %v448_v13 = vld [vmem:[#allocation4 + $0x348] sm:$0xff]  ;;  %v458_v1 = vld [vmem:[#allocation4 + $0x398] sm:$0xff] }
  0x7d   : > { %v10905_v11 = vcombine.high %v439_v6, %v447_v7  ;;  %v423_v14 = vld [vmem:[#allocation4 + $0x280] sm:$0xff]  ;;  %1195 = vmatprep.subr.bf16.mxu0 %v10921_v3  ;;  %v10907_v15 = vcombine.high %v440_v12, %v448_v13  ;;  %v424_v17 = vld [vmem:[#allocation4 + $0x288] sm:$0xff]  ;;  %1236 = vmatprep.subr.bf16.mxu1 %v10923_v9  ;;  %v10904_v19 = vcombine.low %v439_v6, %v447_v7  ;;  %v466_v2 = vld [vmem:[#allocation4 + $0x3d8] sm:$0xff] }
  0x7e   : > { %v431_v16 = vld [vmem:[#allocation4 + $0x2c0] sm:$0xff]  ;;  %v432_v18 = vld [vmem:[#allocation4 + $0x2c8] sm:$0xff]  ;;  %1196 = vmatpush1.bf16.msra.mxu0 %v10920_v5  ;;  %1237 = vmatpush1.bf16.msra.mxu1 %v10922_v10  ;;  %v10906_v20 = vcombine.low %v440_v12, %v448_v13  ;;  %v10925_v5 = vcombine.high %v457_v63, %v465_v0  ;;  %v10927_v6 = vcombine.high %v458_v1, %v466_v2  ;;  %v441_v7 = vld [vmem:[#allocation4 + $0x310] sm:$0xff] }
  0x7f   : > { %1197 = vmatprep.subr.bf16.mxu0 %v10905_v11  ;;  %v10889_v21 = vcombine.high %v423_v14, %v431_v16  ;;  %1238 = vmatprep.subr.bf16.mxu1 %v10907_v15  ;;  %v10891_v22 = vcombine.high %v424_v17, %v432_v18  ;;  %v407_v23 = vld [vmem:[#allocation4 + $0x200] sm:$0xff]  ;;  %v408_v25 = vld [vmem:[#allocation4 + $0x208] sm:$0xff]  ;;  %v10888_v27 = vcombine.low %v423_v14, %v431_v16  ;;  %v449_v9 = vld [vmem:[#allocation4 + $0x350] sm:$0xff] }
  0x80   : > { %v415_v24 = vld [vmem:[#allocation4 + $0x240] sm:$0xff]  ;;  %v416_v26 = vld [vmem:[#allocation4 + $0x248] sm:$0xff]  ;;  %v10890_v28 = vcombine.low %v424_v17, %v432_v18  ;;  %v442_v10 = vld [vmem:[#allocation4 + $0x318] sm:$0xff]  ;;  %v10924_v13 = vcombine.low %v457_v63, %v465_v0  ;;  %v10926_v14 = vcombine.low %v458_v1, %v466_v2  ;;  %v10909_v15 = vcombine.high %v441_v7, %v449_v9 }
  0x81   : > { %v10873_v29 = vcombine.high %v407_v23, %v415_v24  ;;  %v10875_v30 = vcombine.high %v408_v25, %v416_v26  ;;  %v391_v31 = vld [vmem:[#allocation4 + $0x180] sm:$0xff]  ;;  %v392_v33 = vld [vmem:[#allocation4 + $0x188] sm:$0xff]  ;;  %v10872_v35 = vcombine.low %v407_v23, %v415_v24  ;;  %v10874_v36 = vcombine.low %v408_v25, %v416_v26  ;;  %v450_v11 = vld [vmem:[#allocation4 + $0x358] sm:$0xff] }
  0x82   : > { %1198 = vmatpush1.bf16.msra.mxu0 %v10904_v19  ;;  %1239 = vmatpush1.bf16.msra.mxu1 %v10906_v20  ;;  %v399_v32 = vld [vmem:[#allocation4 + $0x1c0] sm:$0xff]  ;;  %v400_v34 = vld [vmem:[#allocation4 + $0x1c8] sm:$0xff]  ;;  %v10911_v16 = vcombine.high %v442_v10, %v450_v11  ;;  %v425_v17 = vld [vmem:[#allocation4 + $0x290] sm:$0xff] }
  0x83   : > { %1199 = vmatprep.subr.bf16.mxu0 %v10889_v21  ;;  %1240 = vmatprep.subr.bf16.mxu1 %v10891_v22  ;;  %v10857_v37 = vcombine.high %v391_v31, %v399_v32  ;;  %v10859_v38 = vcombine.high %v392_v33, %v400_v34  ;;  %v375_v39 = vld [vmem:[#allocation4 + $0x100] sm:$0xff]  ;;  %v376_v41 = vld [vmem:[#allocation4 + $0x108] sm:$0xff]  ;;  %v10856_v43 = vcombine.low %v391_v31, %v399_v32  ;;  %v433_v18 = vld [vmem:[#allocation4 + $0x2d0] sm:$0xff] }
  0x84   : > { %v383_v40 = vld [vmem:[#allocation4 + $0x140] sm:$0xff]  ;;  %v384_v42 = vld [vmem:[#allocation4 + $0x148] sm:$0xff]  ;;  %v10858_v44 = vcombine.low %v392_v33, %v400_v34  ;;  %v426_v19 = vld [vmem:[#allocation4 + $0x298] sm:$0xff]  ;;  %v10908_v21 = vcombine.low %v441_v7, %v449_v9  ;;  %v10910_v22 = vcombine.low %v442_v10, %v450_v11  ;;  %v10893_v23 = vcombine.high %v425_v17, %v433_v18 }
  0x85   : > { %v10841_v45 = vcombine.high %v375_v39, %v383_v40  ;;  %v10843_v46 = vcombine.high %v376_v41, %v384_v42  ;;  %v359_v47 = vld [vmem:[#allocation4 + $0x80] sm:$0xff]  ;;  %v360_v49 = vld [vmem:[#allocation4 + $0x88] sm:$0xff]  ;;  %v10840_v51 = vcombine.low %v375_v39, %v383_v40  ;;  %v10842_v52 = vcombine.low %v376_v41, %v384_v42  ;;  %v434_v20 = vld [vmem:[#allocation4 + $0x2d8] sm:$0xff] }
  0x86   : > { %1200 = vmatpush1.bf16.msra.mxu0 %v10888_v27  ;;  %1241 = vmatpush1.bf16.msra.mxu1 %v10890_v28  ;;  %v367_v48 = vld [vmem:[#allocation4 + $0xc0] sm:$0xff]  ;;  %v368_v50 = vld [vmem:[#allocation4 + $0xc8] sm:$0xff]  ;;  %v10895_v24 = vcombine.high %v426_v19, %v434_v20  ;;  %v409_v25 = vld [vmem:[#allocation4 + $0x210] sm:$0xff] }
  0x87   : > { %1201 = vmatprep.subr.bf16.mxu0 %v10873_v29  ;;  %1242 = vmatprep.subr.bf16.mxu1 %v10875_v30  ;;  %v10825_v53 = vcombine.high %v359_v47, %v367_v48  ;;  %v10827_v54 = vcombine.high %v360_v49, %v368_v50  ;;  %v343_v55 = vld [vmem:[#allocation4] sm:$0xff]  ;;  %v344_v57 = vld [vmem:[#allocation4 + $0x8] sm:$0xff]  ;;  %v10824_v59 = vcombine.low %v359_v47, %v367_v48  ;;  %v417_v26 = vld [vmem:[#allocation4 + $0x250] sm:$0xff] }
  0x88   : > { %v351_v56 = vld [vmem:[#allocation4 + $0x40] sm:$0xff]  ;;  %v352_v58 = vld [vmem:[#allocation4 + $0x48] sm:$0xff]  ;;  %v10826_v60 = vcombine.low %v360_v49, %v368_v50  ;;  %v410_v27 = vld [vmem:[#allocation4 + $0x218] sm:$0xff]  ;;  %v10892_v29 = vcombine.low %v425_v17, %v433_v18  ;;  %v10894_v30 = vcombine.low %v426_v19, %v434_v20  ;;  %v10877_v31 = vcombine.high %v409_v25, %v417_v26 }
  0x89   : > { %v10809_v61 = vcombine.high %v343_v55, %v351_v56  ;;  %v10811_v62 = vcombine.high %v344_v57, %v352_v58  ;;  %v10808_v3 = vcombine.low %v343_v55, %v351_v56  ;;  %v10810_v4 = vcombine.low %v344_v57, %v352_v58  ;;  %v12956_v12 = vld [vmem:[%s14698_s0] sm:$0xf]  ;;  %v418_v28 = vld [vmem:[#allocation4 + $0x258] sm:$0xff]  ;;  %v393_v33 = vld [vmem:[#allocation4 + $0x190] sm:$0xff] }
  0x8a   : > { %1202 = vmatpush1.bf16.msra.mxu0 %v10872_v35  ;;  %1243 = vmatpush1.bf16.msra.mxu1 %v10874_v36  ;;  %v10879_v32 = vcombine.high %v410_v27, %v418_v28  ;;  %v401_v34 = vld [vmem:[#allocation4 + $0x1d0] sm:$0xff]  ;;  %v394_v35 = vld [vmem:[#allocation4 + $0x198] sm:$0xff]  ;;  %v459_v1 = vld [vmem:[#allocation4 + $0x3a0] sm:$0xff] }
  0x8b   : > { %1203 = vmatprep.subr.bf16.mxu0 %v10857_v37  ;;  %1244 = vmatprep.subr.bf16.mxu1 %v10859_v38  ;;  %v402_v36 = vld [vmem:[#allocation4 + $0x1d8] sm:$0xff]  ;;  %v10876_v37 = vcombine.low %v409_v25, %v417_v26  ;;  %v10878_v38 = vcombine.low %v410_v27, %v418_v28  ;;  %v10861_v39 = vcombine.high %v393_v33, %v401_v34  ;;  %v377_v41 = vld [vmem:[#allocation4 + $0x110] sm:$0xff]  ;;  %v467_v2 = vld [vmem:[#allocation4 + $0x3e0] sm:$0xff] }
  0x8c   : > { %v10863_v40 = vcombine.high %v394_v35, %v402_v36  ;;  %v385_v42 = vld [vmem:[#allocation4 + $0x150] sm:$0xff]  ;;  %v10929_v7 = vcombine.high %v459_v1, %v467_v2  ;;  %v443_v10 = vld [vmem:[#allocation4 + $0x320] sm:$0xff] }
  0x8d   : > { %v10845_v47 = vcombine.high %v377_v41, %v385_v42  ;;  %v361_v49 = vld [vmem:[#allocation4 + $0x90] sm:$0xff]  ;;  %v451_v11 = vld [vmem:[#allocation4 + $0x360] sm:$0xff] }
  0x8e   : > { %1204 = vmatpush1.bf16.msra.mxu0 %v10856_v43  ;;  %1245 = vmatpush1.bf16.msra.mxu1 %v10858_v44  ;;  %v378_v43 = vld [vmem:[#allocation4 + $0x118] sm:$0xff]  ;;  %v369_v50 = vld [vmem:[#allocation4 + $0xd0] sm:$0xff]  ;;  %v10913_v17 = vcombine.high %v443_v10, %v451_v11  ;;  %v427_v19 = vld [vmem:[#allocation4 + $0x2a0] sm:$0xff] }
  0x8f   : > { %1205 = vmatprep.subr.bf16.mxu0 %v10841_v45  ;;  %1246 = vmatprep.subr.bf16.mxu1 %v10843_v46  ;;  %v386_v44 = vld [vmem:[#allocation4 + $0x158] sm:$0xff]  ;;  %v10860_v45 = vcombine.low %v393_v33, %v401_v34  ;;  %v10862_v46 = vcombine.low %v394_v35, %v402_v36  ;;  %v10829_v55 = vcombine.high %v361_v49, %v369_v50  ;;  %v345_v57 = vld [vmem:[#allocation4 + $0x10] sm:$0xff]  ;;  %v435_v20 = vld [vmem:[#allocation4 + $0x2e0] sm:$0xff] }
  0x90   : > { %v10847_v48 = vcombine.high %v378_v43, %v386_v44  ;;  %v353_v58 = vld [vmem:[#allocation4 + $0x50] sm:$0xff]  ;;  %v10897_v25 = vcombine.high %v427_v19, %v435_v20  ;;  %v411_v27 = vld [vmem:[#allocation4 + $0x220] sm:$0xff] }
  0x91   : > { %v10813_v63 = vcombine.high %v345_v57, %v353_v58  ;;  %v419_v28 = vld [vmem:[#allocation4 + $0x260] sm:$0xff] }
  0x92   : > { %1206 = vmatpush1.bf16.msra.mxu0 %v10840_v51  ;;  %1247 = vmatpush1.bf16.msra.mxu1 %v10842_v52  ;;  %v362_v51 = vld [vmem:[#allocation4 + $0x98] sm:$0xff]  ;;  %v10881_v33 = vcombine.high %v411_v27, %v419_v28  ;;  %v395_v35 = vld [vmem:[#allocation4 + $0x1a0] sm:$0xff] }
  0x93   : > { %1207 = vmatprep.subr.bf16.mxu0 %v10825_v53  ;;  %1248 = vmatprep.subr.bf16.mxu1 %v10827_v54  ;;  %v370_v52 = vld [vmem:[#allocation4 + $0xd8] sm:$0xff]  ;;  %v10844_v53 = vcombine.low %v377_v41, %v385_v42  ;;  %v10846_v54 = vcombine.low %v378_v43, %v386_v44  ;;  %v403_v36 = vld [vmem:[#allocation4 + $0x1e0] sm:$0xff] }
  0x94   : > { %v10831_v56 = vcombine.high %v362_v51, %v370_v52  ;;  %v10865_v41 = vcombine.high %v395_v35, %v403_v36  ;;  %v379_v43 = vld [vmem:[#allocation4 + $0x120] sm:$0xff] }
  0x95   : > { %v387_v44 = vld [vmem:[#allocation4 + $0x160] sm:$0xff] }
  0x96   : > { %1208 = vmatpush1.bf16.msra.mxu0 %v10824_v59  ;;  %1249 = vmatpush1.bf16.msra.mxu1 %v10826_v60  ;;  %v346_v59 = vld [vmem:[#allocation4 + $0x18] sm:$0xff] }
  0x97   : > { %1209 = vmatprep.subr.bf16.mxu0 %v10809_v61  ;;  %1250 = vmatprep.subr.bf16.mxu1 %v10811_v62  ;;  %v354_v60 = vld [vmem:[#allocation4 + $0x58] sm:$0xff]  ;;  %v10828_v61 = vcombine.low %v361_v49, %v369_v50  ;;  %v10830_v62 = vcombine.low %v362_v51, %v370_v52  ;;  %v10849_v49 = vcombine.high %v379_v43, %v387_v44  ;;  %v363_v51 = vld [vmem:[#allocation4 + $0xa0] sm:$0xff] }
  0x98   : > { %v10815_v0 = vcombine.high %v346_v59, %v354_v60  ;;  %v371_v52 = vld [vmem:[#allocation4 + $0xe0] sm:$0xff] }
  0x9a   : > { %1210 = vmatpush1.bf16.msra.mxu0 %v10808_v3  ;;  %1251 = vmatpush1.bf16.msra.mxu1 %v10810_v4  ;;  %v460_v3 = vld [vmem:[#allocation4 + $0x3a8] sm:$0xff] }
  0x9b   : > { %1277 = vmatprep.subr.bf16.mxu0 %v10925_v5  ;;  %1318 = vmatprep.subr.bf16.mxu1 %v10927_v6  ;;  %v468_v4 = vld [vmem:[#allocation4 + $0x3e8] sm:$0xff]  ;;  %v10812_v5 = vcombine.low %v345_v57, %v353_v58  ;;  %v10814_v6 = vcombine.low %v346_v59, %v354_v60  ;;  %v10833_v57 = vcombine.high %v363_v51, %v371_v52  ;;  %v347_v59 = vld [vmem:[#allocation4 + $0x20] sm:$0xff] }
  0x9c   : > { %v10931_v9 = vcombine.high %v460_v3, %v468_v4  ;;  %v355_v60 = vld [vmem:[#allocation4 + $0x60] sm:$0xff] }
  0x9d   : > { %1228 = vmatmul.mubr.bf16.vlgmr.msra.gmra.mxu0 %v12956_v12  ;;  %1269 = vmatmul.mubr.bf16.vlgmr.msra.gmra.mxu1 %v12956_v12 }
  0x9e   : > { %1278 = vmatpush1.bf16.msra.mxu0 %v10924_v13  ;;  %1319 = vmatpush1.bf16.msra.mxu1 %v10926_v14  ;;  %v444_v13 = vld [vmem:[#allocation4 + $0x328] sm:$0xff] }
  0x9f   : > { %1279 = vmatprep.subr.bf16.mxu0 %v10909_v15  ;;  %1320 = vmatprep.subr.bf16.mxu1 %v10911_v16  ;;  %v452_v14 = vld [vmem:[#allocation4 + $0x368] sm:$0xff]  ;;  %v10928_v15 = vcombine.low %v459_v1, %v467_v2  ;;  %v10930_v16 = vcombine.low %v460_v3, %v468_v4  ;;  %v10817_v1 = vcombine.high %v347_v59, %v355_v60  ;;  %v461_v3 = vld [vmem:[#allocation4 + $0x3b0] sm:$0xff] }
  0xa0   : > { %1309 = vmatprep.mubr.bf16.mxu0 %v12749_v8  ;;  %1350 = vmatprep.mubr.bf16.mxu1 %v12749_v8  ;;  %v10915_v18 = vcombine.high %v444_v13, %v452_v14  ;;  %v469_v4 = vld [vmem:[#allocation4 + $0x3f0] sm:$0xff] }
  0xa2   : > { %1280 = vmatpush1.bf16.msra.mxu0 %v10908_v21  ;;  %1321 = vmatpush1.bf16.msra.mxu1 %v10910_v22  ;;  %v428_v21 = vld [vmem:[#allocation4 + $0x2a8] sm:$0xff] }
  0xa3   : > { %1281 = vmatprep.subr.bf16.mxu0 %v10893_v23  ;;  %1322 = vmatprep.subr.bf16.mxu1 %v10895_v24  ;;  %v436_v22 = vld [vmem:[#allocation4 + $0x2e8] sm:$0xff]  ;;  %v10912_v23 = vcombine.low %v443_v10, %v451_v11  ;;  %v10914_v24 = vcombine.low %v444_v13, %v452_v14  ;;  %v10933_v10 = vcombine.high %v461_v3, %v469_v4  ;;  %v445_v13 = vld [vmem:[#allocation4 + $0x330] sm:$0xff] }
  0xa4   : > { %v10899_v26 = vcombine.high %v428_v21, %v436_v22  ;;  %v453_v14 = vld [vmem:[#allocation4 + $0x370] sm:$0xff] }
  0xa6   : > { %1282 = vmatpush1.bf16.msra.mxu0 %v10892_v29  ;;  %1323 = vmatpush1.bf16.msra.mxu1 %v10894_v30  ;;  %v412_v29 = vld [vmem:[#allocation4 + $0x228] sm:$0xff] }
  0xa7   : > { %1283 = vmatprep.subr.bf16.mxu0 %v10877_v31  ;;  %1324 = vmatprep.subr.bf16.mxu1 %v10879_v32  ;;  %v420_v30 = vld [vmem:[#allocation4 + $0x268] sm:$0xff]  ;;  %v10896_v31 = vcombine.low %v427_v19, %v435_v20  ;;  %v10898_v32 = vcombine.low %v428_v21, %v436_v22  ;;  %v10917_v19 = vcombine.high %v445_v13, %v453_v14  ;;  %v429_v21 = vld [vmem:[#allocation4 + $0x2b0] sm:$0xff] }
  0xa8   : > { %v10883_v34 = vcombine.high %v412_v29, %v420_v30  ;;  %v437_v22 = vld [vmem:[#allocation4 + $0x2f0] sm:$0xff] }
  0xaa   : > { %1284 = vmatpush1.bf16.msra.mxu0 %v10876_v37  ;;  %1325 = vmatpush1.bf16.msra.mxu1 %v10878_v38  ;;  %v396_v37 = vld [vmem:[#allocation4 + $0x1a8] sm:$0xff] }
  0xab   : > { %1285 = vmatprep.subr.bf16.mxu0 %v10861_v39  ;;  %1326 = vmatprep.subr.bf16.mxu1 %v10863_v40  ;;  %v404_v38 = vld [vmem:[#allocation4 + $0x1e8] sm:$0xff]  ;;  %v10880_v39 = vcombine.low %v411_v27, %v419_v28  ;;  %v10882_v40 = vcombine.low %v412_v29, %v420_v30  ;;  %v10901_v27 = vcombine.high %v429_v21, %v437_v22  ;;  %v413_v29 = vld [vmem:[#allocation4 + $0x230] sm:$0xff] }
  0xac   : > { %v10867_v42 = vcombine.high %v396_v37, %v404_v38  ;;  %v421_v30 = vld [vmem:[#allocation4 + $0x270] sm:$0xff] }
  0xae   : > { %1286 = vmatpush1.bf16.msra.mxu0 %v10860_v45  ;;  %1327 = vmatpush1.bf16.msra.mxu1 %v10862_v46  ;;  %v380_v45 = vld [vmem:[#allocation4 + $0x128] sm:$0xff] }
  0xaf   : > { %1287 = vmatprep.subr.bf16.mxu0 %v10845_v47  ;;  %1328 = vmatprep.subr.bf16.mxu1 %v10847_v48  ;;  %v388_v46 = vld [vmem:[#allocation4 + $0x168] sm:$0xff]  ;;  %v10864_v47 = vcombine.low %v395_v35, %v403_v36  ;;  %v10866_v48 = vcombine.low %v396_v37, %v404_v38  ;;  %v10885_v35 = vcombine.high %v413_v29, %v421_v30  ;;  %v397_v37 = vld [vmem:[#allocation4 + $0x1b0] sm:$0xff] }
  0xb0   : > { %v10851_v50 = vcombine.high %v380_v45, %v388_v46  ;;  %v405_v38 = vld [vmem:[#allocation4 + $0x1f0] sm:$0xff] }
  0xb2   : > { %1288 = vmatpush1.bf16.msra.mxu0 %v10844_v53  ;;  %1329 = vmatpush1.bf16.msra.mxu1 %v10846_v54  ;;  %v364_v53 = vld [vmem:[#allocation4 + $0xa8] sm:$0xff] }
  0xb3   : > { %1289 = vmatprep.subr.bf16.mxu0 %v10829_v55  ;;  %1330 = vmatprep.subr.bf16.mxu1 %v10831_v56  ;;  %v372_v54 = vld [vmem:[#allocation4 + $0xe8] sm:$0xff]  ;;  %v10848_v55 = vcombine.low %v379_v43, %v387_v44  ;;  %v10850_v56 = vcombine.low %v380_v45, %v388_v46  ;;  %v10869_v43 = vcombine.high %v397_v37, %v405_v38  ;;  %v381_v44 = vld [vmem:[#allocation4 + $0x130] sm:$0xff]  ;;  %v382_v46 = vld [vmem:[#allocation4 + $0x138] sm:$0xff] }
  0xb4   : > { %v10835_v58 = vcombine.high %v364_v53, %v372_v54  ;;  %v389_v45 = vld [vmem:[#allocation4 + $0x170] sm:$0xff] }
  0xb6   : > { %1290 = vmatpush1.bf16.msra.mxu0 %v10828_v61  ;;  %1331 = vmatpush1.bf16.msra.mxu1 %v10830_v62  ;;  %v348_v61 = vld [vmem:[#allocation4 + $0x28] sm:$0xff] }
  0xb7   : > { %1291 = vmatprep.subr.bf16.mxu0 %v10813_v63  ;;  %1332 = vmatprep.subr.bf16.mxu1 %v10815_v0  ;;  %v356_v62 = vld [vmem:[#allocation4 + $0x68] sm:$0xff]  ;;  %v10832_v63 = vcombine.low %v363_v51, %v371_v52  ;;  %v10834_v0 = vcombine.low %v364_v53, %v372_v54  ;;  %v365_v52 = vld [vmem:[#allocation4 + $0xb0] sm:$0xff]  ;;  %v366_v54 = vld [vmem:[#allocation4 + $0xb8] sm:$0xff] }
  0xb8   : > { %v10819_v2 = vcombine.high %v348_v61, %v356_v62  ;;  %v373_v53 = vld [vmem:[#allocation4 + $0xf0] sm:$0xff] }
  0xba   : > { %1292 = vmatpush1.bf16.msra.mxu0 %v10812_v5  ;;  %1333 = vmatpush1.bf16.msra.mxu1 %v10814_v6  ;;  %v462_v5 = vld [vmem:[#allocation4 + $0x3b8] sm:$0xff] }
  0xbb   : > { %1359 = vmatprep.subr.bf16.mxu0 %v10929_v7  ;;  %1400 = vmatprep.subr.bf16.mxu1 %v10931_v9  ;;  %v470_v6 = vld [vmem:[#allocation4 + $0x3f8] sm:$0xff]  ;;  %v10816_v7 = vcombine.low %v347_v59, %v355_v60  ;;  %v10818_v9 = vcombine.low %v348_v61, %v356_v62  ;;  %v349_v60 = vld [vmem:[#allocation4 + $0x30] sm:$0xff] }
  0xbc   : > { %v10935_v11 = vcombine.high %v462_v5, %v470_v6  ;;  %v357_v61 = vld [vmem:[#allocation4 + $0x70] sm:$0xff]  ;;  %v350_v62 = vld [vmem:[#allocation4 + $0x38] sm:$0xff] }
  0xbd   : > { %1310 = vmatmul.mubr.bf16.vlgmr.msra.gmra.mxu0 %v12956_v12  ;;  %1351 = vmatmul.mubr.bf16.vlgmr.msra.gmra.mxu1 %v12956_v12 }
  0xbe   : > { %1360 = vmatpush1.bf16.msra.mxu0 %v10928_v15  ;;  %1401 = vmatpush1.bf16.msra.mxu1 %v10930_v16  ;;  %v446_v15 = vld [vmem:[#allocation4 + $0x338] sm:$0xff] }
  0xbf   : > { %1361 = vmatprep.subr.bf16.mxu0 %v10913_v17  ;;  %1402 = vmatprep.subr.bf16.mxu1 %v10915_v18  ;;  %v454_v16 = vld [vmem:[#allocation4 + $0x378] sm:$0xff]  ;;  %v10932_v17 = vcombine.low %v461_v3, %v469_v4  ;;  %v10934_v18 = vcombine.low %v462_v5, %v470_v6  ;;  %v10820_v4 = vcombine.low %v349_v60, %v357_v61  ;;  %v475_v6 = vlaneseq }
  0xc0   : > { %1391 = vmatprep.mubr.bf16.mxu0 %v12749_v8  ;;  %1432 = vmatprep.mubr.bf16.mxu1 %v12749_v8  ;;  %v10919_v20 = vcombine.high %v446_v15, %v454_v16 }
  0xc2   : > { %1362 = vmatpush1.bf16.msra.mxu0 %v10912_v23  ;;  %1403 = vmatpush1.bf16.msra.mxu1 %v10914_v24  ;;  %v430_v23 = vld [vmem:[#allocation4 + $0x2b8] sm:$0xff] }
  0xc3   : > { %1363 = vmatprep.subr.bf16.mxu0 %v10897_v25  ;;  %1404 = vmatprep.subr.bf16.mxu1 %v10899_v26  ;;  %v438_v24 = vld [vmem:[#allocation4 + $0x2f8] sm:$0xff]  ;;  %v10916_v25 = vcombine.low %v445_v13, %v453_v14  ;;  %v10918_v26 = vcombine.low %v446_v15, %v454_v16 }
  0xc4   : > { %v10903_v28 = vcombine.high %v430_v23, %v438_v24 }
  0xc6   : > { %1364 = vmatpush1.bf16.msra.mxu0 %v10896_v31  ;;  %1405 = vmatpush1.bf16.msra.mxu1 %v10898_v32  ;;  %v414_v31 = vld [vmem:[#allocation4 + $0x238] sm:$0xff] }
  0xc7   : > { %1365 = vmatprep.subr.bf16.mxu0 %v10881_v33  ;;  %1406 = vmatprep.subr.bf16.mxu1 %v10883_v34  ;;  %v422_v32 = vld [vmem:[#allocation4 + $0x278] sm:$0xff]  ;;  %v10900_v33 = vcombine.low %v429_v21, %v437_v22  ;;  %v10902_v34 = vcombine.low %v430_v23, %v438_v24 }
  0xc8   : > { %v10887_v36 = vcombine.high %v414_v31, %v422_v32 }
  0xca   : > { %1366 = vmatpush1.bf16.msra.mxu0 %v10880_v39  ;;  %1407 = vmatpush1.bf16.msra.mxu1 %v10882_v40  ;;  %v398_v39 = vld [vmem:[#allocation4 + $0x1b8] sm:$0xff] }
  0xcb   : > { %1367 = vmatprep.subr.bf16.mxu0 %v10865_v41  ;;  %1408 = vmatprep.subr.bf16.mxu1 %v10867_v42  ;;  %v406_v40 = vld [vmem:[#allocation4 + $0x1f8] sm:$0xff]  ;;  %v10884_v41 = vcombine.low %v413_v29, %v421_v30  ;;  %v10886_v42 = vcombine.low %v414_v31, %v422_v32 }
  0xce   : > { %1368 = vmatpush1.bf16.msra.mxu0 %v10864_v47  ;;  %1409 = vmatpush1.bf16.msra.mxu1 %v10866_v48  ;;  %v390_v47 = vld [vmem:[#allocation4 + $0x178] sm:$0xff]  ;;  %v10868_v48 = vcombine.low %v397_v37, %v405_v38 }
  0xcf   : > { %1369 = vmatprep.subr.bf16.mxu0 %v10849_v49  ;;  %1410 = vmatprep.subr.bf16.mxu1 %v10851_v50  ;;  %v10870_v49 = vcombine.low %v398_v39, %v406_v40  ;;  %v10853_v50 = vcombine.high %v381_v44, %v389_v45  ;;  %v10855_v51 = vcombine.high %v382_v46, %v390_v47 }
  0xd2   : > { %1370 = vmatpush1.bf16.msra.mxu0 %v10848_v55  ;;  %1411 = vmatpush1.bf16.msra.mxu1 %v10850_v56  ;;  %v374_v55 = vld [vmem:[#allocation4 + $0xf8] sm:$0xff]  ;;  %v10852_v56 = vcombine.low %v381_v44, %v389_v45 }
  0xd3   : > { %1371 = vmatprep.subr.bf16.mxu0 %v10833_v57  ;;  %1412 = vmatprep.subr.bf16.mxu1 %v10835_v58  ;;  %v10854_v57 = vcombine.low %v382_v46, %v390_v47  ;;  %v10837_v58 = vcombine.high %v365_v52, %v373_v53  ;;  %v10839_v59 = vcombine.high %v366_v54, %v374_v55 }
  0xd6   : > { %1372 = vmatpush1.bf16.msra.mxu0 %v10832_v63  ;;  %1413 = vmatpush1.bf16.msra.mxu1 %v10834_v0  ;;  %v358_v63 = vld [vmem:[#allocation4 + $0x78] sm:$0xff]  ;;  %v10836_v0 = vcombine.low %v365_v52, %v373_v53 }
  0xd7   : > { %1373 = vmatprep.subr.bf16.mxu0 %v10817_v1  ;;  %1414 = vmatprep.subr.bf16.mxu1 %v10819_v2  ;;  %v10838_v1 = vcombine.low %v366_v54, %v374_v55  ;;  %v10821_v2 = vcombine.high %v349_v60, %v357_v61  ;;  %v10823_v3 = vcombine.high %v350_v62, %v358_v63  ;;  %v472_v61 = vld [vmem:[#allocation7 + $0x8] sm:$0xff] }
  0xd8   : > { %v10822_v5 = vcombine.low %v350_v62, %v358_v63 }
  0xda   : > { %1374 = vmatpush1.bf16.msra.mxu0 %v10816_v7  ;;  %1415 = vmatpush1.bf16.msra.mxu1 %v10818_v9  ;;  %v12972_v7 = vshrl.u32 %v475_v6, 7 }
  0xdb   : > { %1441 = vmatprep.subr.bf16.mxu0 %v10933_v10  ;;  %1482 = vmatprep.subr.bf16.mxu1 %v10935_v11  ;;  %v471_v10 = vld [vmem:[#allocation7] sm:$0xff] }
  0xdc   : > { %v477_v9 = vsub.s32 0, %v12972_v7  ;;  %v485_v11 = vsub.s32 2, %v12972_v7  ;;  %v481_v13 = vsub.s32 1, %v12972_v7  ;;  %v489_v14 = vsub.s32 3, %v12972_v7 }
  0xdd   : > { %1392 = vmatmul.mubr.bf16.vlgmr.msra.gmra.mxu0 %v12956_v12  ;;  %1433 = vmatmul.mubr.bf16.vlgmr.msra.gmra.mxu1 %v12956_v12  ;;  %v501_v37 = vsub.s32 6, %v12972_v7  ;;  %v497_v38 = vsub.s32 5, %v12972_v7 }
  0xde   : > { %1442 = vmatpush1.bf16.msra.mxu0 %v10932_v17  ;;  %1483 = vmatpush1.bf16.msra.mxu1 %v10934_v18  ;;  %v478_v15 = vrot.slane %v471_v10, %v477_v9  ;;  %v486_v16 = vrot.slane %v471_v10, %v485_v11  ;;  %v482_v17 = vrot.slane %v471_v10, %v481_v13 }
  0xdf   : > { %1443 = vmatprep.subr.bf16.mxu0 %v10917_v19  ;;  %1484 = vmatprep.subr.bf16.mxu1 %v10919_v20  ;;  %v490_v19 = vrot.slane %v471_v10, %v489_v14  ;;  %v510_v62 = vrot.slane %v472_v61, %v477_v9  ;;  %v518_v63 = vrot.slane %v472_v61, %v485_v11 }
  0xe0   : > { %1473 = vmatprep.mubr.bf16.mxu0 %v12749_v8  ;;  %1514 = vmatprep.mubr.bf16.mxu1 %v12749_v8  ;;  %v10871_v8 = vcombine.high %v398_v39, %v406_v40  ;;  %v505_v39 = vsub.s32 7, %v12972_v7 }
  0xe2   : > { %1444 = vmatpush1.bf16.msra.mxu0 %v10916_v25  ;;  %1485 = vmatpush1.bf16.msra.mxu1 %v10918_v26 }
  0xe3   : > { %1445 = vmatprep.subr.bf16.mxu0 %v10901_v27  ;;  %1486 = vmatprep.subr.bf16.mxu1 %v10903_v28 }
  0xe6   : > { %1446 = vmatpush1.bf16.msra.mxu0 %v10900_v33  ;;  %1487 = vmatpush1.bf16.msra.mxu1 %v10902_v34 }
  0xe7   : > { %1447 = vmatprep.subr.bf16.mxu0 %v10885_v35  ;;  %1488 = vmatprep.subr.bf16.mxu1 %v10887_v36  ;;  %v493_v36 = vsub.s32 4, %v12972_v7 }
  0xe9   : > { %v494_v40 = vrot.slane %v471_v10, %v493_v36 }
  0xea   : > { %1448 = vmatpush1.bf16.msra.mxu0 %v10884_v41  ;;  %1489 = vmatpush1.bf16.msra.mxu1 %v10886_v42  ;;  %v502_v41 = vrot.slane %v471_v10, %v501_v37  ;;  %v498_v42 = vrot.slane %v471_v10, %v497_v38 }
  0xeb   : > { %1449 = vmatprep.subr.bf16.mxu0 %v10869_v43  ;;  %1490 = vmatprep.subr.bf16.mxu1 %v10871_v8  ;;  %v506_v8 = vrot.slane %v471_v10, %v505_v39 }
  0xee   : > { %1450 = vmatpush1.bf16.msra.mxu0 %v10868_v48  ;;  %1491 = vmatpush1.bf16.msra.mxu1 %v10870_v49 }
  0xef   : > { %1451 = vmatprep.subr.bf16.mxu0 %v10853_v50  ;;  %1492 = vmatprep.subr.bf16.mxu1 %v10855_v51 }
  0xf2   : > { %1452 = vmatpush1.bf16.msra.mxu0 %v10852_v56  ;;  %1493 = vmatpush1.bf16.msra.mxu1 %v10854_v57 }
  0xf3   : > { %1453 = vmatprep.subr.bf16.mxu0 %v10837_v58  ;;  %1494 = vmatprep.subr.bf16.mxu1 %v10839_v59 }
  0xf6   : > { %1454 = vmatpush1.bf16.msra.mxu0 %v10836_v0  ;;  %1495 = vmatpush1.bf16.msra.mxu1 %v10838_v1  ;;  %v514_v0 = vrot.slane %v472_v61, %v481_v13  ;;  %v526_v13 = vrot.slane %v472_v61, %v493_v36 }
  0xf7   : > { %1455 = vmatprep.subr.bf16.mxu0 %v10821_v2  ;;  %1496 = vmatprep.subr.bf16.mxu1 %v10823_v3  ;;  %v522_v2 = vrot.slane %v472_v61, %v489_v14  ;;  %v534_v14 = vrot.slane %v472_v61, %v501_v37 }
  0xfa   : > { %1456 = vmatpush1.bf16.msra.mxu0 %v10820_v4  ;;  %1497 = vmatpush1.bf16.msra.mxu1 %v10822_v5 }
  0xfd   : > { %1474 = vmatmul.mubr.bf16.vlgmr.msra.gmra.mxu0 %v12956_v12  ;;  %1515 = vmatmul.mubr.bf16.vlgmr.msra.gmra.mxu1 %v12956_v12 }
 0x15d   : > { %v1229_v18 = vpop.f32.mrf.mxu0  ;;  %v1270_v21 = vpop.f32.mrf.mxu1 }
 0x15e   : > { %v1230_v20 = vadd.f32 %v1229_v18, %v478_v15  ;;  %v1271_v12 = vadd.f32 %v1270_v21, %v486_v16 }
 0x15f   : > { %v1231_v22 = vpop.f32.mrf.mxu0  ;;  %v1272_v25 = vpop.f32.mrf.mxu1 }
 0x160   : > { %v1523_v23 = vmax.f32 %v1230_v20, 0.0  ;;  %v1232_v24 = vadd.f32 %v1231_v22, %v482_v17  ;;  %v1525_v26 = vmax.f32 %v1271_v12, 0.0  ;;  %v1273_v27 = vadd.f32 %v1272_v25, %v490_v19 }
 0x161   : > { %v1233_v28 = vpop.f32.mrf.mxu0  ;;  %v1274_v30 = vpop.f32.mrf.mxu1  ;;  %v538_v25 = vrot.slane %v472_v61, %v505_v39 }
 0x162   : > { %v1524_v29 = vmax.f32 %v1232_v24, 0.0  ;;  %v1526_v31 = vmax.f32 %v1273_v27, 0.0 }
 0x163   : > { %v1234_v32 = vpop.f32.mrf.mxu0  ;;  %v1275_v34 = vpop.f32.mrf.mxu1 }
 0x164   : > { %v12116_v33 = vpack.c.bf16 %v1524_v29, %v1523_v23  ;;  %v12117_v35 = vpack.c.bf16 %v1526_v31, %v1525_v26  ;;  %v530_v23 = vrot.slane %v472_v61, %v497_v38 }
 0x166   : > { %1603 = vst [vmem:[#allocation2] sm:$0xff] %v12116_v33  ;;  %1604 = vst [vmem:[#allocation2 + $0x8] sm:$0xff] %v12117_v35 }
 0x17d   : > { %v1311_v43 = vpop.f32.mrf.mxu0  ;;  %v1352_v45 = vpop.f32.mrf.mxu1 }
 0x17e   : > { %v1312_v44 = vadd.f32 %v1311_v43, %v494_v40  ;;  %v1353_v46 = vadd.f32 %v1352_v45, %v502_v41 }
 0x17f   : > { %v1313_v47 = vpop.f32.mrf.mxu0  ;;  %v1354_v50 = vpop.f32.mrf.mxu1 }
 0x180   : > { %v1527_v48 = vmax.f32 %v1312_v44, 0.0  ;;  %v1314_v49 = vadd.f32 %v1313_v47, %v498_v42  ;;  %v1529_v51 = vmax.f32 %v1353_v46, 0.0  ;;  %v1355_v52 = vadd.f32 %v1354_v50, %v506_v8 }
 0x181   : > { %v1315_v53 = vpop.f32.mrf.mxu0  ;;  %v1356_v55 = vpop.f32.mrf.mxu1 }
 0x182   : > { %v1528_v54 = vmax.f32 %v1314_v49, 0.0  ;;  %v1530_v56 = vmax.f32 %v1355_v52, 0.0 }
 0x183   : > { %v1316_v57 = vpop.f32.mrf.mxu0  ;;  %v1357_v59 = vpop.f32.mrf.mxu1 }
 0x184   : > { %v12118_v58 = vpack.c.bf16 %v1528_v54, %v1527_v48  ;;  %v12119_v60 = vpack.c.bf16 %v1530_v56, %v1529_v51 }
 0x186   : > { %1605 = vst [vmem:[#allocation2 + $0x10] sm:$0xff] %v12118_v58  ;;  %1606 = vst [vmem:[#allocation2 + $0x18] sm:$0xff] %v12119_v60 }
 0x19d   : > { %v1393_v1 = vpop.f32.mrf.mxu0  ;;  %v1434_v4 = vpop.f32.mrf.mxu1 }
 0x19e   : > { %v1394_v3 = vadd.f32 %v1393_v1, %v510_v62  ;;  %v1435_v5 = vadd.f32 %v1434_v4, %v518_v63 }
 0x19f   : > { %v1395_v6 = vpop.f32.mrf.mxu0  ;;  %v1436_v15 = vpop.f32.mrf.mxu1 }
 0x1a0   : > { %v1531_v7 = vmax.f32 %v1394_v3, 0.0  ;;  %v1396_v10 = vadd.f32 %v1395_v6, %v514_v0  ;;  %v1533_v16 = vmax.f32 %v1435_v5, 0.0  ;;  %v1437_v17 = vadd.f32 %v1436_v15, %v522_v2 }
 0x1a1   : > { %v1397_v18 = vpop.f32.mrf.mxu0  ;;  %v1438_v20 = vpop.f32.mrf.mxu1 }
 0x1a2   : > { %v1532_v19 = vmax.f32 %v1396_v10, 0.0  ;;  %v1534_v21 = vmax.f32 %v1437_v17, 0.0 }
 0x1a3   : > { %v1398_v12 = vpop.f32.mrf.mxu0  ;;  %v1439_v9 = vpop.f32.mrf.mxu1 }
 0x1a4   : > { %v12120_v22 = vpack.c.bf16 %v1532_v19, %v1531_v7  ;;  %v12121_v11 = vpack.c.bf16 %v1534_v21, %v1533_v16 }
 0x1a6   : > { %1607 = vst [vmem:[#allocation2 + $0x20] sm:$0xff] %v12120_v22  ;;  %1608 = vst [vmem:[#allocation2 + $0x28] sm:$0xff] %v12121_v11 }
 0x1bd   : > { %v1475_v24 = vpop.f32.mrf.mxu0  ;;  %v1516_v27 = vpop.f32.mrf.mxu1 }
 0x1be   : > { %v1476_v26 = vadd.f32 %v1475_v24, %v526_v13  ;;  %v1517_v28 = vadd.f32 %v1516_v27, %v534_v14 }
 0x1bf   : > { %v1477_v29 = vpop.f32.mrf.mxu0  ;;  %v1518_v31 = vpop.f32.mrf.mxu1 }
 0x1c0   : > { %v1478_v30 = vadd.f32 %v1477_v29, %v530_v23  ;;  %v1519_v32 = vadd.f32 %v1518_v31, %v538_v25  ;;  %v1535_v34 = vmax.f32 %v1476_v26, 0.0  ;;  %v1537_v41 = vmax.f32 %v1517_v28, 0.0 }
 0x1c1   : > { %v1479_v33 = vpop.f32.mrf.mxu0  ;;  %v1520_v40 = vpop.f32.mrf.mxu1 }
 0x1c2   : > { %v1536_v35 = vmax.f32 %v1478_v30, 0.0  ;;  %v1538_v42 = vmax.f32 %v1519_v32, 0.0 }
 0x1c3   : > { %v1480_v43 = vpop.f32.mrf.mxu0  ;;  %v1521_v36 = vpop.f32.mrf.mxu1 }
 0x1c4   : > { %v12122_v8 = vpack.c.bf16 %v1536_v35, %v1535_v34  ;;  %v12123_v37 = vpack.c.bf16 %v1538_v42, %v1537_v41 }
 0x1c6   : > { %1609 = vst [vmem:[#allocation2 + $0x30] sm:$0xff] %v12122_v8  ;;  %1610 = vst [vmem:[#allocation2 + $0x38] sm:$0xff] %v12123_v37 }
 0x1c7 PF: > { %v1732_v38 = vld [vmem:[%s12935_s11 + $0x380] sm:$0xff]  ;;  %s10944_s18 = sshll.u32 %s12810_s28, 10  ;;  %p14724_p12 = scmp.ne.s32.totalorder %s12810_s28, 0 }
 0x1c8   : > { %v1740_v39 = vld [vmem:[%s12935_s11 + $0x3c0] sm:$0xff]  ;;  %s13003_s27 = sshra.s32 %s10944_s18, 7 }
 0x1c9   : > { %v1988_v44 = vld [vmem:[%s12935_s11 + $0xb80] sm:$0xff]  ;;  %v11067_v45 = vcombine.high %v1732_v38, %v1740_v39  ;;  %v11066_v47 = vcombine.low %v1732_v38, %v1740_v39  ;;  %s10945_s19 = sshll.u32 %s13003_s27, 2 }
 0x1ca   : > { %v1996_v46 = vld [vmem:[%s12935_s11 + $0xbc0] sm:$0xff]  ;;  %s13014_s10 = scalar_lea.vmem [#allocation2], %s10945_s19 }
 0x1cb   : > { %v1716_v48 = vld [vmem:[%s12935_s11 + $0x300] sm:$0xff]  ;;  %v11323_v50 = vcombine.high %v1988_v44, %v1996_v46  ;;  %v11322_v51 = vcombine.low %v1988_v44, %v1996_v46  ;;  %7792 = vmatprep.subr.bf16.mxu0 %v11067_v45 }
 0x1cc   : > { %v1724_v49 = vld [vmem:[%s12935_s11 + $0x340] sm:$0xff]  ;;  %7793 = vmatpush1.bf16.msra.mxu0 %v11066_v47 }
 0x1cd   : > { %v11051_v52 = vcombine.high %v1716_v48, %v1724_v49  ;;  %v1972_v53 = vld [vmem:[%s12935_s11 + $0xb00] sm:$0xff]  ;;  %7833 = vmatprep.subr.bf16.mxu1 %v11323_v50  ;;  %v11050_v60 = vcombine.low %v1716_v48, %v1724_v49  ;;  %v13017_v32 = vld [vmem:[%s13014_s10] sm:$0xff]  ;;  %v13020_v33 = vld [vmem:[%s13014_s10 + $0x8] sm:$0xff] }
 0x1ce   : > { %v1980_v54 = vld [vmem:[%s12935_s11 + $0xb40] sm:$0xff]  ;;  %7834 = vmatpush1.bf16.msra.mxu1 %v11322_v51  ;;  %v13026_v41 = vcombine.high %v13017_v32, %v13017_v32  ;;  %v13030_v42 = vcombine.high %v13020_v33, %v13020_v33 }
 0x1cf   : > { %v1700_v55 = vld [vmem:[%s12935_s11 + $0x280] sm:$0xff]  ;;  %v11307_v56 = vcombine.high %v1972_v53, %v1980_v54  ;;  %7794 = vmatprep.subr.bf16.mxu0 %v11051_v52  ;;  %v11306_v61 = vcombine.low %v1972_v53, %v1980_v54 }
 0x1d0   : > { %v1708_v57 = vld [vmem:[%s12935_s11 + $0x2c0] sm:$0xff]  ;;  %7795 = vmatpush1.bf16.msra.mxu0 %v11050_v60  ;;  %7824 = vmatprep.mubr.bf16.mxu0 %v13026_v41 }
 0x1d1   : > { %v1956_v58 = vld [vmem:[%s12935_s11 + $0xa80] sm:$0xff]  ;;  %v11035_v62 = vcombine.high %v1700_v55, %v1708_v57  ;;  %7835 = vmatprep.subr.bf16.mxu1 %v11307_v56  ;;  %v11034_v4 = vcombine.low %v1700_v55, %v1708_v57  ;;  %7865 = vmatprep.mubr.bf16.mxu1 %v13030_v42 }
 0x1d2   : > { %v1964_v59 = vld [vmem:[%s12935_s11 + $0xac0] sm:$0xff]  ;;  %7836 = vmatpush1.bf16.msra.mxu1 %v11306_v61 }
 0x1d3   : > { %v11291_v63 = vcombine.high %v1956_v58, %v1964_v59  ;;  %v1684_v0 = vld [vmem:[%s12935_s11 + $0x200] sm:$0xff]  ;;  %7796 = vmatprep.subr.bf16.mxu0 %v11035_v62  ;;  %v11290_v5 = vcombine.low %v1956_v58, %v1964_v59 }
 0x1d4   : > { %v1692_v1 = vld [vmem:[%s12935_s11 + $0x240] sm:$0xff]  ;;  %7797 = vmatpush1.bf16.msra.mxu0 %v11034_v4 }
 0x1d5   : > { %v1940_v2 = vld [vmem:[%s12935_s11 + $0xa00] sm:$0xff]  ;;  %v11019_v6 = vcombine.high %v1684_v0, %v1692_v1  ;;  %7837 = vmatprep.subr.bf16.mxu1 %v11291_v63  ;;  %v11018_v18 = vcombine.low %v1684_v0, %v1692_v1 }
 0x1d6   : > { %v1948_v3 = vld [vmem:[%s12935_s11 + $0xa40] sm:$0xff]  ;;  %7838 = vmatpush1.bf16.msra.mxu1 %v11290_v5 }
 0x1d7   : > { %v11275_v7 = vcombine.high %v1940_v2, %v1948_v3  ;;  %v1668_v10 = vld [vmem:[%s12935_s11 + $0x180] sm:$0xff]  ;;  %7798 = vmatprep.subr.bf16.mxu0 %v11019_v6  ;;  %v11274_v19 = vcombine.low %v1940_v2, %v1948_v3 }
 0x1d8   : > { %v1676_v15 = vld [vmem:[%s12935_s11 + $0x1c0] sm:$0xff]  ;;  %7799 = vmatpush1.bf16.msra.mxu0 %v11018_v18 }
 0x1d9   : > { %v1924_v16 = vld [vmem:[%s12935_s11 + $0x980] sm:$0xff]  ;;  %v11003_v20 = vcombine.high %v1668_v10, %v1676_v15  ;;  %7839 = vmatprep.subr.bf16.mxu1 %v11275_v7  ;;  %v11002_v13 = vcombine.low %v1668_v10, %v1676_v15 }
 0x1da   : > { %v1932_v17 = vld [vmem:[%s12935_s11 + $0x9c0] sm:$0xff]  ;;  %7840 = vmatpush1.bf16.msra.mxu1 %v11274_v19 }
 0x1db   : > { %v11259_v21 = vcombine.high %v1924_v16, %v1932_v17  ;;  %v1652_v12 = vld [vmem:[%s12935_s11 + $0x100] sm:$0xff]  ;;  %7800 = vmatprep.subr.bf16.mxu0 %v11003_v20  ;;  %v11258_v14 = vcombine.low %v1924_v16, %v1932_v17 }
 0x1dc   : > { %v1660_v22 = vld [vmem:[%s12935_s11 + $0x140] sm:$0xff]  ;;  %7801 = vmatpush1.bf16.msra.mxu0 %v11002_v13 }
 0x1dd   : > { %v1908_v9 = vld [vmem:[%s12935_s11 + $0x900] sm:$0xff]  ;;  %v10987_v23 = vcombine.high %v1652_v12, %v1660_v22  ;;  %7841 = vmatprep.subr.bf16.mxu1 %v11259_v21  ;;  %v10986_v29 = vcombine.low %v1652_v12, %v1660_v22 }
 0x1de   : > { %v1916_v11 = vld [vmem:[%s12935_s11 + $0x940] sm:$0xff]  ;;  %7842 = vmatpush1.bf16.msra.mxu1 %v11258_v14 }
 0x1df   : > { %v11243_v24 = vcombine.high %v1908_v9, %v1916_v11  ;;  %v1636_v25 = vld [vmem:[%s12935_s11 + $0x80] sm:$0xff]  ;;  %7802 = vmatprep.subr.bf16.mxu0 %v10987_v23  ;;  %v11242_v30 = vcombine.low %v1908_v9, %v1916_v11 }
 0x1e0   : > { %v1644_v26 = vld [vmem:[%s12935_s11 + $0xc0] sm:$0xff]  ;;  %7803 = vmatpush1.bf16.msra.mxu0 %v10986_v29 }
 0x1e1   : > { %v1892_v27 = vld [vmem:[%s12935_s11 + $0x880] sm:$0xff]  ;;  %v10971_v31 = vcombine.high %v1636_v25, %v1644_v26  ;;  %7843 = vmatprep.subr.bf16.mxu1 %v11243_v24  ;;  %v10970_v36 = vcombine.low %v1636_v25, %v1644_v26 }
 0x1e2   : > { %v1900_v28 = vld [vmem:[%s12935_s11 + $0x8c0] sm:$0xff]  ;;  %7844 = vmatpush1.bf16.msra.mxu1 %v11242_v30 }
 0x1e3   : > { %v11227_v34 = vcombine.high %v1892_v27, %v1900_v28  ;;  %v1620_v35 = vld [vmem:[%s12935_s11] sm:$0xff]  ;;  %7804 = vmatprep.subr.bf16.mxu0 %v10971_v31  ;;  %v11226_v37 = vcombine.low %v1892_v27, %v1900_v28 }
 0x1e4   : > { %v1628_v40 = vld [vmem:[%s12935_s11 + $0x40] sm:$0xff]  ;;  %7805 = vmatpush1.bf16.msra.mxu0 %v10970_v36 }
 0x1e5   : > { %v1876_v43 = vld [vmem:[%s12935_s11 + $0x800] sm:$0xff]  ;;  %v10955_v38 = vcombine.high %v1620_v35, %v1628_v40  ;;  %7845 = vmatprep.subr.bf16.mxu1 %v11227_v34  ;;  %v10954_v48 = vcombine.low %v1620_v35, %v1628_v40 }
 0x1e6   : > { %v1884_v8 = vld [vmem:[%s12935_s11 + $0x840] sm:$0xff]  ;;  %7846 = vmatpush1.bf16.msra.mxu1 %v11226_v37 }
 0x1e7   : > { %v11211_v39 = vcombine.high %v1876_v43, %v1884_v8  ;;  %v1860_v44 = vld [vmem:[%s12935_s11 + $0x780] sm:$0xff]  ;;  %7806 = vmatprep.subr.bf16.mxu0 %v10955_v38  ;;  %v11210_v49 = vcombine.low %v1876_v43, %v1884_v8 }
 0x1e8   : > { %v1868_v45 = vld [vmem:[%s12935_s11 + $0x7c0] sm:$0xff]  ;;  %7807 = vmatpush1.bf16.msra.mxu0 %v10954_v48 }
 0x1e9   : > { %v2116_v46 = vld [vmem:[%s12935_s11 + $0xf80] sm:$0xff]  ;;  %v11195_v50 = vcombine.high %v1860_v44, %v1868_v45  ;;  %7847 = vmatprep.subr.bf16.mxu1 %v11211_v39  ;;  %v11194_v56 = vcombine.low %v1860_v44, %v1868_v45 }
 0x1ea   : > { %v2124_v47 = vld [vmem:[%s12935_s11 + $0xfc0] sm:$0xff]  ;;  %7848 = vmatpush1.bf16.msra.mxu1 %v11210_v49 }
 0x1eb   : > { %v11451_v51 = vcombine.high %v2116_v46, %v2124_v47  ;;  %v1844_v52 = vld [vmem:[%s12935_s11 + $0x700] sm:$0xff]  ;;  %7808 = vmatprep.subr.bf16.mxu0 %v11195_v50  ;;  %v11450_v57 = vcombine.low %v2116_v46, %v2124_v47 }
 0x1ec   : > { %v1852_v53 = vld [vmem:[%s12935_s11 + $0x740] sm:$0xff]  ;;  %7809 = vmatpush2.bf16.msra.mxu0 %v11194_v56 }
 0x1ed   : > { %v2100_v54 = vld [vmem:[%s12935_s11 + $0xf00] sm:$0xff]  ;;  %v11179_v58 = vcombine.high %v1844_v52, %v1852_v53  ;;  %7849 = vmatprep.subr.bf16.mxu1 %v11451_v51  ;;  %v11178_v0 = vcombine.low %v1844_v52, %v1852_v53 }
 0x1ee   : > { %v2108_v55 = vld [vmem:[%s12935_s11 + $0xf40] sm:$0xff]  ;;  %7850 = vmatpush2.bf16.msra.mxu1 %v11450_v57 }
 0x1ef   : > { %v11435_v59 = vcombine.high %v2100_v54, %v2108_v55  ;;  %v1828_v60 = vld [vmem:[%s12935_s11 + $0x680] sm:$0xff]  ;;  %7810 = vmatprep.subr.bf16.mxu0 %v11179_v58  ;;  %v11434_v1 = vcombine.low %v2100_v54, %v2108_v55  ;;  %v13076_v58 = vcombine.low %v13017_v32, %v13017_v32 }
 0x1f0   : > { %v1836_v61 = vld [vmem:[%s12935_s11 + $0x6c0] sm:$0xff]  ;;  %7811 = vmatpush2.bf16.msra.mxu0 %v11178_v0  ;;  %v13088_v0 = vld [vmem:[%s13014_s10 + $0x18] sm:$0xff] }
 0x1f1   : > { %v2084_v62 = vld [vmem:[%s12935_s11 + $0xe80] sm:$0xff]  ;;  %v11163_v2 = vcombine.high %v1828_v60, %v1836_v61  ;;  %7851 = vmatprep.subr.bf16.mxu1 %v11435_v59  ;;  %v11162_v10 = vcombine.low %v1828_v60, %v1836_v61 }
 0x1f2   : > { %v2092_v63 = vld [vmem:[%s12935_s11 + $0xec0] sm:$0xff]  ;;  %7852 = vmatpush2.bf16.msra.mxu1 %v11434_v1 }
 0x1f3   : > { %v11419_v3 = vcombine.high %v2084_v62, %v2092_v63  ;;  %v1812_v4 = vld [vmem:[%s12935_s11 + $0x600] sm:$0xff]  ;;  %7812 = vmatprep.subr.bf16.mxu0 %v11163_v2  ;;  %v11418_v15 = vcombine.low %v2084_v62, %v2092_v63  ;;  %v13085_v62 = vcombine.low %v13020_v33, %v13020_v33 }
 0x1f4   : > { %v1820_v5 = vld [vmem:[%s12935_s11 + $0x640] sm:$0xff]  ;;  %7813 = vmatpush2.bf16.msra.mxu0 %v11162_v10 }
 0x1f5   : > { %v2068_v6 = vld [vmem:[%s12935_s11 + $0xe00] sm:$0xff]  ;;  %v11147_v16 = vcombine.high %v1812_v4, %v1820_v5  ;;  %7853 = vmatprep.subr.bf16.mxu1 %v11419_v3  ;;  %v11146_v12 = vcombine.low %v1812_v4, %v1820_v5 }
 0x1f6   : > { %v2076_v7 = vld [vmem:[%s12935_s11 + $0xe40] sm:$0xff]  ;;  %7854 = vmatpush2.bf16.msra.mxu1 %v11418_v15 }
 0x1f7   : > { %v11403_v17 = vcombine.high %v2068_v6, %v2076_v7  ;;  %v1796_v18 = vld [vmem:[%s12935_s11 + $0x580] sm:$0xff]  ;;  %7814 = vmatprep.subr.bf16.mxu0 %v11147_v16  ;;  %v11402_v22 = vcombine.low %v2068_v6, %v2076_v7  ;;  %v13101_v7 = vcombine.high %v13088_v0, %v13088_v0 }
 0x1f8   : > { %v1804_v19 = vld [vmem:[%s12935_s11 + $0x5c0] sm:$0xff]  ;;  %7815 = vmatpush2.bf16.msra.mxu0 %v11146_v12 }
 0x1f9   : > { %v2052_v20 = vld [vmem:[%s12935_s11 + $0xd80] sm:$0xff]  ;;  %v11131_v9 = vcombine.high %v1796_v18, %v1804_v19  ;;  %7855 = vmatprep.subr.bf16.mxu1 %v11403_v17  ;;  %v11130_v25 = vcombine.low %v1796_v18, %v1804_v19 }
 0x1fa   : > { %v2060_v21 = vld [vmem:[%s12935_s11 + $0xdc0] sm:$0xff]  ;;  %7856 = vmatpush2.bf16.msra.mxu1 %v11402_v22 }
 0x1fb   : > { %v11387_v11 = vcombine.high %v2052_v20, %v2060_v21  ;;  %v1780_v13 = vld [vmem:[%s12935_s11 + $0x500] sm:$0xff]  ;;  %7816 = vmatprep.subr.bf16.mxu0 %v11131_v9  ;;  %v11386_v26 = vcombine.low %v2052_v20, %v2060_v21 }
 0x1fc   : > { %v1788_v14 = vld [vmem:[%s12935_s11 + $0x540] sm:$0xff]  ;;  %7817 = vmatpush2.bf16.msra.mxu0 %v11130_v25 }
 0x1fd   : > { %v2036_v23 = vld [vmem:[%s12935_s11 + $0xd00] sm:$0xff]  ;;  %v11115_v27 = vcombine.high %v1780_v13, %v1788_v14  ;;  %7857 = vmatprep.subr.bf16.mxu1 %v11387_v11  ;;  %v11114_v35 = vcombine.low %v1780_v13, %v1788_v14 }
 0x1fe   : > { %v2044_v24 = vld [vmem:[%s12935_s11 + $0xd40] sm:$0xff]  ;;  %7858 = vmatpush2.bf16.msra.mxu1 %v11386_v26 }
 0x1ff   : > { %v11371_v28 = vcombine.high %v2036_v23, %v2044_v24  ;;  %v1764_v29 = vld [vmem:[%s12935_s11 + $0x480] sm:$0xff]  ;;  %7818 = vmatprep.subr.bf16.mxu0 %v11115_v27  ;;  %v11370_v40 = vcombine.low %v2036_v23, %v2044_v24 }
 0x200   : > { %v1772_v30 = vld [vmem:[%s12935_s11 + $0x4c0] sm:$0xff]  ;;  %7819 = vmatpush2.bf16.msra.mxu0 %v11114_v35 }
 0x201   : > { %v2020_v31 = vld [vmem:[%s12935_s11 + $0xc80] sm:$0xff]  ;;  %v11099_v43 = vcombine.high %v1764_v29, %v1772_v30  ;;  %7859 = vmatprep.subr.bf16.mxu1 %v11371_v28  ;;  %v11098_v44 = vcombine.low %v1764_v29, %v1772_v30 }
 0x202   : > { %v2028_v34 = vld [vmem:[%s12935_s11 + $0xcc0] sm:$0xff]  ;;  %7860 = vmatpush2.bf16.msra.mxu1 %v11370_v40 }
 0x203   : > { %v11355_v8 = vcombine.high %v2020_v31, %v2028_v34  ;;  %v1748_v36 = vld [vmem:[%s12935_s11 + $0x400] sm:$0xff]  ;;  %7820 = vmatprep.subr.bf16.mxu0 %v11099_v43  ;;  %v11354_v45 = vcombine.low %v2020_v31, %v2028_v34 }
 0x204   : > { %v1756_v37 = vld [vmem:[%s12935_s11 + $0x440] sm:$0xff]  ;;  %7821 = vmatpush2.bf16.msra.mxu0 %v11098_v44 }
 0x205   : > { %v2004_v38 = vld [vmem:[%s12935_s11 + $0xc00] sm:$0xff]  ;;  %v11083_v46 = vcombine.high %v1748_v36, %v1756_v37  ;;  %7861 = vmatprep.subr.bf16.mxu1 %v11355_v8  ;;  %v11082_v52 = vcombine.low %v1748_v36, %v1756_v37 }
 0x206   : > { %v2012_v39 = vld [vmem:[%s12935_s11 + $0xc40] sm:$0xff]  ;;  %7862 = vmatpush2.bf16.msra.mxu1 %v11354_v45 }
 0x207   : > { %v11339_v47 = vcombine.high %v2004_v38, %v2012_v39  ;;  %v2244_v48 = vld [vmem:[%s12935_s11 + $0x1380] sm:$0xff]  ;;  %7822 = vmatprep.subr.bf16.mxu0 %v11083_v46  ;;  %v11338_v53 = vcombine.low %v2004_v38, %v2012_v39 }
 0x208   : > { %v2252_v49 = vld [vmem:[%s12935_s11 + $0x13c0] sm:$0xff]  ;;  %7823 = vmatpush2.bf16.msra.mxu0 %v11082_v52 }
 0x209   : > { %v2500_v50 = vld [vmem:[%s12935_s11 + $0x1b80] sm:$0xff]  ;;  %v11579_v54 = vcombine.high %v2244_v48, %v2252_v49  ;;  %7863 = vmatprep.subr.bf16.mxu1 %v11339_v47  ;;  %v11578_v63 = vcombine.low %v2244_v48, %v2252_v49 }
 0x20a   : > { %v2508_v51 = vld [vmem:[%s12935_s11 + $0x1bc0] sm:$0xff]  ;;  %7864 = vmatpush2.bf16.msra.mxu1 %v11338_v53 }
 0x20b   : > { %v11835_v55 = vcombine.high %v2500_v50, %v2508_v51  ;;  %v2228_v56 = vld [vmem:[%s12935_s11 + $0x1300] sm:$0xff]  ;;  %7874 = vmatprep.subr.bf16.mxu0 %v11579_v54  ;;  %v11834_v1 = vcombine.low %v2500_v50, %v2508_v51  ;;  %7825 = vmatmul.mubr.bf16.vlgmr.msra.gmra.mxu0 %v13076_v58 }
 0x20c   : > { %v2236_v57 = vld [vmem:[%s12935_s11 + $0x1340] sm:$0xff]  ;;  %7875 = vmatpush1.bf16.msra.mxu0 %v11578_v63 }
 0x20d   : > { %v2484_v59 = vld [vmem:[%s12935_s11 + $0x1b00] sm:$0xff]  ;;  %v11563_v2 = vcombine.high %v2228_v56, %v2236_v57  ;;  %7915 = vmatprep.subr.bf16.mxu1 %v11835_v55  ;;  %7866 = vmatmul.mubr.bf16.vlgmr.msra.gmra.mxu1 %v13085_v62  ;;  %v11562_v10 = vcombine.low %v2228_v56, %v2236_v57 }
 0x20e   : > { %v2492_v60 = vld [vmem:[%s12935_s11 + $0x1b40] sm:$0xff]  ;;  %7916 = vmatpush1.bf16.msra.mxu1 %v11834_v1  ;;  %7947 = vmatprep.mubr.bf16.mxu1 %v13101_v7 }
 0x20f   : > { %v13081_v61 = vld [vmem:[%s13014_s10 + $0x10] sm:$0xff]  ;;  %v11819_v32 = vcombine.high %v2484_v59, %v2492_v60  ;;  %7876 = vmatprep.subr.bf16.mxu0 %v11563_v2  ;;  %v11818_v15 = vcombine.low %v2484_v59, %v2492_v60 }
 0x210   : > { %v2212_v3 = vld [vmem:[%s12935_s11 + $0x1280] sm:$0xff]  ;;  %v13094_v5 = vcombine.high %v13081_v61, %v13081_v61  ;;  %7877 = vmatpush1.bf16.msra.mxu0 %v11562_v10 }
 0x211   : > { %v2220_v4 = vld [vmem:[%s12935_s11 + $0x12c0] sm:$0xff]  ;;  %7917 = vmatprep.subr.bf16.mxu1 %v11819_v32 }
 0x212   : > { %v2468_v33 = vld [vmem:[%s12935_s11 + $0x1a80] sm:$0xff]  ;;  %v11547_v16 = vcombine.high %v2212_v3, %v2220_v4  ;;  %7906 = vmatprep.mubr.bf16.mxu0 %v13094_v5  ;;  %v11546_v12 = vcombine.low %v2212_v3, %v2220_v4  ;;  %7918 = vmatpush1.bf16.msra.mxu1 %v11818_v15 }
 0x213   : > { %v2476_v6 = vld [vmem:[%s12935_s11 + $0x1ac0] sm:$0xff] }
 0x214   : > { %v11803_v17 = vcombine.high %v2468_v33, %v2476_v6  ;;  %v2196_v18 = vld [vmem:[%s12935_s11 + $0x1200] sm:$0xff]  ;;  %7878 = vmatprep.subr.bf16.mxu0 %v11547_v16  ;;  %v11802_v22 = vcombine.low %v2468_v33, %v2476_v6 }
 0x215   : > { %v2204_v19 = vld [vmem:[%s12935_s11 + $0x1240] sm:$0xff]  ;;  %7879 = vmatpush1.bf16.msra.mxu0 %v11546_v12 }
 0x216   : > { %v2452_v20 = vld [vmem:[%s12935_s11 + $0x1a00] sm:$0xff]  ;;  %v11531_v9 = vcombine.high %v2196_v18, %v2204_v19  ;;  %7919 = vmatprep.subr.bf16.mxu1 %v11803_v17  ;;  %v11530_v25 = vcombine.low %v2196_v18, %v2204_v19 }
 0x217   : > { %v2460_v21 = vld [vmem:[%s12935_s11 + $0x1a40] sm:$0xff]  ;;  %7920 = vmatpush1.bf16.msra.mxu1 %v11802_v22 }
 0x218   : > { %v11787_v11 = vcombine.high %v2452_v20, %v2460_v21  ;;  %v2180_v13 = vld [vmem:[%s12935_s11 + $0x1180] sm:$0xff]  ;;  %7880 = vmatprep.subr.bf16.mxu0 %v11531_v9  ;;  %v11786_v26 = vcombine.low %v2452_v20, %v2460_v21 }
 0x219   : > { %v2188_v14 = vld [vmem:[%s12935_s11 + $0x11c0] sm:$0xff]  ;;  %7881 = vmatpush1.bf16.msra.mxu0 %v11530_v25 }
 0x21a   : > { %v2436_v23 = vld [vmem:[%s12935_s11 + $0x1980] sm:$0xff]  ;;  %v11515_v27 = vcombine.high %v2180_v13, %v2188_v14  ;;  %7921 = vmatprep.subr.bf16.mxu1 %v11787_v11  ;;  %v11514_v35 = vcombine.low %v2180_v13, %v2188_v14 }
 0x21b   : > { %v2444_v24 = vld [vmem:[%s12935_s11 + $0x19c0] sm:$0xff]  ;;  %7922 = vmatpush1.bf16.msra.mxu1 %v11786_v26 }
 0x21c   : > { %v11771_v28 = vcombine.high %v2436_v23, %v2444_v24  ;;  %v2164_v29 = vld [vmem:[%s12935_s11 + $0x1100] sm:$0xff]  ;;  %7882 = vmatprep.subr.bf16.mxu0 %v11515_v27  ;;  %v11770_v40 = vcombine.low %v2436_v23, %v2444_v24 }
 0x21d   : > { %v2172_v30 = vld [vmem:[%s12935_s11 + $0x1140] sm:$0xff]  ;;  %7883 = vmatpush1.bf16.msra.mxu0 %v11514_v35 }
 0x21e   : > { %v2420_v31 = vld [vmem:[%s12935_s11 + $0x1900] sm:$0xff]  ;;  %v11499_v43 = vcombine.high %v2164_v29, %v2172_v30  ;;  %7923 = vmatprep.subr.bf16.mxu1 %v11771_v28  ;;  %v11498_v44 = vcombine.low %v2164_v29, %v2172_v30 }
 0x21f   : > { %v2428_v34 = vld [vmem:[%s12935_s11 + $0x1940] sm:$0xff]  ;;  %7924 = vmatpush1.bf16.msra.mxu1 %v11770_v40 }
 0x220   : > { %v11755_v8 = vcombine.high %v2420_v31, %v2428_v34  ;;  %v2148_v36 = vld [vmem:[%s12935_s11 + $0x1080] sm:$0xff]  ;;  %7884 = vmatprep.subr.bf16.mxu0 %v11499_v43  ;;  %v11754_v45 = vcombine.low %v2420_v31, %v2428_v34 }
 0x221   : > { %v2156_v37 = vld [vmem:[%s12935_s11 + $0x10c0] sm:$0xff]  ;;  %7885 = vmatpush1.bf16.msra.mxu0 %v11498_v44 }
 0x222   : > { %v2404_v38 = vld [vmem:[%s12935_s11 + $0x1880] sm:$0xff]  ;;  %v11483_v46 = vcombine.high %v2148_v36, %v2156_v37  ;;  %7925 = vmatprep.subr.bf16.mxu1 %v11755_v8  ;;  %v11482_v52 = vcombine.low %v2148_v36, %v2156_v37 }
 0x223   : > { %v2412_v39 = vld [vmem:[%s12935_s11 + $0x18c0] sm:$0xff]  ;;  %7926 = vmatpush1.bf16.msra.mxu1 %v11754_v45 }
 0x224   : > { %v11739_v47 = vcombine.high %v2404_v38, %v2412_v39  ;;  %v2132_v48 = vld [vmem:[%s12935_s11 + $0x1000] sm:$0xff]  ;;  %7886 = vmatprep.subr.bf16.mxu0 %v11483_v46  ;;  %v11738_v53 = vcombine.low %v2404_v38, %v2412_v39 }
 0x225   : > { %v2140_v49 = vld [vmem:[%s12935_s11 + $0x1040] sm:$0xff]  ;;  %7887 = vmatpush1.bf16.msra.mxu0 %v11482_v52 }
 0x226   : > { %v2388_v50 = vld [vmem:[%s12935_s11 + $0x1800] sm:$0xff]  ;;  %v11467_v54 = vcombine.high %v2132_v48, %v2140_v49  ;;  %7927 = vmatprep.subr.bf16.mxu1 %v11739_v47  ;;  %v11466_v63 = vcombine.low %v2132_v48, %v2140_v49 }
 0x227   : > { %v2396_v51 = vld [vmem:[%s12935_s11 + $0x1840] sm:$0xff]  ;;  %7928 = vmatpush1.bf16.msra.mxu1 %v11738_v53 }
 0x228   : > { %v11723_v55 = vcombine.high %v2388_v50, %v2396_v51  ;;  %v2372_v56 = vld [vmem:[%s12935_s11 + $0x1780] sm:$0xff]  ;;  %7888 = vmatprep.subr.bf16.mxu0 %v11467_v54  ;;  %v11722_v1 = vcombine.low %v2388_v50, %v2396_v51 }
 0x229   : > { %v2380_v57 = vld [vmem:[%s12935_s11 + $0x17c0] sm:$0xff]  ;;  %7889 = vmatpush1.bf16.msra.mxu0 %v11466_v63 }
 0x22a   : > { %v2628_v59 = vld [vmem:[%s12935_s11 + $0x1f80] sm:$0xff]  ;;  %v11707_v2 = vcombine.high %v2372_v56, %v2380_v57  ;;  %7929 = vmatprep.subr.bf16.mxu1 %v11723_v55  ;;  %v11706_v10 = vcombine.low %v2372_v56, %v2380_v57 }
 0x22b   : > { %v2636_v60 = vld [vmem:[%s12935_s11 + $0x1fc0] sm:$0xff]  ;;  %7930 = vmatpush1.bf16.msra.mxu1 %v11722_v1 }
 0x22c   : > { %v11963_v32 = vcombine.high %v2628_v59, %v2636_v60  ;;  %v2356_v3 = vld [vmem:[%s12935_s11 + $0x1700] sm:$0xff]  ;;  %7890 = vmatprep.subr.bf16.mxu0 %v11707_v2  ;;  %v11962_v15 = vcombine.low %v2628_v59, %v2636_v60 }
 0x22d   : > { %v2364_v4 = vld [vmem:[%s12935_s11 + $0x1740] sm:$0xff]  ;;  %7891 = vmatpush2.bf16.msra.mxu0 %v11706_v10 }
 0x22e   : > { %v2612_v33 = vld [vmem:[%s12935_s11 + $0x1f00] sm:$0xff]  ;;  %v11691_v16 = vcombine.high %v2356_v3, %v2364_v4  ;;  %7931 = vmatprep.subr.bf16.mxu1 %v11963_v32  ;;  %v11690_v12 = vcombine.low %v2356_v3, %v2364_v4  ;;  %v1733_v3 = vld [vmem:[%s12935_s11 + $0x388] sm:$0xff] }
 0x22f   : > { %v2620_v6 = vld [vmem:[%s12935_s11 + $0x1f40] sm:$0xff]  ;;  %7932 = vmatpush2.bf16.msra.mxu1 %v11962_v15  ;;  %v1741_v4 = vld [vmem:[%s12935_s11 + $0x3c8] sm:$0xff] }
 0x230   : > { %v11947_v17 = vcombine.high %v2612_v33, %v2620_v6  ;;  %v2340_v18 = vld [vmem:[%s12935_s11 + $0x1680] sm:$0xff]  ;;  %7892 = vmatprep.subr.bf16.mxu0 %v11691_v16  ;;  %v11946_v22 = vcombine.low %v2612_v33, %v2620_v6  ;;  %v1989_v33 = vld [vmem:[%s12935_s11 + $0xb88] sm:$0xff]  ;;  %v11069_v16 = vcombine.high %v1733_v3, %v1741_v4 }
 0x231   : > { %v2348_v19 = vld [vmem:[%s12935_s11 + $0x16c0] sm:$0xff]  ;;  %7893 = vmatpush2.bf16.msra.mxu0 %v11690_v12  ;;  %v1997_v6 = vld [vmem:[%s12935_s11 + $0xbc8] sm:$0xff] }
 0x232   : > { %v2596_v20 = vld [vmem:[%s12935_s11 + $0x1e80] sm:$0xff]  ;;  %v11675_v9 = vcombine.high %v2340_v18, %v2348_v19  ;;  %7933 = vmatprep.subr.bf16.mxu1 %v11947_v17  ;;  %v11674_v25 = vcombine.low %v2340_v18, %v2348_v19  ;;  %v11325_v17 = vcombine.high %v1989_v33, %v1997_v6  ;;  %v1717_v18 = vld [vmem:[%s12935_s11 + $0x308] sm:$0xff] }
 0x233   : > { %v2604_v21 = vld [vmem:[%s12935_s11 + $0x1ec0] sm:$0xff]  ;;  %7934 = vmatpush2.bf16.msra.mxu1 %v11946_v22  ;;  %v1725_v19 = vld [vmem:[%s12935_s11 + $0x348] sm:$0xff]  ;;  %v13172_v22 = vcombine.low %v13088_v0, %v13088_v0 }
 0x234   : > { %v11931_v11 = vcombine.high %v2596_v20, %v2604_v21  ;;  %v2324_v13 = vld [vmem:[%s12935_s11 + $0x1600] sm:$0xff]  ;;  %7894 = vmatprep.subr.bf16.mxu0 %v11675_v9  ;;  %v11930_v26 = vcombine.low %v2596_v20, %v2604_v21  ;;  %v13166_v20 = vcombine.low %v13081_v61, %v13081_v61  ;;  %v1973_v21 = vld [vmem:[%s12935_s11 + $0xb08] sm:$0xff]  ;;  %v11068_v9 = vcombine.low %v1733_v3, %v1741_v4 }
 0x235   : > { %v2332_v14 = vld [vmem:[%s12935_s11 + $0x1640] sm:$0xff]  ;;  %7895 = vmatpush2.bf16.msra.mxu0 %v11674_v25  ;;  %v1981_v12 = vld [vmem:[%s12935_s11 + $0xb48] sm:$0xff]  ;;  %v11052_v0 = vcombine.low %v1717_v18, %v1725_v19 }
 0x236   : > { %v2580_v23 = vld [vmem:[%s12935_s11 + $0x1e00] sm:$0xff]  ;;  %v11659_v27 = vcombine.high %v2324_v13, %v2332_v14  ;;  %7935 = vmatprep.subr.bf16.mxu1 %v11931_v11  ;;  %v11658_v35 = vcombine.low %v2324_v13, %v2332_v14  ;;  %v11324_v11 = vcombine.low %v1989_v33, %v1997_v6  ;;  %v11053_v13 = vcombine.high %v1717_v18, %v1725_v19  ;;  %v1709_v61 = vld [vmem:[%s12935_s11 + $0x2c8] sm:$0xff] }
 0x237   : > { %v2588_v24 = vld [vmem:[%s12935_s11 + $0x1e40] sm:$0xff]  ;;  %7936 = vmatpush2.bf16.msra.mxu1 %v11930_v26  ;;  %v11309_v14 = vcombine.high %v1973_v21, %v1981_v12  ;;  %v1965_v25 = vld [vmem:[%s12935_s11 + $0xac8] sm:$0xff]  ;;  %v11308_v26 = vcombine.low %v1973_v21, %v1981_v12 }
 0x238   : > { %v11915_v28 = vcombine.high %v2580_v23, %v2588_v24  ;;  %v2308_v29 = vld [vmem:[%s12935_s11 + $0x1580] sm:$0xff]  ;;  %7896 = vmatprep.subr.bf16.mxu0 %v11659_v27  ;;  %v11914_v40 = vcombine.low %v2580_v23, %v2588_v24  ;;  %v1701_v23 = vld [vmem:[%s12935_s11 + $0x288] sm:$0xff] }
 0x239   : > { %v2316_v30 = vld [vmem:[%s12935_s11 + $0x15c0] sm:$0xff]  ;;  %7897 = vmatpush2.bf16.msra.mxu0 %v11658_v35  ;;  %v1957_v24 = vld [vmem:[%s12935_s11 + $0xa88] sm:$0xff]  ;;  %v11037_v27 = vcombine.high %v1701_v23, %v1709_v61  ;;  %v11036_v35 = vcombine.low %v1701_v23, %v1709_v61 }
 0x23a   : > { %v2564_v31 = vld [vmem:[%s12935_s11 + $0x1d80] sm:$0xff]  ;;  %v11643_v43 = vcombine.high %v2308_v29, %v2316_v30  ;;  %7937 = vmatprep.subr.bf16.mxu1 %v11915_v28  ;;  %v11642_v44 = vcombine.low %v2308_v29, %v2316_v30  ;;  %v11293_v28 = vcombine.high %v1957_v24, %v1965_v25  ;;  %v1685_v29 = vld [vmem:[%s12935_s11 + $0x208] sm:$0xff] }
 0x23b   : > { %v2572_v34 = vld [vmem:[%s12935_s11 + $0x1dc0] sm:$0xff]  ;;  %7938 = vmatpush2.bf16.msra.mxu1 %v11914_v40  ;;  %v1693_v30 = vld [vmem:[%s12935_s11 + $0x248] sm:$0xff]  ;;  %v11292_v40 = vcombine.low %v1957_v24, %v1965_v25 }
 0x23c   : > { %v11899_v8 = vcombine.high %v2564_v31, %v2572_v34  ;;  %v2292_v36 = vld [vmem:[%s12935_s11 + $0x1500] sm:$0xff]  ;;  %7898 = vmatprep.subr.bf16.mxu0 %v11643_v43  ;;  %v11898_v45 = vcombine.low %v2564_v31, %v2572_v34  ;;  %v1941_v31 = vld [vmem:[%s12935_s11 + $0xa08] sm:$0xff]  ;;  %v11021_v43 = vcombine.high %v1685_v29, %v1693_v30 }
 0x23d   : > { %v2300_v37 = vld [vmem:[%s12935_s11 + $0x1540] sm:$0xff]  ;;  %7899 = vmatpush2.bf16.msra.mxu0 %v11642_v44  ;;  %v1949_v34 = vld [vmem:[%s12935_s11 + $0xa48] sm:$0xff]  ;;  %v11020_v44 = vcombine.low %v1685_v29, %v1693_v30 }
 0x23e   : > { %v2548_v38 = vld [vmem:[%s12935_s11 + $0x1d00] sm:$0xff]  ;;  %v11627_v46 = vcombine.high %v2292_v36, %v2300_v37  ;;  %7939 = vmatprep.subr.bf16.mxu1 %v11899_v8  ;;  %v11626_v52 = vcombine.low %v2292_v36, %v2300_v37  ;;  %v11277_v8 = vcombine.high %v1941_v31, %v1949_v34  ;;  %v1669_v36 = vld [vmem:[%s12935_s11 + $0x188] sm:$0xff] }
 0x23f   : > { %v2556_v39 = vld [vmem:[%s12935_s11 + $0x1d40] sm:$0xff]  ;;  %7940 = vmatpush2.bf16.msra.mxu1 %v11898_v45  ;;  %v1677_v37 = vld [vmem:[%s12935_s11 + $0x1c8] sm:$0xff]  ;;  %v11276_v45 = vcombine.low %v1941_v31, %v1949_v34 }
 0x240   : > { %v11883_v47 = vcombine.high %v2548_v38, %v2556_v39  ;;  %v2276_v48 = vld [vmem:[%s12935_s11 + $0x1480] sm:$0xff]  ;;  %7900 = vmatprep.subr.bf16.mxu0 %v11627_v46  ;;  %v11882_v53 = vcombine.low %v2548_v38, %v2556_v39  ;;  %v1925_v38 = vld [vmem:[%s12935_s11 + $0x988] sm:$0xff]  ;;  %v11005_v46 = vcombine.high %v1669_v36, %v1677_v37 }
 0x241   : > { %v2284_v49 = vld [vmem:[%s12935_s11 + $0x14c0] sm:$0xff]  ;;  %7901 = vmatpush2.bf16.msra.mxu0 %v11626_v52  ;;  %v1933_v39 = vld [vmem:[%s12935_s11 + $0x9c8] sm:$0xff]  ;;  %v11004_v52 = vcombine.low %v1669_v36, %v1677_v37 }
 0x242   : > { %v2532_v50 = vld [vmem:[%s12935_s11 + $0x1c80] sm:$0xff]  ;;  %v11611_v54 = vcombine.high %v2276_v48, %v2284_v49  ;;  %7941 = vmatprep.subr.bf16.mxu1 %v11883_v47  ;;  %v11610_v63 = vcombine.low %v2276_v48, %v2284_v49  ;;  %v11261_v47 = vcombine.high %v1925_v38, %v1933_v39  ;;  %v1653_v48 = vld [vmem:[%s12935_s11 + $0x108] sm:$0xff] }
 0x243   : > { %v2540_v51 = vld [vmem:[%s12935_s11 + $0x1cc0] sm:$0xff]  ;;  %7942 = vmatpush2.bf16.msra.mxu1 %v11882_v53  ;;  %v1661_v49 = vld [vmem:[%s12935_s11 + $0x148] sm:$0xff]  ;;  %v11260_v53 = vcombine.low %v1925_v38, %v1933_v39 }
 0x244   : > { %v11867_v55 = vcombine.high %v2532_v50, %v2540_v51  ;;  %v2260_v56 = vld [vmem:[%s12935_s11 + $0x1400] sm:$0xff]  ;;  %7902 = vmatprep.subr.bf16.mxu0 %v11611_v54  ;;  %v11866_v1 = vcombine.low %v2532_v50, %v2540_v51  ;;  %v1909_v50 = vld [vmem:[%s12935_s11 + $0x908] sm:$0xff]  ;;  %v10989_v54 = vcombine.high %v1653_v48, %v1661_v49 }
 0x245   : > { %v2268_v57 = vld [vmem:[%s12935_s11 + $0x1440] sm:$0xff]  ;;  %7903 = vmatpush2.bf16.msra.mxu0 %v11610_v63  ;;  %v1917_v51 = vld [vmem:[%s12935_s11 + $0x948] sm:$0xff]  ;;  %v10988_v63 = vcombine.low %v1653_v48, %v1661_v49 }
 0x246   : > { %v2516_v59 = vld [vmem:[%s12935_s11 + $0x1c00] sm:$0xff]  ;;  %v11595_v2 = vcombine.high %v2260_v56, %v2268_v57  ;;  %7943 = vmatprep.subr.bf16.mxu1 %v11867_v55  ;;  %v11594_v10 = vcombine.low %v2260_v56, %v2268_v57  ;;  %v11245_v55 = vcombine.high %v1909_v50, %v1917_v51  ;;  %v1637_v56 = vld [vmem:[%s12935_s11 + $0x88] sm:$0xff] }
 0x247   : > { %v2524_v60 = vld [vmem:[%s12935_s11 + $0x1c40] sm:$0xff]  ;;  %7944 = vmatpush2.bf16.msra.mxu1 %v11866_v1  ;;  %v1645_v57 = vld [vmem:[%s12935_s11 + $0xc8] sm:$0xff]  ;;  %v11244_v1 = vcombine.low %v1909_v50, %v1917_v51 }
 0x248   : > { %v11851_v32 = vcombine.high %v2516_v59, %v2524_v60  ;;  %7904 = vmatprep.subr.bf16.mxu0 %v11595_v2  ;;  %v11850_v15 = vcombine.low %v2516_v59, %v2524_v60  ;;  %v1893_v59 = vld [vmem:[%s12935_s11 + $0x888] sm:$0xff]  ;;  %v10973_v2 = vcombine.high %v1637_v56, %v1645_v57 }
 0x249   : > { %7905 = vmatpush2.bf16.msra.mxu0 %v11594_v10  ;;  %v1901_v60 = vld [vmem:[%s12935_s11 + $0x8c8] sm:$0xff]  ;;  %v10972_v10 = vcombine.low %v1637_v56, %v1645_v57 }
 0x24a   : > { %7945 = vmatprep.subr.bf16.mxu1 %v11851_v32  ;;  %7956 = vmatprep.subr.bf16.mxu0 %v11069_v16  ;;  %v11229_v32 = vcombine.high %v1893_v59, %v1901_v60  ;;  %v1621_v3 = vld [vmem:[%s12935_s11 + $0x8] sm:$0xff] }
 0x24b   : > { %7946 = vmatpush2.bf16.msra.mxu1 %v11850_v15  ;;  %v1629_v4 = vld [vmem:[%s12935_s11 + $0x48] sm:$0xff]  ;;  %v11228_v15 = vcombine.low %v1893_v59, %v1901_v60 }
 0x24c   : > { %7997 = vmatprep.subr.bf16.mxu1 %v11325_v17  ;;  %7907 = vmatmul.mubr.bf16.vlgmr.msra.gmra.mxu0 %v13166_v20  ;;  %v1877_v33 = vld [vmem:[%s12935_s11 + $0x808] sm:$0xff]  ;;  %v10957_v16 = vcombine.high %v1621_v3, %v1629_v4 }
 0x24d   : > { %7957 = vmatpush1.bf16.msra.mxu0 %v11068_v9  ;;  %7988 = vmatprep.mubr.bf16.mxu0 %v13026_v41  ;;  %v1885_v6 = vld [vmem:[%s12935_s11 + $0x848] sm:$0xff]  ;;  %v10956_v9 = vcombine.low %v1621_v3, %v1629_v4 }
 0x24e   : > { %7948 = vmatmul.mubr.bf16.vlgmr.msra.gmra.mxu1 %v13172_v22  ;;  %7958 = vmatprep.subr.bf16.mxu0 %v11053_v13  ;;  %v11213_v17 = vcombine.high %v1877_v33, %v1885_v6  ;;  %v1861_v18 = vld [vmem:[%s12935_s11 + $0x788] sm:$0xff] }
 0x24f   : > { %7998 = vmatpush1.bf16.msra.mxu1 %v11324_v11  ;;  %8029 = vmatprep.mubr.bf16.mxu1 %v13030_v42  ;;  %v1869_v19 = vld [vmem:[%s12935_s11 + $0x7c8] sm:$0xff]  ;;  %v11212_v11 = vcombine.low %v1877_v33, %v1885_v6 }
 0x250   : > { %7999 = vmatprep.subr.bf16.mxu1 %v11309_v14  ;;  %v2117_v21 = vld [vmem:[%s12935_s11 + $0xf88] sm:$0xff]  ;;  %v11197_v13 = vcombine.high %v1861_v18, %v1869_v19 }
 0x251   : > { %7959 = vmatpush1.bf16.msra.mxu0 %v11052_v0  ;;  %v2125_v12 = vld [vmem:[%s12935_s11 + $0xfc8] sm:$0xff]  ;;  %v11196_v0 = vcombine.low %v1861_v18, %v1869_v19 }
 0x252   : > { %7960 = vmatprep.subr.bf16.mxu0 %v11037_v27  ;;  %v11453_v14 = vcombine.high %v2117_v21, %v2125_v12  ;;  %v1845_v23 = vld [vmem:[%s12935_s11 + $0x708] sm:$0xff] }
 0x253   : > { %8000 = vmatpush1.bf16.msra.mxu1 %v11308_v26  ;;  %v1853_v61 = vld [vmem:[%s12935_s11 + $0x748] sm:$0xff]  ;;  %v11452_v26 = vcombine.low %v2117_v21, %v2125_v12 }
 0x254   : > { %8001 = vmatprep.subr.bf16.mxu1 %v11293_v28  ;;  %v2101_v24 = vld [vmem:[%s12935_s11 + $0xf08] sm:$0xff]  ;;  %v11181_v27 = vcombine.high %v1845_v23, %v1853_v61 }
 0x255   : > { %7961 = vmatpush1.bf16.msra.mxu0 %v11036_v35  ;;  %v2109_v25 = vld [vmem:[%s12935_s11 + $0xf48] sm:$0xff]  ;;  %v11180_v35 = vcombine.low %v1845_v23, %v1853_v61 }
 0x256   : > { %7962 = vmatprep.subr.bf16.mxu0 %v11021_v43  ;;  %v11437_v28 = vcombine.high %v2101_v24, %v2109_v25  ;;  %v1829_v29 = vld [vmem:[%s12935_s11 + $0x688] sm:$0xff] }
 0x257   : > { %8002 = vmatpush1.bf16.msra.mxu1 %v11292_v40  ;;  %v1837_v30 = vld [vmem:[%s12935_s11 + $0x6c8] sm:$0xff]  ;;  %v11436_v40 = vcombine.low %v2101_v24, %v2109_v25 }
 0x258   : > { %8003 = vmatprep.subr.bf16.mxu1 %v11277_v8  ;;  %v2085_v31 = vld [vmem:[%s12935_s11 + $0xe88] sm:$0xff]  ;;  %v11165_v43 = vcombine.high %v1829_v29, %v1837_v30 }
 0x259   : > { %7963 = vmatpush1.bf16.msra.mxu0 %v11020_v44  ;;  %v2093_v34 = vld [vmem:[%s12935_s11 + $0xec8] sm:$0xff]  ;;  %v11164_v44 = vcombine.low %v1829_v29, %v1837_v30 }
 0x25a   : > { %7964 = vmatprep.subr.bf16.mxu0 %v11005_v46  ;;  %v11421_v8 = vcombine.high %v2085_v31, %v2093_v34  ;;  %v1813_v36 = vld [vmem:[%s12935_s11 + $0x608] sm:$0xff] }
 0x25b   : > { %8004 = vmatpush1.bf16.msra.mxu1 %v11276_v45  ;;  %v1821_v37 = vld [vmem:[%s12935_s11 + $0x648] sm:$0xff]  ;;  %v11420_v45 = vcombine.low %v2085_v31, %v2093_v34 }
 0x25c   : > { %8005 = vmatprep.subr.bf16.mxu1 %v11261_v47  ;;  %v2069_v38 = vld [vmem:[%s12935_s11 + $0xe08] sm:$0xff]  ;;  %v11149_v46 = vcombine.high %v1813_v36, %v1821_v37 }
 0x25d   : > { %7965 = vmatpush1.bf16.msra.mxu0 %v11004_v52  ;;  %v2077_v39 = vld [vmem:[%s12935_s11 + $0xe48] sm:$0xff]  ;;  %v11148_v52 = vcombine.low %v1813_v36, %v1821_v37 }
 0x25e   : > { %7966 = vmatprep.subr.bf16.mxu0 %v10989_v54  ;;  %v11405_v47 = vcombine.high %v2069_v38, %v2077_v39  ;;  %v1797_v48 = vld [vmem:[%s12935_s11 + $0x588] sm:$0xff] }
 0x25f   : > { %8006 = vmatpush1.bf16.msra.mxu1 %v11260_v53  ;;  %v1805_v49 = vld [vmem:[%s12935_s11 + $0x5c8] sm:$0xff]  ;;  %v11404_v53 = vcombine.low %v2069_v38, %v2077_v39 }
 0x260   : > { %8007 = vmatprep.subr.bf16.mxu1 %v11245_v55  ;;  %v2053_v50 = vld [vmem:[%s12935_s11 + $0xd88] sm:$0xff]  ;;  %v11133_v54 = vcombine.high %v1797_v48, %v1805_v49 }
 0x261   : > { %7967 = vmatpush1.bf16.msra.mxu0 %v10988_v63  ;;  %v2061_v51 = vld [vmem:[%s12935_s11 + $0xdc8] sm:$0xff]  ;;  %v11132_v63 = vcombine.low %v1797_v48, %v1805_v49 }
 0x262   : > { %7968 = vmatprep.subr.bf16.mxu0 %v10973_v2  ;;  %v11389_v55 = vcombine.high %v2053_v50, %v2061_v51  ;;  %v1781_v56 = vld [vmem:[%s12935_s11 + $0x508] sm:$0xff] }
 0x263   : > { %8008 = vmatpush1.bf16.msra.mxu1 %v11244_v1  ;;  %v1789_v57 = vld [vmem:[%s12935_s11 + $0x548] sm:$0xff]  ;;  %v11388_v1 = vcombine.low %v2053_v50, %v2061_v51 }
 0x264   : > { %8009 = vmatprep.subr.bf16.mxu1 %v11229_v32  ;;  %v2037_v59 = vld [vmem:[%s12935_s11 + $0xd08] sm:$0xff]  ;;  %v11117_v2 = vcombine.high %v1781_v56, %v1789_v57 }
 0x265   : > { %7969 = vmatpush1.bf16.msra.mxu0 %v10972_v10  ;;  %v2045_v60 = vld [vmem:[%s12935_s11 + $0xd48] sm:$0xff]  ;;  %v11116_v10 = vcombine.low %v1781_v56, %v1789_v57 }
 0x266   : > { %7970 = vmatprep.subr.bf16.mxu0 %v10957_v16  ;;  %v11373_v32 = vcombine.high %v2037_v59, %v2045_v60  ;;  %v1765_v3 = vld [vmem:[%s12935_s11 + $0x488] sm:$0xff] }
 0x267   : > { %8010 = vmatpush1.bf16.msra.mxu1 %v11228_v15  ;;  %v1773_v4 = vld [vmem:[%s12935_s11 + $0x4c8] sm:$0xff]  ;;  %v11372_v15 = vcombine.low %v2037_v59, %v2045_v60 }
 0x268   : > { %8011 = vmatprep.subr.bf16.mxu1 %v11213_v17  ;;  %v2021_v33 = vld [vmem:[%s12935_s11 + $0xc88] sm:$0xff]  ;;  %v11101_v16 = vcombine.high %v1765_v3, %v1773_v4 }
 0x269   : > { %7971 = vmatpush1.bf16.msra.mxu0 %v10956_v9  ;;  %v2029_v6 = vld [vmem:[%s12935_s11 + $0xcc8] sm:$0xff]  ;;  %v11100_v9 = vcombine.low %v1765_v3, %v1773_v4 }
 0x26a   : > { %7972 = vmatprep.subr.bf16.mxu0 %v11197_v13  ;;  %v11357_v17 = vcombine.high %v2021_v33, %v2029_v6  ;;  %v1749_v18 = vld [vmem:[%s12935_s11 + $0x408] sm:$0xff] }
 0x26b   : > { %8012 = vmatpush1.bf16.msra.mxu1 %v11212_v11  ;;  %v1757_v19 = vld [vmem:[%s12935_s11 + $0x448] sm:$0xff]  ;;  %v11356_v11 = vcombine.low %v2021_v33, %v2029_v6 }
 0x26c   : > { %8013 = vmatprep.subr.bf16.mxu1 %v11453_v14  ;;  %v2005_v21 = vld [vmem:[%s12935_s11 + $0xc08] sm:$0xff]  ;;  %v11085_v13 = vcombine.high %v1749_v18, %v1757_v19 }
 0x26d   : > { %7973 = vmatpush2.bf16.msra.mxu0 %v11196_v0  ;;  %v2013_v12 = vld [vmem:[%s12935_s11 + $0xc48] sm:$0xff]  ;;  %v11084_v0 = vcombine.low %v1749_v18, %v1757_v19 }
 0x26e   : > { %7974 = vmatprep.subr.bf16.mxu0 %v11181_v27  ;;  %v11341_v14 = vcombine.high %v2005_v21, %v2013_v12  ;;  %v2245_v23 = vld [vmem:[%s12935_s11 + $0x1388] sm:$0xff] }
 0x26f   : > { %8014 = vmatpush2.bf16.msra.mxu1 %v11452_v26  ;;  %v2253_v61 = vld [vmem:[%s12935_s11 + $0x13c8] sm:$0xff]  ;;  %v11340_v26 = vcombine.low %v2005_v21, %v2013_v12 }
 0x270   : > { %8015 = vmatprep.subr.bf16.mxu1 %v11437_v28  ;;  %v2501_v24 = vld [vmem:[%s12935_s11 + $0x1b88] sm:$0xff]  ;;  %v11581_v27 = vcombine.high %v2245_v23, %v2253_v61 }
 0x271   : > { %7975 = vmatpush2.bf16.msra.mxu0 %v11180_v35  ;;  %v2509_v25 = vld [vmem:[%s12935_s11 + $0x1bc8] sm:$0xff]  ;;  %v11580_v35 = vcombine.low %v2245_v23, %v2253_v61 }
 0x272   : > { %7976 = vmatprep.subr.bf16.mxu0 %v11165_v43  ;;  %v11837_v28 = vcombine.high %v2501_v24, %v2509_v25  ;;  %v2229_v29 = vld [vmem:[%s12935_s11 + $0x1308] sm:$0xff] }
 0x273   : > { %8016 = vmatpush2.bf16.msra.mxu1 %v11436_v40  ;;  %v2237_v30 = vld [vmem:[%s12935_s11 + $0x1348] sm:$0xff]  ;;  %v11836_v40 = vcombine.low %v2501_v24, %v2509_v25 }
 0x274   : > { %8017 = vmatprep.subr.bf16.mxu1 %v11421_v8  ;;  %v2485_v31 = vld [vmem:[%s12935_s11 + $0x1b08] sm:$0xff]  ;;  %v11565_v43 = vcombine.high %v2229_v29, %v2237_v30 }
 0x275   : > { %7977 = vmatpush2.bf16.msra.mxu0 %v11164_v44  ;;  %v2493_v34 = vld [vmem:[%s12935_s11 + $0x1b48] sm:$0xff]  ;;  %v11564_v44 = vcombine.low %v2229_v29, %v2237_v30 }
 0x276   : > { %7978 = vmatprep.subr.bf16.mxu0 %v11149_v46  ;;  %v11821_v8 = vcombine.high %v2485_v31, %v2493_v34  ;;  %v2213_v36 = vld [vmem:[%s12935_s11 + $0x1288] sm:$0xff] }
 0x277   : > { %8018 = vmatpush2.bf16.msra.mxu1 %v11420_v45  ;;  %v2221_v37 = vld [vmem:[%s12935_s11 + $0x12c8] sm:$0xff]  ;;  %v11820_v45 = vcombine.low %v2485_v31, %v2493_v34 }
 0x278   : > { %8019 = vmatprep.subr.bf16.mxu1 %v11405_v47  ;;  %v2469_v38 = vld [vmem:[%s12935_s11 + $0x1a88] sm:$0xff]  ;;  %v11549_v46 = vcombine.high %v2213_v36, %v2221_v37 }
 0x279   : > { %7979 = vmatpush2.bf16.msra.mxu0 %v11148_v52  ;;  %v2477_v39 = vld [vmem:[%s12935_s11 + $0x1ac8] sm:$0xff]  ;;  %v11548_v52 = vcombine.low %v2213_v36, %v2221_v37 }
 0x27a   : > { %7980 = vmatprep.subr.bf16.mxu0 %v11133_v54  ;;  %v11805_v47 = vcombine.high %v2469_v38, %v2477_v39  ;;  %v2197_v48 = vld [vmem:[%s12935_s11 + $0x1208] sm:$0xff] }
 0x27b   : > { %8020 = vmatpush2.bf16.msra.mxu1 %v11404_v53  ;;  %v2205_v49 = vld [vmem:[%s12935_s11 + $0x1248] sm:$0xff]  ;;  %v11804_v53 = vcombine.low %v2469_v38, %v2477_v39 }
 0x27c   : > { %8021 = vmatprep.subr.bf16.mxu1 %v11389_v55  ;;  %v2453_v50 = vld [vmem:[%s12935_s11 + $0x1a08] sm:$0xff]  ;;  %v11533_v54 = vcombine.high %v2197_v48, %v2205_v49 }
 0x27d   : > { %7981 = vmatpush2.bf16.msra.mxu0 %v11132_v63  ;;  %v2461_v51 = vld [vmem:[%s12935_s11 + $0x1a48] sm:$0xff]  ;;  %v11532_v63 = vcombine.low %v2197_v48, %v2205_v49 }
 0x27e   : > { %7982 = vmatprep.subr.bf16.mxu0 %v11117_v2  ;;  %v11789_v55 = vcombine.high %v2453_v50, %v2461_v51  ;;  %v2181_v56 = vld [vmem:[%s12935_s11 + $0x1188] sm:$0xff] }
 0x27f   : > { %8022 = vmatpush2.bf16.msra.mxu1 %v11388_v1  ;;  %v2189_v57 = vld [vmem:[%s12935_s11 + $0x11c8] sm:$0xff]  ;;  %v11788_v1 = vcombine.low %v2453_v50, %v2461_v51 }
 0x280   : > { %8023 = vmatprep.subr.bf16.mxu1 %v11373_v32  ;;  %v2437_v59 = vld [vmem:[%s12935_s11 + $0x1988] sm:$0xff]  ;;  %v11517_v2 = vcombine.high %v2181_v56, %v2189_v57 }
 0x281   : > { %7983 = vmatpush2.bf16.msra.mxu0 %v11116_v10  ;;  %v2445_v60 = vld [vmem:[%s12935_s11 + $0x19c8] sm:$0xff]  ;;  %v11516_v10 = vcombine.low %v2181_v56, %v2189_v57 }
 0x282   : > { %7984 = vmatprep.subr.bf16.mxu0 %v11101_v16  ;;  %v11773_v32 = vcombine.high %v2437_v59, %v2445_v60  ;;  %v2165_v3 = vld [vmem:[%s12935_s11 + $0x1108] sm:$0xff] }
 0x283   : > { %8024 = vmatpush2.bf16.msra.mxu1 %v11372_v15  ;;  %v2173_v4 = vld [vmem:[%s12935_s11 + $0x1148] sm:$0xff]  ;;  %v11772_v15 = vcombine.low %v2437_v59, %v2445_v60 }
 0x284   : > { %8025 = vmatprep.subr.bf16.mxu1 %v11357_v17  ;;  %v2421_v33 = vld [vmem:[%s12935_s11 + $0x1908] sm:$0xff]  ;;  %v11501_v16 = vcombine.high %v2165_v3, %v2173_v4 }
 0x285   : > { %7985 = vmatpush2.bf16.msra.mxu0 %v11100_v9  ;;  %v2429_v6 = vld [vmem:[%s12935_s11 + $0x1948] sm:$0xff]  ;;  %v11500_v9 = vcombine.low %v2165_v3, %v2173_v4 }
 0x286   : > { %7986 = vmatprep.subr.bf16.mxu0 %v11085_v13  ;;  %v11757_v17 = vcombine.high %v2421_v33, %v2429_v6  ;;  %v2149_v18 = vld [vmem:[%s12935_s11 + $0x1088] sm:$0xff] }
 0x287   : > { %8026 = vmatpush2.bf16.msra.mxu1 %v11356_v11  ;;  %v2157_v19 = vld [vmem:[%s12935_s11 + $0x10c8] sm:$0xff]  ;;  %v11756_v11 = vcombine.low %v2421_v33, %v2429_v6 }
 0x288   : > { %8027 = vmatprep.subr.bf16.mxu1 %v11341_v14  ;;  %v2405_v21 = vld [vmem:[%s12935_s11 + $0x1888] sm:$0xff]  ;;  %v11485_v13 = vcombine.high %v2149_v18, %v2157_v19 }
 0x289   : > { %7987 = vmatpush2.bf16.msra.mxu0 %v11084_v0  ;;  %v2413_v12 = vld [vmem:[%s12935_s11 + $0x18c8] sm:$0xff]  ;;  %v11484_v0 = vcombine.low %v2149_v18, %v2157_v19 }
 0x28a   : > { %8038 = vmatprep.subr.bf16.mxu0 %v11581_v27  ;;  %v11741_v14 = vcombine.high %v2405_v21, %v2413_v12  ;;  %v2133_v23 = vld [vmem:[%s12935_s11 + $0x1008] sm:$0xff] }
 0x28b   : > { %8028 = vmatpush2.bf16.msra.mxu1 %v11340_v26  ;;  %v2141_v61 = vld [vmem:[%s12935_s11 + $0x1048] sm:$0xff]  ;;  %v11740_v26 = vcombine.low %v2405_v21, %v2413_v12 }
 0x28c   : > { %8079 = vmatprep.subr.bf16.mxu1 %v11837_v28  ;;  %7989 = vmatmul.mubr.bf16.vlgmr.msra.gmra.mxu0 %v13076_v58  ;;  %v2389_v24 = vld [vmem:[%s12935_s11 + $0x1808] sm:$0xff]  ;;  %v11469_v27 = vcombine.high %v2133_v23, %v2141_v61 }
 0x28d   : > { %8039 = vmatpush1.bf16.msra.mxu0 %v11580_v35  ;;  %8070 = vmatprep.mubr.bf16.mxu0 %v13094_v5  ;;  %v2397_v25 = vld [vmem:[%s12935_s11 + $0x1848] sm:$0xff]  ;;  %v11468_v35 = vcombine.low %v2133_v23, %v2141_v61 }
 0x28e   : > { %8030 = vmatmul.mubr.bf16.vlgmr.msra.gmra.mxu1 %v13085_v62  ;;  %8040 = vmatprep.subr.bf16.mxu0 %v11565_v43  ;;  %v11725_v28 = vcombine.high %v2389_v24, %v2397_v25  ;;  %v2373_v29 = vld [vmem:[%s12935_s11 + $0x1788] sm:$0xff] }
 0x28f   : > { %8080 = vmatpush1.bf16.msra.mxu1 %v11836_v40  ;;  %8111 = vmatprep.mubr.bf16.mxu1 %v13101_v7  ;;  %v2381_v30 = vld [vmem:[%s12935_s11 + $0x17c8] sm:$0xff]  ;;  %v11724_v40 = vcombine.low %v2389_v24, %v2397_v25 }
 0x290   : > { %8081 = vmatprep.subr.bf16.mxu1 %v11821_v8  ;;  %v2629_v31 = vld [vmem:[%s12935_s11 + $0x1f88] sm:$0xff]  ;;  %v11709_v43 = vcombine.high %v2373_v29, %v2381_v30 }
 0x291   : > { %8041 = vmatpush1.bf16.msra.mxu0 %v11564_v44  ;;  %v2637_v34 = vld [vmem:[%s12935_s11 + $0x1fc8] sm:$0xff]  ;;  %v11708_v44 = vcombine.low %v2373_v29, %v2381_v30 }
 0x292   : > { %8042 = vmatprep.subr.bf16.mxu0 %v11549_v46  ;;  %v11965_v8 = vcombine.high %v2629_v31, %v2637_v34  ;;  %v2357_v36 = vld [vmem:[%s12935_s11 + $0x1708] sm:$0xff] }
 0x293   : > { %8082 = vmatpush1.bf16.msra.mxu1 %v11820_v45  ;;  %v2365_v37 = vld [vmem:[%s12935_s11 + $0x1748] sm:$0xff]  ;;  %v11964_v45 = vcombine.low %v2629_v31, %v2637_v34 }
 0x294   : > { %8083 = vmatprep.subr.bf16.mxu1 %v11805_v47  ;;  %v2613_v38 = vld [vmem:[%s12935_s11 + $0x1f08] sm:$0xff]  ;;  %v11693_v46 = vcombine.high %v2357_v36, %v2365_v37 }
 0x295   : > { %8043 = vmatpush1.bf16.msra.mxu0 %v11548_v52  ;;  %v2621_v39 = vld [vmem:[%s12935_s11 + $0x1f48] sm:$0xff]  ;;  %v11692_v52 = vcombine.low %v2357_v36, %v2365_v37  ;;  %v1734_v36 = vld [vmem:[%s12935_s11 + $0x390] sm:$0xff] }
 0x296   : > { %8044 = vmatprep.subr.bf16.mxu0 %v11533_v54  ;;  %v11949_v47 = vcombine.high %v2613_v38, %v2621_v39  ;;  %v2341_v48 = vld [vmem:[%s12935_s11 + $0x1688] sm:$0xff]  ;;  %v1742_v37 = vld [vmem:[%s12935_s11 + $0x3d0] sm:$0xff] }
 0x297   : > { %8084 = vmatpush1.bf16.msra.mxu1 %v11804_v53  ;;  %v2349_v49 = vld [vmem:[%s12935_s11 + $0x16c8] sm:$0xff]  ;;  %v11948_v53 = vcombine.low %v2613_v38, %v2621_v39  ;;  %v1990_v38 = vld [vmem:[%s12935_s11 + $0xb90] sm:$0xff] }
 0x298   : > { %8085 = vmatprep.subr.bf16.mxu1 %v11789_v55  ;;  %v2597_v50 = vld [vmem:[%s12935_s11 + $0x1e88] sm:$0xff]  ;;  %v11677_v54 = vcombine.high %v2341_v48, %v2349_v49  ;;  %v1998_v39 = vld [vmem:[%s12935_s11 + $0xbd0] sm:$0xff] }
 0x299   : > { %8045 = vmatpush1.bf16.msra.mxu0 %v11532_v63  ;;  %v2605_v51 = vld [vmem:[%s12935_s11 + $0x1ec8] sm:$0xff]  ;;  %v11676_v63 = vcombine.low %v2341_v48, %v2349_v49  ;;  %v1718_v48 = vld [vmem:[%s12935_s11 + $0x310] sm:$0xff] }
 0x29a   : > { %8046 = vmatprep.subr.bf16.mxu0 %v11517_v2  ;;  %v11933_v55 = vcombine.high %v2597_v50, %v2605_v51  ;;  %v2325_v56 = vld [vmem:[%s12935_s11 + $0x1608] sm:$0xff]  ;;  %v1726_v49 = vld [vmem:[%s12935_s11 + $0x350] sm:$0xff] }
 0x29b   : > { %8086 = vmatpush1.bf16.msra.mxu1 %v11788_v1  ;;  %v2333_v57 = vld [vmem:[%s12935_s11 + $0x1648] sm:$0xff]  ;;  %v11932_v1 = vcombine.low %v2597_v50, %v2605_v51  ;;  %v1974_v50 = vld [vmem:[%s12935_s11 + $0xb10] sm:$0xff] }
 0x29c   : > { %8087 = vmatprep.subr.bf16.mxu1 %v11773_v32  ;;  %v2581_v59 = vld [vmem:[%s12935_s11 + $0x1e08] sm:$0xff]  ;;  %v11661_v2 = vcombine.high %v2325_v56, %v2333_v57  ;;  %v1982_v51 = vld [vmem:[%s12935_s11 + $0xb50] sm:$0xff] }
 0x29d   : > { %8047 = vmatpush1.bf16.msra.mxu0 %v11516_v10  ;;  %v2589_v60 = vld [vmem:[%s12935_s11 + $0x1e48] sm:$0xff]  ;;  %v11660_v10 = vcombine.low %v2325_v56, %v2333_v57  ;;  %v1702_v56 = vld [vmem:[%s12935_s11 + $0x290] sm:$0xff] }
 0x29e   : > { %8048 = vmatprep.subr.bf16.mxu0 %v11501_v16  ;;  %v11917_v32 = vcombine.high %v2581_v59, %v2589_v60  ;;  %v2309_v3 = vld [vmem:[%s12935_s11 + $0x1588] sm:$0xff]  ;;  %v1710_v57 = vld [vmem:[%s12935_s11 + $0x2d0] sm:$0xff] }
 0x29f   : > { %8088 = vmatpush1.bf16.msra.mxu1 %v11772_v15  ;;  %v2317_v4 = vld [vmem:[%s12935_s11 + $0x15c8] sm:$0xff]  ;;  %v11916_v15 = vcombine.low %v2581_v59, %v2589_v60  ;;  %v1958_v60 = vld [vmem:[%s12935_s11 + $0xa90] sm:$0xff] }
 0x2a0   : > { %8089 = vmatprep.subr.bf16.mxu1 %v11757_v17  ;;  %v2565_v33 = vld [vmem:[%s12935_s11 + $0x1d88] sm:$0xff]  ;;  %v11645_v16 = vcombine.high %v2309_v3, %v2317_v4 }
 0x2a1   : > { %8049 = vmatpush1.bf16.msra.mxu0 %v11500_v9  ;;  %v2573_v6 = vld [vmem:[%s12935_s11 + $0x1dc8] sm:$0xff]  ;;  %v11644_v9 = vcombine.low %v2309_v3, %v2317_v4  ;;  %v11310_v4 = vcombine.low %v1974_v50, %v1982_v51 }
 0x2a2   : > { %8050 = vmatprep.subr.bf16.mxu0 %v11485_v13  ;;  %v11901_v17 = vcombine.high %v2565_v33, %v2573_v6  ;;  %v2293_v18 = vld [vmem:[%s12935_s11 + $0x1508] sm:$0xff] }
 0x2a3   : > { %8090 = vmatpush1.bf16.msra.mxu1 %v11756_v11  ;;  %v2301_v19 = vld [vmem:[%s12935_s11 + $0x1548] sm:$0xff]  ;;  %v11900_v11 = vcombine.low %v2565_v33, %v2573_v6  ;;  %v11039_v33 = vcombine.high %v1702_v56, %v1710_v57 }
 0x2a4   : > { %8091 = vmatprep.subr.bf16.mxu1 %v11741_v14  ;;  %v2549_v21 = vld [vmem:[%s12935_s11 + $0x1d08] sm:$0xff]  ;;  %v11629_v13 = vcombine.high %v2293_v18, %v2301_v19 }
 0x2a5   : > { %8051 = vmatpush1.bf16.msra.mxu0 %v11484_v0  ;;  %v2557_v12 = vld [vmem:[%s12935_s11 + $0x1d48] sm:$0xff]  ;;  %v11628_v0 = vcombine.low %v2293_v18, %v2301_v19  ;;  %v1942_v19 = vld [vmem:[%s12935_s11 + $0xa10] sm:$0xff] }
 0x2a6   : > { %8052 = vmatprep.subr.bf16.mxu0 %v11469_v27  ;;  %v11885_v14 = vcombine.high %v2549_v21, %v2557_v12  ;;  %v2277_v23 = vld [vmem:[%s12935_s11 + $0x1488] sm:$0xff] }
 0x2a7   : > { %8092 = vmatpush1.bf16.msra.mxu1 %v11740_v26  ;;  %v2285_v61 = vld [vmem:[%s12935_s11 + $0x14c8] sm:$0xff]  ;;  %v11884_v26 = vcombine.low %v2549_v21, %v2557_v12  ;;  %v1950_v21 = vld [vmem:[%s12935_s11 + $0xa50] sm:$0xff] }
 0x2a8   : > { %8093 = vmatprep.subr.bf16.mxu1 %v11725_v28  ;;  %v2533_v24 = vld [vmem:[%s12935_s11 + $0x1c88] sm:$0xff]  ;;  %v11613_v27 = vcombine.high %v2277_v23, %v2285_v61 }
 0x2a9   : > { %8053 = vmatpush1.bf16.msra.mxu0 %v11468_v35  ;;  %v2541_v25 = vld [vmem:[%s12935_s11 + $0x1cc8] sm:$0xff]  ;;  %v11612_v35 = vcombine.low %v2277_v23, %v2285_v61  ;;  %v11279_v61 = vcombine.high %v1942_v19, %v1950_v21 }
 0x2aa   : > { %8054 = vmatprep.subr.bf16.mxu0 %v11709_v43  ;;  %v11869_v28 = vcombine.high %v2533_v24, %v2541_v25  ;;  %v2261_v29 = vld [vmem:[%s12935_s11 + $0x1408] sm:$0xff] }
 0x2ab   : > { %8094 = vmatpush1.bf16.msra.mxu1 %v11724_v40  ;;  %v2269_v30 = vld [vmem:[%s12935_s11 + $0x1448] sm:$0xff]  ;;  %v11868_v40 = vcombine.low %v2533_v24, %v2541_v25  ;;  %v1670_v24 = vld [vmem:[%s12935_s11 + $0x190] sm:$0xff] }
 0x2ac   : > { %8095 = vmatprep.subr.bf16.mxu1 %v11965_v8  ;;  %v2517_v31 = vld [vmem:[%s12935_s11 + $0x1c08] sm:$0xff]  ;;  %v11597_v43 = vcombine.high %v2261_v29, %v2269_v30  ;;  %v1678_v25 = vld [vmem:[%s12935_s11 + $0x1d0] sm:$0xff] }
 0x2ad   : > { %8055 = vmatpush2.bf16.msra.mxu0 %v11708_v44  ;;  %v2525_v34 = vld [vmem:[%s12935_s11 + $0x1c48] sm:$0xff]  ;;  %v11596_v44 = vcombine.low %v2261_v29, %v2269_v30  ;;  %v11007_v29 = vcombine.high %v1670_v24, %v1678_v25 }
 0x2ae   : > { %8056 = vmatprep.subr.bf16.mxu0 %v11693_v46  ;;  %v11853_v8 = vcombine.high %v2517_v31, %v2525_v34  ;;  %v11071_v46 = vcombine.high %v1734_v36, %v1742_v37 }
 0x2af   : > { %8096 = vmatpush2.bf16.msra.mxu1 %v11964_v45  ;;  %v11852_v45 = vcombine.low %v2517_v31, %v2525_v34  ;;  %v1654_v31 = vld [vmem:[%s12935_s11 + $0x110] sm:$0xff] }
 0x2b0   : > { %8097 = vmatprep.subr.bf16.mxu1 %v11949_v47  ;;  %v11327_v47 = vcombine.high %v1990_v38, %v1998_v39  ;;  %v1662_v34 = vld [vmem:[%s12935_s11 + $0x150] sm:$0xff] }
 0x2b1   : > { %8057 = vmatpush2.bf16.msra.mxu0 %v11692_v52  ;;  %v11070_v52 = vcombine.low %v1734_v36, %v1742_v37  ;;  %v10991_v36 = vcombine.high %v1654_v31, %v1662_v34 }
 0x2b2   : > { %8058 = vmatprep.subr.bf16.mxu0 %v11677_v54  ;;  %v11055_v54 = vcombine.high %v1718_v48, %v1726_v49 }
 0x2b3   : > { %8098 = vmatpush2.bf16.msra.mxu1 %v11948_v53  ;;  %v11326_v53 = vcombine.low %v1990_v38, %v1998_v39  ;;  %v1638_v38 = vld [vmem:[%s12935_s11 + $0x90] sm:$0xff] }
 0x2b4   : > { %8099 = vmatprep.subr.bf16.mxu1 %v11933_v55  ;;  %v11311_v55 = vcombine.high %v1974_v50, %v1982_v51  ;;  %v1646_v39 = vld [vmem:[%s12935_s11 + $0xd0] sm:$0xff] }
 0x2b5   : > { %8059 = vmatpush2.bf16.msra.mxu0 %v11676_v63  ;;  %v1966_v63 = vld [vmem:[%s12935_s11 + $0xad0] sm:$0xff] }
 0x2b6   : > { %8060 = vmatprep.subr.bf16.mxu0 %v11661_v2  ;;  %v11054_v2 = vcombine.low %v1718_v48, %v1726_v49  ;;  %v10975_v48 = vcombine.high %v1638_v38, %v1646_v39  ;;  %v1622_v50 = vld [vmem:[%s12935_s11 + $0x10] sm:$0xff] }
 0x2b7   : > { %8100 = vmatpush2.bf16.msra.mxu1 %v11932_v1  ;;  %v1630_v51 = vld [vmem:[%s12935_s11 + $0x50] sm:$0xff] }
 0x2b8   : > { %8101 = vmatprep.subr.bf16.mxu1 %v11917_v32 }
 0x2b9   : > { %8061 = vmatpush2.bf16.msra.mxu0 %v11660_v10  ;;  %v11295_v10 = vcombine.high %v1958_v60, %v1966_v63 }
 0x2ba   : > { %8062 = vmatprep.subr.bf16.mxu0 %v11645_v16  ;;  %v1694_v16 = vld [vmem:[%s12935_s11 + $0x250] sm:$0xff] }
 0x2bb   : > { %8102 = vmatpush2.bf16.msra.mxu1 %v11916_v15  ;;  %v1686_v15 = vld [vmem:[%s12935_s11 + $0x210] sm:$0xff] }
 0x2bc   : > { %8103 = vmatprep.subr.bf16.mxu1 %v11901_v17 }
 0x2bd   : > { %8063 = vmatpush2.bf16.msra.mxu0 %v11644_v9  ;;  %v11038_v9 = vcombine.low %v1702_v56, %v1710_v57  ;;  %v10959_v56 = vcombine.high %v1622_v50, %v1630_v51 }
 0x2be   : > { %8064 = vmatprep.subr.bf16.mxu0 %v11629_v13  ;;  %v11294_v13 = vcombine.low %v1958_v60, %v1966_v63  ;;  %v1870_v60 = vld [vmem:[%s12935_s11 + $0x7d0] sm:$0xff] }
 0x2bf   : > { %8104 = vmatpush2.bf16.msra.mxu1 %v11900_v11  ;;  %v2118_v63 = vld [vmem:[%s12935_s11 + $0xf90] sm:$0xff] }
 0x2c0   : > { %8105 = vmatprep.subr.bf16.mxu1 %v11885_v14  ;;  %v11023_v14 = vcombine.high %v1686_v15, %v1694_v16 }
 0x2c1   : > { %8065 = vmatpush2.bf16.msra.mxu0 %v11628_v0  ;;  %v1926_v0 = vld [vmem:[%s12935_s11 + $0x990] sm:$0xff] }
 0x2c2   : > { %8066 = vmatprep.subr.bf16.mxu0 %v11613_v27  ;;  %v11022_v27 = vcombine.low %v1686_v15, %v1694_v16  ;;  %v2102_v15 = vld [vmem:[%s12935_s11 + $0xf10] sm:$0xff] }
 0x2c3   : > { %8106 = vmatpush2.bf16.msra.mxu1 %v11884_v26  ;;  %v1934_v26 = vld [vmem:[%s12935_s11 + $0x9d0] sm:$0xff] }
 0x2c4   : > { %8107 = vmatprep.subr.bf16.mxu1 %v11869_v28  ;;  %v11278_v28 = vcombine.low %v1942_v19, %v1950_v21  ;;  %v11263_v30 = vcombine.high %v1926_v0, %v1934_v26  ;;  %v2110_v16 = vld [vmem:[%s12935_s11 + $0xf50] sm:$0xff] }
 0x2c5   : > { %8067 = vmatpush2.bf16.msra.mxu0 %v11612_v35  ;;  %v1910_v35 = vld [vmem:[%s12935_s11 + $0x910] sm:$0xff] }
 0x2c6   : > { %8068 = vmatprep.subr.bf16.mxu0 %v11597_v43  ;;  %v11006_v43 = vcombine.low %v1670_v24, %v1678_v25 }
 0x2c7   : > { %8108 = vmatpush2.bf16.msra.mxu1 %v11868_v40  ;;  %v1918_v40 = vld [vmem:[%s12935_s11 + $0x950] sm:$0xff] }
 0x2c8   : > { %8109 = vmatprep.subr.bf16.mxu1 %v11853_v8  ;;  %v11262_v8 = vcombine.low %v1926_v0, %v1934_v26  ;;  %v11247_v37 = vcombine.high %v1910_v35, %v1918_v40  ;;  %v1814_v0 = vld [vmem:[%s12935_s11 + $0x610] sm:$0xff] }
 0x2c9   : > { %8069 = vmatpush2.bf16.msra.mxu0 %v11596_v44  ;;  %v1894_v44 = vld [vmem:[%s12935_s11 + $0x890] sm:$0xff] }
 0x2ca   : > { %8120 = vmatprep.subr.bf16.mxu0 %v11071_v46  ;;  %v10990_v46 = vcombine.low %v1654_v31, %v1662_v34  ;;  %v1822_v26 = vld [vmem:[%s12935_s11 + $0x650] sm:$0xff] }
 0x2cb   : > { %8110 = vmatpush2.bf16.msra.mxu1 %v11852_v45  ;;  %v7826_v59 = vpop.f32.mrf.mxu0  ;;  %v1902_v45 = vld [vmem:[%s12935_s11 + $0x8d0] sm:$0xff]  ;;  %v11151_v31 = vcombine.high %v1814_v0, %v1822_v26 }
 0x2cc   : > { %8161 = vmatprep.subr.bf16.mxu1 %v11327_v47  ;;  %8071 = vmatmul.mubr.bf16.vlgmr.msra.gmra.mxu0 %v13166_v20  ;;  %v11246_v47 = vcombine.low %v1910_v35, %v1918_v40  ;;  %v11231_v49 = vcombine.high %v1894_v44, %v1902_v45  ;;  %v1798_v35 = vld [vmem:[%s12935_s11 + $0x590] sm:$0xff] }
 0x2cd   : > { %v7867_v1 = vpop.f32.mrf.mxu1  ;;  %8121 = vmatpush1.bf16.msra.mxu0 %v11070_v52  ;;  %v7828_v3 = vpop.f32.mrf.mxu0  ;;  %8152 = vmatprep.mubr.bf16.mxu0 %v13026_v41  ;;  %v1878_v52 = vld [vmem:[%s12935_s11 + $0x810] sm:$0xff] }
 0x2ce   : > { %8112 = vmatmul.mubr.bf16.vlgmr.msra.gmra.mxu1 %v13172_v22  ;;  %v13316_v32 = vadd.f32 %v7867_v1, %v7826_v59  ;;  %8122 = vmatprep.subr.bf16.mxu0 %v11055_v54  ;;  %v10974_v54 = vcombine.low %v1638_v38, %v1646_v39  ;;  %v1862_v59 = vld [vmem:[%s12935_s11 + $0x790] sm:$0xff] }
 0x2cf   : > { %8162 = vmatpush1.bf16.msra.mxu1 %v11326_v53  ;;  %v7869_v6 = vpop.f32.mrf.mxu1  ;;  %v7830_v18 = vpop.f32.mrf.mxu0  ;;  %8193 = vmatprep.mubr.bf16.mxu1 %v13030_v42  ;;  %v1886_v53 = vld [vmem:[%s12935_s11 + $0x850] sm:$0xff] }
 0x2d0   : > { %8163 = vmatprep.subr.bf16.mxu1 %v11311_v55  ;;  %v13321_v17 = vadd.f32 %v7869_v6, %v7828_v3  ;;  %v11230_v55 = vcombine.low %v1894_v44, %v1902_v45  ;;  %v11215_v57 = vcombine.high %v1878_v52, %v1886_v53  ;;  %v2126_v1 = vld [vmem:[%s12935_s11 + $0xfd0] sm:$0xff]  ;;  %v11214_v3 = vcombine.low %v1878_v52, %v1886_v53 }
 0x2d1   : > { %v7871_v12 = vpop.f32.mrf.mxu1  ;;  %8123 = vmatpush1.bf16.msra.mxu0 %v11054_v2  ;;  %v7831_v11 = vpop.f32.mrf.mxu0  ;;  %v10958_v2 = vcombine.low %v1622_v50, %v1630_v51  ;;  %v1846_v6 = vld [vmem:[%s12935_s11 + $0x710] sm:$0xff]  ;;  %v11198_v18 = vcombine.low %v1862_v59, %v1870_v60  ;;  %v11454_v19 = vcombine.low %v2118_v63, %v2126_v1 }
 0x2d2   : > { %8124 = vmatprep.subr.bf16.mxu0 %v11039_v33  ;;  %v11455_v33 = vcombine.high %v2118_v63, %v2126_v1  ;;  %v11439_v12 = vcombine.high %v2102_v15, %v2110_v16  ;;  %v1838_v11 = vld [vmem:[%s12935_s11 + $0x6d0] sm:$0xff] }
 0x2d3   : > { %8164 = vmatpush1.bf16.msra.mxu1 %v11310_v4  ;;  %v7872_v23 = vpop.f32.mrf.mxu1  ;;  %v11199_v4 = vcombine.high %v1862_v59, %v1870_v60  ;;  %v1806_v40 = vld [vmem:[%s12935_s11 + $0x5d0] sm:$0xff] }
 0x2d4   : > { %8165 = vmatprep.subr.bf16.mxu1 %v11295_v10  ;;  %v1854_v10 = vld [vmem:[%s12935_s11 + $0x750] sm:$0xff]  ;;  %v11135_v38 = vcombine.high %v1798_v35, %v1806_v40 }
 0x2d5   : > { %8125 = vmatpush1.bf16.msra.mxu0 %v11038_v9  ;;  %v11183_v21 = vcombine.high %v1846_v6, %v1854_v10  ;;  %v1830_v9 = vld [vmem:[%s12935_s11 + $0x690] sm:$0xff]  ;;  %v11182_v23 = vcombine.low %v1846_v6, %v1854_v10 }
 0x2d6   : > { %8126 = vmatprep.subr.bf16.mxu0 %v11023_v14  ;;  %v2094_v14 = vld [vmem:[%s12935_s11 + $0xed0] sm:$0xff]  ;;  %v11167_v24 = vcombine.high %v1830_v9, %v1838_v11 }
 0x2d7   : > { %8166 = vmatpush1.bf16.msra.mxu1 %v11294_v13  ;;  %v2086_v13 = vld [vmem:[%s12935_s11 + $0xe90] sm:$0xff] }
 0x2d8   : > { %8167 = vmatprep.subr.bf16.mxu1 %v11279_v61  ;;  %v11438_v61 = vcombine.low %v2102_v15, %v2110_v16  ;;  %v11423_v25 = vcombine.high %v2086_v13, %v2094_v14  ;;  %v1782_v44 = vld [vmem:[%s12935_s11 + $0x510] sm:$0xff] }
 0x2d9   : > { %8127 = vmatpush1.bf16.msra.mxu0 %v11022_v27  ;;  %v2070_v27 = vld [vmem:[%s12935_s11 + $0xe10] sm:$0xff] }
 0x2da   : > { %8128 = vmatprep.subr.bf16.mxu0 %v11007_v29  ;;  %v11166_v29 = vcombine.low %v1830_v9, %v1838_v11  ;;  %v1790_v45 = vld [vmem:[%s12935_s11 + $0x550] sm:$0xff] }
 0x2db   : > { %8168 = vmatpush1.bf16.msra.mxu1 %v11278_v28  ;;  %v2078_v28 = vld [vmem:[%s12935_s11 + $0xe50] sm:$0xff]  ;;  %v11119_v50 = vcombine.high %v1782_v44, %v1790_v45 }
 0x2dc   : > { %8169 = vmatprep.subr.bf16.mxu1 %v11263_v30  ;;  %v11422_v30 = vcombine.low %v2086_v13, %v2094_v14  ;;  %v11407_v34 = vcombine.high %v2070_v27, %v2078_v28  ;;  %v1766_v52 = vld [vmem:[%s12935_s11 + $0x490] sm:$0xff] }
 0x2dd   : > { %8129 = vmatpush1.bf16.msra.mxu0 %v11006_v43  ;;  %v2054_v43 = vld [vmem:[%s12935_s11 + $0xd90] sm:$0xff] }
 0x2de   : > { %8130 = vmatprep.subr.bf16.mxu0 %v10991_v36  ;;  %v11150_v36 = vcombine.low %v1814_v0, %v1822_v26  ;;  %v1774_v53 = vld [vmem:[%s12935_s11 + $0x4d0] sm:$0xff] }
 0x2df   : > { %8170 = vmatpush1.bf16.msra.mxu1 %v11262_v8  ;;  %v2062_v8 = vld [vmem:[%s12935_s11 + $0xdd0] sm:$0xff]  ;;  %v11103_v59 = vcombine.high %v1766_v52, %v1774_v53 }
 0x2e0   : > { %8171 = vmatprep.subr.bf16.mxu1 %v11247_v37  ;;  %v11406_v37 = vcombine.low %v2070_v27, %v2078_v28  ;;  %v11391_v39 = vcombine.high %v2054_v43, %v2062_v8  ;;  %v1750_v63 = vld [vmem:[%s12935_s11 + $0x410] sm:$0xff] }
 0x2e1   : > { %8131 = vmatpush1.bf16.msra.mxu0 %v10990_v46  ;;  %v2038_v46 = vld [vmem:[%s12935_s11 + $0xd10] sm:$0xff] }
 0x2e2   : > { %8132 = vmatprep.subr.bf16.mxu0 %v10975_v48  ;;  %v11134_v48 = vcombine.low %v1798_v35, %v1806_v40  ;;  %v1758_v1 = vld [vmem:[%s12935_s11 + $0x450] sm:$0xff] }
 0x2e3   : > { %8172 = vmatpush1.bf16.msra.mxu1 %v11246_v47  ;;  %v2046_v47 = vld [vmem:[%s12935_s11 + $0xd50] sm:$0xff]  ;;  %v11087_v6 = vcombine.high %v1750_v63, %v1758_v1 }
 0x2e4   : > { %8173 = vmatprep.subr.bf16.mxu1 %v11231_v49  ;;  %v11390_v49 = vcombine.low %v2054_v43, %v2062_v8  ;;  %v11375_v51 = vcombine.high %v2038_v46, %v2046_v47  ;;  %v2246_v15 = vld [vmem:[%s12935_s11 + $0x1390] sm:$0xff] }
 0x2e5   : > { %8133 = vmatpush1.bf16.msra.mxu0 %v10974_v54  ;;  %v2022_v54 = vld [vmem:[%s12935_s11 + $0xc90] sm:$0xff] }
 0x2e6   : > { %8134 = vmatprep.subr.bf16.mxu0 %v10959_v56  ;;  %v11118_v56 = vcombine.low %v1782_v44, %v1790_v45  ;;  %v2254_v16 = vld [vmem:[%s12935_s11 + $0x13d0] sm:$0xff] }
 0x2e7   : > { %8174 = vmatpush1.bf16.msra.mxu1 %v11230_v55  ;;  %v2030_v55 = vld [vmem:[%s12935_s11 + $0xcd0] sm:$0xff]  ;;  %v11583_v9 = vcombine.high %v2246_v15, %v2254_v16 }
 0x2e8   : > { %8175 = vmatprep.subr.bf16.mxu1 %v11215_v57  ;;  %v11374_v57 = vcombine.low %v2038_v46, %v2046_v47  ;;  %v11359_v60 = vcombine.high %v2022_v54, %v2030_v55  ;;  %v2230_v13 = vld [vmem:[%s12935_s11 + $0x1310] sm:$0xff] }
 0x2e9   : > { %8135 = vmatpush1.bf16.msra.mxu0 %v10958_v2  ;;  %v2006_v2 = vld [vmem:[%s12935_s11 + $0xc10] sm:$0xff] }
 0x2ea   : > { %8136 = vmatprep.subr.bf16.mxu0 %v11199_v4  ;;  %v11102_v4 = vcombine.low %v1766_v52, %v1774_v53  ;;  %v2238_v14 = vld [vmem:[%s12935_s11 + $0x1350] sm:$0xff] }
 0x2eb   : > { %8176 = vmatpush1.bf16.msra.mxu1 %v11214_v3  ;;  %v2014_v3 = vld [vmem:[%s12935_s11 + $0xc50] sm:$0xff]  ;;  %v11567_v0 = vcombine.high %v2230_v13, %v2238_v14  ;;  %v11566_v40 = vcombine.low %v2230_v13, %v2238_v14 }
 0x2ec   : > { %8177 = vmatprep.subr.bf16.mxu1 %v11455_v33  ;;  %v11358_v33 = vcombine.low %v2022_v54, %v2030_v55  ;;  %v11343_v10 = vcombine.high %v2006_v2, %v2014_v3  ;;  %v2214_v27 = vld [vmem:[%s12935_s11 + $0x1290] sm:$0xff] }
 0x2ed   : > { %8137 = vmatpush2.bf16.msra.mxu0 %v11198_v18  ;;  %v2502_v18 = vld [vmem:[%s12935_s11 + $0x1b90] sm:$0xff] }
 0x2ee   : > { %8138 = vmatprep.subr.bf16.mxu0 %v11183_v21  ;;  %v11086_v21 = vcombine.low %v1750_v63, %v1758_v1  ;;  %v2222_v28 = vld [vmem:[%s12935_s11 + $0x12d0] sm:$0xff] }
 0x2ef   : > { %8178 = vmatpush2.bf16.msra.mxu1 %v11454_v19  ;;  %v2510_v19 = vld [vmem:[%s12935_s11 + $0x1bd0] sm:$0xff] }
 0x2f0   : > { %8179 = vmatprep.subr.bf16.mxu1 %v11439_v12  ;;  %v11342_v12 = vcombine.low %v2006_v2, %v2014_v3  ;;  %v11839_v11 = vcombine.high %v2502_v18, %v2510_v19  ;;  %v2198_v44 = vld [vmem:[%s12935_s11 + $0x1210] sm:$0xff] }
 0x2f1   : > { %8139 = vmatpush2.bf16.msra.mxu0 %v11182_v23  ;;  %v2486_v23 = vld [vmem:[%s12935_s11 + $0x1b10] sm:$0xff] }
 0x2f2   : > { %8140 = vmatprep.subr.bf16.mxu0 %v11167_v24  ;;  %v11582_v24 = vcombine.low %v2246_v15, %v2254_v16  ;;  %v2206_v45 = vld [vmem:[%s12935_s11 + $0x1250] sm:$0xff] }
 0x2f3   : > { %8180 = vmatpush2.bf16.msra.mxu1 %v11438_v61  ;;  %v2494_v61 = vld [vmem:[%s12935_s11 + $0x1b50] sm:$0xff]  ;;  %v11535_v53 = vcombine.high %v2198_v44, %v2206_v45  ;;  %v11534_v63 = vcombine.low %v2198_v44, %v2206_v45 }
 0x2f4   : > { %8181 = vmatprep.subr.bf16.mxu1 %v11423_v25  ;;  %v11838_v25 = vcombine.low %v2502_v18, %v2510_v19  ;;  %v11823_v26 = vcombine.high %v2486_v23, %v2494_v61  ;;  %v11822_v8 = vcombine.low %v2486_v23, %v2494_v61  ;;  %v2454_v47 = vld [vmem:[%s12935_s11 + $0x1a10] sm:$0xff] }
 0x2f5   : > { %8141 = vmatpush2.bf16.msra.mxu0 %v11166_v29  ;;  %v2614_v44 = vld [vmem:[%s12935_s11 + $0x1f10] sm:$0xff] }
 0x2f6   : > { %8142 = vmatprep.subr.bf16.mxu0 %v11151_v31  ;;  %v2478_v31 = vld [vmem:[%s12935_s11 + $0x1ad0] sm:$0xff] }
 0x2f7   : > { %8182 = vmatpush2.bf16.msra.mxu1 %v11422_v30  ;;  %v2470_v30 = vld [vmem:[%s12935_s11 + $0x1a90] sm:$0xff] }
 0x2f8   : > { %8183 = vmatprep.subr.bf16.mxu1 %v11407_v34  ;;  %v11806_v52 = vcombine.low %v2470_v30, %v2478_v31  ;;  %v2622_v45 = vld [vmem:[%s12935_s11 + $0x1f50] sm:$0xff] }
 0x2f9   : > { %8143 = vmatpush2.bf16.msra.mxu0 %v11150_v36  ;;  %v11551_v36 = vcombine.high %v2214_v27, %v2222_v28 }
 0x2fa   : > { %8144 = vmatprep.subr.bf16.mxu0 %v11135_v38 }
 0x2fb   : > { %8184 = vmatpush2.bf16.msra.mxu1 %v11406_v37 }
 0x2fc   : > { %8185 = vmatprep.subr.bf16.mxu1 %v11391_v39 }
 0x2fd   : > { %8145 = vmatpush2.bf16.msra.mxu0 %v11134_v48  ;;  %v2462_v48 = vld [vmem:[%s12935_s11 + $0x1a50] sm:$0xff] }
 0x2fe   : > { %8146 = vmatprep.subr.bf16.mxu0 %v11119_v50  ;;  %v11791_v55 = vcombine.high %v2454_v47, %v2462_v48  ;;  %v11790_v1 = vcombine.low %v2454_v47, %v2462_v48 }
 0x2ff   : > { %8186 = vmatpush2.bf16.msra.mxu1 %v11390_v49 }
 0x300   : > { %8187 = vmatprep.subr.bf16.mxu1 %v11375_v51 }
 0x301   : > { %8147 = vmatpush2.bf16.msra.mxu0 %v11118_v56  ;;  %v2182_v56 = vld [vmem:[%s12935_s11 + $0x1190] sm:$0xff] }
 0x302   : > { %8148 = vmatprep.subr.bf16.mxu0 %v11103_v59  ;;  %v2438_v59 = vld [vmem:[%s12935_s11 + $0x1990] sm:$0xff] }
 0x303   : > { %8188 = vmatpush2.bf16.msra.mxu1 %v11374_v57  ;;  %v2190_v57 = vld [vmem:[%s12935_s11 + $0x11d0] sm:$0xff] }
 0x304   : > { %8189 = vmatprep.subr.bf16.mxu1 %v11359_v60  ;;  %v2446_v60 = vld [vmem:[%s12935_s11 + $0x19d0] sm:$0xff]  ;;  %v11519_v2 = vcombine.high %v2182_v56, %v2190_v57  ;;  %v11518_v15 = vcombine.low %v2182_v56, %v2190_v57 }
 0x305   : > { %8149 = vmatpush2.bf16.msra.mxu0 %v11102_v4  ;;  %v11775_v3 = vcombine.high %v2438_v59, %v2446_v60  ;;  %v2166_v4 = vld [vmem:[%s12935_s11 + $0x1110] sm:$0xff]  ;;  %v11774_v16 = vcombine.low %v2438_v59, %v2446_v60 }
 0x306   : > { %8150 = vmatprep.subr.bf16.mxu0 %v11087_v6  ;;  %v2422_v6 = vld [vmem:[%s12935_s11 + $0x1910] sm:$0xff] }
 0x307   : > { %8190 = vmatpush2.bf16.msra.mxu1 %v11358_v33  ;;  %v2174_v33 = vld [vmem:[%s12935_s11 + $0x1150] sm:$0xff] }
 0x308   : > { %8191 = vmatprep.subr.bf16.mxu1 %v11343_v10  ;;  %v2430_v10 = vld [vmem:[%s12935_s11 + $0x1950] sm:$0xff]  ;;  %v11503_v18 = vcombine.high %v2166_v4, %v2174_v33  ;;  %v11502_v13 = vcombine.low %v2166_v4, %v2174_v33 }
 0x309   : > { %8151 = vmatpush2.bf16.msra.mxu0 %v11086_v21  ;;  %v11759_v19 = vcombine.high %v2422_v6, %v2430_v10  ;;  %v2150_v21 = vld [vmem:[%s12935_s11 + $0x1090] sm:$0xff]  ;;  %v11758_v14 = vcombine.low %v2422_v6, %v2430_v10 }
 0x30a   : > { %8202 = vmatprep.subr.bf16.mxu0 %v11583_v9  ;;  %v2406_v9 = vld [vmem:[%s12935_s11 + $0x1890] sm:$0xff] }
 0x30b   : > { %8192 = vmatpush2.bf16.msra.mxu1 %v11342_v12  ;;  %v2158_v12 = vld [vmem:[%s12935_s11 + $0x10d0] sm:$0xff] }
 0x30c   : > { %8243 = vmatprep.subr.bf16.mxu1 %v11839_v11  ;;  %v7908_v29 = vpop.f32.mrf.mxu0  ;;  %8153 = vmatmul.mubr.bf16.vlgmr.msra.gmra.mxu0 %v13076_v58  ;;  %v2414_v11 = vld [vmem:[%s12935_s11 + $0x18d0] sm:$0xff]  ;;  %v11487_v23 = vcombine.high %v2150_v21, %v2158_v12 }
 0x30d   : > { %v7909_v34 = vadd.f32 %v7908_v29, %v13316_v32  ;;  %8203 = vmatpush1.bf16.msra.mxu0 %v11582_v24  ;;  %v11807_v32 = vcombine.high %v2470_v30, %v2478_v31  ;;  %8234 = vmatprep.mubr.bf16.mxu0 %v13094_v5  ;;  %v11743_v61 = vcombine.high %v2406_v9, %v2414_v11  ;;  %v2134_v24 = vld [vmem:[%s12935_s11 + $0x1010] sm:$0xff] }
 0x30e   : > { %v7949_v35 = vpop.f32.mrf.mxu1  ;;  %8194 = vmatmul.mubr.bf16.vlgmr.msra.gmra.mxu1 %v13085_v62  ;;  %v7910_v43 = vpop.f32.mrf.mxu0  ;;  %8204 = vmatprep.subr.bf16.mxu0 %v11567_v0  ;;  %v2390_v0 = vld [vmem:[%s12935_s11 + $0x1810] sm:$0xff] }
 0x30f   : > { %8244 = vmatpush1.bf16.msra.mxu1 %v11838_v25  ;;  %v13389_v37 = vadd.f32 %v7949_v35, %v7909_v34  ;;  %v7911_v38 = vadd.f32 %v7910_v43, %v13321_v17  ;;  %8275 = vmatprep.mubr.bf16.mxu1 %v13101_v7  ;;  %v11550_v17 = vcombine.low %v2214_v27, %v2222_v28  ;;  %v2142_v25 = vld [vmem:[%s12935_s11 + $0x1050] sm:$0xff] }
 0x310   : > { %v7951_v39 = vpop.f32.mrf.mxu1  ;;  %8245 = vmatprep.subr.bf16.mxu1 %v11823_v26  ;;  %v7912_v46 = vpop.f32.mrf.mxu0  ;;  %v2398_v26 = vld [vmem:[%s12935_s11 + $0x1850] sm:$0xff]  ;;  %v11486_v27 = vcombine.low %v2150_v21, %v2158_v12  ;;  %v11742_v28 = vcombine.low %v2406_v9, %v2414_v11  ;;  %v11471_v29 = vcombine.high %v2134_v24, %v2142_v25  ;;  %v11470_v43 = vcombine.low %v2134_v24, %v2142_v25 }
 0x311   : > { %v13398_v49 = vadd.f32 %v7951_v39, %v7911_v38  ;;  %8205 = vmatpush1.bf16.msra.mxu0 %v11566_v40  ;;  %v11727_v30 = vcombine.high %v2390_v0, %v2398_v26  ;;  %v2374_v31 = vld [vmem:[%s12935_s11 + $0x1790] sm:$0xff] }
 0x312   : > { %v7953_v50 = vpop.f32.mrf.mxu1  ;;  %v7913_v51 = vpop.f32.mrf.mxu0  ;;  %8206 = vmatprep.subr.bf16.mxu0 %v11551_v36  ;;  %v2382_v34 = vld [vmem:[%s12935_s11 + $0x17d0] sm:$0xff] }
 0x313   : > { %8246 = vmatpush1.bf16.msra.mxu1 %v11822_v8  ;;  %v2630_v35 = vld [vmem:[%s12935_s11 + $0x1f90] sm:$0xff]  ;;  %v11726_v8 = vcombine.low %v2390_v0, %v2398_v26  ;;  %v11711_v36 = vcombine.high %v2374_v31, %v2382_v34  ;;  %v11710_v46 = vcombine.low %v2374_v31, %v2382_v34  ;;  %v11951_v50 = vcombine.high %v2614_v44, %v2622_v45 }
 0x314   : > { %v7954_v54 = vpop.f32.mrf.mxu1  ;;  %8247 = vmatprep.subr.bf16.mxu1 %v11807_v32  ;;  %v2638_v40 = vld [vmem:[%s12935_s11 + $0x1fd0] sm:$0xff] }
 0x315   : > { %8207 = vmatpush1.bf16.msra.mxu0 %v11550_v17  ;;  %v11967_v38 = vcombine.high %v2630_v35, %v2638_v40  ;;  %v2358_v39 = vld [vmem:[%s12935_s11 + $0x1710] sm:$0xff]  ;;  %v11966_v47 = vcombine.low %v2630_v35, %v2638_v40 }
 0x316   : > { %8208 = vmatprep.subr.bf16.mxu0 %v11535_v53  ;;  %v2366_v32 = vld [vmem:[%s12935_s11 + $0x1750] sm:$0xff] }
 0x317   : > { %8248 = vmatpush1.bf16.msra.mxu1 %v11806_v52  ;;  %v11695_v48 = vcombine.high %v2358_v39, %v2366_v32  ;;  %v2342_v17 = vld [vmem:[%s12935_s11 + $0x1690] sm:$0xff]  ;;  %v11694_v54 = vcombine.low %v2358_v39, %v2366_v32 }
 0x318   : > { %8249 = vmatprep.subr.bf16.mxu1 %v11791_v55  ;;  %v2350_v51 = vld [vmem:[%s12935_s11 + $0x16d0] sm:$0xff]  ;;  %v11950_v55 = vcombine.low %v2614_v44, %v2622_v45  ;;  %v1735_v44 = vld [vmem:[%s12935_s11 + $0x398] sm:$0xff] }
 0x319   : > { %8209 = vmatpush1.bf16.msra.mxu0 %v11534_v63  ;;  %v2598_v52 = vld [vmem:[%s12935_s11 + $0x1e90] sm:$0xff]  ;;  %v11679_v56 = vcombine.high %v2342_v17, %v2350_v51  ;;  %v1743_v45 = vld [vmem:[%s12935_s11 + $0x3d8] sm:$0xff] }
 0x31a   : > { %8210 = vmatprep.subr.bf16.mxu0 %v11519_v2  ;;  %v2606_v53 = vld [vmem:[%s12935_s11 + $0x1ed0] sm:$0xff]  ;;  %v11678_v2 = vcombine.low %v2342_v17, %v2350_v51  ;;  %v11073_v17 = vcombine.high %v1735_v44, %v1743_v45 }
 0x31b   : > { %8250 = vmatpush1.bf16.msra.mxu1 %v11790_v1  ;;  %v11935_v57 = vcombine.high %v2598_v52, %v2606_v53  ;;  %v2326_v59 = vld [vmem:[%s12935_s11 + $0x1610] sm:$0xff] }
 0x31c   : > { %8251 = vmatprep.subr.bf16.mxu1 %v11775_v3  ;;  %v2334_v60 = vld [vmem:[%s12935_s11 + $0x1650] sm:$0xff]  ;;  %v11934_v3 = vcombine.low %v2598_v52, %v2606_v53  ;;  %v1719_v52 = vld [vmem:[%s12935_s11 + $0x318] sm:$0xff] }
 0x31d   : > { %8211 = vmatpush1.bf16.msra.mxu0 %v11518_v15  ;;  %v2582_v63 = vld [vmem:[%s12935_s11 + $0x1e10] sm:$0xff]  ;;  %v11663_v4 = vcombine.high %v2326_v59, %v2334_v60  ;;  %v1727_v53 = vld [vmem:[%s12935_s11 + $0x358] sm:$0xff] }
 0x31e   : > { %8212 = vmatprep.subr.bf16.mxu0 %v11503_v18  ;;  %v2590_v1 = vld [vmem:[%s12935_s11 + $0x1e50] sm:$0xff]  ;;  %v11662_v18 = vcombine.low %v2326_v59, %v2334_v60  ;;  %v11057_v59 = vcombine.high %v1719_v52, %v1727_v53 }
 0x31f   : > { %8252 = vmatpush1.bf16.msra.mxu1 %v11774_v16  ;;  %v11919_v33 = vcombine.high %v2582_v63, %v2590_v1  ;;  %v2310_v6 = vld [vmem:[%s12935_s11 + $0x1590] sm:$0xff] }
 0x320   : > { %8253 = vmatprep.subr.bf16.mxu1 %v11759_v19  ;;  %v2318_v10 = vld [vmem:[%s12935_s11 + $0x15d0] sm:$0xff]  ;;  %v11918_v19 = vcombine.low %v2582_v63, %v2590_v1  ;;  %v1703_v63 = vld [vmem:[%s12935_s11 + $0x298] sm:$0xff] }
 0x321   : > { %8213 = vmatpush1.bf16.msra.mxu0 %v11502_v13  ;;  %v2566_v15 = vld [vmem:[%s12935_s11 + $0x1d90] sm:$0xff]  ;;  %v11647_v21 = vcombine.high %v2310_v6, %v2318_v10  ;;  %v1711_v1 = vld [vmem:[%s12935_s11 + $0x2d8] sm:$0xff] }
 0x322   : > { %8214 = vmatprep.subr.bf16.mxu0 %v11487_v23  ;;  %v2574_v16 = vld [vmem:[%s12935_s11 + $0x1dd0] sm:$0xff]  ;;  %v11646_v23 = vcombine.low %v2310_v6, %v2318_v10  ;;  %v11056_v6 = vcombine.low %v1719_v52, %v1727_v53 }
 0x323   : > { %8254 = vmatpush1.bf16.msra.mxu1 %v11758_v14  ;;  %v11903_v12 = vcombine.high %v2566_v15, %v2574_v16  ;;  %v2294_v9 = vld [vmem:[%s12935_s11 + $0x1510] sm:$0xff] }
 0x324   : > { %8255 = vmatprep.subr.bf16.mxu1 %v11743_v61  ;;  %v2302_v11 = vld [vmem:[%s12935_s11 + $0x1550] sm:$0xff]  ;;  %v11902_v61 = vcombine.low %v2566_v15, %v2574_v16 }
 0x325   : > { %8215 = vmatpush1.bf16.msra.mxu0 %v11486_v27  ;;  %v2550_v13 = vld [vmem:[%s12935_s11 + $0x1d10] sm:$0xff]  ;;  %v11631_v24 = vcombine.high %v2294_v9, %v2302_v11 }
 0x326   : > { %8216 = vmatprep.subr.bf16.mxu0 %v11471_v29  ;;  %v2558_v14 = vld [vmem:[%s12935_s11 + $0x1d50] sm:$0xff]  ;;  %v11630_v29 = vcombine.low %v2294_v9, %v2302_v11  ;;  %v1695_v9 = vld [vmem:[%s12935_s11 + $0x258] sm:$0xff] }
 0x327   : > { %8256 = vmatpush1.bf16.msra.mxu1 %v11742_v28  ;;  %v11887_v25 = vcombine.high %v2550_v13, %v2558_v14  ;;  %v2278_v0 = vld [vmem:[%s12935_s11 + $0x1490] sm:$0xff] }
 0x328   : > { %8257 = vmatprep.subr.bf16.mxu1 %v11727_v30  ;;  %v2286_v26 = vld [vmem:[%s12935_s11 + $0x14d0] sm:$0xff]  ;;  %v11886_v30 = vcombine.low %v2550_v13, %v2558_v14  ;;  %v1943_v14 = vld [vmem:[%s12935_s11 + $0xa18] sm:$0xff] }
 0x329   : > { %8217 = vmatpush1.bf16.msra.mxu0 %v11470_v43  ;;  %v2534_v27 = vld [vmem:[%s12935_s11 + $0x1c90] sm:$0xff]  ;;  %v11615_v31 = vcombine.high %v2278_v0, %v2286_v26 }
 0x32a   : > { %8218 = vmatprep.subr.bf16.mxu0 %v11711_v36  ;;  %v2542_v28 = vld [vmem:[%s12935_s11 + $0x1cd0] sm:$0xff]  ;;  %v11614_v36 = vcombine.low %v2278_v0, %v2286_v26 }
 0x32b   : > { %8258 = vmatpush1.bf16.msra.mxu1 %v11726_v8  ;;  %v11871_v34 = vcombine.high %v2534_v27, %v2542_v28  ;;  %v2262_v35 = vld [vmem:[%s12935_s11 + $0x1410] sm:$0xff] }
 0x32c   : > { %8259 = vmatprep.subr.bf16.mxu1 %v11967_v38  ;;  %v2270_v40 = vld [vmem:[%s12935_s11 + $0x1450] sm:$0xff]  ;;  %v11870_v38 = vcombine.low %v2534_v27, %v2542_v28 }
 0x32d   : > { %8219 = vmatpush2.bf16.msra.mxu0 %v11710_v46  ;;  %v2518_v43 = vld [vmem:[%s12935_s11 + $0x1c10] sm:$0xff]  ;;  %v11599_v39 = vcombine.high %v2262_v35, %v2270_v40  ;;  %v1991_v46 = vld [vmem:[%s12935_s11 + $0xb98] sm:$0xff] }
 0x32e   : > { %8220 = vmatprep.subr.bf16.mxu0 %v11695_v48  ;;  %v2526_v8 = vld [vmem:[%s12935_s11 + $0x1c50] sm:$0xff]  ;;  %v11598_v48 = vcombine.low %v2262_v35, %v2270_v40 }
 0x32f   : > { %8260 = vmatpush2.bf16.msra.mxu1 %v11966_v47  ;;  %v11855_v32 = vcombine.high %v2518_v43, %v2526_v8  ;;  %v1999_v47 = vld [vmem:[%s12935_s11 + $0xbd8] sm:$0xff] }
 0x330   : > { %8261 = vmatprep.subr.bf16.mxu1 %v11951_v50  ;;  %v11854_v50 = vcombine.low %v2518_v43, %v2526_v8  ;;  %v11329_v51 = vcombine.high %v1991_v46, %v1999_v47 }
 0x331   : > { %8221 = vmatpush2.bf16.msra.mxu0 %v11694_v54  ;;  %v1975_v54 = vld [vmem:[%s12935_s11 + $0xb18] sm:$0xff] }
 0x332   : > { %8222 = vmatprep.subr.bf16.mxu0 %v11679_v56  ;;  %v11072_v56 = vcombine.low %v1735_v44, %v1743_v45 }
 0x333   : > { %8262 = vmatpush2.bf16.msra.mxu1 %v11950_v55  ;;  %v1983_v55 = vld [vmem:[%s12935_s11 + $0xb58] sm:$0xff] }
 0x334   : > { %8263 = vmatprep.subr.bf16.mxu1 %v11935_v57  ;;  %v11328_v57 = vcombine.low %v1991_v46, %v1999_v47  ;;  %v11313_v60 = vcombine.high %v1975_v54, %v1983_v55  ;;  %v11312_v16 = vcombine.low %v1975_v54, %v1983_v55 }
 0x335   : > { %8223 = vmatpush2.bf16.msra.mxu0 %v11678_v2 }
 0x336   : > { %8224 = vmatprep.subr.bf16.mxu0 %v11663_v4  ;;  %v1967_v4 = vld [vmem:[%s12935_s11 + $0xad8] sm:$0xff] }
 0x337   : > { %8264 = vmatpush2.bf16.msra.mxu1 %v11934_v3  ;;  %v1959_v3 = vld [vmem:[%s12935_s11 + $0xa98] sm:$0xff] }
 0x338   : > { %8265 = vmatprep.subr.bf16.mxu1 %v11919_v33  ;;  %v11296_v0 = vcombine.low %v1959_v3, %v1967_v4 }
 0x339   : > { %8225 = vmatpush2.bf16.msra.mxu0 %v11662_v18  ;;  %v11041_v18 = vcombine.high %v1703_v63, %v1711_v1 }
 0x33a   : > { %8226 = vmatprep.subr.bf16.mxu0 %v11647_v21  ;;  %v11297_v21 = vcombine.high %v1959_v3, %v1967_v4  ;;  %v1863_v4 = vld [vmem:[%s12935_s11 + $0x798] sm:$0xff] }
 0x33b   : > { %8266 = vmatpush2.bf16.msra.mxu1 %v11918_v19 }
 0x33c   : > { %8267 = vmatprep.subr.bf16.mxu1 %v11903_v12  ;;  %v1687_v12 = vld [vmem:[%s12935_s11 + $0x218] sm:$0xff] }
 0x33d   : > { %8227 = vmatpush2.bf16.msra.mxu0 %v11646_v23  ;;  %v1951_v23 = vld [vmem:[%s12935_s11 + $0xa58] sm:$0xff]  ;;  %v11025_v26 = vcombine.high %v1687_v12, %v1695_v9  ;;  %v11024_v35 = vcombine.low %v1687_v12, %v1695_v9 }
 0x33e   : > { %8228 = vmatprep.subr.bf16.mxu0 %v11631_v24  ;;  %v11040_v24 = vcombine.low %v1703_v63, %v1711_v1  ;;  %v11281_v28 = vcombine.high %v1943_v14, %v1951_v23  ;;  %v11280_v40 = vcombine.low %v1943_v14, %v1951_v23  ;;  %v1847_v12 = vld [vmem:[%s12935_s11 + $0x718] sm:$0xff] }
 0x33f   : > { %8268 = vmatpush2.bf16.msra.mxu1 %v11902_v61  ;;  %v1855_v9 = vld [vmem:[%s12935_s11 + $0x758] sm:$0xff] }
 0x340   : > { %8269 = vmatprep.subr.bf16.mxu1 %v11887_v25  ;;  %v2111_v14 = vld [vmem:[%s12935_s11 + $0xf58] sm:$0xff] }
 0x341   : > { %8229 = vmatpush2.bf16.msra.mxu0 %v11630_v29  ;;  %v1671_v29 = vld [vmem:[%s12935_s11 + $0x198] sm:$0xff] }
 0x342   : > { %8230 = vmatprep.subr.bf16.mxu0 %v11615_v31  ;;  %v1927_v31 = vld [vmem:[%s12935_s11 + $0x998] sm:$0xff] }
 0x343   : > { %8270 = vmatpush2.bf16.msra.mxu1 %v11886_v30  ;;  %v1679_v30 = vld [vmem:[%s12935_s11 + $0x1d8] sm:$0xff] }
 0x344   : > { %8271 = vmatprep.subr.bf16.mxu1 %v11871_v34  ;;  %v1935_v34 = vld [vmem:[%s12935_s11 + $0x9d8] sm:$0xff]  ;;  %v11009_v43 = vcombine.high %v1671_v29, %v1679_v30  ;;  %v11008_v44 = vcombine.low %v1671_v29, %v1679_v30  ;;  %v11184_v29 = vcombine.low %v1847_v12, %v1855_v9 }
 0x345   : > { %8231 = vmatpush2.bf16.msra.mxu0 %v11614_v36  ;;  %v11265_v8 = vcombine.high %v1927_v31, %v1935_v34  ;;  %v1655_v36 = vld [vmem:[%s12935_s11 + $0x118] sm:$0xff]  ;;  %v11264_v45 = vcombine.low %v1927_v31, %v1935_v34 }
 0x346   : > { %8232 = vmatprep.subr.bf16.mxu0 %v11599_v39  ;;  %v1911_v39 = vld [vmem:[%s12935_s11 + $0x918] sm:$0xff] }
 0x347   : > { %8272 = vmatpush2.bf16.msra.mxu1 %v11870_v38  ;;  %v1663_v38 = vld [vmem:[%s12935_s11 + $0x158] sm:$0xff] }
 0x348   : > { %8273 = vmatprep.subr.bf16.mxu1 %v11855_v32  ;;  %v1919_v32 = vld [vmem:[%s12935_s11 + $0x958] sm:$0xff]  ;;  %v10993_v46 = vcombine.high %v1655_v36, %v1663_v38  ;;  %v10992_v52 = vcombine.low %v1655_v36, %v1663_v38 }
 0x349   : > { %8233 = vmatpush2.bf16.msra.mxu0 %v11598_v48  ;;  %v11249_v47 = vcombine.high %v1911_v39, %v1919_v32  ;;  %v1639_v48 = vld [vmem:[%s12935_s11 + $0x98] sm:$0xff]  ;;  %v11248_v53 = vcombine.low %v1911_v39, %v1919_v32 }
 0x34a   : > { %8284 = vmatprep.subr.bf16.mxu0 %v11073_v17  ;;  %v1895_v17 = vld [vmem:[%s12935_s11 + $0x898] sm:$0xff] }
 0x34b   : > { %8274 = vmatpush2.bf16.msra.mxu1 %v11854_v50  ;;  %v1647_v50 = vld [vmem:[%s12935_s11 + $0xd8] sm:$0xff] }
 0x34c   : > { %8325 = vmatprep.subr.bf16.mxu1 %v11329_v51  ;;  %v7990_v2 = vpop.f32.mrf.mxu0  ;;  %8235 = vmatmul.mubr.bf16.vlgmr.msra.gmra.mxu0 %v13166_v20  ;;  %v1903_v51 = vld [vmem:[%s12935_s11 + $0x8d8] sm:$0xff]  ;;  %v10977_v54 = vcombine.high %v1639_v48, %v1647_v50  ;;  %v10976_v63 = vcombine.low %v1639_v48, %v1647_v50 }
 0x34d   : > { %8285 = vmatpush1.bf16.msra.mxu0 %v11072_v56  ;;  %8316 = vmatprep.mubr.bf16.mxu0 %v13026_v41  ;;  %v11233_v55 = vcombine.high %v1895_v17, %v1903_v51  ;;  %v1623_v56 = vld [vmem:[%s12935_s11 + $0x18] sm:$0xff]  ;;  %v11232_v1 = vcombine.low %v1895_v17, %v1903_v51 }
 0x34e   : > { %v8031_v33 = vpop.f32.mrf.mxu1  ;;  %8276 = vmatmul.mubr.bf16.vlgmr.msra.gmra.mxu1 %v13172_v22  ;;  %v7992_v15 = vpop.f32.mrf.mxu0  ;;  %8286 = vmatprep.subr.bf16.mxu0 %v11057_v59  ;;  %v1879_v59 = vld [vmem:[%s12935_s11 + $0x818] sm:$0xff] }
 0x34f   : > { %v13462_v10 = vadd.f32 %v8031_v33, %v7990_v2  ;;  %8326 = vmatpush1.bf16.msra.mxu1 %v11328_v57  ;;  %8357 = vmatprep.mubr.bf16.mxu1 %v13030_v42  ;;  %v1631_v57 = vld [vmem:[%s12935_s11 + $0x58] sm:$0xff] }
 0x350   : > { %v8033_v19 = vpop.f32.mrf.mxu1  ;;  %8327 = vmatprep.subr.bf16.mxu1 %v11313_v60  ;;  %v7994_v13 = vpop.f32.mrf.mxu0  ;;  %v1887_v60 = vld [vmem:[%s12935_s11 + $0x858] sm:$0xff]  ;;  %v10961_v2 = vcombine.high %v1623_v56, %v1631_v57 }
 0x351   : > { %v13467_v11 = vadd.f32 %v8033_v19, %v7992_v15  ;;  %8287 = vmatpush1.bf16.msra.mxu0 %v11056_v6  ;;  %v11217_v3 = vcombine.high %v1879_v59, %v1887_v60  ;;  %v1871_v33 = vld [vmem:[%s12935_s11 + $0x7d8] sm:$0xff] }
 0x352   : > { %v8035_v61 = vpop.f32.mrf.mxu1  ;;  %v7995_v25 = vpop.f32.mrf.mxu0  ;;  %8288 = vmatprep.subr.bf16.mxu0 %v11041_v18  ;;  %v2119_v6 = vld [vmem:[%s12935_s11 + $0xf98] sm:$0xff]  ;;  %v11216_v18 = vcombine.low %v1879_v59, %v1887_v60  ;;  %v11201_v19 = vcombine.high %v1863_v4, %v1871_v33  ;;  %v11200_v23 = vcombine.low %v1863_v4, %v1871_v33 }
 0x353   : > { %8328 = vmatpush1.bf16.msra.mxu1 %v11312_v16  ;;  %v2127_v15 = vld [vmem:[%s12935_s11 + $0xfd8] sm:$0xff]  ;;  %v10960_v16 = vcombine.low %v1623_v56, %v1631_v57 }
 0x354   : > { %v8036_v27 = vpop.f32.mrf.mxu1  ;;  %8329 = vmatprep.subr.bf16.mxu1 %v11297_v21  ;;  %v11457_v21 = vcombine.high %v2119_v6, %v2127_v15  ;;  %v2103_v13 = vld [vmem:[%s12935_s11 + $0xf18] sm:$0xff]  ;;  %v11456_v61 = vcombine.low %v2119_v6, %v2127_v15 }
 0x355   : > { %8289 = vmatpush1.bf16.msra.mxu0 %v11040_v24  ;;  %v11185_v24 = vcombine.high %v1847_v12, %v1855_v9  ;;  %v11441_v25 = vcombine.high %v2103_v13, %v2111_v14  ;;  %v2087_v27 = vld [vmem:[%s12935_s11 + $0xe98] sm:$0xff]  ;;  %v11440_v30 = vcombine.low %v2103_v13, %v2111_v14 }
 0x356   : > { %8290 = vmatprep.subr.bf16.mxu0 %v11025_v26  ;;  %v1839_v26 = vld [vmem:[%s12935_s11 + $0x6d8] sm:$0xff] }
 0x357   : > { %8330 = vmatpush1.bf16.msra.mxu1 %v11296_v0  ;;  %v1831_v0 = vld [vmem:[%s12935_s11 + $0x698] sm:$0xff] }
 0x358   : > { %8331 = vmatprep.subr.bf16.mxu1 %v11281_v28  ;;  %v2095_v28 = vld [vmem:[%s12935_s11 + $0xed8] sm:$0xff]  ;;  %v11169_v31 = vcombine.high %v1831_v0, %v1839_v26  ;;  %v11168_v36 = vcombine.low %v1831_v0, %v1839_v26 }
 0x359   : > { %8291 = vmatpush1.bf16.msra.mxu0 %v11024_v35  ;;  %v11425_v34 = vcombine.high %v2087_v27, %v2095_v28  ;;  %v1815_v35 = vld [vmem:[%s12935_s11 + $0x618] sm:$0xff]  ;;  %v11424_v38 = vcombine.low %v2087_v27, %v2095_v28 }
 0x35a   : > { %8292 = vmatprep.subr.bf16.mxu0 %v11009_v43  ;;  %v2071_v43 = vld [vmem:[%s12935_s11 + $0xe18] sm:$0xff] }
 0x35b   : > { %8332 = vmatpush1.bf16.msra.mxu1 %v11280_v40  ;;  %v1823_v40 = vld [vmem:[%s12935_s11 + $0x658] sm:$0xff] }
 0x35c   : > { %8333 = vmatprep.subr.bf16.mxu1 %v11265_v8  ;;  %v2079_v8 = vld [vmem:[%s12935_s11 + $0xe58] sm:$0xff]  ;;  %v11153_v39 = vcombine.high %v1815_v35, %v1823_v40  ;;  %v11152_v48 = vcombine.low %v1815_v35, %v1823_v40 }
 0x35d   : > { %8293 = vmatpush1.bf16.msra.mxu0 %v11008_v44  ;;  %v11409_v32 = vcombine.high %v2071_v43, %v2079_v8  ;;  %v1799_v44 = vld [vmem:[%s12935_s11 + $0x598] sm:$0xff]  ;;  %v11408_v50 = vcombine.low %v2071_v43, %v2079_v8 }
 0x35e   : > { %8294 = vmatprep.subr.bf16.mxu0 %v10993_v46  ;;  %v2055_v46 = vld [vmem:[%s12935_s11 + $0xd98] sm:$0xff] }
 0x35f   : > { %8334 = vmatpush1.bf16.msra.mxu1 %v11264_v45  ;;  %v1807_v45 = vld [vmem:[%s12935_s11 + $0x5d8] sm:$0xff] }
 0x360   : > { %8335 = vmatprep.subr.bf16.mxu1 %v11249_v47  ;;  %v2063_v47 = vld [vmem:[%s12935_s11 + $0xdd8] sm:$0xff]  ;;  %v11137_v17 = vcombine.high %v1799_v44, %v1807_v45  ;;  %v11136_v56 = vcombine.low %v1799_v44, %v1807_v45 }
 0x361   : > { %8295 = vmatpush1.bf16.msra.mxu0 %v10992_v52  ;;  %v11393_v51 = vcombine.high %v2055_v46, %v2063_v47  ;;  %v1783_v52 = vld [vmem:[%s12935_s11 + $0x518] sm:$0xff]  ;;  %v11392_v57 = vcombine.low %v2055_v46, %v2063_v47 }
 0x362   : > { %8296 = vmatprep.subr.bf16.mxu0 %v10977_v54  ;;  %v2039_v54 = vld [vmem:[%s12935_s11 + $0xd18] sm:$0xff] }
 0x363   : > { %8336 = vmatpush1.bf16.msra.mxu1 %v11248_v53  ;;  %v1791_v53 = vld [vmem:[%s12935_s11 + $0x558] sm:$0xff] }
 0x364   : > { %8337 = vmatprep.subr.bf16.mxu1 %v11233_v55  ;;  %v2047_v55 = vld [vmem:[%s12935_s11 + $0xd58] sm:$0xff]  ;;  %v11121_v59 = vcombine.high %v1783_v52, %v1791_v53  ;;  %v11120_v4 = vcombine.low %v1783_v52, %v1791_v53 }
 0x365   : > { %8297 = vmatpush1.bf16.msra.mxu0 %v10976_v63  ;;  %v11377_v60 = vcombine.high %v2039_v54, %v2047_v55  ;;  %v1767_v63 = vld [vmem:[%s12935_s11 + $0x498] sm:$0xff]  ;;  %v11376_v33 = vcombine.low %v2039_v54, %v2047_v55 }
 0x366   : > { %8298 = vmatprep.subr.bf16.mxu0 %v10961_v2  ;;  %v2023_v2 = vld [vmem:[%s12935_s11 + $0xc98] sm:$0xff] }
 0x367   : > { %8338 = vmatpush1.bf16.msra.mxu1 %v11232_v1  ;;  %v1775_v1 = vld [vmem:[%s12935_s11 + $0x4d8] sm:$0xff] }
 0x368   : > { %8339 = vmatprep.subr.bf16.mxu1 %v11217_v3  ;;  %v2031_v3 = vld [vmem:[%s12935_s11 + $0xcd8] sm:$0xff]  ;;  %v11105_v6 = vcombine.high %v1767_v63, %v1775_v1  ;;  %v11104_v12 = vcombine.low %v1767_v63, %v1775_v1 }
 0x369   : > { %8299 = vmatpush1.bf16.msra.mxu0 %v10960_v16  ;;  %v11361_v15 = vcombine.high %v2023_v2, %v2031_v3  ;;  %v1751_v16 = vld [vmem:[%s12935_s11 + $0x418] sm:$0xff]  ;;  %v11360_v9 = vcombine.low %v2023_v2, %v2031_v3 }
 0x36a   : > { %8300 = vmatprep.subr.bf16.mxu0 %v11201_v19  ;;  %v2007_v19 = vld [vmem:[%s12935_s11 + $0xc18] sm:$0xff] }
 0x36b   : > { %8340 = vmatpush1.bf16.msra.mxu1 %v11216_v18  ;;  %v1759_v18 = vld [vmem:[%s12935_s11 + $0x458] sm:$0xff] }
 0x36c   : > { %8341 = vmatprep.subr.bf16.mxu1 %v11457_v21  ;;  %v2015_v21 = vld [vmem:[%s12935_s11 + $0xc58] sm:$0xff]  ;;  %v11089_v13 = vcombine.high %v1751_v16, %v1759_v18  ;;  %v11088_v0 = vcombine.low %v1751_v16, %v1759_v18 }
 0x36d   : > { %8301 = vmatpush2.bf16.msra.mxu0 %v11200_v23  ;;  %v11345_v14 = vcombine.high %v2007_v19, %v2015_v21  ;;  %v2247_v23 = vld [vmem:[%s12935_s11 + $0x1398] sm:$0xff]  ;;  %v11344_v26 = vcombine.low %v2007_v19, %v2015_v21 }
 0x36e   : > { %8302 = vmatprep.subr.bf16.mxu0 %v11185_v24  ;;  %v2503_v24 = vld [vmem:[%s12935_s11 + $0x1b98] sm:$0xff] }
 0x36f   : > { %8342 = vmatpush2.bf16.msra.mxu1 %v11456_v61  ;;  %v2255_v61 = vld [vmem:[%s12935_s11 + $0x13d8] sm:$0xff] }
 0x370   : > { %8343 = vmatprep.subr.bf16.mxu1 %v11441_v25  ;;  %v2511_v25 = vld [vmem:[%s12935_s11 + $0x1bd8] sm:$0xff]  ;;  %v11585_v27 = vcombine.high %v2247_v23, %v2255_v61  ;;  %v11584_v35 = vcombine.low %v2247_v23, %v2255_v61 }
 0x371   : > { %8303 = vmatpush2.bf16.msra.mxu0 %v11184_v29  ;;  %v11841_v28 = vcombine.high %v2503_v24, %v2511_v25  ;;  %v2231_v29 = vld [vmem:[%s12935_s11 + $0x1318] sm:$0xff]  ;;  %v11840_v40 = vcombine.low %v2503_v24, %v2511_v25 }
 0x372   : > { %8304 = vmatprep.subr.bf16.mxu0 %v11169_v31  ;;  %v2487_v31 = vld [vmem:[%s12935_s11 + $0x1b18] sm:$0xff] }
 0x373   : > { %8344 = vmatpush2.bf16.msra.mxu1 %v11440_v30  ;;  %v2239_v30 = vld [vmem:[%s12935_s11 + $0x1358] sm:$0xff] }
 0x374   : > { %8345 = vmatprep.subr.bf16.mxu1 %v11425_v34  ;;  %v2495_v34 = vld [vmem:[%s12935_s11 + $0x1b58] sm:$0xff]  ;;  %v11569_v43 = vcombine.high %v2231_v29, %v2239_v30  ;;  %v11568_v47 = vcombine.low %v2231_v29, %v2239_v30 }
 0x375   : > { %8305 = vmatpush2.bf16.msra.mxu0 %v11168_v36  ;;  %v11825_v8 = vcombine.high %v2487_v31, %v2495_v34  ;;  %v2215_v36 = vld [vmem:[%s12935_s11 + $0x1298] sm:$0xff] }
 0x376   : > { %8306 = vmatprep.subr.bf16.mxu0 %v11153_v39  ;;  %v2479_v44 = vld [vmem:[%s12935_s11 + $0x1ad8] sm:$0xff] }
 0x377   : > { %8346 = vmatpush2.bf16.msra.mxu1 %v11424_v38  ;;  %v2223_v38 = vld [vmem:[%s12935_s11 + $0x12d8] sm:$0xff] }
 0x378   : > { %8347 = vmatprep.subr.bf16.mxu1 %v11409_v32  ;;  %v2471_v32 = vld [vmem:[%s12935_s11 + $0x1a98] sm:$0xff] }
 0x379   : > { %8307 = vmatpush2.bf16.msra.mxu0 %v11152_v48  ;;  %v2199_v54 = vld [vmem:[%s12935_s11 + $0x1218] sm:$0xff]  ;;  %v11808_v2 = vcombine.low %v2471_v32, %v2479_v44 }
 0x37a   : > { %8308 = vmatprep.subr.bf16.mxu0 %v11137_v17  ;;  %v11553_v17 = vcombine.high %v2215_v36, %v2223_v38  ;;  %v2207_v55 = vld [vmem:[%s12935_s11 + $0x1258] sm:$0xff] }
 0x37b   : > { %8348 = vmatpush2.bf16.msra.mxu1 %v11408_v50  ;;  %v11824_v50 = vcombine.low %v2487_v31, %v2495_v34  ;;  %v11537_v3 = vcombine.high %v2199_v54, %v2207_v55  ;;  %v2439_v16 = vld [vmem:[%s12935_s11 + $0x1998] sm:$0xff]  ;;  %v11536_v19 = vcombine.low %v2199_v54, %v2207_v55 }
 0x37c   : > { %8349 = vmatprep.subr.bf16.mxu1 %v11393_v51  ;;  %v2447_v18 = vld [vmem:[%s12935_s11 + $0x19d8] sm:$0xff] }
 0x37d   : > { %8309 = vmatpush2.bf16.msra.mxu0 %v11136_v56  ;;  %v2423_v23 = vld [vmem:[%s12935_s11 + $0x1918] sm:$0xff]  ;;  %v11776_v25 = vcombine.low %v2439_v16, %v2447_v18 }
 0x37e   : > { %8310 = vmatprep.subr.bf16.mxu0 %v11121_v59  ;;  %v2463_v59 = vld [vmem:[%s12935_s11 + $0x1a58] sm:$0xff] }
 0x37f   : > { %8350 = vmatpush2.bf16.msra.mxu1 %v11392_v57  ;;  %v2455_v57 = vld [vmem:[%s12935_s11 + $0x1a18] sm:$0xff] }
 0x380   : > { %8351 = vmatprep.subr.bf16.mxu1 %v11377_v60  ;;  %v11792_v21 = vcombine.low %v2455_v57, %v2463_v59  ;;  %v2431_v61 = vld [vmem:[%s12935_s11 + $0x1958] sm:$0xff] }
 0x381   : > { %8311 = vmatpush2.bf16.msra.mxu0 %v11120_v4  ;;  %v2407_v29 = vld [vmem:[%s12935_s11 + $0x1898] sm:$0xff]  ;;  %v11760_v34 = vcombine.low %v2423_v23, %v2431_v61 }
 0x382   : > { %8312 = vmatprep.subr.bf16.mxu0 %v11105_v6  ;;  %v2183_v6 = vld [vmem:[%s12935_s11 + $0x1198] sm:$0xff] }
 0x383   : > { %8352 = vmatpush2.bf16.msra.mxu1 %v11376_v33  ;;  %v11793_v33 = vcombine.high %v2455_v57, %v2463_v59  ;;  %v2415_v30 = vld [vmem:[%s12935_s11 + $0x18d8] sm:$0xff] }
 0x384   : > { %8353 = vmatprep.subr.bf16.mxu1 %v11361_v15  ;;  %v2191_v15 = vld [vmem:[%s12935_s11 + $0x11d8] sm:$0xff] }
 0x385   : > { %8313 = vmatpush2.bf16.msra.mxu0 %v11104_v12  ;;  %v11521_v12 = vcombine.high %v2183_v6, %v2191_v15  ;;  %v11520_v24 = vcombine.low %v2183_v6, %v2191_v15  ;;  %v2359_v54 = vld [vmem:[%s12935_s11 + $0x1718] sm:$0xff] }
 0x386   : > { %8314 = vmatprep.subr.bf16.mxu0 %v11089_v13  ;;  %v2167_v13 = vld [vmem:[%s12935_s11 + $0x1118] sm:$0xff] }
 0x387   : > { %8354 = vmatpush2.bf16.msra.mxu1 %v11360_v9  ;;  %v11777_v9 = vcombine.high %v2439_v16, %v2447_v18  ;;  %v2367_v55 = vld [vmem:[%s12935_s11 + $0x1758] sm:$0xff] }
 0x388   : > { %8355 = vmatprep.subr.bf16.mxu1 %v11345_v14  ;;  %v2175_v14 = vld [vmem:[%s12935_s11 + $0x1158] sm:$0xff]  ;;  %v11696_v6 = vcombine.low %v2359_v54, %v2367_v55 }
 0x389   : > { %8315 = vmatpush2.bf16.msra.mxu0 %v11088_v0  ;;  %v11505_v0 = vcombine.high %v2167_v13, %v2175_v14  ;;  %v11504_v31 = vcombine.low %v2167_v13, %v2175_v14  ;;  %v2623_v57 = vld [vmem:[%s12935_s11 + $0x1f58] sm:$0xff] }
 0x38a   : > { %8366 = vmatprep.subr.bf16.mxu0 %v11585_v27  ;;  %v2151_v27 = vld [vmem:[%s12935_s11 + $0x1098] sm:$0xff] }
 0x38b   : > { %8356 = vmatpush2.bf16.msra.mxu1 %v11344_v26  ;;  %v11761_v26 = vcombine.high %v2423_v23, %v2431_v61 }
 0x38c   : > { %8407 = vmatprep.subr.bf16.mxu1 %v11841_v28  ;;  %v8072_v39 = vpop.f32.mrf.mxu0  ;;  %8317 = vmatmul.mubr.bf16.vlgmr.msra.gmra.mxu0 %v13076_v58  ;;  %v2159_v28 = vld [vmem:[%s12935_s11 + $0x10d8] sm:$0xff] }
 0x38d   : > { %v8073_v45 = vadd.f32 %v8072_v39, %v13462_v10  ;;  %8367 = vmatpush1.bf16.msra.mxu0 %v11584_v35  ;;  %v11809_v10 = vcombine.high %v2471_v32, %v2479_v44  ;;  %8398 = vmatprep.mubr.bf16.mxu0 %v13094_v5  ;;  %v11489_v35 = vcombine.high %v2151_v27, %v2159_v28 }
 0x38e   : > { %v8113_v46 = vpop.f32.mrf.mxu1  ;;  %8358 = vmatmul.mubr.bf16.vlgmr.msra.gmra.mxu1 %v13085_v62  ;;  %v8074_v48 = vpop.f32.mrf.mxu0  ;;  %8368 = vmatprep.subr.bf16.mxu0 %v11569_v43  ;;  %v2135_v43 = vld [vmem:[%s12935_s11 + $0x1018] sm:$0xff]  ;;  %v11488_v39 = vcombine.low %v2151_v27, %v2159_v28  ;;  %v11744_v32 = vcombine.low %v2407_v29, %v2415_v30 }
 0x38f   : > { %8408 = vmatpush1.bf16.msra.mxu1 %v11840_v40  ;;  %v13535_v51 = vadd.f32 %v8113_v46, %v8073_v45  ;;  %v8075_v52 = vadd.f32 %v8074_v48, %v13467_v11  ;;  %8439 = vmatprep.mubr.bf16.mxu1 %v13101_v7  ;;  %v11552_v11 = vcombine.low %v2215_v36, %v2223_v38  ;;  %v2391_v36 = vld [vmem:[%s12935_s11 + $0x1818] sm:$0xff] }
 0x390   : > { %v8115_v53 = vpop.f32.mrf.mxu1  ;;  %8409 = vmatprep.subr.bf16.mxu1 %v11825_v8  ;;  %v8076_v56 = vpop.f32.mrf.mxu0  ;;  %v11745_v40 = vcombine.high %v2407_v29, %v2415_v30  ;;  %v2143_v8 = vld [vmem:[%s12935_s11 + $0x1058] sm:$0xff] }
 0x391   : > { %v13544_v60 = vadd.f32 %v8115_v53, %v8075_v52  ;;  %8369 = vmatpush1.bf16.msra.mxu0 %v11568_v47  ;;  %v2399_v38 = vld [vmem:[%s12935_s11 + $0x1858] sm:$0xff]  ;;  %v11473_v44 = vcombine.high %v2135_v43, %v2143_v8 }
 0x392   : > { %v8117_v63 = vpop.f32.mrf.mxu1  ;;  %v8077_v1 = vpop.f32.mrf.mxu0  ;;  %8370 = vmatprep.subr.bf16.mxu0 %v11553_v17  ;;  %v11729_v45 = vcombine.high %v2391_v36, %v2399_v38  ;;  %v2375_v46 = vld [vmem:[%s12935_s11 + $0x1798] sm:$0xff]  ;;  %v11472_v17 = vcombine.low %v2135_v43, %v2143_v8  ;;  %v11728_v52 = vcombine.low %v2391_v36, %v2399_v38 }
 0x393   : > { %8410 = vmatpush1.bf16.msra.mxu1 %v11824_v50  ;;  %v2383_v47 = vld [vmem:[%s12935_s11 + $0x17d8] sm:$0xff] }
 0x394   : > { %v8118_v4 = vpop.f32.mrf.mxu1  ;;  %8411 = vmatprep.subr.bf16.mxu1 %v11809_v10  ;;  %v2631_v48 = vld [vmem:[%s12935_s11 + $0x1f98] sm:$0xff]  ;;  %v11713_v53 = vcombine.high %v2375_v46, %v2383_v47  ;;  %v11712_v59 = vcombine.low %v2375_v46, %v2383_v47 }
 0x395   : > { %8371 = vmatpush1.bf16.msra.mxu0 %v11552_v11  ;;  %v2639_v50 = vld [vmem:[%s12935_s11 + $0x1fd8] sm:$0xff]  ;;  %v11697_v11 = vcombine.high %v2359_v54, %v2367_v55 }
 0x396   : > { %8372 = vmatprep.subr.bf16.mxu0 %v11537_v3  ;;  %v11969_v10 = vcombine.high %v2631_v48, %v2639_v50  ;;  %v2615_v56 = vld [vmem:[%s12935_s11 + $0x1f18] sm:$0xff]  ;;  %v11968_v63 = vcombine.low %v2631_v48, %v2639_v50 }
 0x397   : > { %8412 = vmatpush1.bf16.msra.mxu1 %v11808_v2  ;;  %v11953_v1 = vcombine.high %v2615_v56, %v2623_v57  ;;  %v2343_v2 = vld [vmem:[%s12935_s11 + $0x1698] sm:$0xff]  ;;  %v11952_v15 = vcombine.low %v2615_v56, %v2623_v57 }
 0x398   : > { %8413 = vmatprep.subr.bf16.mxu1 %v11793_v33  ;;  %v2351_v3 = vld [vmem:[%s12935_s11 + $0x16d8] sm:$0xff] }
 0x399   : > { %8373 = vmatpush1.bf16.msra.mxu0 %v11536_v19  ;;  %v2599_v4 = vld [vmem:[%s12935_s11 + $0x1e98] sm:$0xff]  ;;  %v11681_v16 = vcombine.high %v2343_v2, %v2351_v3  ;;  %v11680_v13 = vcombine.low %v2343_v2, %v2351_v3 }
 0x39a   : > { %8374 = vmatprep.subr.bf16.mxu0 %v11521_v12  ;;  %v2607_v33 = vld [vmem:[%s12935_s11 + $0x1ed8] sm:$0xff] }
 0x39b   : > { %8414 = vmatpush1.bf16.msra.mxu1 %v11792_v21  ;;  %v11937_v18 = vcombine.high %v2599_v4, %v2607_v33  ;;  %v2327_v19 = vld [vmem:[%s12935_s11 + $0x1618] sm:$0xff]  ;;  %v11936_v14 = vcombine.low %v2599_v4, %v2607_v33 }
 0x39c   : > { %8415 = vmatprep.subr.bf16.mxu1 %v11777_v9  ;;  %v2335_v21 = vld [vmem:[%s12935_s11 + $0x1658] sm:$0xff] }
 0x39d   : > { %8375 = vmatpush1.bf16.msra.mxu0 %v11520_v24  ;;  %v2583_v12 = vld [vmem:[%s12935_s11 + $0x1e18] sm:$0xff]  ;;  %v11665_v23 = vcombine.high %v2327_v19, %v2335_v21  ;;  %v11664_v27 = vcombine.low %v2327_v19, %v2335_v21 }
 0x39e   : > { %8376 = vmatprep.subr.bf16.mxu0 %v11505_v0  ;;  %v2591_v9 = vld [vmem:[%s12935_s11 + $0x1e58] sm:$0xff] }
 0x39f   : > { %8416 = vmatpush1.bf16.msra.mxu1 %v11776_v25  ;;  %v11921_v61 = vcombine.high %v2583_v12, %v2591_v9  ;;  %v2311_v24 = vld [vmem:[%s12935_s11 + $0x1598] sm:$0xff]  ;;  %v11920_v28 = vcombine.low %v2583_v12, %v2591_v9 }
 0x3a0   : > { %8417 = vmatprep.subr.bf16.mxu1 %v11761_v26  ;;  %v2319_v25 = vld [vmem:[%s12935_s11 + $0x15d8] sm:$0xff] }
 0x3a1   : > { %8377 = vmatpush1.bf16.msra.mxu0 %v11504_v31  ;;  %v2567_v0 = vld [vmem:[%s12935_s11 + $0x1d98] sm:$0xff]  ;;  %v11649_v29 = vcombine.high %v2311_v24, %v2319_v25  ;;  %v11648_v43 = vcombine.low %v2311_v24, %v2319_v25  ;;  %v1968_v24 = vld [vmem:[%s12935_s11 + $0xae0] sm:$0xff] }
 0x3a2   : > { %8378 = vmatprep.subr.bf16.mxu0 %v11489_v35  ;;  %v2575_v26 = vld [vmem:[%s12935_s11 + $0x1dd8] sm:$0xff] }
 0x3a3   : > { %8418 = vmatpush1.bf16.msra.mxu1 %v11760_v34  ;;  %v11905_v30 = vcombine.high %v2567_v0, %v2575_v26  ;;  %v2295_v31 = vld [vmem:[%s12935_s11 + $0x1518] sm:$0xff]  ;;  %v11904_v8 = vcombine.low %v2567_v0, %v2575_v26 }
 0x3a4   : > { %8419 = vmatprep.subr.bf16.mxu1 %v11745_v40  ;;  %v2303_v34 = vld [vmem:[%s12935_s11 + $0x1558] sm:$0xff] }
 0x3a5   : > { %8379 = vmatpush1.bf16.msra.mxu0 %v11488_v39  ;;  %v2551_v35 = vld [vmem:[%s12935_s11 + $0x1d18] sm:$0xff]  ;;  %v11633_v36 = vcombine.high %v2295_v31, %v2303_v34  ;;  %v11632_v46 = vcombine.low %v2295_v31, %v2303_v34  ;;  %v1688_v34 = vld [vmem:[%s12935_s11 + $0x220] sm:$0xff] }
 0x3a6   : > { %8380 = vmatprep.subr.bf16.mxu0 %v11473_v44  ;;  %v2559_v40 = vld [vmem:[%s12935_s11 + $0x1d58] sm:$0xff] }
 0x3a7   : > { %8420 = vmatpush1.bf16.msra.mxu1 %v11744_v32  ;;  %v11889_v38 = vcombine.high %v2551_v35, %v2559_v40  ;;  %v2279_v39 = vld [vmem:[%s12935_s11 + $0x1498] sm:$0xff]  ;;  %v11888_v47 = vcombine.low %v2551_v35, %v2559_v40  ;;  %v1696_v35 = vld [vmem:[%s12935_s11 + $0x260] sm:$0xff] }
 0x3a8   : > { %8421 = vmatprep.subr.bf16.mxu1 %v11729_v45  ;;  %v2287_v32 = vld [vmem:[%s12935_s11 + $0x14d8] sm:$0xff] }
 0x3a9   : > { %8381 = vmatpush1.bf16.msra.mxu0 %v11472_v17  ;;  %v2535_v44 = vld [vmem:[%s12935_s11 + $0x1c98] sm:$0xff]  ;;  %v11617_v48 = vcombine.high %v2279_v39, %v2287_v32  ;;  %v11616_v54 = vcombine.low %v2279_v39, %v2287_v32 }
 0x3aa   : > { %8382 = vmatprep.subr.bf16.mxu0 %v11713_v53  ;;  %v2543_v45 = vld [vmem:[%s12935_s11 + $0x1cd8] sm:$0xff] }
 0x3ab   : > { %8422 = vmatpush1.bf16.msra.mxu1 %v11728_v52  ;;  %v11873_v50 = vcombine.high %v2535_v44, %v2543_v45  ;;  %v2263_v17 = vld [vmem:[%s12935_s11 + $0x1418] sm:$0xff]  ;;  %v11872_v55 = vcombine.low %v2535_v44, %v2543_v45  ;;  %v11027_v45 = vcombine.high %v1688_v34, %v1696_v35 }
 0x3ac   : > { %8423 = vmatprep.subr.bf16.mxu1 %v11969_v10  ;;  %v2271_v52 = vld [vmem:[%s12935_s11 + $0x1458] sm:$0xff] }
 0x3ad   : > { %8383 = vmatpush2.bf16.msra.mxu0 %v11712_v59  ;;  %v2519_v53 = vld [vmem:[%s12935_s11 + $0x1c18] sm:$0xff]  ;;  %v11601_v56 = vcombine.high %v2263_v17, %v2271_v52  ;;  %v1736_v59 = vld [vmem:[%s12935_s11 + $0x3a0] sm:$0xff]  ;;  %v11600_v2 = vcombine.low %v2263_v17, %v2271_v52 }
 0x3ae   : > { %8384 = vmatprep.subr.bf16.mxu0 %v11697_v11  ;;  %v2527_v10 = vld [vmem:[%s12935_s11 + $0x1c58] sm:$0xff]  ;;  %v1992_v11 = vld [vmem:[%s12935_s11 + $0xba0] sm:$0xff] }
 0x3af   : > { %8424 = vmatpush2.bf16.msra.mxu1 %v11968_v63  ;;  %v11857_v57 = vcombine.high %v2519_v53, %v2527_v10  ;;  %v1744_v63 = vld [vmem:[%s12935_s11 + $0x3e0] sm:$0xff]  ;;  %v11856_v3 = vcombine.low %v2519_v53, %v2527_v10  ;;  %v11026_v53 = vcombine.low %v1688_v34, %v1696_v35 }
 0x3b0   : > { %8425 = vmatprep.subr.bf16.mxu1 %v11953_v1  ;;  %v2000_v1 = vld [vmem:[%s12935_s11 + $0xbe0] sm:$0xff]  ;;  %v11075_v4 = vcombine.high %v1736_v59, %v1744_v63  ;;  %v11074_v19 = vcombine.low %v1736_v59, %v1744_v63 }
 0x3b1   : > { %8385 = vmatpush2.bf16.msra.mxu0 %v11696_v6  ;;  %v11331_v33 = vcombine.high %v1992_v11, %v2000_v1  ;;  %v1720_v6 = vld [vmem:[%s12935_s11 + $0x320] sm:$0xff]  ;;  %v11330_v21 = vcombine.low %v1992_v11, %v2000_v1 }
 0x3b2   : > { %8386 = vmatprep.subr.bf16.mxu0 %v11681_v16  ;;  %v1976_v16 = vld [vmem:[%s12935_s11 + $0xb20] sm:$0xff] }
 0x3b3   : > { %8426 = vmatpush2.bf16.msra.mxu1 %v11952_v15  ;;  %v1728_v15 = vld [vmem:[%s12935_s11 + $0x360] sm:$0xff] }
 0x3b4   : > { %8427 = vmatprep.subr.bf16.mxu1 %v11937_v18  ;;  %v1984_v18 = vld [vmem:[%s12935_s11 + $0xb60] sm:$0xff]  ;;  %v11059_v12 = vcombine.high %v1720_v6, %v1728_v15  ;;  %v11058_v0 = vcombine.low %v1720_v6, %v1728_v15 }
 0x3b5   : > { %8387 = vmatpush2.bf16.msra.mxu0 %v11680_v13  ;;  %v11315_v9 = vcombine.high %v1976_v16, %v1984_v18  ;;  %v1704_v13 = vld [vmem:[%s12935_s11 + $0x2a0] sm:$0xff] }
 0x3b6   : > { %8388 = vmatprep.subr.bf16.mxu0 %v11665_v23  ;;  %v1928_v17 = vld [vmem:[%s12935_s11 + $0x9a0] sm:$0xff] }
 0x3b7   : > { %8428 = vmatpush2.bf16.msra.mxu1 %v11936_v14  ;;  %v1712_v14 = vld [vmem:[%s12935_s11 + $0x2e0] sm:$0xff] }
 0x3b8   : > { %8429 = vmatprep.subr.bf16.mxu1 %v11921_v61  ;;  %v1960_v61 = vld [vmem:[%s12935_s11 + $0xaa0] sm:$0xff]  ;;  %v11042_v39 = vcombine.low %v1704_v13, %v1712_v14 }
 0x3b9   : > { %8389 = vmatpush2.bf16.msra.mxu0 %v11664_v27  ;;  %v11299_v31 = vcombine.high %v1960_v61, %v1968_v24  ;;  %v11298_v44 = vcombine.low %v1960_v61, %v1968_v24  ;;  %v1936_v52 = vld [vmem:[%s12935_s11 + $0x9e0] sm:$0xff] }
 0x3ba   : > { %8390 = vmatprep.subr.bf16.mxu0 %v11649_v29  ;;  %v11043_v29 = vcombine.high %v1704_v13, %v1712_v14  ;;  %v1912_v59 = vld [vmem:[%s12935_s11 + $0x920] sm:$0xff]  ;;  %v11266_v1 = vcombine.low %v1928_v17, %v1936_v52 }
 0x3bb   : > { %8430 = vmatpush2.bf16.msra.mxu1 %v11920_v28  ;;  %v11314_v28 = vcombine.low %v1976_v16, %v1984_v18  ;;  %v1920_v63 = vld [vmem:[%s12935_s11 + $0x960] sm:$0xff] }
 0x3bc   : > { %8431 = vmatprep.subr.bf16.mxu1 %v11905_v30  ;;  %v1896_v6 = vld [vmem:[%s12935_s11 + $0x8a0] sm:$0xff]  ;;  %v11250_v18 = vcombine.low %v1912_v59, %v1920_v63 }
 0x3bd   : > { %8391 = vmatpush2.bf16.msra.mxu0 %v11648_v43  ;;  %v1904_v15 = vld [vmem:[%s12935_s11 + $0x8e0] sm:$0xff] }
 0x3be   : > { %8392 = vmatprep.subr.bf16.mxu0 %v11633_v36  ;;  %v1952_v36 = vld [vmem:[%s12935_s11 + $0xa60] sm:$0xff]  ;;  %v11234_v61 = vcombine.low %v1896_v6, %v1904_v15 }
 0x3bf   : > { %8432 = vmatpush2.bf16.msra.mxu1 %v11904_v8  ;;  %v1944_v8 = vld [vmem:[%s12935_s11 + $0xa20] sm:$0xff] }
 0x3c0   : > { %8433 = vmatprep.subr.bf16.mxu1 %v11889_v38  ;;  %v11282_v10 = vcombine.low %v1944_v8, %v1952_v36  ;;  %v1880_v13 = vld [vmem:[%s12935_s11 + $0x820] sm:$0xff] }
 0x3c1   : > { %8393 = vmatpush2.bf16.msra.mxu0 %v11632_v46  ;;  %v1888_v14 = vld [vmem:[%s12935_s11 + $0x860] sm:$0xff] }
 0x3c2   : > { %8394 = vmatprep.subr.bf16.mxu0 %v11617_v48  ;;  %v1672_v48 = vld [vmem:[%s12935_s11 + $0x1a0] sm:$0xff] }
 0x3c3   : > { %8434 = vmatpush2.bf16.msra.mxu1 %v11888_v47  ;;  %v11283_v47 = vcombine.high %v1944_v8, %v1952_v36  ;;  %v1856_v8 = vld [vmem:[%s12935_s11 + $0x760] sm:$0xff] }
 0x3c4   : > { %8435 = vmatprep.subr.bf16.mxu1 %v11873_v50  ;;  %v1680_v50 = vld [vmem:[%s12935_s11 + $0x1e0] sm:$0xff] }
 0x3c5   : > { %8395 = vmatpush2.bf16.msra.mxu0 %v11616_v54  ;;  %v11011_v54 = vcombine.high %v1672_v48, %v1680_v50  ;;  %v11010_v11 = vcombine.low %v1672_v48, %v1680_v50  ;;  %v2104_v36 = vld [vmem:[%s12935_s11 + $0xf20] sm:$0xff] }
 0x3c6   : > { %8396 = vmatprep.subr.bf16.mxu0 %v11601_v56  ;;  %v1656_v56 = vld [vmem:[%s12935_s11 + $0x120] sm:$0xff] }
 0x3c7   : > { %8436 = vmatpush2.bf16.msra.mxu1 %v11872_v55  ;;  %v11267_v55 = vcombine.high %v1928_v17, %v1936_v52  ;;  %v2088_v48 = vld [vmem:[%s12935_s11 + $0xea0] sm:$0xff] }
 0x3c8   : > { %8437 = vmatprep.subr.bf16.mxu1 %v11857_v57  ;;  %v1664_v57 = vld [vmem:[%s12935_s11 + $0x160] sm:$0xff] }
 0x3c9   : > { %8397 = vmatpush2.bf16.msra.mxu0 %v11600_v2  ;;  %v10995_v2 = vcombine.high %v1656_v56, %v1664_v57  ;;  %v10994_v16 = vcombine.low %v1656_v56, %v1664_v57  ;;  %v2096_v50 = vld [vmem:[%s12935_s11 + $0xee0] sm:$0xff] }
 0x3ca   : > { %8448 = vmatprep.subr.bf16.mxu0 %v11075_v4  ;;  %v1640_v4 = vld [vmem:[%s12935_s11 + $0xa0] sm:$0xff] }
 0x3cb   : > { %8438 = vmatpush2.bf16.msra.mxu1 %v11856_v3  ;;  %v11251_v3 = vcombine.high %v1912_v59, %v1920_v63  ;;  %v2072_v56 = vld [vmem:[%s12935_s11 + $0xe20] sm:$0xff]  ;;  %v11426_v63 = vcombine.low %v2088_v48, %v2096_v50 }
 0x3cc   : > { %8489 = vmatprep.subr.bf16.mxu1 %v11331_v33  ;;  %v8154_v23 = vpop.f32.mrf.mxu0  ;;  %8399 = vmatmul.mubr.bf16.vlgmr.msra.gmra.mxu0 %v13166_v20  ;;  %v1648_v33 = vld [vmem:[%s12935_s11 + $0xe0] sm:$0xff] }
 0x3cd   : > { %8449 = vmatpush1.bf16.msra.mxu0 %v11074_v19  ;;  %8480 = vmatprep.mubr.bf16.mxu0 %v13026_v41  ;;  %v10979_v19 = vcombine.high %v1640_v4, %v1648_v33  ;;  %v2080_v57 = vld [vmem:[%s12935_s11 + $0xe60] sm:$0xff] }
 0x3ce   : > { %v8195_v25 = vpop.f32.mrf.mxu1  ;;  %8440 = vmatmul.mubr.bf16.vlgmr.msra.gmra.mxu1 %v13172_v22  ;;  %v8156_v27 = vpop.f32.mrf.mxu0  ;;  %8450 = vmatprep.subr.bf16.mxu0 %v11059_v12  ;;  %v1624_v12 = vld [vmem:[%s12935_s11 + $0x20] sm:$0xff] }
 0x3cf   : > { %v13608_v26 = vadd.f32 %v8195_v25, %v8154_v23  ;;  %8490 = vmatpush1.bf16.msra.mxu1 %v11330_v21  ;;  %8521 = vmatprep.mubr.bf16.mxu1 %v13030_v42  ;;  %v11235_v21 = vcombine.high %v1896_v6, %v1904_v15  ;;  %v10978_v23 = vcombine.low %v1640_v4, %v1648_v33  ;;  %v2056_v4 = vld [vmem:[%s12935_s11 + $0xda0] sm:$0xff] }
 0x3d0   : > { %v8197_v30 = vpop.f32.mrf.mxu1  ;;  %8491 = vmatprep.subr.bf16.mxu1 %v11315_v9  ;;  %v8158_v43 = vpop.f32.mrf.mxu0  ;;  %v1632_v9 = vld [vmem:[%s12935_s11 + $0x60] sm:$0xff]  ;;  %v11219_v25 = vcombine.high %v1880_v13, %v1888_v14  ;;  %v11410_v15 = vcombine.low %v2072_v56, %v2080_v57 }
 0x3d1   : > { %v13613_v40 = vadd.f32 %v8197_v30, %v8156_v27  ;;  %8451 = vmatpush1.bf16.msra.mxu0 %v11058_v0  ;;  %v10963_v24 = vcombine.high %v1624_v12, %v1632_v9  ;;  %v1864_v0 = vld [vmem:[%s12935_s11 + $0x7a0] sm:$0xff]  ;;  %v10962_v30 = vcombine.low %v1624_v12, %v1632_v9 }
 0x3d2   : > { %v8199_v38 = vpop.f32.mrf.mxu1  ;;  %v8159_v32 = vpop.f32.mrf.mxu0  ;;  %8452 = vmatprep.subr.bf16.mxu0 %v11043_v29  ;;  %v1872_v27 = vld [vmem:[%s12935_s11 + $0x7e0] sm:$0xff] }
 0x3d3   : > { %8492 = vmatpush1.bf16.msra.mxu1 %v11314_v28  ;;  %v2120_v28 = vld [vmem:[%s12935_s11 + $0xfa0] sm:$0xff]  ;;  %v11203_v34 = vcombine.high %v1864_v0, %v1872_v27 }
 0x3d4   : > { %v8200_v46 = vpop.f32.mrf.mxu1  ;;  %8493 = vmatprep.subr.bf16.mxu1 %v11299_v31  ;;  %v2128_v29 = vld [vmem:[%s12935_s11 + $0xfe0] sm:$0xff]  ;;  %v11218_v31 = vcombine.low %v1880_v13, %v1888_v14 }
 0x3d5   : > { %8453 = vmatpush1.bf16.msra.mxu0 %v11042_v39  ;;  %v11459_v35 = vcombine.high %v2120_v28, %v2128_v29  ;;  %v1848_v43 = vld [vmem:[%s12935_s11 + $0x720] sm:$0xff]  ;;  %v11202_v39 = vcombine.low %v1864_v0, %v1872_v27  ;;  %v11458_v32 = vcombine.low %v2120_v28, %v2128_v29 }
 0x3d6   : > { %8454 = vmatprep.subr.bf16.mxu0 %v11027_v45  ;;  %v2112_v38 = vld [vmem:[%s12935_s11 + $0xf60] sm:$0xff]  ;;  %v11186_v17 = vcombine.low %v1848_v43, %v1856_v8 }
 0x3d7   : > { %8494 = vmatpush1.bf16.msra.mxu1 %v11298_v44  ;;  %v11187_v44 = vcombine.high %v1848_v43, %v1856_v8  ;;  %v11443_v45 = vcombine.high %v2104_v36, %v2112_v38  ;;  %v1832_v46 = vld [vmem:[%s12935_s11 + $0x6a0] sm:$0xff]  ;;  %v11442_v52 = vcombine.low %v2104_v36, %v2112_v38 }
 0x3d8   : > { %8495 = vmatprep.subr.bf16.mxu1 %v11283_v47  ;;  %v1840_v47 = vld [vmem:[%s12935_s11 + $0x6e0] sm:$0xff] }
 0x3d9   : > { %8455 = vmatpush1.bf16.msra.mxu0 %v11026_v53  ;;  %v11171_v53 = vcombine.high %v1832_v46, %v1840_v47  ;;  %v11170_v59 = vcombine.low %v1832_v46, %v1840_v47  ;;  %v2064_v33 = vld [vmem:[%s12935_s11 + $0xde0] sm:$0xff] }
 0x3da   : > { %8456 = vmatprep.subr.bf16.mxu0 %v11011_v54  ;;  %v1816_v54 = vld [vmem:[%s12935_s11 + $0x620] sm:$0xff]  ;;  %v11394_v14 = vcombine.low %v2056_v4, %v2064_v33 }
 0x3db   : > { %8496 = vmatpush1.bf16.msra.mxu1 %v11282_v10  ;;  %v11427_v10 = vcombine.high %v2088_v48, %v2096_v50  ;;  %v2040_v12 = vld [vmem:[%s12935_s11 + $0xd20] sm:$0xff] }
 0x3dc   : > { %8497 = vmatprep.subr.bf16.mxu1 %v11267_v55  ;;  %v1824_v55 = vld [vmem:[%s12935_s11 + $0x660] sm:$0xff] }
 0x3dd   : > { %8457 = vmatpush1.bf16.msra.mxu0 %v11010_v11  ;;  %v11155_v11 = vcombine.high %v1816_v54, %v1824_v55  ;;  %v11154_v6 = vcombine.low %v1816_v54, %v1824_v55  ;;  %v2048_v9 = vld [vmem:[%s12935_s11 + $0xd60] sm:$0xff] }
 0x3de   : > { %8458 = vmatprep.subr.bf16.mxu0 %v10995_v2  ;;  %v1800_v2 = vld [vmem:[%s12935_s11 + $0x5a0] sm:$0xff]  ;;  %v11378_v29 = vcombine.low %v2040_v12, %v2048_v9 }
 0x3df   : > { %8498 = vmatpush1.bf16.msra.mxu1 %v11266_v1  ;;  %v11411_v1 = vcombine.high %v2072_v56, %v2080_v57  ;;  %v2024_v0 = vld [vmem:[%s12935_s11 + $0xca0] sm:$0xff] }
 0x3e0   : > { %8499 = vmatprep.subr.bf16.mxu1 %v11251_v3  ;;  %v1808_v3 = vld [vmem:[%s12935_s11 + $0x5e0] sm:$0xff] }
 0x3e1   : > { %8459 = vmatpush1.bf16.msra.mxu0 %v10994_v16  ;;  %v11139_v16 = vcombine.high %v1800_v2, %v1808_v3  ;;  %v11138_v13 = vcombine.low %v1800_v2, %v1808_v3  ;;  %v2032_v27 = vld [vmem:[%s12935_s11 + $0xce0] sm:$0xff] }
 0x3e2   : > { %8460 = vmatprep.subr.bf16.mxu0 %v10979_v19  ;;  %v1784_v19 = vld [vmem:[%s12935_s11 + $0x520] sm:$0xff]  ;;  %v11362_v38 = vcombine.low %v2024_v0, %v2032_v27 }
 0x3e3   : > { %8500 = vmatpush1.bf16.msra.mxu1 %v11250_v18  ;;  %v11395_v18 = vcombine.high %v2056_v4, %v2064_v33  ;;  %v2008_v43 = vld [vmem:[%s12935_s11 + $0xc20] sm:$0xff] }
 0x3e4   : > { %8501 = vmatprep.subr.bf16.mxu1 %v11235_v21  ;;  %v1792_v21 = vld [vmem:[%s12935_s11 + $0x560] sm:$0xff] }
 0x3e5   : > { %8461 = vmatpush1.bf16.msra.mxu0 %v10978_v23  ;;  %v11123_v23 = vcombine.high %v1784_v19, %v1792_v21  ;;  %v11122_v28 = vcombine.low %v1784_v19, %v1792_v21  ;;  %v2016_v8 = vld [vmem:[%s12935_s11 + $0xc60] sm:$0xff] }
 0x3e6   : > { %8462 = vmatprep.subr.bf16.mxu0 %v10963_v24  ;;  %v1768_v24 = vld [vmem:[%s12935_s11 + $0x4a0] sm:$0xff]  ;;  %v11346_v50 = vcombine.low %v2008_v43, %v2016_v8 }
 0x3e7   : > { %8502 = vmatpush1.bf16.msra.mxu1 %v11234_v61  ;;  %v11379_v61 = vcombine.high %v2040_v12, %v2048_v9  ;;  %v2504_v46 = vld [vmem:[%s12935_s11 + $0x1ba0] sm:$0xff] }
 0x3e8   : > { %8503 = vmatprep.subr.bf16.mxu1 %v11219_v25  ;;  %v1776_v25 = vld [vmem:[%s12935_s11 + $0x4e0] sm:$0xff] }
 0x3e9   : > { %8463 = vmatpush1.bf16.msra.mxu0 %v10962_v30  ;;  %v11107_v30 = vcombine.high %v1768_v24, %v1776_v25  ;;  %v11106_v36 = vcombine.low %v1768_v24, %v1776_v25  ;;  %v2512_v47 = vld [vmem:[%s12935_s11 + $0x1be0] sm:$0xff] }
 0x3ea   : > { %8464 = vmatprep.subr.bf16.mxu0 %v11203_v34  ;;  %v1752_v34 = vld [vmem:[%s12935_s11 + $0x420] sm:$0xff]  ;;  %v11842_v57 = vcombine.low %v2504_v46, %v2512_v47 }
 0x3eb   : > { %8504 = vmatpush1.bf16.msra.mxu1 %v11218_v31  ;;  %v11363_v31 = vcombine.high %v2024_v0, %v2032_v27  ;;  %v2488_v54 = vld [vmem:[%s12935_s11 + $0x1b20] sm:$0xff] }
 0x3ec   : > { %8505 = vmatprep.subr.bf16.mxu1 %v11459_v35  ;;  %v1760_v35 = vld [vmem:[%s12935_s11 + $0x460] sm:$0xff] }
 0x3ed   : > { %8465 = vmatpush2.bf16.msra.mxu0 %v11202_v39  ;;  %v11091_v39 = vcombine.high %v1752_v34, %v1760_v35  ;;  %v11090_v48 = vcombine.low %v1752_v34, %v1760_v35  ;;  %v2496_v55 = vld [vmem:[%s12935_s11 + $0x1b60] sm:$0xff] }
 0x3ee   : > { %8466 = vmatprep.subr.bf16.mxu0 %v11187_v44  ;;  %v2248_v44 = vld [vmem:[%s12935_s11 + $0x13a0] sm:$0xff] }
 0x3ef   : > { %8506 = vmatpush2.bf16.msra.mxu1 %v11458_v32  ;;  %v11347_v32 = vcombine.high %v2008_v43, %v2016_v8  ;;  %v2472_v3 = vld [vmem:[%s12935_s11 + $0x1aa0] sm:$0xff] }
 0x3f0   : > { %8507 = vmatprep.subr.bf16.mxu1 %v11443_v45  ;;  %v2256_v45 = vld [vmem:[%s12935_s11 + $0x13e0] sm:$0xff] }
 0x3f1   : > { %8467 = vmatpush2.bf16.msra.mxu0 %v11186_v17  ;;  %v11587_v17 = vcombine.high %v2248_v44, %v2256_v45  ;;  %v11586_v56 = vcombine.low %v2248_v44, %v2256_v45  ;;  %v2480_v4 = vld [vmem:[%s12935_s11 + $0x1ae0] sm:$0xff] }
 0x3f2   : > { %8468 = vmatprep.subr.bf16.mxu0 %v11171_v53  ;;  %v2232_v53 = vld [vmem:[%s12935_s11 + $0x1320] sm:$0xff] }
 0x3f3   : > { %8508 = vmatpush2.bf16.msra.mxu1 %v11442_v52  ;;  %v11843_v52 = vcombine.high %v2504_v46, %v2512_v47  ;;  %v2464_v24 = vld [vmem:[%s12935_s11 + $0x1a60] sm:$0xff] }
 0x3f4   : > { %8509 = vmatprep.subr.bf16.mxu1 %v11427_v10  ;;  %v2240_v10 = vld [vmem:[%s12935_s11 + $0x1360] sm:$0xff] }
 0x3f5   : > { %8469 = vmatpush2.bf16.msra.mxu0 %v11170_v59  ;;  %v11571_v59 = vcombine.high %v2232_v53, %v2240_v10  ;;  %v2184_v34 = vld [vmem:[%s12935_s11 + $0x11a0] sm:$0xff] }
 0x3f6   : > { %8470 = vmatprep.subr.bf16.mxu0 %v11155_v11  ;;  %v2216_v11 = vld [vmem:[%s12935_s11 + $0x12a0] sm:$0xff] }
 0x3f7   : > { %8510 = vmatpush2.bf16.msra.mxu1 %v11426_v63  ;;  %v11827_v63 = vcombine.high %v2488_v54, %v2496_v55  ;;  %v2192_v35 = vld [vmem:[%s12935_s11 + $0x11e0] sm:$0xff] }
 0x3f8   : > { %8511 = vmatprep.subr.bf16.mxu1 %v11411_v1  ;;  %v2224_v1 = vld [vmem:[%s12935_s11 + $0x12e0] sm:$0xff] }
 0x3f9   : > { %8471 = vmatpush2.bf16.msra.mxu0 %v11154_v6  ;;  %v11555_v19 = vcombine.high %v2216_v11, %v2224_v1  ;;  %v2440_v43 = vld [vmem:[%s12935_s11 + $0x19a0] sm:$0xff] }
 0x3fa   : > { %8472 = vmatprep.subr.bf16.mxu0 %v11139_v16  ;;  %v2448_v8 = vld [vmem:[%s12935_s11 + $0x19e0] sm:$0xff] }
 0x3fb   : > { %8512 = vmatpush2.bf16.msra.mxu1 %v11410_v15  ;;  %v11570_v15 = vcombine.low %v2232_v53, %v2240_v10  ;;  %v2168_v44 = vld [vmem:[%s12935_s11 + $0x1120] sm:$0xff] }
 0x3fc   : > { %8513 = vmatprep.subr.bf16.mxu1 %v11395_v18  ;;  %v11826_v18 = vcombine.low %v2488_v54, %v2496_v55  ;;  %v2176_v45 = vld [vmem:[%s12935_s11 + $0x1160] sm:$0xff] }
 0x3fd   : > { %8473 = vmatpush2.bf16.msra.mxu0 %v11138_v13  ;;  %v2200_v13 = vld [vmem:[%s12935_s11 + $0x1220] sm:$0xff] }
 0x3fe   : > { %8474 = vmatprep.subr.bf16.mxu0 %v11123_v23  ;;  %v2424_v46 = vld [vmem:[%s12935_s11 + $0x1920] sm:$0xff] }
 0x3ff   : > { %8514 = vmatpush2.bf16.msra.mxu1 %v11394_v14  ;;  %v2208_v14 = vld [vmem:[%s12935_s11 + $0x1260] sm:$0xff] }
 0x400   : > { %8515 = vmatprep.subr.bf16.mxu1 %v11379_v61  ;;  %v2456_v61 = vld [vmem:[%s12935_s11 + $0x1a20] sm:$0xff] }
 0x401   : > { %8475 = vmatpush2.bf16.msra.mxu0 %v11122_v28  ;;  %v11810_v28 = vcombine.low %v2472_v3, %v2480_v4  ;;  %v2432_v47 = vld [vmem:[%s12935_s11 + $0x1960] sm:$0xff] }
 0x402   : > { %8476 = vmatprep.subr.bf16.mxu0 %v11107_v30  ;;  %v2152_v53 = vld [vmem:[%s12935_s11 + $0x10a0] sm:$0xff] }
 0x403   : > { %8516 = vmatpush2.bf16.msra.mxu1 %v11378_v29  ;;  %v11539_v29 = vcombine.high %v2200_v13, %v2208_v14  ;;  %v2160_v10 = vld [vmem:[%s12935_s11 + $0x10e0] sm:$0xff] }
 0x404   : > { %8517 = vmatprep.subr.bf16.mxu1 %v11363_v31  ;;  %v11795_v31 = vcombine.high %v2456_v61, %v2464_v24  ;;  %v2408_v54 = vld [vmem:[%s12935_s11 + $0x18a0] sm:$0xff] }
 0x405   : > { %8477 = vmatpush2.bf16.msra.mxu0 %v11106_v36  ;;  %v11538_v36 = vcombine.low %v2200_v13, %v2208_v14  ;;  %v2416_v55 = vld [vmem:[%s12935_s11 + $0x18e0] sm:$0xff] }
 0x406   : > { %8478 = vmatprep.subr.bf16.mxu0 %v11091_v39  ;;  %v11523_v39 = vcombine.high %v2184_v34, %v2192_v35 }
 0x407   : > { %8518 = vmatpush2.bf16.msra.mxu1 %v11362_v38  ;;  %v11794_v38 = vcombine.low %v2456_v61, %v2464_v24  ;;  %v2368_v61 = vld [vmem:[%s12935_s11 + $0x1760] sm:$0xff] }
 0x408   : > { %8519 = vmatprep.subr.bf16.mxu1 %v11347_v32  ;;  %v11779_v32 = vcombine.high %v2440_v43, %v2448_v8  ;;  %v2616_v24 = vld [vmem:[%s12935_s11 + $0x1f20] sm:$0xff] }
 0x409   : > { %8479 = vmatpush2.bf16.msra.mxu0 %v11090_v48  ;;  %v11522_v48 = vcombine.low %v2184_v34, %v2192_v35  ;;  %v2600_v34 = vld [vmem:[%s12935_s11 + $0x1ea0] sm:$0xff] }
 0x40a   : > { %8530 = vmatprep.subr.bf16.mxu0 %v11587_v17  ;;  %v11507_v17 = vcombine.high %v2168_v44, %v2176_v45  ;;  %v2608_v35 = vld [vmem:[%s12935_s11 + $0x1ee0] sm:$0xff] }
 0x40b   : > { %8520 = vmatpush2.bf16.msra.mxu1 %v11346_v50  ;;  %v11778_v50 = vcombine.low %v2440_v43, %v2448_v8 }
 0x40c   : > { %8571 = vmatprep.subr.bf16.mxu1 %v11843_v52  ;;  %v8236_v2 = vpop.f32.mrf.mxu0  ;;  %8481 = vmatmul.mubr.bf16.vlgmr.msra.gmra.mxu0 %v13076_v58  ;;  %v11763_v52 = vcombine.high %v2424_v46, %v2432_v47 }
 0x40d   : > { %v8237_v33 = vadd.f32 %v8236_v2, %v13608_v26  ;;  %8531 = vmatpush1.bf16.msra.mxu0 %v11586_v56  ;;  %v11811_v26 = vcombine.high %v2472_v3, %v2480_v4  ;;  %8562 = vmatprep.mubr.bf16.mxu0 %v13094_v5  ;;  %v11506_v56 = vcombine.low %v2168_v44, %v2176_v45  ;;  %v2392_v2 = vld [vmem:[%s12935_s11 + $0x1820] sm:$0xff] }
 0x40e   : > { %v8277_v6 = vpop.f32.mrf.mxu1  ;;  %8522 = vmatmul.mubr.bf16.vlgmr.msra.gmra.mxu1 %v13085_v62  ;;  %v8238_v16 = vpop.f32.mrf.mxu0  ;;  %8532 = vmatprep.subr.bf16.mxu0 %v11571_v59  ;;  %v11491_v59 = vcombine.high %v2152_v53, %v2160_v10  ;;  %v2400_v3 = vld [vmem:[%s12935_s11 + $0x1860] sm:$0xff]  ;;  %v11490_v4 = vcombine.low %v2152_v53, %v2160_v10 }
 0x40f   : > { %8572 = vmatpush1.bf16.msra.mxu1 %v11842_v57  ;;  %v13681_v21 = vadd.f32 %v8277_v6, %v8237_v33  ;;  %v8239_v12 = vadd.f32 %v8238_v16, %v13613_v40  ;;  %8603 = vmatprep.mubr.bf16.mxu1 %v13101_v7  ;;  %v11554_v40 = vcombine.low %v2216_v11, %v2224_v1  ;;  %v2136_v11 = vld [vmem:[%s12935_s11 + $0x1020] sm:$0xff] }
 0x410   : > { %v8279_v9 = vpop.f32.mrf.mxu1  ;;  %8573 = vmatprep.subr.bf16.mxu1 %v11827_v63  ;;  %v8240_v23 = vpop.f32.mrf.mxu0  ;;  %v11762_v57 = vcombine.low %v2424_v46, %v2432_v47  ;;  %v11747_v63 = vcombine.high %v2408_v54, %v2416_v55  ;;  %v2144_v1 = vld [vmem:[%s12935_s11 + $0x1060] sm:$0xff]  ;;  %v11746_v33 = vcombine.low %v2408_v54, %v2416_v55  ;;  %v11938_v47 = vcombine.low %v2600_v34, %v2608_v35 }
 0x411   : > { %v13690_v25 = vadd.f32 %v8279_v9, %v8239_v12  ;;  %8533 = vmatpush1.bf16.msra.mxu0 %v11570_v15  ;;  %v11475_v6 = vcombine.high %v2136_v11, %v2144_v1  ;;  %v11731_v15 = vcombine.high %v2392_v2, %v2400_v3  ;;  %v2376_v16 = vld [vmem:[%s12935_s11 + $0x17a0] sm:$0xff]  ;;  %v11474_v9 = vcombine.low %v2136_v11, %v2144_v1 }
 0x412   : > { %v8281_v0 = vpop.f32.mrf.mxu1  ;;  %v8241_v27 = vpop.f32.mrf.mxu0  ;;  %8534 = vmatprep.subr.bf16.mxu0 %v11555_v19  ;;  %v2632_v19 = vld [vmem:[%s12935_s11 + $0x1fa0] sm:$0xff] }
 0x413   : > { %8574 = vmatpush1.bf16.msra.mxu1 %v11826_v18  ;;  %v2384_v18 = vld [vmem:[%s12935_s11 + $0x17e0] sm:$0xff] }
 0x414   : > { %v8282_v30 = vpop.f32.mrf.mxu1  ;;  %8575 = vmatprep.subr.bf16.mxu1 %v11811_v26  ;;  %v2640_v12 = vld [vmem:[%s12935_s11 + $0x1fe0] sm:$0xff]  ;;  %v11730_v26 = vcombine.low %v2392_v2, %v2400_v3  ;;  %v11715_v13 = vcombine.high %v2376_v16, %v2384_v18 }
 0x415   : > { %8535 = vmatpush1.bf16.msra.mxu0 %v11554_v40  ;;  %v11971_v14 = vcombine.high %v2632_v19, %v2640_v12  ;;  %v2360_v23 = vld [vmem:[%s12935_s11 + $0x1720] sm:$0xff]  ;;  %v11714_v40 = vcombine.low %v2376_v16, %v2384_v18  ;;  %v11970_v27 = vcombine.low %v2632_v19, %v2640_v12 }
 0x416   : > { %8536 = vmatprep.subr.bf16.mxu0 %v11539_v29  ;;  %v2624_v0 = vld [vmem:[%s12935_s11 + $0x1f60] sm:$0xff]  ;;  %v11698_v43 = vcombine.low %v2360_v23, %v2368_v61 }
 0x417   : > { %8576 = vmatpush1.bf16.msra.mxu1 %v11810_v28  ;;  %v11699_v28 = vcombine.high %v2360_v23, %v2368_v61  ;;  %v11955_v29 = vcombine.high %v2616_v24, %v2624_v0  ;;  %v2344_v30 = vld [vmem:[%s12935_s11 + $0x16a0] sm:$0xff]  ;;  %v11954_v8 = vcombine.low %v2616_v24, %v2624_v0 }
 0x418   : > { %8577 = vmatprep.subr.bf16.mxu1 %v11795_v31  ;;  %v2352_v31 = vld [vmem:[%s12935_s11 + $0x16e0] sm:$0xff] }
 0x419   : > { %8537 = vmatpush1.bf16.msra.mxu0 %v11538_v36  ;;  %v11683_v36 = vcombine.high %v2344_v30, %v2352_v31  ;;  %v2584_v44 = vld [vmem:[%s12935_s11 + $0x1e20] sm:$0xff]  ;;  %v11682_v46 = vcombine.low %v2344_v30, %v2352_v31  ;;  %v1993_v30 = vld [vmem:[%s12935_s11 + $0xba8] sm:$0xff] }
 0x41a   : > { %8538 = vmatprep.subr.bf16.mxu0 %v11523_v39  ;;  %v2328_v39 = vld [vmem:[%s12935_s11 + $0x1620] sm:$0xff]  ;;  %v2001_v31 = vld [vmem:[%s12935_s11 + $0xbe8] sm:$0xff] }
 0x41b   : > { %8578 = vmatpush1.bf16.msra.mxu1 %v11794_v38  ;;  %v11939_v38 = vcombine.high %v2600_v34, %v2608_v35  ;;  %v2592_v45 = vld [vmem:[%s12935_s11 + $0x1e60] sm:$0xff] }
 0x41c   : > { %8579 = vmatprep.subr.bf16.mxu1 %v11779_v32  ;;  %v2336_v32 = vld [vmem:[%s12935_s11 + $0x1660] sm:$0xff]  ;;  %v11922_v55 = vcombine.low %v2584_v44, %v2592_v45 }
 0x41d   : > { %8539 = vmatpush1.bf16.msra.mxu0 %v11522_v48  ;;  %v11667_v48 = vcombine.high %v2328_v39, %v2336_v32  ;;  %v2568_v53 = vld [vmem:[%s12935_s11 + $0x1da0] sm:$0xff]  ;;  %v11666_v54 = vcombine.low %v2328_v39, %v2336_v32  ;;  %v1977_v39 = vld [vmem:[%s12935_s11 + $0xb28] sm:$0xff] }
 0x41e   : > { %8540 = vmatprep.subr.bf16.mxu0 %v11507_v17  ;;  %v2312_v17 = vld [vmem:[%s12935_s11 + $0x15a0] sm:$0xff]  ;;  %v1985_v32 = vld [vmem:[%s12935_s11 + $0xb68] sm:$0xff] }
 0x41f   : > { %8580 = vmatpush1.bf16.msra.mxu1 %v11778_v50  ;;  %v11923_v50 = vcombine.high %v2584_v44, %v2592_v45  ;;  %v2576_v10 = vld [vmem:[%s12935_s11 + $0x1de0] sm:$0xff]  ;;  %v11332_v45 = vcombine.low %v1993_v30, %v2001_v31 }
 0x420   : > { %8581 = vmatprep.subr.bf16.mxu1 %v11763_v52  ;;  %v2320_v52 = vld [vmem:[%s12935_s11 + $0x15e0] sm:$0xff]  ;;  %v11906_v3 = vcombine.low %v2568_v53, %v2576_v10 }
 0x421   : > { %8541 = vmatpush1.bf16.msra.mxu0 %v11506_v56  ;;  %v11651_v56 = vcombine.high %v2312_v17, %v2320_v52  ;;  %v2552_v11 = vld [vmem:[%s12935_s11 + $0x1d20] sm:$0xff]  ;;  %v11650_v2 = vcombine.low %v2312_v17, %v2320_v52  ;;  %v1961_v52 = vld [vmem:[%s12935_s11 + $0xaa8] sm:$0xff] }
 0x422   : > { %8542 = vmatprep.subr.bf16.mxu0 %v11491_v59  ;;  %v2296_v59 = vld [vmem:[%s12935_s11 + $0x1520] sm:$0xff] }
 0x423   : > { %8582 = vmatpush1.bf16.msra.mxu1 %v11762_v57  ;;  %v11907_v57 = vcombine.high %v2568_v53, %v2576_v10  ;;  %v2560_v1 = vld [vmem:[%s12935_s11 + $0x1d60] sm:$0xff]  ;;  %v1969_v53 = vld [vmem:[%s12935_s11 + $0xae8] sm:$0xff] }
 0x424   : > { %8583 = vmatprep.subr.bf16.mxu1 %v11747_v63  ;;  %v2304_v63 = vld [vmem:[%s12935_s11 + $0x1560] sm:$0xff]  ;;  %v11890_v12 = vcombine.low %v2552_v11, %v2560_v1 }
 0x425   : > { %8543 = vmatpush1.bf16.msra.mxu0 %v11490_v4  ;;  %v11635_v4 = vcombine.high %v2296_v59, %v2304_v63  ;;  %v2536_v16 = vld [vmem:[%s12935_s11 + $0x1ca0] sm:$0xff]  ;;  %v11634_v19 = vcombine.low %v2296_v59, %v2304_v63 }
 0x426   : > { %8544 = vmatprep.subr.bf16.mxu0 %v11475_v6  ;;  %v2280_v6 = vld [vmem:[%s12935_s11 + $0x14a0] sm:$0xff] }
 0x427   : > { %8584 = vmatpush1.bf16.msra.mxu1 %v11746_v33  ;;  %v11891_v33 = vcombine.high %v2552_v11, %v2560_v1  ;;  %v2544_v18 = vld [vmem:[%s12935_s11 + $0x1ce0] sm:$0xff]  ;;  %v11301_v11 = vcombine.high %v1961_v52, %v1969_v53  ;;  %v1689_v1 = vld [vmem:[%s12935_s11 + $0x228] sm:$0xff] }
 0x428   : > { %8585 = vmatprep.subr.bf16.mxu1 %v11731_v15  ;;  %v2288_v15 = vld [vmem:[%s12935_s11 + $0x14e0] sm:$0xff]  ;;  %v11874_v0 = vcombine.low %v2536_v16, %v2544_v18 }
 0x429   : > { %8545 = vmatpush1.bf16.msra.mxu0 %v11474_v9  ;;  %v11619_v9 = vcombine.high %v2280_v6, %v2288_v15  ;;  %v2520_v23 = vld [vmem:[%s12935_s11 + $0x1c20] sm:$0xff]  ;;  %v11618_v24 = vcombine.low %v2280_v6, %v2288_v15  ;;  %v1953_v6 = vld [vmem:[%s12935_s11 + $0xa68] sm:$0xff] }
 0x42a   : > { %8546 = vmatprep.subr.bf16.mxu0 %v11715_v13  ;;  %v2264_v13 = vld [vmem:[%s12935_s11 + $0x1420] sm:$0xff] }
 0x42b   : > { %8586 = vmatpush1.bf16.msra.mxu1 %v11730_v26  ;;  %v11875_v26 = vcombine.high %v2536_v16, %v2544_v18  ;;  %v2528_v61 = vld [vmem:[%s12935_s11 + $0x1c60] sm:$0xff] }
 0x42c   : > { %8587 = vmatprep.subr.bf16.mxu1 %v11971_v14  ;;  %v2272_v14 = vld [vmem:[%s12935_s11 + $0x1460] sm:$0xff]  ;;  %v11858_v35 = vcombine.low %v2520_v23, %v2528_v61 }
 0x42d   : > { %8547 = vmatpush2.bf16.msra.mxu0 %v11714_v40  ;;  %v11603_v40 = vcombine.high %v2264_v13, %v2272_v14  ;;  %v11602_v34 = vcombine.low %v2264_v13, %v2272_v14  ;;  %v1673_v13 = vld [vmem:[%s12935_s11 + $0x1a8] sm:$0xff] }
 0x42e   : > { %8548 = vmatprep.subr.bf16.mxu0 %v11699_v28  ;;  %v1737_v28 = vld [vmem:[%s12935_s11 + $0x3a8] sm:$0xff] }
 0x42f   : > { %8588 = vmatpush2.bf16.msra.mxu1 %v11970_v27  ;;  %v11859_v27 = vcombine.high %v2520_v23, %v2528_v61  ;;  %v1681_v14 = vld [vmem:[%s12935_s11 + $0x1e8] sm:$0xff] }
 0x430   : > { %8589 = vmatprep.subr.bf16.mxu1 %v11955_v29  ;;  %v1745_v29 = vld [vmem:[%s12935_s11 + $0x3e8] sm:$0xff] }
 0x431   : > { %8549 = vmatpush2.bf16.msra.mxu0 %v11698_v43  ;;  %v11077_v43 = vcombine.high %v1737_v28, %v1745_v29  ;;  %v11076_v44 = vcombine.low %v1737_v28, %v1745_v29  ;;  %v1929_v23 = vld [vmem:[%s12935_s11 + $0x9a8] sm:$0xff] }
 0x432   : > { %8550 = vmatprep.subr.bf16.mxu0 %v11683_v36  ;;  %v1721_v36 = vld [vmem:[%s12935_s11 + $0x328] sm:$0xff] }
 0x433   : > { %8590 = vmatpush2.bf16.msra.mxu1 %v11954_v8  ;;  %v11333_v8 = vcombine.high %v1993_v30, %v2001_v31  ;;  %v1937_v61 = vld [vmem:[%s12935_s11 + $0x9e8] sm:$0xff] }
 0x434   : > { %8591 = vmatprep.subr.bf16.mxu1 %v11939_v38  ;;  %v1729_v38 = vld [vmem:[%s12935_s11 + $0x368] sm:$0xff] }
 0x435   : > { %8551 = vmatpush2.bf16.msra.mxu0 %v11682_v46  ;;  %v11061_v46 = vcombine.high %v1721_v36, %v1729_v38  ;;  %v1657_v28 = vld [vmem:[%s12935_s11 + $0x128] sm:$0xff] }
 0x436   : > { %8552 = vmatprep.subr.bf16.mxu0 %v11667_v48  ;;  %v1705_v48 = vld [vmem:[%s12935_s11 + $0x2a8] sm:$0xff] }
 0x437   : > { %8592 = vmatpush2.bf16.msra.mxu1 %v11938_v47  ;;  %v11317_v47 = vcombine.high %v1977_v39, %v1985_v32  ;;  %v1665_v29 = vld [vmem:[%s12935_s11 + $0x168] sm:$0xff] }
 0x438   : > { %8593 = vmatprep.subr.bf16.mxu1 %v11923_v50  ;;  %v1713_v50 = vld [vmem:[%s12935_s11 + $0x2e8] sm:$0xff] }
 0x439   : > { %8553 = vmatpush2.bf16.msra.mxu0 %v11666_v54  ;;  %v11060_v54 = vcombine.low %v1721_v36, %v1729_v38  ;;  %v11045_v59 = vcombine.high %v1705_v48, %v1713_v50  ;;  %v11044_v16 = vcombine.low %v1705_v48, %v1713_v50  ;;  %v1913_v30 = vld [vmem:[%s12935_s11 + $0x928] sm:$0xff] }
 0x43a   : > { %8554 = vmatprep.subr.bf16.mxu0 %v11651_v56  ;;  %v1921_v31 = vld [vmem:[%s12935_s11 + $0x968] sm:$0xff] }
 0x43b   : > { %8594 = vmatpush2.bf16.msra.mxu1 %v11922_v55  ;;  %v1641_v36 = vld [vmem:[%s12935_s11 + $0xa8] sm:$0xff] }
 0x43c   : > { %8595 = vmatprep.subr.bf16.mxu1 %v11907_v57  ;;  %v11316_v57 = vcombine.low %v1977_v39, %v1985_v32  ;;  %v1649_v38 = vld [vmem:[%s12935_s11 + $0xe8] sm:$0xff] }
 0x43d   : > { %8555 = vmatpush2.bf16.msra.mxu0 %v11650_v2  ;;  %v1697_v2 = vld [vmem:[%s12935_s11 + $0x268] sm:$0xff] }
 0x43e   : > { %8556 = vmatprep.subr.bf16.mxu0 %v11635_v4  ;;  %v1897_v39 = vld [vmem:[%s12935_s11 + $0x8a8] sm:$0xff] }
 0x43f   : > { %8596 = vmatpush2.bf16.msra.mxu1 %v11906_v3  ;;  %v1905_v32 = vld [vmem:[%s12935_s11 + $0x8e8] sm:$0xff] }
 0x440   : > { %8597 = vmatprep.subr.bf16.mxu1 %v11891_v33  ;;  %v1945_v33 = vld [vmem:[%s12935_s11 + $0xa28] sm:$0xff] }
 0x441   : > { %8557 = vmatpush2.bf16.msra.mxu0 %v11634_v19  ;;  %v11300_v19 = vcombine.low %v1961_v52, %v1969_v53  ;;  %v1625_v48 = vld [vmem:[%s12935_s11 + $0x28] sm:$0xff]  ;;  %v10980_v53 = vcombine.low %v1641_v36, %v1649_v38 }
 0x442   : > { %8558 = vmatprep.subr.bf16.mxu0 %v11619_v9  ;;  %v1633_v50 = vld [vmem:[%s12935_s11 + $0x68] sm:$0xff] }
 0x443   : > { %8598 = vmatpush2.bf16.msra.mxu1 %v11890_v12  ;;  %v11029_v12 = vcombine.high %v1689_v1, %v1697_v2  ;;  %v1889_v52 = vld [vmem:[%s12935_s11 + $0x868] sm:$0xff] }
 0x444   : > { %8599 = vmatprep.subr.bf16.mxu1 %v11875_v26  ;;  %v11285_v26 = vcombine.high %v1945_v33, %v1953_v6 }
 0x445   : > { %8559 = vmatpush2.bf16.msra.mxu0 %v11618_v24  ;;  %v11028_v24 = vcombine.low %v1689_v1, %v1697_v2  ;;  %v10964_v1 = vcombine.low %v1625_v48, %v1633_v50 }
 0x446   : > { %8560 = vmatprep.subr.bf16.mxu0 %v11603_v40  ;;  %v11013_v40 = vcombine.high %v1673_v13, %v1681_v14 }
 0x447   : > { %8600 = vmatpush2.bf16.msra.mxu1 %v11874_v0  ;;  %v11284_v0 = vcombine.low %v1945_v33, %v1953_v6  ;;  %v1849_v6 = vld [vmem:[%s12935_s11 + $0x728] sm:$0xff] }
 0x448   : > { %8601 = vmatprep.subr.bf16.mxu1 %v11859_v27  ;;  %v11269_v27 = vcombine.high %v1929_v23, %v1937_v61 }
 0x449   : > { %8561 = vmatpush2.bf16.msra.mxu0 %v11602_v34  ;;  %v11012_v34 = vcombine.low %v1673_v13, %v1681_v14  ;;  %v1833_v13 = vld [vmem:[%s12935_s11 + $0x6a8] sm:$0xff] }
 0x44a   : > { %8612 = vmatprep.subr.bf16.mxu0 %v11077_v43  ;;  %v10997_v43 = vcombine.high %v1657_v28, %v1665_v29  ;;  %v1841_v14 = vld [vmem:[%s12935_s11 + $0x6e8] sm:$0xff] }
 0x44b   : > { %8602 = vmatpush2.bf16.msra.mxu1 %v11858_v35  ;;  %v11268_v35 = vcombine.low %v1929_v23, %v1937_v61  ;;  %v2089_v23 = vld [vmem:[%s12935_s11 + $0xea8] sm:$0xff] }
 0x44c   : > { %8653 = vmatprep.subr.bf16.mxu1 %v11333_v8  ;;  %v8318_v17 = vpop.f32.mrf.mxu0  ;;  %8563 = vmatmul.mubr.bf16.vlgmr.msra.gmra.mxu0 %v13166_v20  ;;  %v11253_v8 = vcombine.high %v1913_v30, %v1921_v31  ;;  %v2097_v61 = vld [vmem:[%s12935_s11 + $0xee8] sm:$0xff] }
 0x44d   : > { %8613 = vmatpush1.bf16.msra.mxu0 %v11076_v44  ;;  %8644 = vmatprep.mubr.bf16.mxu0 %v13026_v41  ;;  %v10996_v44 = vcombine.low %v1657_v28, %v1665_v29  ;;  %v1817_v28 = vld [vmem:[%s12935_s11 + $0x628] sm:$0xff] }
 0x44e   : > { %v8359_v10 = vpop.f32.mrf.mxu1  ;;  %8604 = vmatmul.mubr.bf16.vlgmr.msra.gmra.mxu1 %v13172_v22  ;;  %v8320_v56 = vpop.f32.mrf.mxu0  ;;  %8614 = vmatprep.subr.bf16.mxu0 %v11061_v46  ;;  %v10981_v46 = vcombine.high %v1641_v36, %v1649_v38  ;;  %v1825_v29 = vld [vmem:[%s12935_s11 + $0x668] sm:$0xff] }
 0x44f   : > { %v13754_v55 = vadd.f32 %v8359_v10, %v8318_v17  ;;  %8654 = vmatpush1.bf16.msra.mxu1 %v11332_v45  ;;  %8685 = vmatprep.mubr.bf16.mxu1 %v13030_v42  ;;  %v11252_v45 = vcombine.low %v1913_v30, %v1921_v31  ;;  %v1881_v17 = vld [vmem:[%s12935_s11 + $0x828] sm:$0xff]  ;;  %v11236_v10 = vcombine.low %v1897_v39, %v1905_v32 }
 0x450   : > { %v8361_v63 = vpop.f32.mrf.mxu1  ;;  %8655 = vmatprep.subr.bf16.mxu1 %v11317_v47  ;;  %v8322_v4 = vpop.f32.mrf.mxu0  ;;  %v11237_v47 = vcombine.high %v1897_v39, %v1905_v32  ;;  %v11220_v2 = vcombine.low %v1881_v17, %v1889_v52  ;;  %v2073_v30 = vld [vmem:[%s12935_s11 + $0xe28] sm:$0xff] }
 0x451   : > { %v13759_v3 = vadd.f32 %v8361_v63, %v8320_v56  ;;  %8615 = vmatpush1.bf16.msra.mxu0 %v11060_v54  ;;  %v10965_v54 = vcombine.high %v1625_v48, %v1633_v50  ;;  %v11221_v56 = vcombine.high %v1881_v17, %v1889_v52  ;;  %v2121_v63 = vld [vmem:[%s12935_s11 + $0xfa8] sm:$0xff] }
 0x452   : > { %v8363_v15 = vpop.f32.mrf.mxu1  ;;  %v8323_v18 = vpop.f32.mrf.mxu0  ;;  %8616 = vmatprep.subr.bf16.mxu0 %v11045_v59  ;;  %v1873_v59 = vld [vmem:[%s12935_s11 + $0x7e8] sm:$0xff] }
 0x453   : > { %8656 = vmatpush1.bf16.msra.mxu1 %v11316_v57  ;;  %v1865_v57 = vld [vmem:[%s12935_s11 + $0x7a8] sm:$0xff] }
 0x454   : > { %v8364_v9 = vpop.f32.mrf.mxu1  ;;  %8657 = vmatprep.subr.bf16.mxu1 %v11301_v11  ;;  %v2129_v11 = vld [vmem:[%s12935_s11 + $0xfe8] sm:$0xff]  ;;  %v11205_v4 = vcombine.high %v1865_v57, %v1873_v59 }
 0x455   : > { %8617 = vmatpush1.bf16.msra.mxu0 %v11044_v16  ;;  %v11461_v33 = vcombine.high %v2121_v63, %v2129_v11  ;;  %v1857_v15 = vld [vmem:[%s12935_s11 + $0x768] sm:$0xff] }
 0x456   : > { %8618 = vmatprep.subr.bf16.mxu0 %v11029_v12  ;;  %v2105_v16 = vld [vmem:[%s12935_s11 + $0xf28] sm:$0xff]  ;;  %v11460_v12 = vcombine.low %v2121_v63, %v2129_v11  ;;  %v11189_v9 = vcombine.high %v1849_v6, %v1857_v15 }
 0x457   : > { %8658 = vmatpush1.bf16.msra.mxu1 %v11300_v19  ;;  %v2113_v18 = vld [vmem:[%s12935_s11 + $0xf68] sm:$0xff]  ;;  %v11204_v19 = vcombine.low %v1865_v57, %v1873_v59 }
 0x458   : > { %8659 = vmatprep.subr.bf16.mxu1 %v11285_v26  ;;  %v11445_v26 = vcombine.high %v2105_v16, %v2113_v18  ;;  %v2081_v31 = vld [vmem:[%s12935_s11 + $0xe68] sm:$0xff] }
 0x459   : > { %8619 = vmatpush1.bf16.msra.mxu0 %v11028_v24  ;;  %v11188_v24 = vcombine.low %v1849_v6, %v1857_v15  ;;  %v1801_v36 = vld [vmem:[%s12935_s11 + $0x5a8] sm:$0xff] }
 0x45a   : > { %8620 = vmatprep.subr.bf16.mxu0 %v11013_v40  ;;  %v11173_v40 = vcombine.high %v1833_v13, %v1841_v14  ;;  %v1809_v38 = vld [vmem:[%s12935_s11 + $0x5e8] sm:$0xff] }
 0x45b   : > { %8660 = vmatpush1.bf16.msra.mxu1 %v11284_v0  ;;  %v11444_v0 = vcombine.low %v2105_v16, %v2113_v18  ;;  %v2057_v39 = vld [vmem:[%s12935_s11 + $0xda8] sm:$0xff] }
 0x45c   : > { %8661 = vmatprep.subr.bf16.mxu1 %v11269_v27  ;;  %v11429_v27 = vcombine.high %v2089_v23, %v2097_v61  ;;  %v2065_v32 = vld [vmem:[%s12935_s11 + $0xde8] sm:$0xff] }
 0x45d   : > { %8621 = vmatpush1.bf16.msra.mxu0 %v11012_v34  ;;  %v11172_v34 = vcombine.low %v1833_v13, %v1841_v14  ;;  %v1785_v48 = vld [vmem:[%s12935_s11 + $0x528] sm:$0xff] }
 0x45e   : > { %8622 = vmatprep.subr.bf16.mxu0 %v10997_v43  ;;  %v11157_v43 = vcombine.high %v1817_v28, %v1825_v29  ;;  %v1793_v50 = vld [vmem:[%s12935_s11 + $0x568] sm:$0xff] }
 0x45f   : > { %8662 = vmatpush1.bf16.msra.mxu1 %v11268_v35  ;;  %v11428_v35 = vcombine.low %v2089_v23, %v2097_v61  ;;  %v2041_v17 = vld [vmem:[%s12935_s11 + $0xd28] sm:$0xff] }
 0x460   : > { %8663 = vmatprep.subr.bf16.mxu1 %v11253_v8  ;;  %v11413_v8 = vcombine.high %v2073_v30, %v2081_v31  ;;  %v2049_v52 = vld [vmem:[%s12935_s11 + $0xd68] sm:$0xff] }
 0x461   : > { %8623 = vmatpush1.bf16.msra.mxu0 %v10996_v44  ;;  %v11156_v44 = vcombine.low %v1817_v28, %v1825_v29  ;;  %v1769_v57 = vld [vmem:[%s12935_s11 + $0x4a8] sm:$0xff] }
 0x462   : > { %8624 = vmatprep.subr.bf16.mxu0 %v10981_v46  ;;  %v11141_v46 = vcombine.high %v1801_v36, %v1809_v38  ;;  %v1777_v59 = vld [vmem:[%s12935_s11 + $0x4e8] sm:$0xff] }
 0x463   : > { %8664 = vmatpush1.bf16.msra.mxu1 %v11252_v45  ;;  %v11412_v45 = vcombine.low %v2073_v30, %v2081_v31  ;;  %v2025_v63 = vld [vmem:[%s12935_s11 + $0xca8] sm:$0xff] }
 0x464   : > { %8665 = vmatprep.subr.bf16.mxu1 %v11237_v47  ;;  %v11397_v47 = vcombine.high %v2057_v39, %v2065_v32  ;;  %v2033_v11 = vld [vmem:[%s12935_s11 + $0xce8] sm:$0xff] }
 0x465   : > { %8625 = vmatpush1.bf16.msra.mxu0 %v10980_v53  ;;  %v11140_v53 = vcombine.low %v1801_v36, %v1809_v38  ;;  %v1753_v6 = vld [vmem:[%s12935_s11 + $0x428] sm:$0xff] }
 0x466   : > { %8626 = vmatprep.subr.bf16.mxu0 %v10965_v54  ;;  %v11125_v54 = vcombine.high %v1785_v48, %v1793_v50  ;;  %v1761_v15 = vld [vmem:[%s12935_s11 + $0x468] sm:$0xff] }
 0x467   : > { %8666 = vmatpush1.bf16.msra.mxu1 %v11236_v10  ;;  %v11396_v10 = vcombine.low %v2057_v39, %v2065_v32  ;;  %v2009_v16 = vld [vmem:[%s12935_s11 + $0xc28] sm:$0xff] }
 0x468   : > { %8667 = vmatprep.subr.bf16.mxu1 %v11221_v56  ;;  %v11381_v56 = vcombine.high %v2041_v17, %v2049_v52  ;;  %v2017_v18 = vld [vmem:[%s12935_s11 + $0xc68] sm:$0xff] }
 0x469   : > { %8627 = vmatpush1.bf16.msra.mxu0 %v10964_v1  ;;  %v11124_v1 = vcombine.low %v1785_v48, %v1793_v50  ;;  %v2249_v13 = vld [vmem:[%s12935_s11 + $0x13a8] sm:$0xff] }
 0x46a   : > { %8628 = vmatprep.subr.bf16.mxu0 %v11205_v4  ;;  %v11109_v4 = vcombine.high %v1769_v57, %v1777_v59  ;;  %v2257_v14 = vld [vmem:[%s12935_s11 + $0x13e8] sm:$0xff] }
 0x46b   : > { %8668 = vmatpush1.bf16.msra.mxu1 %v11220_v2  ;;  %v11380_v2 = vcombine.low %v2041_v17, %v2049_v52  ;;  %v2505_v23 = vld [vmem:[%s12935_s11 + $0x1ba8] sm:$0xff] }
 0x46c   : > { %8669 = vmatprep.subr.bf16.mxu1 %v11461_v33  ;;  %v11365_v33 = vcombine.high %v2025_v63, %v2033_v11  ;;  %v2513_v61 = vld [vmem:[%s12935_s11 + $0x1be8] sm:$0xff] }
 0x46d   : > { %8629 = vmatpush2.bf16.msra.mxu0 %v11204_v19  ;;  %v11108_v19 = vcombine.low %v1769_v57, %v1777_v59  ;;  %v2233_v28 = vld [vmem:[%s12935_s11 + $0x1328] sm:$0xff] }
 0x46e   : > { %8630 = vmatprep.subr.bf16.mxu0 %v11189_v9  ;;  %v11093_v9 = vcombine.high %v1753_v6, %v1761_v15  ;;  %v2241_v29 = vld [vmem:[%s12935_s11 + $0x1368] sm:$0xff] }
 0x46f   : > { %8670 = vmatpush2.bf16.msra.mxu1 %v11460_v12  ;;  %v11364_v12 = vcombine.low %v2025_v63, %v2033_v11  ;;  %v2489_v30 = vld [vmem:[%s12935_s11 + $0x1b28] sm:$0xff] }
 0x470   : > { %8671 = vmatprep.subr.bf16.mxu1 %v11445_v26  ;;  %v11349_v26 = vcombine.high %v2009_v16, %v2017_v18  ;;  %v2497_v31 = vld [vmem:[%s12935_s11 + $0x1b68] sm:$0xff] }
 0x471   : > { %8631 = vmatpush2.bf16.msra.mxu0 %v11188_v24  ;;  %v11092_v24 = vcombine.low %v1753_v6, %v1761_v15  ;;  %v2217_v36 = vld [vmem:[%s12935_s11 + $0x12a8] sm:$0xff]  ;;  %v11828_v50 = vcombine.low %v2489_v30, %v2497_v31 }
 0x472   : > { %8632 = vmatprep.subr.bf16.mxu0 %v11173_v40  ;;  %v11589_v40 = vcombine.high %v2249_v13, %v2257_v14  ;;  %v2225_v38 = vld [vmem:[%s12935_s11 + $0x12e8] sm:$0xff] }
 0x473   : > { %8672 = vmatpush2.bf16.msra.mxu1 %v11444_v0  ;;  %v11348_v0 = vcombine.low %v2009_v16, %v2017_v18  ;;  %v2473_v32 = vld [vmem:[%s12935_s11 + $0x1aa8] sm:$0xff]  ;;  %v11557_v17 = vcombine.high %v2217_v36, %v2225_v38 }
 0x474   : > { %8673 = vmatprep.subr.bf16.mxu1 %v11429_v27  ;;  %v11845_v27 = vcombine.high %v2505_v23, %v2513_v61  ;;  %v2457_v59 = vld [vmem:[%s12935_s11 + $0x1a28] sm:$0xff] }
 0x475   : > { %8633 = vmatpush2.bf16.msra.mxu0 %v11172_v34  ;;  %v11588_v34 = vcombine.low %v2249_v13, %v2257_v14  ;;  %v2465_v63 = vld [vmem:[%s12935_s11 + $0x1a68] sm:$0xff] }
 0x476   : > { %8634 = vmatprep.subr.bf16.mxu0 %v11157_v43  ;;  %v11573_v43 = vcombine.high %v2233_v28, %v2241_v29  ;;  %v11797_v15 = vcombine.high %v2457_v59, %v2465_v63  ;;  %v2185_v16 = vld [vmem:[%s12935_s11 + $0x11a8] sm:$0xff] }
 0x477   : > { %8674 = vmatpush2.bf16.msra.mxu1 %v11428_v35  ;;  %v11844_v35 = vcombine.low %v2505_v23, %v2513_v61  ;;  %v2193_v18 = vld [vmem:[%s12935_s11 + $0x11e8] sm:$0xff] }
 0x478   : > { %8675 = vmatprep.subr.bf16.mxu1 %v11413_v8  ;;  %v11829_v8 = vcombine.high %v2489_v30, %v2497_v31  ;;  %v11525_v13 = vcombine.high %v2185_v16, %v2193_v18  ;;  %v2169_v23 = vld [vmem:[%s12935_s11 + $0x1128] sm:$0xff] }
 0x479   : > { %8635 = vmatpush2.bf16.msra.mxu0 %v11156_v44  ;;  %v2481_v44 = vld [vmem:[%s12935_s11 + $0x1ae8] sm:$0xff] }
 0x47a   : > { %8636 = vmatprep.subr.bf16.mxu0 %v11141_v46  ;;  %v2177_v61 = vld [vmem:[%s12935_s11 + $0x1168] sm:$0xff] }
 0x47b   : > { %8676 = vmatpush2.bf16.msra.mxu1 %v11412_v45  ;;  %v2153_v30 = vld [vmem:[%s12935_s11 + $0x10a8] sm:$0xff] }
 0x47c   : > { %8677 = vmatprep.subr.bf16.mxu1 %v11397_v47  ;;  %v11572_v47 = vcombine.low %v2233_v28, %v2241_v29  ;;  %v11509_v28 = vcombine.high %v2169_v23, %v2177_v61  ;;  %v2161_v31 = vld [vmem:[%s12935_s11 + $0x10e8] sm:$0xff] }
 0x47d   : > { %8637 = vmatpush2.bf16.msra.mxu0 %v11140_v53 }
 0x47e   : > { %8638 = vmatprep.subr.bf16.mxu0 %v11125_v54  ;;  %v2201_v54 = vld [vmem:[%s12935_s11 + $0x1228] sm:$0xff] }
 0x47f   : > { %8678 = vmatpush2.bf16.msra.mxu1 %v11396_v10 }
 0x480   : > { %8679 = vmatprep.subr.bf16.mxu1 %v11381_v56  ;;  %v2209_v56 = vld [vmem:[%s12935_s11 + $0x1268] sm:$0xff] }
 0x481   : > { %8639 = vmatpush2.bf16.msra.mxu0 %v11124_v1 }
 0x482   : > { %8640 = vmatprep.subr.bf16.mxu0 %v11109_v4  ;;  %v11812_v4 = vcombine.low %v2473_v32, %v2481_v44 }
 0x483   : > { %8680 = vmatpush2.bf16.msra.mxu1 %v11380_v2 }
 0x484   : > { %8681 = vmatprep.subr.bf16.mxu1 %v11365_v33  ;;  %v11541_v33 = vcombine.high %v2201_v54, %v2209_v56 }
 0x485   : > { %8641 = vmatpush2.bf16.msra.mxu0 %v11108_v19  ;;  %v2441_v19 = vld [vmem:[%s12935_s11 + $0x19a8] sm:$0xff] }
 0x486   : > { %8642 = vmatprep.subr.bf16.mxu0 %v11093_v9  ;;  %v11540_v9 = vcombine.low %v2201_v54, %v2209_v56 }
 0x487   : > { %8682 = vmatpush2.bf16.msra.mxu1 %v11364_v12  ;;  %v2449_v12 = vld [vmem:[%s12935_s11 + $0x19e8] sm:$0xff] }
 0x488   : > { %8683 = vmatprep.subr.bf16.mxu1 %v11349_v26  ;;  %v11796_v26 = vcombine.low %v2457_v59, %v2465_v63  ;;  %v11781_v14 = vcombine.high %v2441_v19, %v2449_v12  ;;  %v2361_v63 = vld [vmem:[%s12935_s11 + $0x1728] sm:$0xff] }
 0x489   : > { %8643 = vmatpush2.bf16.msra.mxu0 %v11092_v24  ;;  %v2425_v24 = vld [vmem:[%s12935_s11 + $0x1928] sm:$0xff] }
 0x48a   : > { %8694 = vmatprep.subr.bf16.mxu0 %v11589_v40  ;;  %v11524_v40 = vcombine.low %v2185_v16, %v2193_v18  ;;  %v2345_v16 = vld [vmem:[%s12935_s11 + $0x16a8] sm:$0xff] }
 0x48b   : > { %8684 = vmatpush2.bf16.msra.mxu1 %v11348_v0  ;;  %v2433_v0 = vld [vmem:[%s12935_s11 + $0x1968] sm:$0xff] }
 0x48c   : > { %8735 = vmatprep.subr.bf16.mxu1 %v11845_v27  ;;  %v8400_v39 = vpop.f32.mrf.mxu0  ;;  %8645 = vmatmul.mubr.bf16.vlgmr.msra.gmra.mxu0 %v13076_v58  ;;  %v11780_v27 = vcombine.low %v2441_v19, %v2449_v12  ;;  %v11765_v29 = vcombine.high %v2425_v24, %v2433_v0  ;;  %v2353_v18 = vld [vmem:[%s12935_s11 + $0x16e8] sm:$0xff] }
 0x48d   : > { %v8401_v45 = vadd.f32 %v8400_v39, %v13754_v55  ;;  %8695 = vmatpush1.bf16.msra.mxu0 %v11588_v34  ;;  %v11813_v55 = vcombine.high %v2473_v32, %v2481_v44  ;;  %8726 = vmatprep.mubr.bf16.mxu0 %v13094_v5  ;;  %v2409_v34 = vld [vmem:[%s12935_s11 + $0x18a8] sm:$0xff] }
 0x48e   : > { %v8441_v46 = vpop.f32.mrf.mxu1  ;;  %8686 = vmatmul.mubr.bf16.vlgmr.msra.gmra.mxu1 %v13085_v62  ;;  %v8402_v48 = vpop.f32.mrf.mxu0  ;;  %8696 = vmatprep.subr.bf16.mxu0 %v11573_v43  ;;  %v11508_v43 = vcombine.low %v2169_v23, %v2177_v61  ;;  %v2137_v39 = vld [vmem:[%s12935_s11 + $0x1028] sm:$0xff] }
 0x48f   : > { %8736 = vmatpush1.bf16.msra.mxu1 %v11844_v35  ;;  %v13827_v52 = vadd.f32 %v8441_v46, %v8401_v45  ;;  %v8403_v53 = vadd.f32 %v8402_v48, %v13759_v3  ;;  %8767 = vmatprep.mubr.bf16.mxu1 %v13101_v7  ;;  %v11556_v3 = vcombine.low %v2217_v36, %v2225_v38  ;;  %v2417_v35 = vld [vmem:[%s12935_s11 + $0x18e8] sm:$0xff] }
 0x490   : > { %v8443_v10 = vpop.f32.mrf.mxu1  ;;  %8737 = vmatprep.subr.bf16.mxu1 %v11829_v8  ;;  %v8404_v57 = vpop.f32.mrf.mxu0  ;;  %v11764_v8 = vcombine.low %v2425_v24, %v2433_v0  ;;  %v11493_v36 = vcombine.high %v2153_v30, %v2161_v31  ;;  %v11749_v38 = vcombine.high %v2409_v34, %v2417_v35  ;;  %v2145_v32 = vld [vmem:[%s12935_s11 + $0x1068] sm:$0xff]  ;;  %v11492_v46 = vcombine.low %v2153_v30, %v2161_v31 }
 0x491   : > { %v13836_v11 = vadd.f32 %v8443_v10, %v8403_v53  ;;  %8697 = vmatpush1.bf16.msra.mxu0 %v11572_v47  ;;  %v2393_v44 = vld [vmem:[%s12935_s11 + $0x1828] sm:$0xff]  ;;  %v11748_v47 = vcombine.low %v2409_v34, %v2417_v35  ;;  %v11477_v48 = vcombine.high %v2137_v39, %v2145_v32  ;;  %v11476_v54 = vcombine.low %v2137_v39, %v2145_v32 }
 0x492   : > { %v8445_v1 = vpop.f32.mrf.mxu1  ;;  %v8405_v2 = vpop.f32.mrf.mxu0  ;;  %8698 = vmatprep.subr.bf16.mxu0 %v11557_v17  ;;  %v2401_v45 = vld [vmem:[%s12935_s11 + $0x1868] sm:$0xff] }
 0x493   : > { %8738 = vmatpush1.bf16.msra.mxu1 %v11828_v50  ;;  %v11733_v50 = vcombine.high %v2393_v44, %v2401_v45  ;;  %v2377_v17 = vld [vmem:[%s12935_s11 + $0x17a8] sm:$0xff]  ;;  %v11732_v56 = vcombine.low %v2393_v44, %v2401_v45 }
 0x494   : > { %v8446_v6 = vpop.f32.mrf.mxu1  ;;  %8739 = vmatprep.subr.bf16.mxu1 %v11813_v55  ;;  %v2385_v53 = vld [vmem:[%s12935_s11 + $0x17e8] sm:$0xff] }
 0x495   : > { %8699 = vmatpush1.bf16.msra.mxu0 %v11556_v3  ;;  %v2633_v10 = vld [vmem:[%s12935_s11 + $0x1fa8] sm:$0xff]  ;;  %v11717_v57 = vcombine.high %v2377_v17, %v2385_v53 }
 0x496   : > { %8700 = vmatprep.subr.bf16.mxu0 %v11541_v33  ;;  %v2641_v55 = vld [vmem:[%s12935_s11 + $0x1fe8] sm:$0xff] }
 0x497   : > { %8740 = vmatpush1.bf16.msra.mxu1 %v11812_v4  ;;  %v11973_v59 = vcombine.high %v2633_v10, %v2641_v55  ;;  %v2369_v1 = vld [vmem:[%s12935_s11 + $0x1768] sm:$0xff]  ;;  %v11716_v4 = vcombine.low %v2377_v17, %v2385_v53  ;;  %v11972_v33 = vcombine.low %v2633_v10, %v2641_v55 }
 0x498   : > { %8741 = vmatprep.subr.bf16.mxu1 %v11797_v15  ;;  %v2617_v3 = vld [vmem:[%s12935_s11 + $0x1f28] sm:$0xff]  ;;  %v11701_v6 = vcombine.high %v2361_v63, %v2369_v1 }
 0x499   : > { %8701 = vmatpush1.bf16.msra.mxu0 %v11540_v9  ;;  %v2625_v2 = vld [vmem:[%s12935_s11 + $0x1f68] sm:$0xff]  ;;  %v11700_v9 = vcombine.low %v2361_v63, %v2369_v1 }
 0x49a   : > { %8702 = vmatprep.subr.bf16.mxu0 %v11525_v13  ;;  %v11957_v15 = vcombine.high %v2617_v3, %v2625_v2  ;;  %v2601_v19 = vld [vmem:[%s12935_s11 + $0x1ea8] sm:$0xff]  ;;  %v11685_v13 = vcombine.high %v2345_v16, %v2353_v18 }
 0x49b   : > { %8742 = vmatpush1.bf16.msra.mxu1 %v11796_v26  ;;  %v2609_v12 = vld [vmem:[%s12935_s11 + $0x1ee8] sm:$0xff]  ;;  %v11956_v26 = vcombine.low %v2617_v3, %v2625_v2 }
 0x49c   : > { %8743 = vmatprep.subr.bf16.mxu1 %v11781_v14  ;;  %v11941_v14 = vcombine.high %v2601_v19, %v2609_v12  ;;  %v2329_v23 = vld [vmem:[%s12935_s11 + $0x1628] sm:$0xff] }
 0x49d   : > { %8703 = vmatpush1.bf16.msra.mxu0 %v11524_v40  ;;  %v2337_v61 = vld [vmem:[%s12935_s11 + $0x1668] sm:$0xff]  ;;  %v11684_v40 = vcombine.low %v2345_v16, %v2353_v18  ;;  %v1738_v16 = vld [vmem:[%s12935_s11 + $0x3b0] sm:$0xff] }
 0x49e   : > { %8704 = vmatprep.subr.bf16.mxu0 %v11509_v28  ;;  %v2585_v24 = vld [vmem:[%s12935_s11 + $0x1e28] sm:$0xff]  ;;  %v11669_v28 = vcombine.high %v2329_v23, %v2337_v61  ;;  %v1746_v18 = vld [vmem:[%s12935_s11 + $0x3f0] sm:$0xff] }
 0x49f   : > { %8744 = vmatpush1.bf16.msra.mxu1 %v11780_v27  ;;  %v2593_v0 = vld [vmem:[%s12935_s11 + $0x1e68] sm:$0xff]  ;;  %v11940_v27 = vcombine.low %v2601_v19, %v2609_v12  ;;  %v1994_v19 = vld [vmem:[%s12935_s11 + $0xbb0] sm:$0xff] }
 0x4a0   : > { %8745 = vmatprep.subr.bf16.mxu1 %v11765_v29  ;;  %v11925_v29 = vcombine.high %v2585_v24, %v2593_v0  ;;  %v2313_v30 = vld [vmem:[%s12935_s11 + $0x15a8] sm:$0xff]  ;;  %v2002_v12 = vld [vmem:[%s12935_s11 + $0xbf0] sm:$0xff] }
 0x4a1   : > { %8705 = vmatpush1.bf16.msra.mxu0 %v11508_v43  ;;  %v2321_v31 = vld [vmem:[%s12935_s11 + $0x15e8] sm:$0xff]  ;;  %v11668_v43 = vcombine.low %v2329_v23, %v2337_v61  ;;  %v1722_v23 = vld [vmem:[%s12935_s11 + $0x330] sm:$0xff] }
 0x4a2   : > { %8706 = vmatprep.subr.bf16.mxu0 %v11493_v36  ;;  %v2569_v34 = vld [vmem:[%s12935_s11 + $0x1da8] sm:$0xff]  ;;  %v11653_v36 = vcombine.high %v2313_v30, %v2321_v31  ;;  %v1730_v61 = vld [vmem:[%s12935_s11 + $0x370] sm:$0xff] }
 0x4a3   : > { %8746 = vmatpush1.bf16.msra.mxu1 %v11764_v8  ;;  %v2577_v35 = vld [vmem:[%s12935_s11 + $0x1de8] sm:$0xff]  ;;  %v11924_v8 = vcombine.low %v2585_v24, %v2593_v0  ;;  %v1978_v24 = vld [vmem:[%s12935_s11 + $0xb30] sm:$0xff] }
 0x4a4   : > { %8747 = vmatprep.subr.bf16.mxu1 %v11749_v38  ;;  %v11909_v38 = vcombine.high %v2569_v34, %v2577_v35  ;;  %v2297_v39 = vld [vmem:[%s12935_s11 + $0x1528] sm:$0xff]  ;;  %v1986_v0 = vld [vmem:[%s12935_s11 + $0xb70] sm:$0xff] }
 0x4a5   : > { %8707 = vmatpush1.bf16.msra.mxu0 %v11492_v46  ;;  %v2305_v32 = vld [vmem:[%s12935_s11 + $0x1568] sm:$0xff]  ;;  %v11652_v46 = vcombine.low %v2313_v30, %v2321_v31  ;;  %v1706_v30 = vld [vmem:[%s12935_s11 + $0x2b0] sm:$0xff] }
 0x4a6   : > { %8708 = vmatprep.subr.bf16.mxu0 %v11477_v48  ;;  %v2553_v44 = vld [vmem:[%s12935_s11 + $0x1d28] sm:$0xff]  ;;  %v11637_v48 = vcombine.high %v2297_v39, %v2305_v32  ;;  %v1714_v31 = vld [vmem:[%s12935_s11 + $0x2f0] sm:$0xff] }
 0x4a7   : > { %8748 = vmatpush1.bf16.msra.mxu1 %v11748_v47  ;;  %v2561_v45 = vld [vmem:[%s12935_s11 + $0x1d68] sm:$0xff]  ;;  %v11908_v47 = vcombine.low %v2569_v34, %v2577_v35  ;;  %v1962_v35 = vld [vmem:[%s12935_s11 + $0xab0] sm:$0xff] }
 0x4a8   : > { %8749 = vmatprep.subr.bf16.mxu1 %v11733_v50  ;;  %v11893_v50 = vcombine.high %v2553_v44, %v2561_v45  ;;  %v2281_v17 = vld [vmem:[%s12935_s11 + $0x14a8] sm:$0xff] }
 0x4a9   : > { %8709 = vmatpush1.bf16.msra.mxu0 %v11476_v54  ;;  %v2289_v53 = vld [vmem:[%s12935_s11 + $0x14e8] sm:$0xff]  ;;  %v11636_v54 = vcombine.low %v2297_v39, %v2305_v32  ;;  %v11318_v32 = vcombine.low %v1978_v24, %v1986_v0 }
 0x4aa   : > { %8710 = vmatprep.subr.bf16.mxu0 %v11717_v57  ;;  %v2537_v10 = vld [vmem:[%s12935_s11 + $0x1ca8] sm:$0xff]  ;;  %v11621_v57 = vcombine.high %v2281_v17, %v2289_v53 }
 0x4ab   : > { %8750 = vmatpush1.bf16.msra.mxu1 %v11732_v56  ;;  %v2545_v55 = vld [vmem:[%s12935_s11 + $0x1ce8] sm:$0xff]  ;;  %v11892_v56 = vcombine.low %v2553_v44, %v2561_v45  ;;  %v11047_v44 = vcombine.high %v1706_v30, %v1714_v31 }
 0x4ac   : > { %8751 = vmatprep.subr.bf16.mxu1 %v11973_v59  ;;  %v11877_v59 = vcombine.high %v2537_v10, %v2545_v55  ;;  %v2265_v63 = vld [vmem:[%s12935_s11 + $0x1428] sm:$0xff] }
 0x4ad   : > { %8711 = vmatpush2.bf16.msra.mxu0 %v11716_v4  ;;  %v2273_v1 = vld [vmem:[%s12935_s11 + $0x1468] sm:$0xff]  ;;  %v11620_v4 = vcombine.low %v2281_v17, %v2289_v53  ;;  %v1946_v53 = vld [vmem:[%s12935_s11 + $0xa30] sm:$0xff] }
 0x4ae   : > { %8712 = vmatprep.subr.bf16.mxu0 %v11701_v6  ;;  %v2521_v3 = vld [vmem:[%s12935_s11 + $0x1c28] sm:$0xff]  ;;  %v11605_v6 = vcombine.high %v2265_v63, %v2273_v1 }
 0x4af   : > { %8752 = vmatpush2.bf16.msra.mxu1 %v11972_v33  ;;  %v2529_v2 = vld [vmem:[%s12935_s11 + $0x1c68] sm:$0xff]  ;;  %v11876_v33 = vcombine.low %v2537_v10, %v2545_v55  ;;  %v1954_v10 = vld [vmem:[%s12935_s11 + $0xa70] sm:$0xff] }
 0x4b0   : > { %8753 = vmatprep.subr.bf16.mxu1 %v11957_v15  ;;  %v11861_v15 = vcombine.high %v2521_v3, %v2529_v2 }
 0x4b1   : > { %8713 = vmatpush2.bf16.msra.mxu0 %v11700_v9  ;;  %v11604_v9 = vcombine.low %v2265_v63, %v2273_v1  ;;  %v11287_v1 = vcombine.high %v1946_v53, %v1954_v10 }
 0x4b2   : > { %8714 = vmatprep.subr.bf16.mxu0 %v11685_v13  ;;  %v11079_v13 = vcombine.high %v1738_v16, %v1746_v18 }
 0x4b3   : > { %8754 = vmatpush2.bf16.msra.mxu1 %v11956_v26  ;;  %v11860_v26 = vcombine.low %v2521_v3, %v2529_v2  ;;  %v1674_v3 = vld [vmem:[%s12935_s11 + $0x1b0] sm:$0xff] }
 0x4b4   : > { %8755 = vmatprep.subr.bf16.mxu1 %v11941_v14  ;;  %v11335_v14 = vcombine.high %v1994_v19, %v2002_v12  ;;  %v1682_v2 = vld [vmem:[%s12935_s11 + $0x1f0] sm:$0xff] }
 0x4b5   : > { %8715 = vmatpush2.bf16.msra.mxu0 %v11684_v40  ;;  %v11078_v40 = vcombine.low %v1738_v16, %v1746_v18  ;;  %v11015_v16 = vcombine.high %v1674_v3, %v1682_v2 }
 0x4b6   : > { %8716 = vmatprep.subr.bf16.mxu0 %v11669_v28  ;;  %v11063_v28 = vcombine.high %v1722_v23, %v1730_v61 }
 0x4b7   : > { %8756 = vmatpush2.bf16.msra.mxu1 %v11940_v27  ;;  %v11334_v27 = vcombine.low %v1994_v19, %v2002_v12  ;;  %v1658_v19 = vld [vmem:[%s12935_s11 + $0x130] sm:$0xff] }
 0x4b8   : > { %8757 = vmatprep.subr.bf16.mxu1 %v11925_v29  ;;  %v11319_v29 = vcombine.high %v1978_v24, %v1986_v0  ;;  %v1666_v12 = vld [vmem:[%s12935_s11 + $0x170] sm:$0xff] }
 0x4b9   : > { %8717 = vmatpush2.bf16.msra.mxu0 %v11668_v43  ;;  %v1970_v43 = vld [vmem:[%s12935_s11 + $0xaf0] sm:$0xff] }
 0x4ba   : > { %8718 = vmatprep.subr.bf16.mxu0 %v11653_v36  ;;  %v11062_v36 = vcombine.low %v1722_v23, %v1730_v61  ;;  %v10999_v23 = vcombine.high %v1658_v19, %v1666_v12  ;;  %v1642_v24 = vld [vmem:[%s12935_s11 + $0xb0] sm:$0xff] }
 0x4bb   : > { %8758 = vmatpush2.bf16.msra.mxu1 %v11924_v8  ;;  %v1650_v0 = vld [vmem:[%s12935_s11 + $0xf0] sm:$0xff] }
 0x4bc   : > { %8759 = vmatprep.subr.bf16.mxu1 %v11909_v38 }
 0x4bd   : > { %8719 = vmatpush2.bf16.msra.mxu0 %v11652_v46  ;;  %v11303_v46 = vcombine.high %v1962_v35, %v1970_v43 }
 0x4be   : > { %8720 = vmatprep.subr.bf16.mxu0 %v11637_v48  ;;  %v1698_v48 = vld [vmem:[%s12935_s11 + $0x270] sm:$0xff] }
 0x4bf   : > { %8760 = vmatpush2.bf16.msra.mxu1 %v11908_v47  ;;  %v1690_v47 = vld [vmem:[%s12935_s11 + $0x230] sm:$0xff] }
 0x4c0   : > { %8761 = vmatprep.subr.bf16.mxu1 %v11893_v50 }
 0x4c1   : > { %8721 = vmatpush2.bf16.msra.mxu0 %v11636_v54  ;;  %v11046_v54 = vcombine.low %v1706_v30, %v1714_v31  ;;  %v10983_v30 = vcombine.high %v1642_v24, %v1650_v0 }
 0x4c2   : > { %8722 = vmatprep.subr.bf16.mxu0 %v11621_v57  ;;  %v11302_v57 = vcombine.low %v1962_v35, %v1970_v43  ;;  %v1634_v35 = vld [vmem:[%s12935_s11 + $0x70] sm:$0xff] }
 0x4c3   : > { %8762 = vmatpush2.bf16.msra.mxu1 %v11892_v56  ;;  %v1882_v43 = vld [vmem:[%s12935_s11 + $0x830] sm:$0xff] }
 0x4c4   : > { %8763 = vmatprep.subr.bf16.mxu1 %v11877_v59  ;;  %v11031_v59 = vcombine.high %v1690_v47, %v1698_v48 }
 0x4c5   : > { %8723 = vmatpush2.bf16.msra.mxu0 %v11620_v4  ;;  %v1930_v4 = vld [vmem:[%s12935_s11 + $0x9b0] sm:$0xff] }
 0x4c6   : > { %8724 = vmatprep.subr.bf16.mxu0 %v11605_v6  ;;  %v11030_v6 = vcombine.low %v1690_v47, %v1698_v48  ;;  %v2122_v47 = vld [vmem:[%s12935_s11 + $0xfb0] sm:$0xff] }
 0x4c7   : > { %8764 = vmatpush2.bf16.msra.mxu1 %v11876_v33  ;;  %v1938_v33 = vld [vmem:[%s12935_s11 + $0x9f0] sm:$0xff] }
 0x4c8   : > { %8765 = vmatprep.subr.bf16.mxu1 %v11861_v15  ;;  %v11286_v15 = vcombine.low %v1946_v53, %v1954_v10  ;;  %v11271_v18 = vcombine.high %v1930_v4, %v1938_v33  ;;  %v2130_v48 = vld [vmem:[%s12935_s11 + $0xff0] sm:$0xff] }
 0x4c9   : > { %8725 = vmatpush2.bf16.msra.mxu0 %v11604_v9  ;;  %v1914_v9 = vld [vmem:[%s12935_s11 + $0x930] sm:$0xff] }
 0x4ca   : > { %8776 = vmatprep.subr.bf16.mxu0 %v11079_v13  ;;  %v11014_v13 = vcombine.low %v1674_v3, %v1682_v2 }
 0x4cb   : > { %8766 = vmatpush2.bf16.msra.mxu1 %v11860_v26  ;;  %v1922_v26 = vld [vmem:[%s12935_s11 + $0x970] sm:$0xff] }
 0x4cc   : > { %8817 = vmatprep.subr.bf16.mxu1 %v11335_v14  ;;  %v8482_v34 = vpop.f32.mrf.mxu0  ;;  %8727 = vmatmul.mubr.bf16.vlgmr.msra.gmra.mxu0 %v13166_v20  ;;  %v11270_v14 = vcombine.low %v1930_v4, %v1938_v33  ;;  %v11255_v61 = vcombine.high %v1914_v9, %v1922_v26  ;;  %v1834_v4 = vld [vmem:[%s12935_s11 + $0x6b0] sm:$0xff] }
 0x4cd   : > { %8777 = vmatpush1.bf16.msra.mxu0 %v11078_v40  ;;  %8808 = vmatprep.mubr.bf16.mxu0 %v13026_v41  ;;  %v1898_v40 = vld [vmem:[%s12935_s11 + $0x8b0] sm:$0xff] }
 0x4ce   : > { %v8523_v8 = vpop.f32.mrf.mxu1  ;;  %8768 = vmatmul.mubr.bf16.vlgmr.msra.gmra.mxu1 %v13172_v22  ;;  %v8484_v39 = vpop.f32.mrf.mxu0  ;;  %8778 = vmatprep.subr.bf16.mxu0 %v11063_v28  ;;  %v10998_v28 = vcombine.low %v1658_v19, %v1666_v12  ;;  %v1842_v33 = vld [vmem:[%s12935_s11 + $0x6f0] sm:$0xff] }
 0x4cf   : > { %v13900_v38 = vadd.f32 %v8523_v8, %v8482_v34  ;;  %8818 = vmatpush1.bf16.msra.mxu1 %v11334_v27  ;;  %8849 = vmatprep.mubr.bf16.mxu1 %v13030_v42  ;;  %v1906_v27 = vld [vmem:[%s12935_s11 + $0x8f0] sm:$0xff]  ;;  %v11175_v19 = vcombine.high %v1834_v4, %v1842_v33 }
 0x4d0   : > { %v8525_v45 = vpop.f32.mrf.mxu1  ;;  %8819 = vmatprep.subr.bf16.mxu1 %v11319_v29  ;;  %v8486_v17 = vpop.f32.mrf.mxu0  ;;  %v11254_v29 = vcombine.low %v1914_v9, %v1922_v26  ;;  %v11239_v31 = vcombine.high %v1898_v40, %v1906_v27  ;;  %v1626_v34 = vld [vmem:[%s12935_s11 + $0x30] sm:$0xff] }
 0x4d1   : > { %v13905_v50 = vadd.f32 %v8525_v45, %v8484_v39  ;;  %8779 = vmatpush1.bf16.msra.mxu0 %v11062_v36  ;;  %v1890_v8 = vld [vmem:[%s12935_s11 + $0x870] sm:$0xff]  ;;  %v10982_v36 = vcombine.low %v1642_v24, %v1650_v0  ;;  %v11238_v39 = vcombine.low %v1898_v40, %v1906_v27  ;;  %v10966_v17 = vcombine.low %v1626_v34, %v1634_v35 }
 0x4d2   : > { %v8527_v55 = vpop.f32.mrf.mxu1  ;;  %v8487_v56 = vpop.f32.mrf.mxu0  ;;  %8780 = vmatprep.subr.bf16.mxu0 %v11047_v44  ;;  %v11223_v44 = vcombine.high %v1882_v43, %v1890_v8  ;;  %v1866_v45 = vld [vmem:[%s12935_s11 + $0x7b0] sm:$0xff]  ;;  %v11222_v53 = vcombine.low %v1882_v43, %v1890_v8 }
 0x4d3   : > { %8820 = vmatpush1.bf16.msra.mxu1 %v11318_v32  ;;  %v10967_v32 = vcombine.high %v1626_v34, %v1634_v35  ;;  %v11463_v55 = vcombine.high %v2122_v47, %v2130_v48  ;;  %v1858_v56 = vld [vmem:[%s12935_s11 + $0x770] sm:$0xff] }
 0x4d4   : > { %v8528_v63 = vpop.f32.mrf.mxu1  ;;  %8821 = vmatprep.subr.bf16.mxu1 %v11303_v46  ;;  %v1874_v46 = vld [vmem:[%s12935_s11 + $0x7f0] sm:$0xff] }
 0x4d5   : > { %8781 = vmatpush1.bf16.msra.mxu0 %v11046_v54  ;;  %v11207_v10 = vcombine.high %v1866_v45, %v1874_v46  ;;  %v1850_v54 = vld [vmem:[%s12935_s11 + $0x730] sm:$0xff]  ;;  %v11206_v63 = vcombine.low %v1866_v45, %v1874_v46 }
 0x4d6   : > { %8782 = vmatprep.subr.bf16.mxu0 %v11031_v59  ;;  %v2114_v59 = vld [vmem:[%s12935_s11 + $0xf70] sm:$0xff]  ;;  %v11191_v3 = vcombine.high %v1850_v54, %v1858_v56 }
 0x4d7   : > { %8822 = vmatpush1.bf16.msra.mxu1 %v11302_v57  ;;  %v2106_v57 = vld [vmem:[%s12935_s11 + $0xf30] sm:$0xff] }
 0x4d8   : > { %8823 = vmatprep.subr.bf16.mxu1 %v11287_v1  ;;  %v11462_v1 = vcombine.low %v2122_v47, %v2130_v48  ;;  %v11447_v2 = vcombine.high %v2106_v57, %v2114_v59  ;;  %v1818_v9 = vld [vmem:[%s12935_s11 + $0x630] sm:$0xff] }
 0x4d9   : > { %8783 = vmatpush1.bf16.msra.mxu0 %v11030_v6  ;;  %v2090_v6 = vld [vmem:[%s12935_s11 + $0xeb0] sm:$0xff] }
 0x4da   : > { %8784 = vmatprep.subr.bf16.mxu0 %v11015_v16  ;;  %v11190_v16 = vcombine.low %v1850_v54, %v1858_v56  ;;  %v1826_v26 = vld [vmem:[%s12935_s11 + $0x670] sm:$0xff] }
 0x4db   : > { %8824 = vmatpush1.bf16.msra.mxu1 %v11286_v15  ;;  %v2098_v15 = vld [vmem:[%s12935_s11 + $0xef0] sm:$0xff]  ;;  %v11159_v24 = vcombine.high %v1818_v9, %v1826_v26 }
 0x4dc   : > { %8825 = vmatprep.subr.bf16.mxu1 %v11271_v18  ;;  %v11446_v18 = vcombine.low %v2106_v57, %v2114_v59  ;;  %v11431_v12 = vcombine.high %v2090_v6, %v2098_v15  ;;  %v1802_v40 = vld [vmem:[%s12935_s11 + $0x5b0] sm:$0xff] }
 0x4dd   : > { %8785 = vmatpush1.bf16.msra.mxu0 %v11014_v13  ;;  %v2074_v13 = vld [vmem:[%s12935_s11 + $0xe30] sm:$0xff] }
 0x4de   : > { %8786 = vmatprep.subr.bf16.mxu0 %v10999_v23  ;;  %v11174_v23 = vcombine.low %v1834_v4, %v1842_v33  ;;  %v1810_v27 = vld [vmem:[%s12935_s11 + $0x5f0] sm:$0xff] }
 0x4df   : > { %8826 = vmatpush1.bf16.msra.mxu1 %v11270_v14  ;;  %v2082_v14 = vld [vmem:[%s12935_s11 + $0xe70] sm:$0xff]  ;;  %v11143_v34 = vcombine.high %v1802_v40, %v1810_v27 }
 0x4e0   : > { %8827 = vmatprep.subr.bf16.mxu1 %v11255_v61  ;;  %v11430_v61 = vcombine.low %v2090_v6, %v2098_v15  ;;  %v11415_v0 = vcombine.high %v2074_v13, %v2082_v14  ;;  %v1786_v43 = vld [vmem:[%s12935_s11 + $0x530] sm:$0xff] }
 0x4e1   : > { %8787 = vmatpush1.bf16.msra.mxu0 %v10998_v28  ;;  %v2058_v28 = vld [vmem:[%s12935_s11 + $0xdb0] sm:$0xff] }
 0x4e2   : > { %8788 = vmatprep.subr.bf16.mxu0 %v10983_v30  ;;  %v11158_v30 = vcombine.low %v1818_v9, %v1826_v26  ;;  %v1794_v8 = vld [vmem:[%s12935_s11 + $0x570] sm:$0xff] }
 0x4e3   : > { %8828 = vmatpush1.bf16.msra.mxu1 %v11254_v29  ;;  %v2066_v29 = vld [vmem:[%s12935_s11 + $0xdf0] sm:$0xff]  ;;  %v11127_v45 = vcombine.high %v1786_v43, %v1794_v8 }
 0x4e4   : > { %8829 = vmatprep.subr.bf16.mxu1 %v11239_v31  ;;  %v11414_v31 = vcombine.low %v2074_v13, %v2082_v14  ;;  %v11399_v35 = vcombine.high %v2058_v28, %v2066_v29  ;;  %v1770_v47 = vld [vmem:[%s12935_s11 + $0x4b0] sm:$0xff] }
 0x4e5   : > { %8789 = vmatpush1.bf16.msra.mxu0 %v10982_v36  ;;  %v2042_v36 = vld [vmem:[%s12935_s11 + $0xd30] sm:$0xff] }
 0x4e6   : > { %8790 = vmatprep.subr.bf16.mxu0 %v10967_v32  ;;  %v11142_v32 = vcombine.low %v1802_v40, %v1810_v27  ;;  %v1778_v48 = vld [vmem:[%s12935_s11 + $0x4f0] sm:$0xff] }
 0x4e7   : > { %8830 = vmatpush1.bf16.msra.mxu1 %v11238_v39  ;;  %v2050_v39 = vld [vmem:[%s12935_s11 + $0xd70] sm:$0xff]  ;;  %v11111_v54 = vcombine.high %v1770_v47, %v1778_v48 }
 0x4e8   : > { %8831 = vmatprep.subr.bf16.mxu1 %v11223_v44  ;;  %v11398_v44 = vcombine.low %v2058_v28, %v2066_v29  ;;  %v11383_v46 = vcombine.high %v2042_v36, %v2050_v39  ;;  %v1754_v57 = vld [vmem:[%s12935_s11 + $0x430] sm:$0xff] }
 0x4e9   : > { %8791 = vmatpush1.bf16.msra.mxu0 %v10966_v17  ;;  %v2026_v17 = vld [vmem:[%s12935_s11 + $0xcb0] sm:$0xff] }
 0x4ea   : > { %8792 = vmatprep.subr.bf16.mxu0 %v11207_v10  ;;  %v11126_v10 = vcombine.low %v1786_v43, %v1794_v8  ;;  %v1762_v59 = vld [vmem:[%s12935_s11 + $0x470] sm:$0xff] }
 0x4eb   : > { %8832 = vmatpush1.bf16.msra.mxu1 %v11222_v53  ;;  %v2034_v53 = vld [vmem:[%s12935_s11 + $0xcf0] sm:$0xff]  ;;  %v11095_v4 = vcombine.high %v1754_v57, %v1762_v59 }
 0x4ec   : > { %8833 = vmatprep.subr.bf16.mxu1 %v11463_v55  ;;  %v11382_v55 = vcombine.low %v2042_v36, %v2050_v39  ;;  %v11367_v56 = vcombine.high %v2026_v17, %v2034_v53  ;;  %v2250_v6 = vld [vmem:[%s12935_s11 + $0x13b0] sm:$0xff] }
 0x4ed   : > { %8793 = vmatpush2.bf16.msra.mxu0 %v11206_v63  ;;  %v2010_v63 = vld [vmem:[%s12935_s11 + $0xc30] sm:$0xff] }
 0x4ee   : > { %8794 = vmatprep.subr.bf16.mxu0 %v11191_v3  ;;  %v11110_v3 = vcombine.low %v1770_v47, %v1778_v48  ;;  %v2258_v15 = vld [vmem:[%s12935_s11 + $0x13f0] sm:$0xff] }
 0x4ef   : > { %8834 = vmatpush2.bf16.msra.mxu1 %v11462_v1  ;;  %v2018_v1 = vld [vmem:[%s12935_s11 + $0xc70] sm:$0xff]  ;;  %v11591_v9 = vcombine.high %v2250_v6, %v2258_v15 }
 0x4f0   : > { %8835 = vmatprep.subr.bf16.mxu1 %v11447_v2  ;;  %v11366_v2 = vcombine.low %v2026_v17, %v2034_v53  ;;  %v11351_v33 = vcombine.high %v2010_v63, %v2018_v1  ;;  %v2234_v13 = vld [vmem:[%s12935_s11 + $0x1330] sm:$0xff] }
 0x4f1   : > { %8795 = vmatpush2.bf16.msra.mxu0 %v11190_v16  ;;  %v2506_v16 = vld [vmem:[%s12935_s11 + $0x1bb0] sm:$0xff] }
 0x4f2   : > { %8796 = vmatprep.subr.bf16.mxu0 %v11175_v19  ;;  %v11094_v19 = vcombine.low %v1754_v57, %v1762_v59  ;;  %v2242_v14 = vld [vmem:[%s12935_s11 + $0x1370] sm:$0xff] }
 0x4f3   : > { %8836 = vmatpush2.bf16.msra.mxu1 %v11446_v18  ;;  %v2514_v18 = vld [vmem:[%s12935_s11 + $0x1bf0] sm:$0xff]  ;;  %v11575_v40 = vcombine.high %v2234_v13, %v2242_v14  ;;  %v11574_v8 = vcombine.low %v2234_v13, %v2242_v14 }
 0x4f4   : > { %8837 = vmatprep.subr.bf16.mxu1 %v11431_v12  ;;  %v11350_v12 = vcombine.low %v2010_v63, %v2018_v1  ;;  %v11847_v26 = vcombine.high %v2506_v16, %v2514_v18  ;;  %v2218_v28 = vld [vmem:[%s12935_s11 + $0x12b0] sm:$0xff] }
 0x4f5   : > { %8797 = vmatpush2.bf16.msra.mxu0 %v11174_v23  ;;  %v2490_v23 = vld [vmem:[%s12935_s11 + $0x1b30] sm:$0xff] }
 0x4f6   : > { %8798 = vmatprep.subr.bf16.mxu0 %v11159_v24  ;;  %v11590_v24 = vcombine.low %v2250_v6, %v2258_v15  ;;  %v2226_v29 = vld [vmem:[%s12935_s11 + $0x12f0] sm:$0xff] }
 0x4f7   : > { %8838 = vmatpush2.bf16.msra.mxu1 %v11430_v61  ;;  %v2498_v61 = vld [vmem:[%s12935_s11 + $0x1b70] sm:$0xff] }
 0x4f8   : > { %8839 = vmatprep.subr.bf16.mxu1 %v11415_v0  ;;  %v11846_v0 = vcombine.low %v2506_v16, %v2514_v18  ;;  %v11831_v27 = vcombine.high %v2490_v23, %v2498_v61  ;;  %v11830_v39 = vcombine.low %v2490_v23, %v2498_v61  ;;  %v2202_v47 = vld [vmem:[%s12935_s11 + $0x1230] sm:$0xff] }
 0x4f9   : > { %8799 = vmatpush2.bf16.msra.mxu0 %v11158_v30  ;;  %v2210_v48 = vld [vmem:[%s12935_s11 + $0x1270] sm:$0xff] }
 0x4fa   : > { %8800 = vmatprep.subr.bf16.mxu0 %v11143_v34  ;;  %v2482_v34 = vld [vmem:[%s12935_s11 + $0x1af0] sm:$0xff]  ;;  %v11543_v59 = vcombine.high %v2202_v47, %v2210_v48  ;;  %v11542_v6 = vcombine.low %v2202_v47, %v2210_v48 }
 0x4fb   : > { %8840 = vmatpush2.bf16.msra.mxu1 %v11414_v31  ;;  %v2474_v31 = vld [vmem:[%s12935_s11 + $0x1ab0] sm:$0xff] }
 0x4fc   : > { %8841 = vmatprep.subr.bf16.mxu1 %v11399_v35  ;;  %v2458_v53 = vld [vmem:[%s12935_s11 + $0x1a30] sm:$0xff]  ;;  %v11814_v57 = vcombine.low %v2474_v31, %v2482_v34 }
 0x4fd   : > { %8801 = vmatpush2.bf16.msra.mxu0 %v11142_v32  ;;  %v11559_v32 = vcombine.high %v2218_v28, %v2226_v29  ;;  %v2634_v47 = vld [vmem:[%s12935_s11 + $0x1fb0] sm:$0xff] }
 0x4fe   : > { %8802 = vmatprep.subr.bf16.mxu0 %v11127_v45  ;;  %v2642_v48 = vld [vmem:[%s12935_s11 + $0x1ff0] sm:$0xff] }
 0x4ff   : > { %8842 = vmatpush2.bf16.msra.mxu1 %v11398_v44 }
 0x500   : > { %8843 = vmatprep.subr.bf16.mxu1 %v11383_v46 }
 0x501   : > { %8803 = vmatpush2.bf16.msra.mxu0 %v11126_v10  ;;  %v2466_v10 = vld [vmem:[%s12935_s11 + $0x1a70] sm:$0xff] }
 0x502   : > { %8804 = vmatprep.subr.bf16.mxu0 %v11111_v54  ;;  %v11799_v1 = vcombine.high %v2458_v53, %v2466_v10  ;;  %v11798_v15 = vcombine.low %v2458_v53, %v2466_v10 }
 0x503   : > { %8844 = vmatpush2.bf16.msra.mxu1 %v11382_v55 }
 0x504   : > { %8845 = vmatprep.subr.bf16.mxu1 %v11367_v56 }
 0x505   : > { %8805 = vmatpush2.bf16.msra.mxu0 %v11110_v3  ;;  %v2186_v3 = vld [vmem:[%s12935_s11 + $0x11b0] sm:$0xff] }
 0x506   : > { %8806 = vmatprep.subr.bf16.mxu0 %v11095_v4  ;;  %v2442_v4 = vld [vmem:[%s12935_s11 + $0x19b0] sm:$0xff] }
 0x507   : > { %8846 = vmatpush2.bf16.msra.mxu1 %v11366_v2  ;;  %v2194_v2 = vld [vmem:[%s12935_s11 + $0x11f0] sm:$0xff] }
 0x508   : > { %8847 = vmatprep.subr.bf16.mxu1 %v11351_v33  ;;  %v2450_v33 = vld [vmem:[%s12935_s11 + $0x19f0] sm:$0xff]  ;;  %v11527_v16 = vcombine.high %v2186_v3, %v2194_v2  ;;  %v11526_v13 = vcombine.low %v2186_v3, %v2194_v2 }
 0x509   : > { %8807 = vmatpush2.bf16.msra.mxu0 %v11094_v19  ;;  %v11783_v18 = vcombine.high %v2442_v4, %v2450_v33  ;;  %v2170_v19 = vld [vmem:[%s12935_s11 + $0x1130] sm:$0xff]  ;;  %v11782_v14 = vcombine.low %v2442_v4, %v2450_v33 }
 0x50a   : > { %8858 = vmatprep.subr.bf16.mxu0 %v11591_v9  ;;  %v2426_v9 = vld [vmem:[%s12935_s11 + $0x1930] sm:$0xff] }
 0x50b   : > { %8848 = vmatpush2.bf16.msra.mxu1 %v11350_v12  ;;  %v2178_v12 = vld [vmem:[%s12935_s11 + $0x1170] sm:$0xff] }
 0x50c   : > { %8899 = vmatprep.subr.bf16.mxu1 %v11847_v26  ;;  %v8564_v30 = vpop.f32.mrf.mxu0  ;;  %8809 = vmatmul.mubr.bf16.vlgmr.msra.gmra.mxu0 %v13076_v58  ;;  %v2434_v26 = vld [vmem:[%s12935_s11 + $0x1970] sm:$0xff]  ;;  %v11511_v23 = vcombine.high %v2170_v19, %v2178_v12 }
 0x50d   : > { %v8565_v35 = vadd.f32 %v8564_v30, %v13900_v38  ;;  %8859 = vmatpush1.bf16.msra.mxu0 %v11590_v24  ;;  %v11815_v38 = vcombine.high %v2474_v31, %v2482_v34  ;;  %8890 = vmatprep.mubr.bf16.mxu0 %v13094_v5  ;;  %v11767_v61 = vcombine.high %v2426_v9, %v2434_v26  ;;  %v2154_v24 = vld [vmem:[%s12935_s11 + $0x10b0] sm:$0xff] }
 0x50e   : > { %v8605_v43 = vpop.f32.mrf.mxu1  ;;  %8850 = vmatmul.mubr.bf16.vlgmr.msra.gmra.mxu1 %v13085_v62  ;;  %v8566_v36 = vpop.f32.mrf.mxu0  ;;  %8860 = vmatprep.subr.bf16.mxu0 %v11575_v40  ;;  %v2410_v40 = vld [vmem:[%s12935_s11 + $0x18b0] sm:$0xff] }
 0x50f   : > { %8900 = vmatpush1.bf16.msra.mxu1 %v11846_v0  ;;  %v13973_v44 = vadd.f32 %v8605_v43, %v8565_v35  ;;  %v8567_v45 = vadd.f32 %v8566_v36, %v13905_v50  ;;  %8931 = vmatprep.mubr.bf16.mxu1 %v13101_v7  ;;  %v11558_v50 = vcombine.low %v2218_v28, %v2226_v29  ;;  %v2162_v0 = vld [vmem:[%s12935_s11 + $0x10f0] sm:$0xff] }
 0x510   : > { %v8607_v46 = vpop.f32.mrf.mxu1  ;;  %8901 = vmatprep.subr.bf16.mxu1 %v11831_v27  ;;  %v8568_v17 = vpop.f32.mrf.mxu0  ;;  %v2418_v27 = vld [vmem:[%s12935_s11 + $0x18f0] sm:$0xff]  ;;  %v11510_v28 = vcombine.low %v2170_v19, %v2178_v12  ;;  %v11766_v29 = vcombine.low %v2426_v9, %v2434_v26  ;;  %v11495_v30 = vcombine.high %v2154_v24, %v2162_v0  ;;  %v11494_v36 = vcombine.low %v2154_v24, %v2162_v0 }
 0x511   : > { %v13982_v55 = vadd.f32 %v8607_v46, %v8567_v45  ;;  %8861 = vmatpush1.bf16.msra.mxu0 %v11574_v8  ;;  %v11751_v31 = vcombine.high %v2410_v40, %v2418_v27  ;;  %v2138_v34 = vld [vmem:[%s12935_s11 + $0x1030] sm:$0xff] }
 0x512   : > { %v8609_v54 = vpop.f32.mrf.mxu1  ;;  %v8569_v56 = vpop.f32.mrf.mxu0  ;;  %8862 = vmatprep.subr.bf16.mxu0 %v11559_v32  ;;  %v2146_v35 = vld [vmem:[%s12935_s11 + $0x1070] sm:$0xff] }
 0x513   : > { %8902 = vmatpush1.bf16.msra.mxu1 %v11830_v39  ;;  %v2394_v43 = vld [vmem:[%s12935_s11 + $0x1830] sm:$0xff]  ;;  %v11750_v39 = vcombine.low %v2410_v40, %v2418_v27  ;;  %v11479_v32 = vcombine.high %v2138_v34, %v2146_v35  ;;  %v11478_v17 = vcombine.low %v2138_v34, %v2146_v35  ;;  %v11975_v54 = vcombine.high %v2634_v47, %v2642_v48 }
 0x514   : > { %v8610_v63 = vpop.f32.mrf.mxu1  ;;  %8903 = vmatprep.subr.bf16.mxu1 %v11815_v38  ;;  %v2402_v8 = vld [vmem:[%s12935_s11 + $0x1870] sm:$0xff] }
 0x515   : > { %8863 = vmatpush1.bf16.msra.mxu0 %v11558_v50  ;;  %v11735_v45 = vcombine.high %v2394_v43, %v2402_v8  ;;  %v2378_v46 = vld [vmem:[%s12935_s11 + $0x17b0] sm:$0xff]  ;;  %v11734_v53 = vcombine.low %v2394_v43, %v2402_v8 }
 0x516   : > { %8864 = vmatprep.subr.bf16.mxu0 %v11543_v59  ;;  %v2386_v38 = vld [vmem:[%s12935_s11 + $0x17f0] sm:$0xff] }
 0x517   : > { %8904 = vmatpush1.bf16.msra.mxu1 %v11814_v57  ;;  %v11719_v10 = vcombine.high %v2378_v46, %v2386_v38  ;;  %v2362_v50 = vld [vmem:[%s12935_s11 + $0x1730] sm:$0xff]  ;;  %v11718_v63 = vcombine.low %v2378_v46, %v2386_v38 }
 0x518   : > { %8905 = vmatprep.subr.bf16.mxu1 %v11799_v1  ;;  %v2370_v56 = vld [vmem:[%s12935_s11 + $0x1770] sm:$0xff]  ;;  %v11974_v1 = vcombine.low %v2634_v47, %v2642_v48 }
 0x519   : > { %8865 = vmatpush1.bf16.msra.mxu0 %v11542_v6  ;;  %v2618_v57 = vld [vmem:[%s12935_s11 + $0x1f30] sm:$0xff]  ;;  %v11703_v3 = vcombine.high %v2362_v50, %v2370_v56 }
 0x51a   : > { %8866 = vmatprep.subr.bf16.mxu0 %v11527_v16  ;;  %v2626_v59 = vld [vmem:[%s12935_s11 + $0x1f70] sm:$0xff]  ;;  %v11702_v16 = vcombine.low %v2362_v50, %v2370_v56 }
 0x51b   : > { %8906 = vmatpush1.bf16.msra.mxu1 %v11798_v15  ;;  %v11959_v2 = vcombine.high %v2618_v57, %v2626_v59  ;;  %v2346_v4 = vld [vmem:[%s12935_s11 + $0x16b0] sm:$0xff] }
 0x51c   : > { %8907 = vmatprep.subr.bf16.mxu1 %v11783_v18  ;;  %v2354_v33 = vld [vmem:[%s12935_s11 + $0x16f0] sm:$0xff]  ;;  %v11958_v18 = vcombine.low %v2618_v57, %v2626_v59 }
 0x51d   : > { %8867 = vmatpush1.bf16.msra.mxu0 %v11526_v13  ;;  %v2602_v6 = vld [vmem:[%s12935_s11 + $0x1eb0] sm:$0xff]  ;;  %v11687_v19 = vcombine.high %v2346_v4, %v2354_v33 }
 0x51e   : > { %8868 = vmatprep.subr.bf16.mxu0 %v11511_v23  ;;  %v2610_v15 = vld [vmem:[%s12935_s11 + $0x1ef0] sm:$0xff]  ;;  %v11686_v23 = vcombine.low %v2346_v4, %v2354_v33 }
 0x51f   : > { %8908 = vmatpush1.bf16.msra.mxu1 %v11782_v14  ;;  %v11943_v12 = vcombine.high %v2602_v6, %v2610_v15  ;;  %v2330_v9 = vld [vmem:[%s12935_s11 + $0x1630] sm:$0xff] }
 0x520   : > { %8909 = vmatprep.subr.bf16.mxu1 %v11767_v61  ;;  %v2338_v26 = vld [vmem:[%s12935_s11 + $0x1670] sm:$0xff]  ;;  %v11942_v61 = vcombine.low %v2602_v6, %v2610_v15  ;;  %v1739_v6 = vld [vmem:[%s12935_s11 + $0x3b8] sm:$0xff] }
 0x521   : > { %8869 = vmatpush1.bf16.msra.mxu0 %v11510_v28  ;;  %v2586_v13 = vld [vmem:[%s12935_s11 + $0x1e30] sm:$0xff]  ;;  %v11671_v24 = vcombine.high %v2330_v9, %v2338_v26  ;;  %v1747_v15 = vld [vmem:[%s12935_s11 + $0x3f8] sm:$0xff] }
 0x522   : > { %8870 = vmatprep.subr.bf16.mxu0 %v11495_v30  ;;  %v2594_v14 = vld [vmem:[%s12935_s11 + $0x1e70] sm:$0xff]  ;;  %v11670_v30 = vcombine.low %v2330_v9, %v2338_v26  ;;  %v11081_v9 = vcombine.high %v1739_v6, %v1747_v15 }
 0x523   : > { %8910 = vmatpush1.bf16.msra.mxu1 %v11766_v29  ;;  %v11927_v0 = vcombine.high %v2586_v13, %v2594_v14  ;;  %v2314_v40 = vld [vmem:[%s12935_s11 + $0x15b0] sm:$0xff] }
 0x524   : > { %8911 = vmatprep.subr.bf16.mxu1 %v11751_v31  ;;  %v2322_v27 = vld [vmem:[%s12935_s11 + $0x15f0] sm:$0xff]  ;;  %v11926_v31 = vcombine.low %v2586_v13, %v2594_v14  ;;  %v1723_v13 = vld [vmem:[%s12935_s11 + $0x338] sm:$0xff] }
 0x525   : > { %8871 = vmatpush1.bf16.msra.mxu0 %v11494_v36  ;;  %v2570_v28 = vld [vmem:[%s12935_s11 + $0x1db0] sm:$0xff]  ;;  %v11655_v34 = vcombine.high %v2314_v40, %v2322_v27  ;;  %v1731_v14 = vld [vmem:[%s12935_s11 + $0x378] sm:$0xff] }
 0x526   : > { %8872 = vmatprep.subr.bf16.mxu0 %v11479_v32  ;;  %v2578_v29 = vld [vmem:[%s12935_s11 + $0x1df0] sm:$0xff]  ;;  %v11654_v32 = vcombine.low %v2314_v40, %v2322_v27  ;;  %v11065_v40 = vcombine.high %v1723_v13, %v1731_v14 }
 0x527   : > { %8912 = vmatpush1.bf16.msra.mxu1 %v11750_v39  ;;  %v11911_v35 = vcombine.high %v2570_v28, %v2578_v29  ;;  %v2298_v43 = vld [vmem:[%s12935_s11 + $0x1530] sm:$0xff] }
 0x528   : > { %8913 = vmatprep.subr.bf16.mxu1 %v11735_v45  ;;  %v2306_v8 = vld [vmem:[%s12935_s11 + $0x1570] sm:$0xff]  ;;  %v11910_v45 = vcombine.low %v2570_v28, %v2578_v29  ;;  %v1707_v28 = vld [vmem:[%s12935_s11 + $0x2b8] sm:$0xff] }
 0x529   : > { %8873 = vmatpush1.bf16.msra.mxu0 %v11478_v17  ;;  %v2554_v36 = vld [vmem:[%s12935_s11 + $0x1d30] sm:$0xff]  ;;  %v11639_v46 = vcombine.high %v2298_v43, %v2306_v8  ;;  %v1715_v29 = vld [vmem:[%s12935_s11 + $0x2f8] sm:$0xff] }
 0x52a   : > { %8874 = vmatprep.subr.bf16.mxu0 %v11719_v10  ;;  %v2562_v39 = vld [vmem:[%s12935_s11 + $0x1d70] sm:$0xff]  ;;  %v11638_v10 = vcombine.low %v2298_v43, %v2306_v8  ;;  %v11064_v43 = vcombine.low %v1723_v13, %v1731_v14 }
 0x52b   : > { %8914 = vmatpush1.bf16.msra.mxu1 %v11734_v53  ;;  %v11895_v38 = vcombine.high %v2554_v36, %v2562_v39  ;;  %v2282_v47 = vld [vmem:[%s12935_s11 + $0x14b0] sm:$0xff] }
 0x52c   : > { %8915 = vmatprep.subr.bf16.mxu1 %v11975_v54  ;;  %v2290_v48 = vld [vmem:[%s12935_s11 + $0x14f0] sm:$0xff]  ;;  %v11894_v54 = vcombine.low %v2554_v36, %v2562_v39 }
 0x52d   : > { %8875 = vmatpush2.bf16.msra.mxu0 %v11718_v63  ;;  %v2538_v17 = vld [vmem:[%s12935_s11 + $0x1cb0] sm:$0xff]  ;;  %v11623_v50 = vcombine.high %v2282_v47, %v2290_v48 }
 0x52e   : > { %8876 = vmatprep.subr.bf16.mxu0 %v11703_v3  ;;  %v2546_v53 = vld [vmem:[%s12935_s11 + $0x1cf0] sm:$0xff]  ;;  %v11622_v3 = vcombine.low %v2282_v47, %v2290_v48  ;;  %v1699_v47 = vld [vmem:[%s12935_s11 + $0x278] sm:$0xff] }
 0x52f   : > { %8916 = vmatpush2.bf16.msra.mxu1 %v11974_v1  ;;  %v11879_v56 = vcombine.high %v2538_v17, %v2546_v53  ;;  %v2266_v57 = vld [vmem:[%s12935_s11 + $0x1430] sm:$0xff] }
 0x530   : > { %8917 = vmatprep.subr.bf16.mxu1 %v11959_v2  ;;  %v2274_v59 = vld [vmem:[%s12935_s11 + $0x1470] sm:$0xff]  ;;  %v11878_v2 = vcombine.low %v2538_v17, %v2546_v53  ;;  %v1947_v53 = vld [vmem:[%s12935_s11 + $0xa38] sm:$0xff] }
 0x531   : > { %8877 = vmatpush2.bf16.msra.mxu0 %v11702_v16  ;;  %v2522_v63 = vld [vmem:[%s12935_s11 + $0x1c30] sm:$0xff]  ;;  %v11607_v4 = vcombine.high %v2266_v57, %v2274_v59  ;;  %v1995_v16 = vld [vmem:[%s12935_s11 + $0xbb8] sm:$0xff] }
 0x532   : > { %8878 = vmatprep.subr.bf16.mxu0 %v11687_v19  ;;  %v2530_v1 = vld [vmem:[%s12935_s11 + $0x1c70] sm:$0xff]  ;;  %v11606_v19 = vcombine.low %v2266_v57, %v2274_v59 }
 0x533   : > { %8918 = vmatpush2.bf16.msra.mxu1 %v11958_v18  ;;  %v11863_v33 = vcombine.high %v2522_v63, %v2530_v1  ;;  %v2003_v18 = vld [vmem:[%s12935_s11 + $0xbf8] sm:$0xff] }
 0x534   : > { %8919 = vmatprep.subr.bf16.mxu1 %v11943_v12  ;;  %v11862_v12 = vcombine.low %v2522_v63, %v2530_v1  ;;  %v11337_v26 = vcombine.high %v1995_v16, %v2003_v18  ;;  %v1675_v1 = vld [vmem:[%s12935_s11 + $0x1b8] sm:$0xff] }
 0x535   : > { %8879 = vmatpush2.bf16.msra.mxu0 %v11686_v23  ;;  %v1979_v23 = vld [vmem:[%s12935_s11 + $0xb38] sm:$0xff] }
 0x536   : > { %8880 = vmatprep.subr.bf16.mxu0 %v11671_v24  ;;  %v11080_v24 = vcombine.low %v1739_v6, %v1747_v15 }
 0x537   : > { %8920 = vmatpush2.bf16.msra.mxu1 %v11942_v61  ;;  %v1987_v61 = vld [vmem:[%s12935_s11 + $0xb78] sm:$0xff] }
 0x538   : > { %8921 = vmatprep.subr.bf16.mxu1 %v11927_v0  ;;  %v11336_v0 = vcombine.low %v1995_v16, %v2003_v18  ;;  %v11321_v27 = vcombine.high %v1979_v23, %v1987_v61  ;;  %v11320_v39 = vcombine.low %v1979_v23, %v1987_v61  ;;  %v1659_v16 = vld [vmem:[%s12935_s11 + $0x138] sm:$0xff] }
 0x539   : > { %8881 = vmatpush2.bf16.msra.mxu0 %v11670_v30  ;;  %v1667_v18 = vld [vmem:[%s12935_s11 + $0x178] sm:$0xff] }
 0x53a   : > { %8882 = vmatprep.subr.bf16.mxu0 %v11655_v34  ;;  %v1971_v34 = vld [vmem:[%s12935_s11 + $0xaf8] sm:$0xff]  ;;  %v11001_v13 = vcombine.high %v1659_v16, %v1667_v18 }
 0x53b   : > { %8922 = vmatpush2.bf16.msra.mxu1 %v11926_v31  ;;  %v1963_v31 = vld [vmem:[%s12935_s11 + $0xab8] sm:$0xff] }
 0x53c   : > { %8923 = vmatprep.subr.bf16.mxu1 %v11911_v35  ;;  %v11304_v57 = vcombine.low %v1963_v31, %v1971_v34  ;;  %v1643_v23 = vld [vmem:[%s12935_s11 + $0xb8] sm:$0xff] }
 0x53d   : > { %8883 = vmatpush2.bf16.msra.mxu0 %v11654_v32  ;;  %v11049_v32 = vcombine.high %v1707_v28, %v1715_v29  ;;  %v1651_v61 = vld [vmem:[%s12935_s11 + $0xf8] sm:$0xff] }
 0x53e   : > { %8884 = vmatprep.subr.bf16.mxu0 %v11639_v46  ;;  %v11305_v46 = vcombine.high %v1963_v31, %v1971_v34  ;;  %v1635_v31 = vld [vmem:[%s12935_s11 + $0x78] sm:$0xff] }
 0x53f   : > { %8924 = vmatpush2.bf16.msra.mxu1 %v11910_v45  ;;  %v1883_v34 = vld [vmem:[%s12935_s11 + $0x838] sm:$0xff] }
 0x540   : > { %8925 = vmatprep.subr.bf16.mxu1 %v11895_v38  ;;  %v1691_v38 = vld [vmem:[%s12935_s11 + $0x238] sm:$0xff] }
 0x541   : > { %8885 = vmatpush2.bf16.msra.mxu0 %v11638_v10  ;;  %v1955_v10 = vld [vmem:[%s12935_s11 + $0xa78] sm:$0xff]  ;;  %v11033_v59 = vcombine.high %v1691_v38, %v1699_v47 }
 0x542   : > { %8886 = vmatprep.subr.bf16.mxu0 %v11623_v50  ;;  %v11048_v50 = vcombine.low %v1707_v28, %v1715_v29  ;;  %v11289_v63 = vcombine.high %v1947_v53, %v1955_v10  ;;  %v10985_v28 = vcombine.high %v1643_v23, %v1651_v61 }
 0x543   : > { %8926 = vmatpush2.bf16.msra.mxu1 %v11894_v54 }
 0x544   : > { %8927 = vmatprep.subr.bf16.mxu1 %v11879_v56 }
 0x545   : > { %8887 = vmatpush2.bf16.msra.mxu0 %v11622_v3  ;;  %v1683_v3 = vld [vmem:[%s12935_s11 + $0x1f8] sm:$0xff] }
 0x546   : > { %8888 = vmatprep.subr.bf16.mxu0 %v11607_v4  ;;  %v1939_v4 = vld [vmem:[%s12935_s11 + $0x9f8] sm:$0xff]  ;;  %v11017_v6 = vcombine.high %v1675_v1, %v1683_v3 }
 0x547   : > { %8928 = vmatpush2.bf16.msra.mxu1 %v11878_v2  ;;  %v1931_v2 = vld [vmem:[%s12935_s11 + $0x9b8] sm:$0xff] }
 0x548   : > { %8929 = vmatprep.subr.bf16.mxu1 %v11863_v33  ;;  %v11288_v33 = vcombine.low %v1947_v53, %v1955_v10  ;;  %v11273_v15 = vcombine.high %v1931_v2, %v1939_v4 }
 0x549   : > { %8889 = vmatpush2.bf16.msra.mxu0 %v11606_v19  ;;  %v1915_v19 = vld [vmem:[%s12935_s11 + $0x938] sm:$0xff] }
 0x54a   : > { %8940 = vmatprep.subr.bf16.mxu0 %v11081_v9  ;;  %v11016_v9 = vcombine.low %v1675_v1, %v1683_v3 }
 0x54b   : > { %8930 = vmatpush2.bf16.msra.mxu1 %v11862_v12  ;;  %v1923_v12 = vld [vmem:[%s12935_s11 + $0x978] sm:$0xff] }
 0x54c   : > { %8981 = vmatprep.subr.bf16.mxu1 %v11337_v26  ;;  %v8646_v30 = vpop.f32.mrf.mxu0  ;;  %8891 = vmatmul.mubr.bf16.vlgmr.msra.gmra.mxu0 %v13166_v20  ;;  %v11272_v26 = vcombine.low %v1931_v2, %v1939_v4  ;;  %v11257_v14 = vcombine.high %v1915_v19, %v1923_v12  ;;  %v1835_v2 = vld [vmem:[%s12935_s11 + $0x6b8] sm:$0xff] }
 0x54d   : > { %8941 = vmatpush1.bf16.msra.mxu0 %v11080_v24  ;;  %8972 = vmatprep.mubr.bf16.mxu0 %v13026_v41  ;;  %v1899_v24 = vld [vmem:[%s12935_s11 + $0x8b8] sm:$0xff] }
 0x54e   : > { %v8687_v35 = vpop.f32.mrf.mxu1  ;;  %8932 = vmatmul.mubr.bf16.vlgmr.msra.gmra.mxu1 %v13172_v22  ;;  %v8648_v36 = vpop.f32.mrf.mxu0  ;;  %8942 = vmatprep.subr.bf16.mxu0 %v11065_v40  ;;  %v11000_v40 = vcombine.low %v1659_v16, %v1667_v18  ;;  %v1843_v4 = vld [vmem:[%s12935_s11 + $0x6f8] sm:$0xff] }
 0x54f   : > { %v14046_v8 = vadd.f32 %v8687_v35, %v8646_v30  ;;  %8982 = vmatpush1.bf16.msra.mxu1 %v11336_v0  ;;  %9013 = vmatprep.mubr.bf16.mxu1 %v13030_v42  ;;  %v11032_v42 = vcombine.low %v1691_v38, %v1699_v47  ;;  %v1907_v0 = vld [vmem:[%s12935_s11 + $0x8f8] sm:$0xff]  ;;  %v11177_v16 = vcombine.high %v1835_v2, %v1843_v4 }
 0x550   : > { %v8689_v45 = vpop.f32.mrf.mxu1  ;;  %8983 = vmatprep.subr.bf16.mxu1 %v11321_v27  ;;  %v8650_v17 = vpop.f32.mrf.mxu0  ;;  %v11256_v27 = vcombine.low %v1915_v19, %v1923_v12  ;;  %v11241_v29 = vcombine.high %v1899_v24, %v1907_v0  ;;  %v1627_v30 = vld [vmem:[%s12935_s11 + $0x38] sm:$0xff] }
 0x551   : > { %v14051_v48 = vadd.f32 %v8689_v45, %v8648_v36  ;;  %8943 = vmatpush1.bf16.msra.mxu0 %v11064_v43  ;;  %v1891_v35 = vld [vmem:[%s12935_s11 + $0x878] sm:$0xff]  ;;  %v10984_v43 = vcombine.low %v1643_v23, %v1651_v61  ;;  %v11240_v36 = vcombine.low %v1899_v24, %v1907_v0  ;;  %v10968_v17 = vcombine.low %v1627_v30, %v1635_v31 }
 0x552   : > { %v8691_v54 = vpop.f32.mrf.mxu1  ;;  %v8651_v56 = vpop.f32.mrf.mxu0  ;;  %8944 = vmatprep.subr.bf16.mxu0 %v11049_v32  ;;  %v11225_v32 = vcombine.high %v1883_v34, %v1891_v35  ;;  %v1867_v45 = vld [vmem:[%s12935_s11 + $0x7b8] sm:$0xff]  ;;  %v11224_v53 = vcombine.low %v1883_v34, %v1891_v35 }
 0x553   : > { %8984 = vmatpush1.bf16.msra.mxu1 %v11320_v39  ;;  %v10969_v39 = vcombine.high %v1627_v30, %v1635_v31  ;;  %v2123_v38 = vld [vmem:[%s12935_s11 + $0xfb8] sm:$0xff] }
 0x554   : > { %v8692_v41 = vpop.f32.mrf.mxu1  ;;  %8985 = vmatprep.subr.bf16.mxu1 %v11305_v46  ;;  %v1875_v46 = vld [vmem:[%s12935_s11 + $0x7f8] sm:$0xff] }
 0x555   : > { %8945 = vmatpush1.bf16.msra.mxu0 %v11048_v50  ;;  %v2131_v47 = vld [vmem:[%s12935_s11 + $0xff8] sm:$0xff]  ;;  %v11209_v10 = vcombine.high %v1867_v45, %v1875_v46  ;;  %v11208_v41 = vcombine.low %v1867_v45, %v1875_v46 }
 0x556   : > { %8946 = vmatprep.subr.bf16.mxu0 %v11033_v59  ;;  %v11465_v54 = vcombine.high %v2123_v38, %v2131_v47  ;;  %v1851_v50 = vld [vmem:[%s12935_s11 + $0x738] sm:$0xff] }
 0x557   : > { %8986 = vmatpush1.bf16.msra.mxu1 %v11304_v57  ;;  %v1859_v56 = vld [vmem:[%s12935_s11 + $0x778] sm:$0xff] }
 0x558   : > { %8987 = vmatprep.subr.bf16.mxu1 %v11289_v63  ;;  %v2107_v57 = vld [vmem:[%s12935_s11 + $0xf38] sm:$0xff]  ;;  %v11464_v63 = vcombine.low %v2123_v38, %v2131_v47  ;;  %v11193_v1 = vcombine.high %v1851_v50, %v1859_v56 }
 0x559   : > { %8947 = vmatpush1.bf16.msra.mxu0 %v11032_v42  ;;  %v2115_v59 = vld [vmem:[%s12935_s11 + $0xf78] sm:$0xff] }
 0x55a   : > { %8948 = vmatprep.subr.bf16.mxu0 %v11017_v6  ;;  %v11449_v3 = vcombine.high %v2107_v57, %v2115_v59  ;;  %v2091_v42 = vld [vmem:[%s12935_s11 + $0xeb8] sm:$0xff]  ;;  %v11192_v6 = vcombine.low %v1851_v50, %v1859_v56 }
 0x55b   : > { %8988 = vmatpush1.bf16.msra.mxu1 %v11288_v33  ;;  %v2099_v33 = vld [vmem:[%s12935_s11 + $0xef8] sm:$0xff] }
 0x55c   : > { %8989 = vmatprep.subr.bf16.mxu1 %v11273_v15  ;;  %v11448_v15 = vcombine.low %v2107_v57, %v2115_v59  ;;  %v11433_v18 = vcombine.high %v2091_v42, %v2099_v33  ;;  %v1819_v19 = vld [vmem:[%s12935_s11 + $0x638] sm:$0xff] }
 0x55d   : > { %8949 = vmatpush1.bf16.msra.mxu0 %v11016_v9  ;;  %v1827_v12 = vld [vmem:[%s12935_s11 + $0x678] sm:$0xff] }
 0x55e   : > { %8950 = vmatprep.subr.bf16.mxu0 %v11001_v13  ;;  %v2075_v9 = vld [vmem:[%s12935_s11 + $0xe38] sm:$0xff]  ;;  %v11176_v13 = vcombine.low %v1835_v2, %v1843_v4  ;;  %v11161_v23 = vcombine.high %v1819_v19, %v1827_v12 }
 0x55f   : > { %8990 = vmatpush1.bf16.msra.mxu1 %v11272_v26  ;;  %v2083_v26 = vld [vmem:[%s12935_s11 + $0xe78] sm:$0xff] }
 0x560   : > { %8991 = vmatprep.subr.bf16.mxu1 %v11257_v14  ;;  %v11432_v14 = vcombine.low %v2091_v42, %v2099_v33  ;;  %v11417_v61 = vcombine.high %v2075_v9, %v2083_v26  ;;  %v1803_v24 = vld [vmem:[%s12935_s11 + $0x5b8] sm:$0xff] }
 0x561   : > { %8951 = vmatpush1.bf16.msra.mxu0 %v11000_v40  ;;  %v1811_v0 = vld [vmem:[%s12935_s11 + $0x5f8] sm:$0xff] }
 0x562   : > { %8952 = vmatprep.subr.bf16.mxu0 %v10985_v28  ;;  %v2059_v40 = vld [vmem:[%s12935_s11 + $0xdb8] sm:$0xff]  ;;  %v11160_v28 = vcombine.low %v1819_v19, %v1827_v12  ;;  %v11145_v30 = vcombine.high %v1803_v24, %v1811_v0 }
 0x563   : > { %8992 = vmatpush1.bf16.msra.mxu1 %v11256_v27  ;;  %v2067_v27 = vld [vmem:[%s12935_s11 + $0xdf8] sm:$0xff] }
 0x564   : > { %8993 = vmatprep.subr.bf16.mxu1 %v11241_v29  ;;  %v11416_v29 = vcombine.low %v2075_v9, %v2083_v26  ;;  %v11401_v31 = vcombine.high %v2059_v40, %v2067_v27  ;;  %v1787_v34 = vld [vmem:[%s12935_s11 + $0x538] sm:$0xff] }
 0x565   : > { %8953 = vmatpush1.bf16.msra.mxu0 %v10984_v43  ;;  %v1795_v35 = vld [vmem:[%s12935_s11 + $0x578] sm:$0xff] }
 0x566   : > { %8954 = vmatprep.subr.bf16.mxu0 %v10969_v39  ;;  %v2043_v43 = vld [vmem:[%s12935_s11 + $0xd38] sm:$0xff]  ;;  %v11144_v39 = vcombine.low %v1803_v24, %v1811_v0  ;;  %v11129_v45 = vcombine.high %v1787_v34, %v1795_v35 }
 0x567   : > { %8994 = vmatpush1.bf16.msra.mxu1 %v11240_v36  ;;  %v2051_v36 = vld [vmem:[%s12935_s11 + $0xd78] sm:$0xff] }
 0x568   : > { %8995 = vmatprep.subr.bf16.mxu1 %v11225_v32  ;;  %v11400_v32 = vcombine.low %v2059_v40, %v2067_v27  ;;  %v11385_v46 = vcombine.high %v2043_v43, %v2051_v36  ;;  %v1771_v38 = vld [vmem:[%s12935_s11 + $0x4b8] sm:$0xff] }
 0x569   : > { %8955 = vmatpush1.bf16.msra.mxu0 %v10968_v17  ;;  %v1779_v47 = vld [vmem:[%s12935_s11 + $0x4f8] sm:$0xff] }
 0x56a   : > { %8956 = vmatprep.subr.bf16.mxu0 %v11209_v10  ;;  %v2027_v17 = vld [vmem:[%s12935_s11 + $0xcb8] sm:$0xff]  ;;  %v11128_v10 = vcombine.low %v1787_v34, %v1795_v35  ;;  %v11113_v50 = vcombine.high %v1771_v38, %v1779_v47 }
 0x56b   : > { %8996 = vmatpush1.bf16.msra.mxu1 %v11224_v53  ;;  %v2035_v53 = vld [vmem:[%s12935_s11 + $0xcf8] sm:$0xff] }
 0x56c   : > { %8997 = vmatprep.subr.bf16.mxu1 %v11465_v54  ;;  %v11384_v54 = vcombine.low %v2043_v43, %v2051_v36  ;;  %v11369_v56 = vcombine.high %v2027_v17, %v2035_v53  ;;  %v1755_v57 = vld [vmem:[%s12935_s11 + $0x438] sm:$0xff] }
 0x56d   : > { %8957 = vmatpush2.bf16.msra.mxu0 %v11208_v41  ;;  %v1763_v59 = vld [vmem:[%s12935_s11 + $0x478] sm:$0xff] }
 0x56e   : > { %8958 = vmatprep.subr.bf16.mxu0 %v11193_v1  ;;  %v2011_v41 = vld [vmem:[%s12935_s11 + $0xc38] sm:$0xff]  ;;  %v11112_v1 = vcombine.low %v1771_v38, %v1779_v47  ;;  %v11097_v2 = vcombine.high %v1755_v57, %v1763_v59 }
 0x56f   : > { %8998 = vmatpush2.bf16.msra.mxu1 %v11464_v63  ;;  %v2019_v63 = vld [vmem:[%s12935_s11 + $0xc78] sm:$0xff] }
 0x570   : > { %8999 = vmatprep.subr.bf16.mxu1 %v11449_v3  ;;  %v11368_v3 = vcombine.low %v2027_v17, %v2035_v53  ;;  %v11353_v4 = vcombine.high %v2011_v41, %v2019_v63  ;;  %v2251_v42 = vld [vmem:[%s12935_s11 + $0x13b8] sm:$0xff] }
 0x571   : > { %8959 = vmatpush2.bf16.msra.mxu0 %v11192_v6  ;;  %v2259_v33 = vld [vmem:[%s12935_s11 + $0x13f8] sm:$0xff] }
 0x572   : > { %8960 = vmatprep.subr.bf16.mxu0 %v11177_v16  ;;  %v2507_v6 = vld [vmem:[%s12935_s11 + $0x1bb8] sm:$0xff]  ;;  %v11096_v16 = vcombine.low %v1755_v57, %v1763_v59  ;;  %v11593_v19 = vcombine.high %v2251_v42, %v2259_v33 }
 0x573   : > { %9000 = vmatpush2.bf16.msra.mxu1 %v11448_v15  ;;  %v2515_v15 = vld [vmem:[%s12935_s11 + $0x1bf8] sm:$0xff] }
 0x574   : > { %9001 = vmatprep.subr.bf16.mxu1 %v11433_v18  ;;  %v11352_v18 = vcombine.low %v2011_v41, %v2019_v63  ;;  %v11849_v12 = vcombine.high %v2507_v6, %v2515_v15  ;;  %v2235_v9 = vld [vmem:[%s12935_s11 + $0x1338] sm:$0xff] }
 0x575   : > { %8961 = vmatpush2.bf16.msra.mxu0 %v11176_v13  ;;  %v2243_v26 = vld [vmem:[%s12935_s11 + $0x1378] sm:$0xff] }
 0x576   : > { %8962 = vmatprep.subr.bf16.mxu0 %v11161_v23  ;;  %v2491_v13 = vld [vmem:[%s12935_s11 + $0x1b38] sm:$0xff]  ;;  %v11592_v23 = vcombine.low %v2251_v42, %v2259_v33  ;;  %v11577_v24 = vcombine.high %v2235_v9, %v2243_v26  ;;  %v11576_v35 = vcombine.low %v2235_v9, %v2243_v26 }
 0x577   : > { %9002 = vmatpush2.bf16.msra.mxu1 %v11432_v14  ;;  %v2499_v14 = vld [vmem:[%s12935_s11 + $0x1b78] sm:$0xff] }
 0x578   : > { %9003 = vmatprep.subr.bf16.mxu1 %v11417_v61  ;;  %v11848_v61 = vcombine.low %v2507_v6, %v2515_v15  ;;  %v11833_v0 = vcombine.high %v2491_v13, %v2499_v14  ;;  %v2219_v40 = vld [vmem:[%s12935_s11 + $0x12b8] sm:$0xff]  ;;  %v11832_v36 = vcombine.low %v2491_v13, %v2499_v14 }
 0x579   : > { %8963 = vmatpush2.bf16.msra.mxu0 %v11160_v28  ;;  %v2227_v27 = vld [vmem:[%s12935_s11 + $0x12f8] sm:$0xff] }
 0x57a   : > { %8964 = vmatprep.subr.bf16.mxu0 %v11145_v30  ;;  %v2483_v30 = vld [vmem:[%s12935_s11 + $0x1af8] sm:$0xff] }
 0x57b   : > { %9004 = vmatpush2.bf16.msra.mxu1 %v11416_v29  ;;  %v2475_v29 = vld [vmem:[%s12935_s11 + $0x1ab8] sm:$0xff] }
 0x57c   : > { %9005 = vmatprep.subr.bf16.mxu1 %v11401_v31  ;;  %v2211_v38 = vld [vmem:[%s12935_s11 + $0x1278] sm:$0xff] }
 0x57d   : > { %8965 = vmatpush2.bf16.msra.mxu0 %v11144_v39  ;;  %v11561_v39 = vcombine.high %v2219_v40, %v2227_v27  ;;  %v2459_v47 = vld [vmem:[%s12935_s11 + $0x1a38] sm:$0xff] }
 0x57e   : > { %8966 = vmatprep.subr.bf16.mxu0 %v11129_v45  ;;  %v2467_v17 = vld [vmem:[%s12935_s11 + $0x1a78] sm:$0xff] }
 0x57f   : > { %9006 = vmatpush2.bf16.msra.mxu1 %v11400_v32  ;;  %v11801_v57 = vcombine.high %v2459_v47, %v2467_v17  ;;  %v2187_v59 = vld [vmem:[%s12935_s11 + $0x11b8] sm:$0xff] }
 0x580   : > { %9007 = vmatprep.subr.bf16.mxu1 %v11385_v46  ;;  %v2203_v46 = vld [vmem:[%s12935_s11 + $0x1238] sm:$0xff] }
 0x581   : > { %8967 = vmatpush2.bf16.msra.mxu0 %v11128_v10  ;;  %v2443_v41 = vld [vmem:[%s12935_s11 + $0x19b8] sm:$0xff] }
 0x582   : > { %8968 = vmatprep.subr.bf16.mxu0 %v11113_v50  ;;  %v11816_v50 = vcombine.low %v2475_v29, %v2483_v30  ;;  %v2451_v63 = vld [vmem:[%s12935_s11 + $0x19f8] sm:$0xff] }
 0x583   : > { %9008 = vmatpush2.bf16.msra.mxu1 %v11384_v54  ;;  %v2171_v42 = vld [vmem:[%s12935_s11 + $0x1138] sm:$0xff] }
 0x584   : > { %9009 = vmatprep.subr.bf16.mxu1 %v11369_v56  ;;  %v11545_v56 = vcombine.high %v2203_v46, %v2211_v38  ;;  %v2179_v33 = vld [vmem:[%s12935_s11 + $0x1178] sm:$0xff] }
 0x585   : > { %8969 = vmatpush2.bf16.msra.mxu0 %v11112_v1  ;;  %v11544_v1 = vcombine.low %v2203_v46, %v2211_v38  ;;  %v2427_v6 = vld [vmem:[%s12935_s11 + $0x1938] sm:$0xff] }
 0x586   : > { %8970 = vmatprep.subr.bf16.mxu0 %v11097_v2  ;;  %v2435_v15 = vld [vmem:[%s12935_s11 + $0x1978] sm:$0xff] }
 0x587   : > { %9010 = vmatpush2.bf16.msra.mxu1 %v11368_v3  ;;  %v11800_v3 = vcombine.low %v2459_v47, %v2467_v17  ;;  %v2155_v9 = vld [vmem:[%s12935_s11 + $0x10b8] sm:$0xff] }
 0x588   : > { %9011 = vmatprep.subr.bf16.mxu1 %v11353_v4  ;;  %v11785_v4 = vcombine.high %v2443_v41, %v2451_v63  ;;  %v2163_v26 = vld [vmem:[%s12935_s11 + $0x10f8] sm:$0xff] }
 0x589   : > { %8971 = vmatpush2.bf16.msra.mxu0 %v11096_v16  ;;  %v2411_v13 = vld [vmem:[%s12935_s11 + $0x18b8] sm:$0xff] }
 0x58a   : > { %9022 = vmatprep.subr.bf16.mxu0 %v11593_v19  ;;  %v11513_v19 = vcombine.high %v2171_v42, %v2179_v33  ;;  %v2419_v14 = vld [vmem:[%s12935_s11 + $0x18f8] sm:$0xff] }
 0x58b   : > { %9012 = vmatpush2.bf16.msra.mxu1 %v11352_v18  ;;  %v11784_v18 = vcombine.low %v2443_v41, %v2451_v63  ;;  %v2371_v47 = vld [vmem:[%s12935_s11 + $0x1778] sm:$0xff] }
 0x58c   : > { %9063 = vmatprep.subr.bf16.mxu1 %v11849_v12  ;;  %v8728_v28 = vpop.f32.mrf.mxu0  ;;  %8973 = vmatmul.mubr.bf16.vlgmr.msra.gmra.mxu0 %v13076_v58  ;;  %v11769_v12 = vcombine.high %v2427_v6, %v2435_v15  ;;  %v2619_v17 = vld [vmem:[%s12935_s11 + $0x1f38] sm:$0xff] }
 0x58d   : > { %v8729_v31 = vadd.f32 %v8728_v28, %v14046_v8  ;;  %9023 = vmatpush1.bf16.msra.mxu0 %v11592_v23  ;;  %v11817_v8 = vcombine.high %v2475_v29, %v2483_v30  ;;  %9054 = vmatprep.mubr.bf16.mxu0 %v13094_v5  ;;  %v11512_v23 = vcombine.low %v2171_v42, %v2179_v33  ;;  %v2395_v28 = vld [vmem:[%s12935_s11 + $0x1838] sm:$0xff] }
 0x58e   : > { %v8769_v34 = vpop.f32.mrf.mxu1  ;;  %9014 = vmatmul.mubr.bf16.vlgmr.msra.gmra.mxu1 %v13085_v62  ;;  %v8730_v43 = vpop.f32.mrf.mxu0  ;;  %9024 = vmatprep.subr.bf16.mxu0 %v11577_v24  ;;  %v11497_v24 = vcombine.high %v2155_v9, %v2163_v26  ;;  %v2403_v29 = vld [vmem:[%s12935_s11 + $0x1878] sm:$0xff]  ;;  %v11496_v30 = vcombine.low %v2155_v9, %v2163_v26 }
 0x58f   : > { %9064 = vmatpush1.bf16.msra.mxu1 %v11848_v61  ;;  %v14119_v32 = vadd.f32 %v8769_v34, %v8729_v31  ;;  %v8731_v58 = vadd.f32 %v8730_v43, %v14051_v48  ;;  %9095 = vmatprep.mubr.bf16.mxu1 %v13101_v7  ;;  %v11560_v48 = vcombine.low %v2219_v40, %v2227_v27  ;;  %v2195_v7 = vld [vmem:[%s12935_s11 + $0x11f8] sm:$0xff] }
 0x590   : > { %v8771_v45 = vpop.f32.mrf.mxu1  ;;  %9065 = vmatprep.subr.bf16.mxu1 %v11833_v0  ;;  %v8732_v62 = vpop.f32.mrf.mxu0  ;;  %v11529_v2 = vcombine.high %v2187_v59, %v2195_v7  ;;  %v11528_v16 = vcombine.low %v2187_v59, %v2195_v7  ;;  %v11768_v61 = vcombine.low %v2427_v6, %v2435_v15  ;;  %v11753_v0 = vcombine.high %v2411_v13, %v2419_v14  ;;  %v2139_v40 = vld [vmem:[%s12935_s11 + $0x1038] sm:$0xff] }
 0x591   : > { %v14128_v53 = vadd.f32 %v8771_v45, %v8731_v58  ;;  %9025 = vmatpush1.bf16.msra.mxu0 %v11576_v35  ;;  %v2147_v27 = vld [vmem:[%s12935_s11 + $0x1078] sm:$0xff]  ;;  %v11752_v31 = vcombine.low %v2411_v13, %v2419_v14  ;;  %v11737_v35 = vcombine.high %v2395_v28, %v2403_v29 }
 0x592   : > { %v8773_v10 = vpop.f32.mrf.mxu1  ;;  %v8733_v54 = vpop.f32.mrf.mxu0  ;;  %9026 = vmatprep.subr.bf16.mxu0 %v11561_v39  ;;  %v11481_v34 = vcombine.high %v2139_v40, %v2147_v27  ;;  %v2379_v43 = vld [vmem:[%s12935_s11 + $0x17b8] sm:$0xff]  ;;  %v11480_v45 = vcombine.low %v2139_v40, %v2147_v27 }
 0x593   : > { %9066 = vmatpush1.bf16.msra.mxu1 %v11832_v36  ;;  %v2387_v36 = vld [vmem:[%s12935_s11 + $0x17f8] sm:$0xff] }
 0x594   : > { %v8774_v5 = vpop.f32.mrf.mxu1  ;;  %9067 = vmatprep.subr.bf16.mxu1 %v11817_v8  ;;  %v2635_v39 = vld [vmem:[%s12935_s11 + $0x1fb8] sm:$0xff]  ;;  %v11736_v8 = vcombine.low %v2395_v28, %v2403_v29  ;;  %v11721_v46 = vcombine.high %v2379_v43, %v2387_v36 }
 0x595   : > { %9027 = vmatpush1.bf16.msra.mxu0 %v11560_v48  ;;  %v2643_v58 = vld [vmem:[%s12935_s11 + $0x1ff8] sm:$0xff]  ;;  %v11720_v48 = vcombine.low %v2379_v43, %v2387_v36 }
 0x596   : > { %9028 = vmatprep.subr.bf16.mxu0 %v11545_v56  ;;  %v11977_v38 = vcombine.high %v2635_v39, %v2643_v58  ;;  %v2363_v62 = vld [vmem:[%s12935_s11 + $0x1738] sm:$0xff]  ;;  %v11976_v54 = vcombine.low %v2635_v39, %v2643_v58 }
 0x597   : > { %9068 = vmatpush1.bf16.msra.mxu1 %v11816_v50  ;;  %v2627_v10 = vld [vmem:[%s12935_s11 + $0x1f78] sm:$0xff]  ;;  %v11705_v50 = vcombine.high %v2363_v62, %v2371_v47  ;;  %v11704_v41 = vcombine.low %v2363_v62, %v2371_v47 }
 0x598   : > { %9069 = vmatprep.subr.bf16.mxu1 %v11801_v57  ;;  %v11961_v56 = vcombine.high %v2619_v17, %v2627_v10  ;;  %v2347_v5 = vld [vmem:[%s12935_s11 + $0x16b8] sm:$0xff]  ;;  %v11960_v63 = vcombine.low %v2619_v17, %v2627_v10 }
 0x599   : > { %9029 = vmatpush1.bf16.msra.mxu0 %v11544_v1  ;;  %v2355_v57 = vld [vmem:[%s12935_s11 + $0x16f8] sm:$0xff] }
 0x59a   : > { %9030 = vmatprep.subr.bf16.mxu0 %v11529_v2  ;;  %v2603_v59 = vld [vmem:[%s12935_s11 + $0x1eb8] sm:$0xff]  ;;  %v11689_v1 = vcombine.high %v2347_v5, %v2355_v57  ;;  %v11688_v6 = vcombine.low %v2347_v5, %v2355_v57 }
 0x59b   : > { %9070 = vmatpush1.bf16.msra.mxu1 %v11800_v3  ;;  %v2611_v7 = vld [vmem:[%s12935_s11 + $0x1ef8] sm:$0xff] }
 0x59c   : > { %9071 = vmatprep.subr.bf16.mxu1 %v11785_v4  ;;  %v11945_v3 = vcombine.high %v2603_v59, %v2611_v7  ;;  %v2331_v2 = vld [vmem:[%s12935_s11 + $0x1638] sm:$0xff]  ;;  %v11944_v15 = vcombine.low %v2603_v59, %v2611_v7 }
 0x59d   : > { %9031 = vmatpush1.bf16.msra.mxu0 %v11528_v16  ;;  %v2339_v4 = vld [vmem:[%s12935_s11 + $0x1678] sm:$0xff] }
 0x59e   : > { %9032 = vmatprep.subr.bf16.mxu0 %v11513_v19  ;;  %v2587_v42 = vld [vmem:[%s12935_s11 + $0x1e38] sm:$0xff]  ;;  %v11673_v16 = vcombine.high %v2331_v2, %v2339_v4  ;;  %v11672_v13 = vcombine.low %v2331_v2, %v2339_v4 }
 0x59f   : > { %9072 = vmatpush1.bf16.msra.mxu1 %v11784_v18  ;;  %v2595_v33 = vld [vmem:[%s12935_s11 + $0x1e78] sm:$0xff] }
 0x5a0   : > { %9073 = vmatprep.subr.bf16.mxu1 %v11769_v12  ;;  %v11929_v18 = vcombine.high %v2587_v42, %v2595_v33  ;;  %v2315_v19 = vld [vmem:[%s12935_s11 + $0x15b8] sm:$0xff]  ;;  %v11928_v14 = vcombine.low %v2587_v42, %v2595_v33 }
 0x5a1   : > { %9033 = vmatpush1.bf16.msra.mxu0 %v11512_v23  ;;  %v2323_v12 = vld [vmem:[%s12935_s11 + $0x15f8] sm:$0xff] }
 0x5a2   : > { %9034 = vmatprep.subr.bf16.mxu0 %v11497_v24  ;;  %v2571_v9 = vld [vmem:[%s12935_s11 + $0x1db8] sm:$0xff]  ;;  %v11657_v23 = vcombine.high %v2315_v19, %v2323_v12  ;;  %v11656_v28 = vcombine.low %v2315_v19, %v2323_v12 }
 0x5a3   : > { %9074 = vmatpush1.bf16.msra.mxu1 %v11768_v61  ;;  %v2579_v26 = vld [vmem:[%s12935_s11 + $0x1df8] sm:$0xff] }
 0x5a4   : > { %9075 = vmatprep.subr.bf16.mxu1 %v11753_v0  ;;  %v11913_v61 = vcombine.high %v2571_v9, %v2579_v26  ;;  %v2299_v24 = vld [vmem:[%s12935_s11 + $0x1538] sm:$0xff]  ;;  %v11912_v29 = vcombine.low %v2571_v9, %v2579_v26 }
 0x5a5   : > { %9035 = vmatpush1.bf16.msra.mxu0 %v11496_v30  ;;  %v2307_v0 = vld [vmem:[%s12935_s11 + $0x1578] sm:$0xff] }
 0x5a6   : > { %9036 = vmatprep.subr.bf16.mxu0 %v11481_v34  ;;  %v2555_v40 = vld [vmem:[%s12935_s11 + $0x1d38] sm:$0xff]  ;;  %v11641_v30 = vcombine.high %v2299_v24, %v2307_v0  ;;  %v11640_v39 = vcombine.low %v2299_v24, %v2307_v0 }
 0x5a7   : > { %9076 = vmatpush1.bf16.msra.mxu1 %v11752_v31  ;;  %v2563_v27 = vld [vmem:[%s12935_s11 + $0x1d78] sm:$0xff] }
 0x5a8   : > { %9077 = vmatprep.subr.bf16.mxu1 %v11737_v35  ;;  %v11897_v31 = vcombine.high %v2555_v40, %v2563_v27  ;;  %v2283_v34 = vld [vmem:[%s12935_s11 + $0x14b8] sm:$0xff]  ;;  %v11896_v58 = vcombine.low %v2555_v40, %v2563_v27 }
 0x5a9   : > { %9037 = vmatpush1.bf16.msra.mxu0 %v11480_v45  ;;  %v2291_v35 = vld [vmem:[%s12935_s11 + $0x14f8] sm:$0xff] }
 0x5aa   : > { %9038 = vmatprep.subr.bf16.mxu0 %v11721_v46  ;;  %v2539_v43 = vld [vmem:[%s12935_s11 + $0x1cb8] sm:$0xff]  ;;  %v11625_v45 = vcombine.high %v2283_v34, %v2291_v35  ;;  %v11624_v17 = vcombine.low %v2283_v34, %v2291_v35 }
 0x5ab   : > { %9078 = vmatpush1.bf16.msra.mxu1 %v11736_v8  ;;  %v2547_v36 = vld [vmem:[%s12935_s11 + $0x1cf8] sm:$0xff] }
 0x5ac   : > { %9079 = vmatprep.subr.bf16.mxu1 %v11977_v38  ;;  %v11881_v8 = vcombine.high %v2539_v43, %v2547_v36  ;;  %v2267_v46 = vld [vmem:[%s12935_s11 + $0x1438] sm:$0xff]  ;;  %v11880_v10 = vcombine.low %v2539_v43, %v2547_v36 }
 0x5ad   : > { %9039 = vmatpush2.bf16.msra.mxu0 %v11720_v48  ;;  %v2275_v38 = vld [vmem:[%s12935_s11 + $0x1478] sm:$0xff] }
 0x5ae   : > { %9040 = vmatprep.subr.bf16.mxu0 %v11705_v50  ;;  %v2523_v62 = vld [vmem:[%s12935_s11 + $0x1c38] sm:$0xff]  ;;  %v11609_v48 = vcombine.high %v2267_v46, %v2275_v38  ;;  %v11608_v50 = vcombine.low %v2267_v46, %v2275_v38 }
 0x5af   : > { %9080 = vmatpush2.bf16.msra.mxu1 %v11976_v54  ;;  %v2531_v47 = vld [vmem:[%s12935_s11 + $0x1c78] sm:$0xff] }
 0x5b0   : > { %9081 = vmatprep.subr.bf16.mxu1 %v11961_v56  ;;  %v11865_v54 = vcombine.high %v2523_v62, %v2531_v47  ;;  %v11864_v56 = vcombine.low %v2523_v62, %v2531_v47 }
 0x5b1   : > { %9041 = vmatpush2.bf16.msra.mxu0 %v11704_v41 }
 0x5b2   : > { %9042 = vmatprep.subr.bf16.mxu0 %v11689_v1 }
 0x5b3   : > { %9082 = vmatpush2.bf16.msra.mxu1 %v11960_v63 }
 0x5b4   : > { %9083 = vmatprep.subr.bf16.mxu1 %v11945_v3 }
 0x5b5   : > { %9043 = vmatpush2.bf16.msra.mxu0 %v11688_v6 }
 0x5b6   : > { %9044 = vmatprep.subr.bf16.mxu0 %v11673_v16 }
 0x5b7   : > { %9084 = vmatpush2.bf16.msra.mxu1 %v11944_v15 }
 0x5b8   : > { %9085 = vmatprep.subr.bf16.mxu1 %v11929_v18 }
 0x5b9   : > { %9045 = vmatpush2.bf16.msra.mxu0 %v11672_v13 }
 0x5ba   : > { %9046 = vmatprep.subr.bf16.mxu0 %v11657_v23 }
 0x5bb   : > { %9086 = vmatpush2.bf16.msra.mxu1 %v11928_v14 }
 0x5bc   : > { %9087 = vmatprep.subr.bf16.mxu1 %v11913_v61 }
 0x5bd   : > { %9047 = vmatpush2.bf16.msra.mxu0 %v11656_v28 }
 0x5be   : > { %9048 = vmatprep.subr.bf16.mxu0 %v11641_v30 }
 0x5bf   : > { %9088 = vmatpush2.bf16.msra.mxu1 %v11912_v29 }
 0x5c0   : > { %9089 = vmatprep.subr.bf16.mxu1 %v11897_v31 }
 0x5c1   : > { %9049 = vmatpush2.bf16.msra.mxu0 %v11640_v39 }
 0x5c2   : > { %9050 = vmatprep.subr.bf16.mxu0 %v11625_v45 }
 0x5c3   : > { %9090 = vmatpush2.bf16.msra.mxu1 %v11896_v58 }
 0x5c4   : > { %9091 = vmatprep.subr.bf16.mxu1 %v11881_v8 }
 0x5c5   : > { %9051 = vmatpush2.bf16.msra.mxu0 %v11624_v17 }
 0x5c6   : > { %9052 = vmatprep.subr.bf16.mxu0 %v11609_v48 }
 0x5c7   : > { %9092 = vmatpush2.bf16.msra.mxu1 %v11880_v10 }
 0x5c8   : > { %9093 = vmatprep.subr.bf16.mxu1 %v11865_v54 }
 0x5c9   : > { %9053 = vmatpush2.bf16.msra.mxu0 %v11608_v50 }
 0x5cb   : > { %9094 = vmatpush2.bf16.msra.mxu1 %v11864_v56 }
 0x5cc   : > { %v8810_v5 = vpop.f32.mrf.mxu0  ;;  %9055 = vmatmul.mubr.bf16.vlgmr.msra.gmra.mxu0 %v13166_v20 }
 0x5ce   : > { %v8851_v57 = vpop.f32.mrf.mxu1  ;;  %9096 = vmatmul.mubr.bf16.vlgmr.msra.gmra.mxu1 %v13172_v22  ;;  %v8812_v7 = vpop.f32.mrf.mxu0 }
 0x5cf   : > { %v8852_v59 = vadd.f32 %v8851_v57, %v8810_v5 }
 0x5d0   : > { %v8853_v41 = vpop.f32.mrf.mxu1  ;;  %v8814_v1 = vpop.f32.mrf.mxu0 }
 0x5d1   : > { %v8854_v63 = vadd.f32 %v8853_v41, %v8812_v7 }
 0x5d2   : > { %v8855_v3 = vpop.f32.mrf.mxu1  ;;  %v8815_v2 = vpop.f32.mrf.mxu0 }
 0x5d4   : > { %v8856_v4 = vpop.f32.mrf.mxu1 }
 0x60c   : > { %v8892_v42 = vpop.f32.mrf.mxu0 }
 0x60d   : > { %v8893_v33 = vadd.f32 %v8892_v42, %v8852_v59 }
 0x60e   : > { %v8933_v6 = vpop.f32.mrf.mxu1  ;;  %v8894_v15 = vpop.f32.mrf.mxu0 }
 0x60f   : > { %v14180_v16 = vadd.f32 %v8933_v6, %v8893_v33  ;;  %v8895_v18 = vadd.f32 %v8894_v15, %v8854_v63 }
 0x610   : > { %v8935_v19 = vpop.f32.mrf.mxu1  ;;  %v8896_v20 = vpop.f32.mrf.mxu0 }
 0x611   : > { %v14182_v12 = vadd.f32 %v8935_v19, %v8895_v18 }
 0x612   : > { %v8937_v22 = vpop.f32.mrf.mxu1  ;;  %v8897_v9 = vpop.f32.mrf.mxu0 }
 0x614   : > { %v8938_v26 = vpop.f32.mrf.mxu1 }
 0x64c   : > { %v8974_v13 = vpop.f32.mrf.mxu0 }
 0x64e   : > { %v9015_v14 = vpop.f32.mrf.mxu1  ;;  %v8976_v61 = vpop.f32.mrf.mxu0 }
 0x64f   : > { %v9016_v23 = vadd.f32 %v9015_v14, %v8974_v13 }
 0x650   : > { %v9017_v24 = vpop.f32.mrf.mxu1  ;;  %v8978_v0 = vpop.f32.mrf.mxu0 }
 0x651   : > { %v9018_v30 = vadd.f32 %v9017_v24, %v8976_v61 }
 0x652   : > { %v9019_v40 = vpop.f32.mrf.mxu1  ;;  %v8979_v27 = vpop.f32.mrf.mxu0 }
 0x654   : > { %v9020_v28 = vpop.f32.mrf.mxu1 }
 0x68c   : > { %v9056_v29 = vpop.f32.mrf.mxu0 }
 0x68d   : > { %v9057_v31 = vadd.f32 %v9056_v29, %v9016_v23 }
 0x68e   : > { %v9097_v34 = vpop.f32.mrf.mxu1  ;;  %v9058_v35 = vpop.f32.mrf.mxu0 }
 0x68f   : > { %v14184_v43 = vadd.f32 %v9097_v34, %v9057_v31  ;;  %v9059_v36 = vadd.f32 %v9058_v35, %v9018_v30 }
 0x690   : > { %v9099_v39 = vpop.f32.mrf.mxu1  ;;  %v9060_v58 = vpop.f32.mrf.mxu0  ;;  %9106 = sbr.rel (%p14724_p12) target bundleno = 1693 (0x69d), region = 76 }
 0x691   : > { %v14186_v45 = vadd.f32 %v9099_v39, %v9059_v36 }
 0x692   : > { %v9101_v8 = vpop.f32.mrf.mxu1  ;;  %v9061_v46 = vpop.f32.mrf.mxu0 }
 0x694   : > { %v9102_v38 = vpop.f32.mrf.mxu1 }
 0x695   : > { %9107 = vst [vmem:[#allocation3 + $0x30] sm:$0xff] %v13389_v37  ;;  %9108 = vst [vmem:[#allocation3] sm:$0xff] %v13398_v49 }
 0x696   : > { %9109 = vst [vmem:[#allocation3 + $0x58] sm:$0xff] %v13535_v51  ;;  %9110 = vst [vmem:[#allocation3 + $0x18] sm:$0xff] %v13544_v60 }
 0x697   : > { %9111 = vst [vmem:[#allocation3 + $0x50] sm:$0xff] %v13681_v21  ;;  %9112 = vst [vmem:[#allocation3 + $0x68] sm:$0xff] %v13690_v25 }
 0x698   : > { %9113 = vst [vmem:[#allocation3 + $0x8] sm:$0xff] %v13827_v52  ;;  %9114 = vst [vmem:[#allocation3 + $0x48] sm:$0xff] %v13836_v11 }
 0x699   : > { %9115 = vst [vmem:[#allocation3 + $0x40] sm:$0xff] %v13973_v44  ;;  %9116 = vst [vmem:[#allocation3 + $0x20] sm:$0xff] %v13982_v55 }
 0x69a   : > { %9117 = vst [vmem:[#allocation3 + $0x10] sm:$0xff] %v14119_v32  ;;  %9118 = vst [vmem:[#allocation3 + $0x38] sm:$0xff] %v14128_v53 }
 0x69b   : > { %9119 = vst [vmem:[#allocation3 + $0x60] sm:$0xff] %v14180_v16  ;;  %9120 = vst [vmem:[#allocation3 + $0x70] sm:$0xff] %v14182_v12 }
 0x69c   : > { %9121 = vst [vmem:[#allocation3 + $0x78] sm:$0xff] %v14184_v43  ;;  %9122 = vst [vmem:[#allocation3 + $0x28] sm:$0xff] %v14186_v45 }
 0x69d PF: > { %p11979_p11 = scmp.le.s32.totalorder %s12810_s28, 0 }
 0x69f   : > { %9126 = sbr.rel (%p11979_p11) target bundleno = 1711 (0x6af), region = 80 }
 0x6a4   : > { %v9127_v62 = vld [vmem:[#allocation3 + $0x30] sm:$0xff]  ;;  %v9128_v47 = vld [vmem:[#allocation3] sm:$0xff]  ;;  %v9129_v17 = vld [vmem:[#allocation3 + $0x58] sm:$0xff] }
 0x6a5   : > { %v9143_v10 = vadd.f32 %v9127_v62, %v13389_v37  ;;  %v9144_v48 = vadd.f32 %v9128_v47, %v13398_v49  ;;  %v9145_v54 = vadd.f32 %v9129_v17, %v13535_v51  ;;  %v9130_v50 = vld [vmem:[#allocation3 + $0x18] sm:$0xff]  ;;  %v9131_v56 = vld [vmem:[#allocation3 + $0x50] sm:$0xff]  ;;  %v9132_v5 = vld [vmem:[#allocation3 + $0x68] sm:$0xff] }
 0x6a6   : > { %v9146_v57 = vadd.f32 %v9130_v50, %v13544_v60  ;;  %v9147_v59 = vadd.f32 %v9131_v56, %v13681_v21  ;;  %v9148_v7 = vadd.f32 %v9132_v5, %v13690_v25  ;;  %v9133_v41 = vld [vmem:[#allocation3 + $0x8] sm:$0xff]  ;;  %v9135_v1 = vld [vmem:[#allocation3 + $0x40] sm:$0xff]  ;;  %v9137_v2 = vld [vmem:[#allocation3 + $0x10] sm:$0xff] }
 0x6a7   : > { %v9134_v63 = vld [vmem:[#allocation3 + $0x48] sm:$0xff]  ;;  %9159 = vst [vmem:[#allocation3 + $0x30] sm:$0xff] %v9143_v10  ;;  %9160 = vst [vmem:[#allocation3] sm:$0xff] %v9144_v48  ;;  %v9149_v37 = vadd.f32 %v9133_v41, %v13827_v52  ;;  %v9151_v51 = vadd.f32 %v9135_v1, %v13973_v44  ;;  %v9136_v3 = vld [vmem:[#allocation3 + $0x20] sm:$0xff]  ;;  %v9153_v21 = vadd.f32 %v9137_v2, %v14119_v32 }
 0x6a8   : > { %9161 = vst [vmem:[#allocation3 + $0x58] sm:$0xff] %v9145_v54  ;;  %v9150_v49 = vadd.f32 %v9134_v63, %v13836_v11  ;;  %v9138_v4 = vld [vmem:[#allocation3 + $0x38] sm:$0xff]  ;;  %9162 = vst [vmem:[#allocation3 + $0x18] sm:$0xff] %v9146_v57  ;;  %v9152_v60 = vadd.f32 %v9136_v3, %v13982_v55  ;;  %v9139_v42 = vld [vmem:[#allocation3 + $0x60] sm:$0xff] }
 0x6a9   : > { %9163 = vst [vmem:[#allocation3 + $0x50] sm:$0xff] %v9147_v59  ;;  %9164 = vst [vmem:[#allocation3 + $0x68] sm:$0xff] %v9148_v7  ;;  %v9154_v25 = vadd.f32 %v9138_v4, %v14128_v53  ;;  %v9140_v33 = vld [vmem:[#allocation3 + $0x70] sm:$0xff]  ;;  %v9141_v6 = vld [vmem:[#allocation3 + $0x78] sm:$0xff]  ;;  %v9155_v52 = vadd.f32 %v9139_v42, %v14180_v16 }
 0x6aa   : > { %9165 = vst [vmem:[#allocation3 + $0x8] sm:$0xff] %v9149_v37  ;;  %9166 = vst [vmem:[#allocation3 + $0x48] sm:$0xff] %v9150_v49  ;;  %v9156_v11 = vadd.f32 %v9140_v33, %v14182_v12  ;;  %v9157_v44 = vadd.f32 %v9141_v6, %v14184_v43  ;;  %v9142_v15 = vld [vmem:[#allocation3 + $0x28] sm:$0xff] }
 0x6ab   : > { %9167 = vst [vmem:[#allocation3 + $0x40] sm:$0xff] %v9151_v51  ;;  %9168 = vst [vmem:[#allocation3 + $0x20] sm:$0xff] %v9152_v60  ;;  %v9158_v55 = vadd.f32 %v9142_v15, %v14186_v45 }
 0x6ac   : > { %9169 = vst [vmem:[#allocation3 + $0x10] sm:$0xff] %v9153_v21  ;;  %9170 = vst [vmem:[#allocation3 + $0x38] sm:$0xff] %v9154_v25 }
 0x6ad   : > { %9171 = vst [vmem:[#allocation3 + $0x60] sm:$0xff] %v9155_v52  ;;  %9172 = vst [vmem:[#allocation3 + $0x70] sm:$0xff] %v9156_v11 }
 0x6ae   : > { %9173 = vst [vmem:[#allocation3 + $0x78] sm:$0xff] %v9157_v44  ;;  %9174 = vst [vmem:[#allocation3 + $0x28] sm:$0xff] %v9158_v55 }
 0x6af PF: > { %p11980_p13 = scmp.ne.s32.totalorder %s12810_s28, 1 }
 0x6b1   : > { %9178 = sbr.rel (%p11980_p13) target bundleno = 2366 (0x93e), region = 84 }
 0x6b6   : > { %v12398_v32 = vld [vmem:[%s14703_s5 + $0x78] sm:$0xff]   ;;  %v12402_v19 = vld [vmem:[%s14703_s5 + $0x70] sm:$0xff]   ;;  %v12406_v9 = vld [vmem:[%s14703_s5 + $0x68] sm:$0xff]   ;;  %v9199_v29 = vlaneseq  ;;  %vm10678_vm0 = vcmask 80896  }
 0x6b7   : > { %v12399_v53 = vld [vmem:[%s14703_s5 + $0xf8] sm:$0xff]   ;;  %12124 = vmatprep.subr.bf16.mxu0 %v12398_v32  ;;  %v12403_v20 = vld [vmem:[%s14703_s5 + $0xf0] sm:$0xff]   ;;  %v12407_v26 = vld [vmem:[%s14703_s5 + $0xe8] sm:$0xff]  }
 0x6b8   : > { %v12400_v16 = vld [vmem:[%s14703_s5 + $0x38] sm:$0xff]   ;;  %12146 = vmatprep.subr.bf16.mxu1 %v12399_v53  ;;  %v12404_v12 = vld [vmem:[%s14703_s5 + $0x30] sm:$0xff]   ;;  %v12408_v13 = vld [vmem:[%s14703_s5 + $0x28] sm:$0xff]   ;;  %v14293_v43 = vshrl.u32 %v9199_v29, 7 }
 0x6b9   : > { %v12401_v18 = vld [vmem:[%s14703_s5 + $0xb8] sm:$0xff]   ;;  %12125 = vmatpush3.bf16.msra.mxu0 %v12400_v16  ;;  %v12405_v22 = vld [vmem:[%s14703_s5 + $0xb0] sm:$0xff]   ;;  %v12409_v14 = vld [vmem:[%s14703_s5 + $0xa8] sm:$0xff]  }
 0x6ba   : > { %12147 = vmatpush3.bf16.msra.mxu1 %v12401_v18  ;;  %12126 = vmatprep.subr.bf16.mxu0 %v12402_v19  ;;  %v12410_v23 = vld [vmem:[%s14703_s5 + $0x60] sm:$0xff]   ;;  %v12414_v40 = vld [vmem:[%s14703_s5 + $0x58] sm:$0xff]   ;;  %v12418_v31 = vld [vmem:[%s14703_s5 + $0x50] sm:$0xff]   ;;  %v9205_v8 = vsub.s32 1, %v14293_v43  ;;  %v9213_v38 = vsub.s32 3, %v14293_v43  ;;  %v9201_v47 = vsub.s32 0, %v14293_v43 }
 0x6bb   : > { %12148 = vmatprep.subr.bf16.mxu1 %v12403_v20  ;;  %v12411_v61 = vld [vmem:[%s14703_s5 + $0xe0] sm:$0xff]   ;;  %v12415_v27 = vld [vmem:[%s14703_s5 + $0xd8] sm:$0xff]   ;;  %v12419_v34 = vld [vmem:[%s14703_s5 + $0xd0] sm:$0xff]   ;;  %v9209_v10 = vsub.s32 2, %v14293_v43 }
 0x6bc   : > { %v12412_v24 = vld [vmem:[%s14703_s5 + $0x20] sm:$0xff]   ;;  %v12416_v28 = vld [vmem:[%s14703_s5 + $0x18] sm:$0xff]   ;;  %v12420_v35 = vld [vmem:[%s14703_s5 + $0x10] sm:$0xff]  }
 0x6bd   : > { %12127 = vmatpush3.bf16.msra.mxu0 %v12404_v12  ;;  %v12413_v0 = vld [vmem:[%s14703_s5 + $0xa0] sm:$0xff]   ;;  %v12417_v30 = vld [vmem:[%s14703_s5 + $0x98] sm:$0xff]   ;;  %v12421_v36 = vld [vmem:[%s14703_s5 + $0x90] sm:$0xff]  }
 0x6be   : > { %12149 = vmatpush3.bf16.msra.mxu1 %v12405_v22  ;;  %12128 = vmatprep.subr.bf16.mxu0 %v12406_v9  ;;  %v12422_v39 = vld [vmem:[%s14703_s5 + $0x48] sm:$0xff]   ;;  %v12426_v62 = vld [vmem:[%s14703_s5 + $0x40] sm:$0xff]   ;;  %v14326_v56 = vld [vmem:[#allocation10] sm:$0xff] }
 0x6bf   : > { %12150 = vmatprep.subr.bf16.mxu1 %v12407_v26  ;;  %v12423_v58 = vld [vmem:[%s14703_s5 + $0xc8] sm:$0xff]   ;;  %v12427_v17 = vld [vmem:[%s14703_s5 + $0xc0] sm:$0xff]   ;;  %v9182_v5 = vld [vmem:[#allocation3 + $0x18] sm:$0xff]  ;;  %v9206_v57 = vrot.slane %v14326_v56, %v9205_v8  ;;  %v9214_v59 = vrot.slane %v14326_v56, %v9213_v38  ;;  %v9202_v41 = vrot.slane %v14326_v56, %v9201_v47  ;;  %v9210_v1 = vrot.slane %v14326_v56, %v9209_v10 }
 0x6c0   : > { %v12424_v45 = vld [vmem:[%s14703_s5 + $0x8] sm:$0xff]   ;;  %v12428_v48 = vld [vmem:[%s14703_s5] sm:$0xff]   ;;  %v9179_v7 = vld [vmem:[#allocation3 + $0x30] sm:$0xff] }
 0x6c1   : > { %12129 = vmatpush3.bf16.msra.mxu0 %v12408_v13  ;;  %v12425_v46 = vld [vmem:[%s14703_s5 + $0x88] sm:$0xff]   ;;  %v12429_v54 = vld [vmem:[%s14703_s5 + $0x80] sm:$0xff]   ;;  %v9181_v63 = vld [vmem:[#allocation3 + $0x58] sm:$0xff]  ;;  %v9282_v51 = vadd.f32 %v9214_v59, %v9182_v5  ;;  %v9279_v3 = vadd.f32 %v9202_v41, %v9179_v7 }
 0x6c2   : > { %12151 = vmatpush3.bf16.msra.mxu1 %v12409_v14  ;;  %12130 = vmatprep.subr.bf16.mxu0 %v12410_v23  ;;  %v9180_v50 = vld [vmem:[#allocation3] sm:$0xff]  ;;  %v12430_v37 = vld [vmem:[%s14703_s5 + $0x178] sm:$0xff]   ;;  %v9281_v2 = vadd.f32 %v9210_v1, %v9181_v63  ;;  %v12434_v55 = vld [vmem:[%s14703_s5 + $0x170] sm:$0xff]  }
 0x6c3   : > { %12152 = vmatprep.subr.bf16.mxu1 %v12411_v61  ;;  %v9280_v49 = vadd.f32 %v9206_v57, %v9180_v50  ;;  %v12431_v4 = vld [vmem:[%s14703_s5 + $0x1f8] sm:$0xff]   ;;  %v9298_v21 = vmax.f32 %v9282_v51, 0.0  ;;  %v9295_v25 = vmax.f32 %v9279_v3, 0.0  ;;  %v12435_v32 = vld [vmem:[%s14703_s5 + $0x1f0] sm:$0xff]   ;;  %v12438_v18 = vld [vmem:[%s14703_s5 + $0x168] sm:$0xff]  }
 0x6c4   : > { %v9297_v42 = vmax.f32 %v9281_v2, 0.0  ;;  %v12432_v33 = vld [vmem:[%s14703_s5 + $0x138] sm:$0xff]   ;;  %v12436_v53 = vld [vmem:[%s14703_s5 + $0x130] sm:$0xff]   ;;  %v12439_v19 = vld [vmem:[%s14703_s5 + $0x1e8] sm:$0xff]  }
 0x6c5   : > { %12131 = vmatpush3.bf16.msra.mxu0 %v12412_v24  ;;  %v9296_v60 = vmax.f32 %v9280_v49, 0.0  ;;  %v12433_v6 = vld [vmem:[%s14703_s5 + $0x1b8] sm:$0xff]   ;;  %v9314_v11 = vpack.c.bf16 %v9298_v21, %v9298_v21  ;;  %v9311_v44 = vpack.c.bf16 %v9295_v25, %v9295_v25  ;;  %v12437_v16 = vld [vmem:[%s14703_s5 + $0x1b0] sm:$0xff]   ;;  %v12440_v20 = vld [vmem:[%s14703_s5 + $0x128] sm:$0xff]  }
 0x6c6   : > { %12153 = vmatpush3.bf16.msra.mxu1 %v12413_v0  ;;  %12132 = vmatprep.subr.bf16.mxu0 %v12414_v40  ;;  %v9313_v15 = vpack.c.bf16 %v9297_v42, %v9297_v42  ;;  %v12441_v12 = vld [vmem:[%s14703_s5 + $0x1a8] sm:$0xff]   ;;  %v12442_v22 = vld [vmem:[%s14703_s5 + $0x160] sm:$0xff]   ;;  %v12446_v14 = vld [vmem:[%s14703_s5 + $0x158] sm:$0xff]  }
 0x6c7   : > { %12154 = vmatprep.subr.bf16.mxu1 %v12415_v27  ;;  %v9312_v52 = vpack.c.bf16 %v9296_v60, %v9296_v60  ;;  %10430 = vmatprep.mubr.bf16.mxu1 %v9314_v11  ;;  %v12443_v9 = vld [vmem:[%s14703_s5 + $0x1e0] sm:$0xff]   ;;  %v12447_v23 = vld [vmem:[%s14703_s5 + $0x1d8] sm:$0xff]   ;;  %v12450_v0 = vld [vmem:[%s14703_s5 + $0x150] sm:$0xff]  }
 0x6c8   : > { %v12444_v26 = vld [vmem:[%s14703_s5 + $0x120] sm:$0xff]   ;;  %v12448_v61 = vld [vmem:[%s14703_s5 + $0x118] sm:$0xff]   ;;  %v12451_v40 = vld [vmem:[%s14703_s5 + $0x1d0] sm:$0xff]  }
 0x6c9   : > { %12133 = vmatpush3.bf16.msra.mxu0 %v12416_v28  ;;  %10390 = vmatprep.mubr.bf16.mxu0 %v9312_v52  ;;  %v12445_v13 = vld [vmem:[%s14703_s5 + $0x1a0] sm:$0xff]   ;;  %v12449_v24 = vld [vmem:[%s14703_s5 + $0x198] sm:$0xff]   ;;  %v12452_v27 = vld [vmem:[%s14703_s5 + $0x110] sm:$0xff]   ;;  %v9221_v28 = vsub.s32 5, %v14293_v43 }
 0x6ca   : > { %12155 = vmatpush3.bf16.msra.mxu1 %v12417_v30  ;;  %12134 = vmatprep.subr.bf16.mxu0 %v12418_v31  ;;  %v12453_v29 = vld [vmem:[%s14703_s5 + $0x190] sm:$0xff]   ;;  %v9229_v30 = vsub.s32 7, %v14293_v43  ;;  %v12454_v31 = vld [vmem:[%s14703_s5 + $0x148] sm:$0xff]   ;;  %v12460_v50 = vld [vmem:[%s14703_s5 + $0x100] sm:$0xff]  }
 0x6cb   : > { %12156 = vmatprep.subr.bf16.mxu1 %v12419_v34  ;;  %v9217_v34 = vsub.s32 4, %v14293_v43  ;;  %v12461_v5 = vld [vmem:[%s14703_s5 + $0x180] sm:$0xff]   ;;  %v9184_v57 = vld [vmem:[#allocation3 + $0x68] sm:$0xff]  ;;  %v9183_v63 = vld [vmem:[#allocation3 + $0x50] sm:$0xff] }
 0x6cc   : > { %v9186_v59 = vld [vmem:[#allocation3 + $0x48] sm:$0xff]  ;;  %v12462_v49 = vld [vmem:[%s14703_s5 + $0x278] sm:$0xff]   ;;  %v12466_v11 = vld [vmem:[%s14703_s5 + $0x270] sm:$0xff]  }
 0x6cd   : > { %12135 = vmatpush3.bf16.msra.mxu0 %v12420_v35  ;;  %v12455_v35 = vld [vmem:[%s14703_s5 + $0x1c8] sm:$0xff]   ;;  %v12463_v2 = vld [vmem:[%s14703_s5 + $0x2f8] sm:$0xff]  }
 0x6ce   : > { %12157 = vmatpush3.bf16.msra.mxu1 %v12421_v36  ;;  %12136 = vmatprep.subr.bf16.mxu0 %v12422_v39  ;;  %v9225_v36 = vsub.s32 6, %v14293_v43  ;;  %v12456_v39 = vld [vmem:[%s14703_s5 + $0x108] sm:$0xff]  }
 0x6cf   : > { %12158 = vmatprep.subr.bf16.mxu1 %v12423_v58  ;;  %v12457_v58 = vld [vmem:[%s14703_s5 + $0x188] sm:$0xff]  }
 0x6d0   : > { %v9185_v1 = vld [vmem:[#allocation3 + $0x8] sm:$0xff] }
 0x6d1   : > { %12137 = vmatpush3.bf16.msra.mxu0 %v12424_v45  ;;  %v12458_v45 = vld [vmem:[%s14703_s5 + $0x140] sm:$0xff]  }
 0x6d2   : > { %12159 = vmatpush3.bf16.msra.mxu1 %v12425_v46  ;;  %12138 = vmatprep.subr.bf16.mxu0 %v12426_v62  ;;  %v9222_v46 = vrot.slane %v14326_v56, %v9221_v28  ;;  %v9230_v62 = vrot.slane %v14326_v56, %v9229_v30 }
 0x6d3   : > { %12160 = vmatprep.subr.bf16.mxu1 %v12427_v17  ;;  %v12459_v17 = vld [vmem:[%s14703_s5 + $0x1c0] sm:$0xff]  }
 0x6d4   : > { %v9284_v7 = vadd.f32 %v9222_v46, %v9184_v57  ;;  %v9286_v41 = vadd.f32 %v9230_v62, %v9186_v59  ;;  %v9188_v46 = vld [vmem:[#allocation3 + $0x20] sm:$0xff]  ;;  %v14548_v62 = vld [vmem:[#allocation10 + $0x8] sm:$0xff]  ;;  %v9189_v57 = vld [vmem:[#allocation3 + $0x10] sm:$0xff] }
 0x6d5   : > { %12139 = vmatpush3.bf16.msra.mxu0 %v12428_v48  ;;  %v9218_v48 = vrot.slane %v14326_v56, %v9217_v34  ;;  %v9242_v59 = vrot.slane %v14548_v62, %v9209_v10  ;;  %v12496_v10 = vld [vmem:[%s14703_s5 + $0x338] sm:$0xff]  }
 0x6d6   : > { %12161 = vmatpush3.bf16.msra.mxu1 %v12429_v54  ;;  %12168 = vmatprep.subr.bf16.mxu0 %v12430_v37  ;;  %v9226_v54 = vrot.slane %v14326_v56, %v9225_v36  ;;  %v9300_v51 = vmax.f32 %v9284_v7, 0.0  ;;  %v9302_v3 = vmax.f32 %v9286_v41, 0.0  ;;  %v12494_v7 = vld [vmem:[%s14703_s5 + $0x378] sm:$0xff]  }
 0x6d7   : > { %12190 = vmatprep.subr.bf16.mxu1 %v12431_v4  ;;  %v9283_v37 = vadd.f32 %v9218_v48, %v9183_v63  ;;  %v12464_v4 = vld [vmem:[%s14703_s5 + $0x238] sm:$0xff]   ;;  %v9238_v48 = vrot.slane %v14548_v62, %v9205_v8 }
 0x6d8   : > { %10391 = vmatmul.mubr.bf16.vlgmr.msra.gmra.mxu0 %v9311_v44  ;;  %v9285_v56 = vadd.f32 %v9226_v54, %v9185_v1  ;;  %v9316_v25 = vpack.c.bf16 %v9300_v51, %v9300_v51  ;;  %v9318_v42 = vpack.c.bf16 %v9302_v3, %v9302_v3  ;;  %v12467_v44 = vld [vmem:[%s14703_s5 + $0x2f0] sm:$0xff]   ;;  %v9246_v54 = vrot.slane %v14548_v62, %v9213_v38  ;;  %v12495_v38 = vld [vmem:[%s14703_s5 + $0x3f8] sm:$0xff]  }
 0x6d9   : > { %10431 = vmatmul.mubr.bf16.vlgmr.msra.gmra.mxu1 %v9313_v15  ;;  %12169 = vmatpush3.bf16.msra.mxu0 %v12432_v33  ;;  %v9299_v60 = vmax.f32 %v9283_v37, 0.0  ;;  %v12465_v33 = vld [vmem:[%s14703_s5 + $0x2b8] sm:$0xff]   ;;  %v12468_v15 = vld [vmem:[%s14703_s5 + $0x230] sm:$0xff]   ;;  %v9288_v8 = vadd.f32 %v9238_v48, %v9188_v46  ;;  %v9289_v1 = vadd.f32 %v9242_v59, %v9189_v57 }
 0x6da   : > { %12191 = vmatpush3.bf16.msra.mxu1 %v12433_v6  ;;  %12170 = vmatprep.subr.bf16.mxu0 %v12434_v55  ;;  %v9301_v21 = vmax.f32 %v9285_v56, 0.0  ;;  %v12469_v55 = vld [vmem:[%s14703_s5 + $0x2b0] sm:$0xff]   ;;  %v12497_v51 = vld [vmem:[%s14703_s5 + $0x3b8] sm:$0xff]  }
 0x6db   : > { %12192 = vmatprep.subr.bf16.mxu1 %v12435_v32  ;;  %v9315_v6 = vpack.c.bf16 %v9299_v60, %v9299_v60  ;;  %10470 = vmatprep.mubr.bf16.mxu0 %v9316_v25  ;;  %v12470_v32 = vld [vmem:[%s14703_s5 + $0x268] sm:$0xff]   ;;  %v12498_v60 = vld [vmem:[%s14703_s5 + $0x370] sm:$0xff]  }
 0x6dc   : > { %v9317_v52 = vpack.c.bf16 %v9301_v21, %v9301_v21  ;;  %10510 = vmatprep.mubr.bf16.mxu1 %v9318_v42  ;;  %v12499_v25 = vld [vmem:[%s14703_s5 + $0x3f0] sm:$0xff]  }
 0x6dd   : > { %12171 = vmatpush3.bf16.msra.mxu0 %v12436_v53  ;;  %v12471_v53 = vld [vmem:[%s14703_s5 + $0x2e8] sm:$0xff]   ;;  %v12500_v42 = vld [vmem:[%s14703_s5 + $0x330] sm:$0xff]  }
 0x6de   : > { %12193 = vmatpush3.bf16.msra.mxu1 %v12437_v16  ;;  %12172 = vmatprep.subr.bf16.mxu0 %v12438_v18  ;;  %v12472_v16 = vld [vmem:[%s14703_s5 + $0x228] sm:$0xff]  }
 0x6df   : > { %12194 = vmatprep.subr.bf16.mxu1 %v12439_v19  ;;  %v12473_v18 = vld [vmem:[%s14703_s5 + $0x2a8] sm:$0xff]   ;;  %v12474_v19 = vld [vmem:[%s14703_s5 + $0x260] sm:$0xff]  }
 0x6e1   : > { %12173 = vmatpush3.bf16.msra.mxu0 %v12440_v20  ;;  %v12475_v20 = vld [vmem:[%s14703_s5 + $0x2e0] sm:$0xff]  }
 0x6e2   : > { %12195 = vmatpush3.bf16.msra.mxu1 %v12441_v12  ;;  %12174 = vmatprep.subr.bf16.mxu0 %v12442_v22  ;;  %v12476_v12 = vld [vmem:[%s14703_s5 + $0x220] sm:$0xff]  }
 0x6e3   : > { %12196 = vmatprep.subr.bf16.mxu1 %v12443_v9  ;;  %v12477_v22 = vld [vmem:[%s14703_s5 + $0x2a0] sm:$0xff]   ;;  %v12478_v9 = vld [vmem:[%s14703_s5 + $0x258] sm:$0xff]  }
 0x6e5   : > { %12175 = vmatpush3.bf16.msra.mxu0 %v12444_v26  ;;  %v12479_v26 = vld [vmem:[%s14703_s5 + $0x2d8] sm:$0xff]  }
 0x6e6   : > { %12197 = vmatpush3.bf16.msra.mxu1 %v12445_v13  ;;  %12176 = vmatprep.subr.bf16.mxu0 %v12446_v14  ;;  %v12480_v13 = vld [vmem:[%s14703_s5 + $0x218] sm:$0xff]  }
 0x6e7   : > { %12198 = vmatprep.subr.bf16.mxu1 %v12447_v23  ;;  %v12481_v14 = vld [vmem:[%s14703_s5 + $0x298] sm:$0xff]   ;;  %v12482_v23 = vld [vmem:[%s14703_s5 + $0x250] sm:$0xff]  }
 0x6e9   : > { %12177 = vmatpush3.bf16.msra.mxu0 %v12448_v61  ;;  %v12483_v61 = vld [vmem:[%s14703_s5 + $0x2d0] sm:$0xff]  }
 0x6ea   : > { %12199 = vmatpush3.bf16.msra.mxu1 %v12449_v24  ;;  %12178 = vmatprep.subr.bf16.mxu0 %v12450_v0  ;;  %v12484_v24 = vld [vmem:[%s14703_s5 + $0x210] sm:$0xff]  }
 0x6eb   : > { %12200 = vmatprep.subr.bf16.mxu1 %v12451_v40  ;;  %v12485_v0 = vld [vmem:[%s14703_s5 + $0x290] sm:$0xff]   ;;  %v12486_v40 = vld [vmem:[%s14703_s5 + $0x248] sm:$0xff]  }
 0x6ed   : > { %12179 = vmatpush3.bf16.msra.mxu0 %v12452_v27  ;;  %v12487_v27 = vld [vmem:[%s14703_s5 + $0x2c8] sm:$0xff]  }
 0x6ee   : > { %12201 = vmatpush3.bf16.msra.mxu1 %v12453_v29  ;;  %12180 = vmatprep.subr.bf16.mxu0 %v12454_v31  ;;  %v12488_v29 = vld [vmem:[%s14703_s5 + $0x208] sm:$0xff]  }
 0x6ef   : > { %12202 = vmatprep.subr.bf16.mxu1 %v12455_v35  ;;  %v12489_v31 = vld [vmem:[%s14703_s5 + $0x288] sm:$0xff]   ;;  %v12490_v35 = vld [vmem:[%s14703_s5 + $0x240] sm:$0xff]  }
 0x6f1   : > { %12181 = vmatpush3.bf16.msra.mxu0 %v12456_v39  ;;  %v12491_v39 = vld [vmem:[%s14703_s5 + $0x2c0] sm:$0xff]  }
 0x6f2   : > { %12203 = vmatpush3.bf16.msra.mxu1 %v12457_v58  ;;  %12182 = vmatprep.subr.bf16.mxu0 %v12458_v45  ;;  %v12492_v58 = vld [vmem:[%s14703_s5 + $0x200] sm:$0xff]  }
 0x6f3   : > { %12204 = vmatprep.subr.bf16.mxu1 %v12459_v17  ;;  %v12493_v45 = vld [vmem:[%s14703_s5 + $0x280] sm:$0xff]   ;;  %v9190_v17 = vld [vmem:[#allocation3 + $0x38] sm:$0xff] }
 0x6f4   : > { %v9290_v41 = vadd.f32 %v9246_v54, %v9190_v17  ;;  %v9193_v17 = vld [vmem:[#allocation3 + $0x78] sm:$0xff] }
 0x6f5   : > { %12183 = vmatpush3.bf16.msra.mxu0 %v12460_v50  ;;  %v9187_v50 = vld [vmem:[#allocation3 + $0x40] sm:$0xff] }
 0x6f6   : > { %12205 = vmatpush3.bf16.msra.mxu1 %v12461_v5  ;;  %12212 = vmatprep.subr.bf16.mxu0 %v12462_v49  ;;  %v9234_v5 = vrot.slane %v14548_v62, %v9201_v47  ;;  %v9304_v47 = vmax.f32 %v9288_v8, 0.0  ;;  %v9306_v37 = vmax.f32 %v9290_v41, 0.0  ;;  %v9305_v49 = vmax.f32 %v9289_v1, 0.0  ;;  %v11981_v41 = vld [vmem:[#allocation11] ss:$0 sm:$0xff] }
 0x6f7   : > { %12234 = vmatprep.subr.bf16.mxu1 %v12463_v2 }
 0x6f8   : > { %10471 = vmatmul.mubr.bf16.vlgmr.msra.gmra.mxu0 %v9315_v6  ;;  %v9287_v63 = vadd.f32 %v9234_v5, %v9187_v50  ;;  %v9320_v3 = vpack.c.bf16 %v9304_v47, %v9304_v47  ;;  %v9322_v2 = vpack.c.bf16 %v9306_v37, %v9306_v37  ;;  %v9321_v21 = vpack.c.bf16 %v9305_v49, %v9305_v49  ;;  %v12502_v6 = vld [vmem:[%s14703_s5 + $0x368] sm:$0xff]  }
 0x6f9   : > { %10511 = vmatmul.mubr.bf16.vlgmr.msra.gmra.mxu1 %v9317_v52  ;;  %12213 = vmatpush3.bf16.msra.mxu0 %v12464_v4  ;;  %v12503_v52 = vld [vmem:[%s14703_s5 + $0x3e8] sm:$0xff]  }
 0x6fa   : > { %12235 = vmatpush3.bf16.msra.mxu1 %v12465_v33  ;;  %12214 = vmatprep.subr.bf16.mxu0 %v12466_v11  ;;  %v9303_v56 = vmax.f32 %v9287_v63, 0.0  ;;  %v12501_v33 = vld [vmem:[%s14703_s5 + $0x3b0] sm:$0xff]   ;;  %v12504_v11 = vld [vmem:[%s14703_s5 + $0x328] sm:$0xff]  }
 0x6fb   : > { %12236 = vmatprep.subr.bf16.mxu1 %v12467_v44  ;;  %10550 = vmatprep.mubr.bf16.mxu0 %v9320_v3  ;;  %v12505_v44 = vld [vmem:[%s14703_s5 + $0x3a8] sm:$0xff]  }
 0x6fc   : > { %v9319_v4 = vpack.c.bf16 %v9303_v56, %v9303_v56  ;;  %10590 = vmatprep.mubr.bf16.mxu1 %v9322_v2 }
 0x6fd   : > { %12215 = vmatpush3.bf16.msra.mxu0 %v12468_v15  ;;  %v12506_v15 = vld [vmem:[%s14703_s5 + $0x360] sm:$0xff]  }
 0x6fe   : > { %12237 = vmatpush3.bf16.msra.mxu1 %v12469_v55  ;;  %12216 = vmatprep.subr.bf16.mxu0 %v12470_v32  ;;  %v12507_v55 = vld [vmem:[%s14703_s5 + $0x3e0] sm:$0xff]  }
 0x6ff   : > { %12238 = vmatprep.subr.bf16.mxu1 %v12471_v53  ;;  %v12508_v32 = vld [vmem:[%s14703_s5 + $0x320] sm:$0xff]  }
 0x700   : > { %v12509_v53 = vld [vmem:[%s14703_s5 + $0x3a0] sm:$0xff]  }
 0x701   : > { %12217 = vmatpush3.bf16.msra.mxu0 %v12472_v16  ;;  %v12510_v16 = vld [vmem:[%s14703_s5 + $0x358] sm:$0xff]  }
 0x702   : > { %12239 = vmatpush3.bf16.msra.mxu1 %v12473_v18  ;;  %12218 = vmatprep.subr.bf16.mxu0 %v12474_v19  ;;  %v12511_v18 = vld [vmem:[%s14703_s5 + $0x3d8] sm:$0xff]  }
 0x703   : > { %12240 = vmatprep.subr.bf16.mxu1 %v12475_v20  ;;  %v12512_v19 = vld [vmem:[%s14703_s5 + $0x318] sm:$0xff]  }
 0x704   : > { %v12513_v20 = vld [vmem:[%s14703_s5 + $0x398] sm:$0xff]  }
 0x705   : > { %12219 = vmatpush3.bf16.msra.mxu0 %v12476_v12  ;;  %v12514_v12 = vld [vmem:[%s14703_s5 + $0x350] sm:$0xff]  }
 0x706   : > { %12241 = vmatpush3.bf16.msra.mxu1 %v12477_v22  ;;  %12220 = vmatprep.subr.bf16.mxu0 %v12478_v9  ;;  %v12515_v22 = vld [vmem:[%s14703_s5 + $0x3d0] sm:$0xff]  }
 0x707   : > { %12242 = vmatprep.subr.bf16.mxu1 %v12479_v26  ;;  %v12516_v9 = vld [vmem:[%s14703_s5 + $0x310] sm:$0xff]  }
 0x708   : > { %v12517_v26 = vld [vmem:[%s14703_s5 + $0x390] sm:$0xff]  }
 0x709   : > { %12221 = vmatpush3.bf16.msra.mxu0 %v12480_v13  ;;  %v12518_v13 = vld [vmem:[%s14703_s5 + $0x348] sm:$0xff]  }
 0x70a   : > { %12243 = vmatpush3.bf16.msra.mxu1 %v12481_v14  ;;  %12222 = vmatprep.subr.bf16.mxu0 %v12482_v23  ;;  %v12519_v14 = vld [vmem:[%s14703_s5 + $0x3c8] sm:$0xff]  }
 0x70b   : > { %12244 = vmatprep.subr.bf16.mxu1 %v12483_v61  ;;  %v12520_v23 = vld [vmem:[%s14703_s5 + $0x308] sm:$0xff]  }
 0x70c   : > { %v12521_v61 = vld [vmem:[%s14703_s5 + $0x388] sm:$0xff]  }
 0x70d   : > { %12223 = vmatpush3.bf16.msra.mxu0 %v12484_v24  ;;  %v12522_v24 = vld [vmem:[%s14703_s5 + $0x340] sm:$0xff]  }
 0x70e   : > { %12245 = vmatpush3.bf16.msra.mxu1 %v12485_v0  ;;  %12224 = vmatprep.subr.bf16.mxu0 %v12486_v40  ;;  %v9254_v0 = vrot.slane %v14548_v62, %v9221_v28  ;;  %v9262_v40 = vrot.slane %v14548_v62, %v9229_v30  ;;  %v9194_v28 = vld [vmem:[#allocation3 + $0x28] sm:$0xff]  ;;  %v12524_v30 = vld [vmem:[%s14703_s5 + $0x300] sm:$0xff]  }
 0x70f   : > { %12246 = vmatprep.subr.bf16.mxu1 %v12487_v27  ;;  %v9250_v27 = vrot.slane %v14548_v62, %v9217_v34  ;;  %v12525_v34 = vld [vmem:[%s14703_s5 + $0x380] sm:$0xff]  }
 0x711   : > { %12225 = vmatpush3.bf16.msra.mxu0 %v12488_v29  ;;  %v12523_v29 = vld [vmem:[%s14703_s5 + $0x3c0] sm:$0xff]  }
 0x712   : > { %12247 = vmatpush3.bf16.msra.mxu1 %v12489_v31  ;;  %12226 = vmatprep.subr.bf16.mxu0 %v12490_v35  ;;  %v9258_v31 = vrot.slane %v14548_v62, %v9225_v36  ;;  %v9192_v35 = vld [vmem:[#allocation3 + $0x70] sm:$0xff] }
 0x713   : > { %12248 = vmatprep.subr.bf16.mxu1 %v12491_v39  ;;  %v9191_v39 = vld [vmem:[#allocation3 + $0x60] sm:$0xff] }
 0x714   : > { %v9291_v46 = vadd.f32 %v9250_v27, %v9191_v39  ;;  %v9293_v43 = vadd.f32 %v9258_v31, %v9193_v17 }
 0x715   : > { %12227 = vmatpush3.bf16.msra.mxu0 %v12492_v58  ;;  %v9292_v58 = vadd.f32 %v9254_v0, %v9192_v35 }
 0x716   : > { %12249 = vmatpush3.bf16.msra.mxu1 %v12493_v45  ;;  %12256 = vmatprep.subr.bf16.mxu0 %v12494_v7  ;;  %v9294_v45 = vadd.f32 %v9262_v40, %v9194_v28  ;;  %v9307_v48 = vmax.f32 %v9291_v46, 0.0  ;;  %v9309_v54 = vmax.f32 %v9293_v43, 0.0 }
 0x717   : > { %12278 = vmatprep.subr.bf16.mxu1 %v12495_v38  ;;  %v9308_v36 = vmax.f32 %v9292_v58, 0.0 }
 0x718   : > { %10551 = vmatmul.mubr.bf16.vlgmr.msra.gmra.mxu0 %v9319_v4  ;;  %v9310_v62 = vmax.f32 %v9294_v45, 0.0  ;;  %v9323_v57 = vpack.c.bf16 %v9307_v48, %v9307_v48  ;;  %v9325_v59 = vpack.c.bf16 %v9309_v54, %v9309_v54 }
 0x719   : > { %10591 = vmatmul.mubr.bf16.vlgmr.msra.gmra.mxu1 %v9321_v21  ;;  %12257 = vmatpush3.bf16.msra.mxu0 %v12496_v10  ;;  %v9324_v50 = vpack.c.bf16 %v9308_v36, %v9308_v36 }
 0x71a   : > { %12279 = vmatpush3.bf16.msra.mxu1 %v12497_v51  ;;  %12258 = vmatprep.subr.bf16.mxu0 %v12498_v60  ;;  %v9326_v5 = vpack.c.bf16 %v9310_v62, %v9310_v62 }
 0x71b   : > { %12280 = vmatprep.subr.bf16.mxu1 %v12499_v25  ;;  %10630 = vmatprep.mubr.bf16.mxu0 %v9324_v50 }
 0x71c   : > { %10670 = vmatprep.mubr.bf16.mxu1 %v9326_v5 }
 0x71d   : > { %12259 = vmatpush3.bf16.msra.mxu0 %v12500_v42 }
 0x71e   : > { %12281 = vmatpush3.bf16.msra.mxu1 %v12501_v33  ;;  %12260 = vmatprep.subr.bf16.mxu0 %v12502_v6 }
 0x71f   : > { %12282 = vmatprep.subr.bf16.mxu1 %v12503_v52 }
 0x721   : > { %12261 = vmatpush3.bf16.msra.mxu0 %v12504_v11 }
 0x722   : > { %12283 = vmatpush3.bf16.msra.mxu1 %v12505_v44  ;;  %12262 = vmatprep.subr.bf16.mxu0 %v12506_v15 }
 0x723   : > { %12284 = vmatprep.subr.bf16.mxu1 %v12507_v55 }
 0x725   : > { %12263 = vmatpush3.bf16.msra.mxu0 %v12508_v32 }
 0x726   : > { %12285 = vmatpush3.bf16.msra.mxu1 %v12509_v53  ;;  %12264 = vmatprep.subr.bf16.mxu0 %v12510_v16 }
 0x727   : > { %12286 = vmatprep.subr.bf16.mxu1 %v12511_v18 }
 0x729   : > { %12265 = vmatpush3.bf16.msra.mxu0 %v12512_v19 }
 0x72a   : > { %12287 = vmatpush3.bf16.msra.mxu1 %v12513_v20  ;;  %12266 = vmatprep.subr.bf16.mxu0 %v12514_v12 }
 0x72b   : > { %12288 = vmatprep.subr.bf16.mxu1 %v12515_v22 }
 0x72d   : > { %12267 = vmatpush3.bf16.msra.mxu0 %v12516_v9 }
 0x72e   : > { %12289 = vmatpush3.bf16.msra.mxu1 %v12517_v26  ;;  %12268 = vmatprep.subr.bf16.mxu0 %v12518_v13 }
 0x72f   : > { %12290 = vmatprep.subr.bf16.mxu1 %v12519_v14 }
 0x731   : > { %12269 = vmatpush3.bf16.msra.mxu0 %v12520_v23 }
 0x732   : > { %12291 = vmatpush3.bf16.msra.mxu1 %v12521_v61  ;;  %12270 = vmatprep.subr.bf16.mxu0 %v12522_v24 }
 0x733   : > { %12292 = vmatprep.subr.bf16.mxu1 %v12523_v29 }
 0x735   : > { %12271 = vmatpush3.bf16.msra.mxu0 %v12524_v30 }
 0x736   : > { %12293 = vmatpush3.bf16.msra.mxu1 %v12525_v34 }
 0x738   : > { %10631 = vmatmul.mubr.bf16.vlgmr.msra.gmra.mxu0 %v9323_v57 }
 0x739   : > { %10671 = vmatmul.mubr.bf16.vlgmr.msra.gmra.mxu1 %v9325_v59 }
 0x798   : > { %v12140_v7 = vpop.f32.mrf.mxu0 }
 0x799   : > { %v12162_v8 = vpop.f32.mrf.mxu1 }
 0x79a   : > { %v12141_v63 = vpop.f32.mrf.mxu0 }
 0x79b   : > { %v12163_v38 = vpop.f32.mrf.mxu1  ;;  %v12142_v1 = vadd.f32 %v12141_v63, %v12140_v7 }
 0x79c   : > { %v12164_v47 = vadd.f32 %v12163_v38, %v12162_v8  ;;  %v12143_v37 = vpop.f32.mrf.mxu0 }
 0x79d   : > { %v12165_v56 = vpop.f32.mrf.mxu1  ;;  %v10393_v10 = vadd.f32 %v12142_v1, %v11981_v41 }
 0x79e   : > { %v12144_v49 = vpop.f32.mrf.mxu0 }
 0x79f   : > { %v12166_v51 = vpop.f32.mrf.mxu1  ;;  %v10433_v3 = vadd.f32 %v12164_v47, %v10393_v10 }
 0x7b8   : > { %v12184_v2 = vpop.f32.mrf.mxu0 }
 0x7b9   : > { %v12206_v4 = vpop.f32.mrf.mxu1 }
 0x7ba   : > { %v12185_v60 = vpop.f32.mrf.mxu0 }
 0x7bb   : > { %v12207_v21 = vpop.f32.mrf.mxu1  ;;  %v12186_v25 = vadd.f32 %v12185_v60, %v12184_v2 }
 0x7bc   : > { %v12208_v42 = vadd.f32 %v12207_v21, %v12206_v4  ;;  %v12187_v33 = vpop.f32.mrf.mxu0 }
 0x7bd   : > { %v12209_v6 = vpop.f32.mrf.mxu1  ;;  %v10473_v52 = vadd.f32 %v12186_v25, %v10433_v3 }
 0x7be   : > { %v12188_v11 = vpop.f32.mrf.mxu0 }
 0x7bf   : > { %v12210_v44 = vpop.f32.mrf.mxu1  ;;  %v10513_v15 = vadd.f32 %v12208_v42, %v10473_v52 }
 0x7d8   : > { %v12228_v55 = vpop.f32.mrf.mxu0 }
 0x7d9   : > { %v12250_v32 = vpop.f32.mrf.mxu1 }
 0x7da   : > { %v12229_v53 = vpop.f32.mrf.mxu0 }
 0x7db   : > { %v12251_v16 = vpop.f32.mrf.mxu1  ;;  %v12230_v22 = vadd.f32 %v12229_v53, %v12228_v55 }
 0x7dc   : > { %v12231_v18 = vpop.f32.mrf.mxu0  ;;  %v12252_v26 = vadd.f32 %v12251_v16, %v12250_v32 }
 0x7dd   : > { %v12253_v19 = vpop.f32.mrf.mxu1  ;;  %v10553_v9 = vadd.f32 %v12230_v22, %v10513_v15 }
 0x7de   : > { %v12232_v20 = vpop.f32.mrf.mxu0 }
 0x7df   : > { %v12254_v12 = vpop.f32.mrf.mxu1  ;;  %v10593_v24 = vadd.f32 %v12252_v26, %v10553_v9 }
 0x7f8   : > { %v12272_v13 = vpop.f32.mrf.mxu0 }
 0x7f9   : > { %v12294_v14 = vpop.f32.mrf.mxu1 }
 0x7fa   : > { %v12273_v23 = vpop.f32.mrf.mxu0 }
 0x7fb   : > { %v12295_v61 = vpop.f32.mrf.mxu1  ;;  %v12274_v0 = vadd.f32 %v12273_v23, %v12272_v13 }
 0x7fc   : > { %v12275_v40 = vpop.f32.mrf.mxu0  ;;  %v12296_v31 = vadd.f32 %v12295_v61, %v12294_v14 }
 0x7fd   : > { %v12297_v27 = vpop.f32.mrf.mxu1  ;;  %v10633_v29 = vadd.f32 %v12274_v0, %v10593_v24 }
 0x7fe   : > { %v12276_v35 = vpop.f32.mrf.mxu0 }
 0x7ff   : > { %v12298_v28 = vpop.f32.mrf.mxu1  ;;  %v10673_v39 = vadd.f32 %v12296_v31, %v10633_v29 }
 0x801   : > { %v10679_v30 = vsel %vm10678_vm0, %v10673_v39, -inf }
 0x802   : > { %10680 = vmax.xlane.f32.xlu0 %v10679_v30 }
 0x88b   : > { %v10681_v34 = vpop.xlane.xlu0 %10680 }
 0x88c   : > { %v10682_v58 = vsub.f32 %v10673_v39, %v10681_v34 }
 0x88e   : > { %v10683_v45 = vmul.f32 1.442695, %v10682_v58 }
 0x890   : > { %12526 = vpow2.f32 %v10683_v45 }
 0x89d   : > { %v12527_v46 = vpop.eup %12526 }
 0x89e   : > { %v10685_v17 = vsel %vm10678_vm0, %v12527_v46, 0.0 }
 0x89f   : > { %10686 = vadd.xlane.f32.xlu0 %v10685_v17 }
 0x928   : > { %v10687_v43 = vpop.xlane.xlu0 %10686 }
 0x929   : > { %12528 = vlog2.f32 %v10687_v43 }
 0x936   : > { %v12529_v36 = vpop.eup %12528 }
 0x937   : > { %v10689_v62 = vmul.f32 0.6931472, %v12529_v36 }
 0x939   : > { %v10690_v48 = vadd.f32 %v10689_v62, %v10681_v34 }
 0x93b   : > { %v10691_v54 = vsub.f32 %v10673_v39, %v10690_v48 }
 0x93d   : > { %10692 = vst.msk [vmem:[#allocation13] sm:$0xff] %vm10678_vm0, %v10691_v54 }
 0x93e PF: > { %p12348_p4 = scmp.eq.s32.totalorder %s12810_s28, 1  ;;  %s12750_s24 = smov [#allocation13]  }
 0x93f   : > { %s10700_s9 = sshll.u32 %s12750_s24, 4  ;;  %s10701_s9 = int_to_ptr.vmem [resolvable:$true] %s10700_s9 }
 0x940   : > { %s12662_s13 = scalar_lea.vmem %s10701_s9, 128  ;;  %p12669_p0 = scmp.lt.s32.totalorder %s10701_s9, %s10701_s9 }
 0x941   : > { %p12663_p1 = scmp.ne.s32.totalorder %s10701_s9, %s12662_s13  ;;  %p12670_p8 = scmp.lt.s32.totalorder %s12662_s13, %s12662_s13 }
 0x943   : > { %p12664_p5 = pnand %p12663_p1, %p12348_p4  ;;  %p12671_p2 = por %p12670_p8, %p12669_p0 }
 0x945   : > { %p12665_p6 = pneg %p12664_p5 }
 0x947   : > { %p12672_p9 = pnand %p12671_p2, %p12665_p6 }
 0x949   : > { %12675 = shalt.err (!%p12672_p9)
}
 0x94a   : > { %12319 = dma.vmem_to_hbm [thread:$0]  (%p12348_p4), %s10701_s9, 128, %s14705_s7, [#allocation6]  }
 0x94b   : > { %12723 = dma.done.wait (%p12348_p4), [#allocation6], 128  }
 0x94c   : > { %12725 = vsyncadd (%p12348_p4), [#allocation6], 4294967168 }
 0x94d PF: > { %p18_p3 = scmp.ge.s32.totalorder %s12873_s14, 4   ;;  %s14725_s24 = smov %s12732_s25 }
 0x94e   : > { %s14726_s25 = smov %s12736_s26  ;;  %s14727_s26 = smov %s12884_s21 }
 0x94f   : > { %s14728_s27 = smov %s12873_s14  ;;  %20 = sbr.rel (!%p18_p3) target bundleno = 5 (0x5), region = 117 }
 0x954   :  { %10713 = vsyncpa [#allocation5], 1 }
 0x955   :  { %10715 = vsyncpa [#allocation5 + $0x1], 1 }
 0x956   :  { %10716 = vsyncpa [#allocation8], 1 }
 0x957   :  { %10717 = vsyncpa [#allocation12], 1 }
 0x958   :  { %10718 = vsyncpa [#allocation6], 1 }
 0x959   :  { %10720 = vsyncpa [#allocation6 + $0x1], 1 }

</bundles_post_ra>
